<compile_context>
chip_gen: v7x
topology: tpu7x:2x2x1
jax: 0.10.0
libtpu: 0.0.40
codegen_flags: <defaults>
</compile_context>

<pallas_src>
import math

import jax
import jax.numpy as jnp
from jax.experimental import pallas as pl
from jax.experimental.pallas import tpu as pltpu

EPS = 1e-5           # nn.BatchNorm2d default
C = 256              # tower width
H = W = 8            # board size
NRES = 10            # residual blocks
NL = 1 + 2 * NRES    # stem + 2 convs per res block = 21 fused layers


def _batchnorm(y, gamma, beta):
    """Training-mode BatchNorm over the (N*H*W) rows, per channel, f32."""
    mean = jnp.mean(y, axis=0, keepdims=True)
    d = y - mean
    var = jnp.mean(d * d, axis=0, keepdims=True)        # biased, like PyTorch BN fwd
    return gamma * d * jax.lax.rsqrt(var + EPS) + beta


# ------------------------------ tower kernel -------------------------------- #

def _tower_kernel(x_ref, w_ref, b_ref, g_ref, bt_ref, o_ref, act_ref, res_ref):
    """One grid step = one Conv3x3 -> ReLU (-> +skip) -> BatchNorm layer."""
    l = pl.program_id(0)
    n = act_ref.shape[0]
    m = n * H * W

    # Layer 0: load the (already spatially+channel zero-padded) input board.
    @pl.when(l == 0)
    def _():
        act_ref[...] = x_ref[...]
        res_ref[...] = jnp.zeros_like(res_ref)

    # 3x3 conv (pad=1, stride=1) as 9 shifted (M,C)x(C,C) MXU dots, f32 accumulate.
    acc = None
    for s in range(9):
        di, dj = divmod(s, 3)
        a = act_ref[:, di:di + H, dj:dj + W, :].reshape(m, C).astype(jnp.bfloat16)
        t = jnp.dot(a, w_ref[s], preferred_element_type=jnp.float32)
        acc = t if acc is None else acc + t

    y = jnp.maximum(acc + b_ref[...], 0.0)                       # conv bias + ReLU
    # conv2 of a ResBlock (even layer >= 2): add the skip connection before BN.
    is_res = jnp.logical_and(l >= 2, l % 2 == 0)
    y = y + jnp.where(is_res, res_ref[...], 0.0)
    y = _batchnorm(y, g_ref[...], bt_ref[...])

    # Write back into the interior of the padded activation (border stays zero).
    act_ref[:, 1:1 + H, 1:1 + W, :] = y.reshape(n, H, W, C)

    # Even-layer outputs feed the next ResBlock's skip path.
    @pl.when(l % 2 == 0)
    def _():
        res_ref[...] = y

    # Emit the (padded) tower output once, at the last layer.
    @pl.when(l == pl.num_programs(0) - 1)
    def _():
        o_ref[...] = act_ref[...]


def tower_apply(x_pad, w_stack, b_stack, g_stack, beta_stack):
    n = x_pad.shape[0]
    pad_shape = (n, H + 2, W + 2, C)
    return pl.pallas_call(
        _tower_kernel,
        out_shape=jax.ShapeDtypeStruct(pad_shape, jnp.float32),
        grid=(NL,),
        in_specs=[
            pl.BlockSpec(pad_shape, lambda l: (0, 0, 0, 0)),        # resident input
            pl.BlockSpec((None, 9, C, C), lambda l: (l, 0, 0, 0)),  # streamed weights
            pl.BlockSpec((None, 1, C), lambda l: (l, 0, 0)),        # conv bias
            pl.BlockSpec((None, 1, C), lambda l: (l, 0, 0)),        # BN gamma
            pl.BlockSpec((None, 1, C), lambda l: (l, 0, 0)),        # BN beta
        ],
        out_specs=pl.BlockSpec(pad_shape, lambda l: (0, 0, 0, 0)),
        scratch_shapes=[
            pltpu.VMEM(pad_shape, jnp.float32),                     # padded activation
            pltpu.VMEM((n * H * W, C), jnp.float32),                # skip-connection
        ],
        compiler_params=pltpu.CompilerParams(
            dimension_semantics=("arbitrary",),
            vmem_limit_bytes=32 * 1024 * 1024,
        ),
    )(x_pad, w_stack, b_stack, g_stack, beta_stack)


# ------------------------------ OutBlock kernel ------------------------------ #

def _heads_kernel(xp_ref, wc_ref, bc_ref, g_ref, bt_ref,
                  wpfc_ref, bpfc_ref, wvfc_ref, bvfc_ref, wv2_ref, bv2_ref,
                  pol_ref, val_ref):
    n = xp_ref.shape[0]
    m = n * H * W

    # Fused head convs: cols 0:2 = policy 1x1 conv (center tap only), 2:4 = value 3x3.
    acc = None
    for s in range(9):
        di, dj = divmod(s, 3)
        a = xp_ref[:, di:di + H, dj:dj + W, :].reshape(m, C)
        t = jnp.dot(a, wc_ref[s], preferred_element_type=jnp.float32)
        acc = t if acc is None else acc + t
    y = jnp.maximum(acc + bc_ref[...], 0.0)
    y = _batchnorm(y, g_ref[...], bt_ref[...])                   # (M, 4)

    def fc_from_feat(c0, c1, w, b):
        # PyTorch NCHW flatten folded in: out[n,o] = sum_m feat[n*64+m, c0]*w[m,o]
        #                                          + sum_m feat[n*64+m, c1]*w[64+m,o]
        t = (y[:, c0:c0 + 1].reshape(n, H * W, 1) * w[0:H * W, :]
             + y[:, c1:c1 + 1].reshape(n, H * W, 1) * w[H * W:2 * H * W, :])
        return jnp.sum(t, axis=1) + b

    # Policy head: fc_policy + softmax (f32).
    logits = fc_from_feat(0, 1, wpfc_ref[...], bpfc_ref[...])    # (N, 64)
    mx = jnp.max(logits, axis=1, keepdims=True)
    e = jnp.exp(logits - mx)
    pol_ref[...] = e / jnp.sum(e, axis=1, keepdims=True)

    # Value head: fc1 + ReLU, fc2 + tanh.
    h = jnp.maximum(fc_from_feat(2, 3, wvfc_ref[...], bvfc_ref[...]), 0.0)   # (N, 64)
    v = jnp.sum(h * wv2_ref[...], axis=1, keepdims=True) + bv2_ref[...]      # (N, 1)
    val_ref[...] = jnp.tanh(v)


def heads_apply(xp, hp):
    n = xp.shape[0]

    def _full(a):
        nd = a.ndim
        return pl.BlockSpec(a.shape, lambda i, nd=nd: (0,) * nd)

    args = (xp, hp["wc"], hp["bc"], hp["g"], hp["beta"],
            hp["wpfc"], hp["bpfc"], hp["wvfc"], hp["bvfc"], hp["wv2"], hp["bv2"])
    policy, value = pl.pallas_call(
        _heads_kernel,
        out_shape=(jax.ShapeDtypeStruct((n, 64), jnp.float32),
                   jax.ShapeDtypeStruct((n, 1), jnp.float32)),
        grid=(1,),
        in_specs=[_full(a) for a in args],
        out_specs=(pl.BlockSpec((n, 64), lambda i: (0, 0)),
                   pl.BlockSpec((n, 1), lambda i: (0, 0))),
        compiler_params=pltpu.CompilerParams(dimension_semantics=("arbitrary",)),
    )(*args)
    return policy, value


# --------------------------------- Net fwd ----------------------------------- #

def net_forward(packed, x_nchw):
    x = jnp.transpose(x_nchw.astype(jnp.float32), (0, 2, 3, 1))          # NCHW -> NHWC
    n, h, w, cin = x.shape
    # Zero-pad: +1 spatial ring (conv pad=1) and channels up to C (stem weights match).
    x_pad = jnp.pad(x, ((0, 0), (1, 1), (1, 1), (0, C - cin)))
    xp = tower_apply(x_pad, packed["w"], packed["b"], packed["g"], packed["beta"])
    policy, value = heads_apply(xp, packed["head"])
    return policy, value.reshape(-1)


# ------------------------------ parameter prep ------------------------------- #

def init_params(key):
    keys = iter(jax.random.split(key, 64))

    def conv_block_params(cin, cout, k):
        s = 1.0 / math.sqrt(k * k * cin)
        return {
            "w": jax.random.uniform(next(keys), (k, k, cin, cout), jnp.float32, -s, s),
            "b": jax.random.uniform(next(keys), (1, cout), jnp.float32, -s, s),
            "gamma": jnp.ones((1, cout), jnp.float32),   # BatchNorm2d default init
            "beta": jnp.zeros((1, cout), jnp.float32),
        }

    def linear_params(fin, fout):
        s = 1.0 / math.sqrt(fin)
        return {
            "w": jax.random.uniform(next(keys), (fin, fout), jnp.float32, -s, s),
            "b": jax.random.uniform(next(keys), (1, fout), jnp.float32, -s, s),
        }

    return {
        "conv": conv_block_params(6, C, 3),
        "res": [{"cb1": conv_block_params(C, C, 3),
                 "cb2": conv_block_params(C, C, 3)} for _ in range(NRES)],
        "out": {
            "pol_cb": conv_block_params(C, 2, 1),
            "val_cb": conv_block_params(C, 2, 3),
            "fc_policy": linear_params(2 * H * W, 64),
            "fc1_value": linear_params(2 * H * W, 64),
            "fc2_value": linear_params(64, 1),
        },
    }


def pack_params(params):
    """One-time repack: stack tower weights (bf16 stream), build fused head weights."""
    layers = [params["conv"]] + [cb for rp in params["res"]
                                 for cb in (rp["cb1"], rp["cb2"])]
    ws, bs, gs, betas = [], [], [], []
    for cb in layers:
        w = cb["w"]                                        # (3,3,cin,C)
        cin = w.shape[2]
        if cin < C:                                        # stem: zero-pad cin 6 -> 256
            w = jnp.pad(w, ((0, 0), (0, 0), (0, C - cin), (0, 0)))
        ws.append(w.reshape(9, C, C))
        bs.append(cb["b"].reshape(1, C))
        gs.append(cb["gamma"].reshape(1, C))
        betas.append(cb["beta"].reshape(1, C))

    out = params["out"]
    wp = out["pol_cb"]["w"].reshape(C, 2)                  # 1x1 conv
    wv = out["val_cb"]["w"].reshape(9, C, 2)               # 3x3 conv
    whead = jnp.zeros((9, C, 4), jnp.float32)
    whead = whead.at[:, :, 2:4].set(wv)                    # value channels
    whead = whead.at[4, :, 0:2].set(wp)                    # policy = center tap only
    head = {
        "wc": whead,
        "bc": jnp.concatenate([out["pol_cb"]["b"], out["val_cb"]["b"]], axis=-1),
        "g": jnp.concatenate([out["pol_cb"]["gamma"], out["val_cb"]["gamma"]], axis=-1),
        "beta": jnp.concatenate([out["pol_cb"]["beta"], out["val_cb"]["beta"]], axis=-1),
        "wpfc": out["fc_policy"]["w"], "bpfc": out["fc_policy"]["b"],
        "wvfc": out["fc1_value"]["w"], "bvfc": out["fc1_value"]["b"],
        "wv2": out["fc2_value"]["w"].reshape(1, 64),
        "bv2": out["fc2_value"]["b"].reshape(1, 1),
    }
    return {
        "w": jnp.stack(ws).astype(jnp.bfloat16),           # (21, 9, 256, 256) bf16 stream
        "b": jnp.stack(bs),                                # (21, 1, 256) f32
        "g": jnp.stack(gs),
        "beta": jnp.stack(betas),
        "head": head,
    }


if __name__ == "__main__":
    key = jax.random.PRNGKey(0)
    pkey, xkey = jax.random.split(key)
    params = init_params(pkey)
    packed = jax.tree_util.tree_map(jnp.asarray, pack_params(params))
    x = jax.random.normal(xkey, (2, 6, 8, 8), jnp.float32)   # NCHW, like the PyTorch module

    fwd = jax.jit(net_forward)
    policy, value = fwd(packed, x)
    jax.block_until_ready((policy, value))

    assert policy.shape == (2, 64) and value.shape == (2,)
    assert bool(jnp.all(jnp.isfinite(policy))) and bool(jnp.all(jnp.isfinite(value)))
    assert bool(jnp.allclose(jnp.sum(policy, axis=1), 1.0, atol=1e-5))   # softmax rows
    print("KERNEL_OK")
</pallas_src>

<mosaic_0001>
module attributes {stable_mosaic.version = 11 : i64} {
  func.func @_tower_kernel(%arg0: i32, %arg1: memref<2x10x10x256xf32, #tpu.memory_space<vmem>>, %arg2: memref<1x9x256x256xbf16, #tpu.memory_space<vmem>>, %arg3: memref<1x1x256xf32, #tpu.memory_space<vmem>>, %arg4: memref<1x1x256xf32, #tpu.memory_space<vmem>>, %arg5: memref<1x1x256xf32, #tpu.memory_space<vmem>>, %arg6: memref<2x10x10x256xf32, #tpu.memory_space<vmem>>, %arg7: memref<2x10x10x256xf32, #tpu.memory_space<vmem>>, %arg8: memref<128x256xf32, #tpu.memory_space<vmem>>) attributes {dimension_semantics = [#tpu.dimension_semantics<arbitrary>], iteration_bounds = array<i64: 21>, scalar_prefetch = 0 : i64, scratch_operands = 2 : i64, tpu.core_type = #tpu.core_type<tc>, window_params = [{pipeline_mode = #tpu.pipeline_mode<synchronous>, transform_indices = @transform_0, window_bounds = array<i64: 2, 10, 10, 256>}, {transform_indices = @transform_1, window_bounds = array<i64: 1, 9, 256, 256>}, {transform_indices = @transform_2, window_bounds = array<i64: 1, 1, 256>}, {transform_indices = @transform_3, window_bounds = array<i64: 1, 1, 256>}, {transform_indices = @transform_4, window_bounds = array<i64: 1, 1, 256>}, {pipeline_mode = #tpu.pipeline_mode<synchronous>, transform_indices = @transform_5, window_bounds = array<i64: 2, 10, 10, 256>}]} {
    %c0_i32 = arith.constant 0 : i32
    %0 = arith.cmpi eq, %arg0, %c0_i32 : i32
    %1 = arith.extui %0 : i1 to i32
    %c0_i32_0 = arith.constant 0 : i32
    %2 = arith.cmpi ne, %1, %c0_i32_0 : i32
    scf.if %2 {
      %c0_109 = arith.constant 0 : index
      %c0_110 = arith.constant 0 : index
      %c0_111 = arith.constant 0 : index
      %c0_112 = arith.constant 0 : index
      %130 = vector.load %arg1[%c0_109, %c0_110, %c0_111, %c0_112] : memref<2x10x10x256xf32, #tpu.memory_space<vmem>>, vector<2x10x10x256xf32>
      %c0_113 = arith.constant 0 : index
      %c0_114 = arith.constant 0 : index
      %c0_115 = arith.constant 0 : index
      %c0_116 = arith.constant 0 : index
      %131 = vector.load %arg7[%c0_113, %c0_114, %c0_115, %c0_116] : memref<2x10x10x256xf32, #tpu.memory_space<vmem>>, vector<2x10x10x256xf32>
      tpu.vector_store %arg7[%c0_113, %c0_114, %c0_115, %c0_116], %130 {strides = array<i32>} : memref<2x10x10x256xf32, #tpu.memory_space<vmem>>, vector<2x10x10x256xf32>,
      %cst_117 = arith.constant 0.000000e+00 : f32
      %132 = vector.broadcast %cst_117 : f32 to vector<128x256xf32>
      %c0_118 = arith.constant 0 : index
      %c0_119 = arith.constant 0 : index
      %133 = vector.load %arg8[%c0_118, %c0_119] : memref<128x256xf32, #tpu.memory_space<vmem>>, vector<128x256xf32>
      tpu.vector_store %arg8[%c0_118, %c0_119], %132 {strides = array<i32>} : memref<128x256xf32, #tpu.memory_space<vmem>>, vector<128x256xf32>,
    } else {
    }
    %c0 = arith.constant 0 : index
    %c0_1 = arith.constant 0 : index
    %c0_2 = arith.constant 0 : index
    %c0_3 = arith.constant 0 : index
    %3 = vector.load %arg7[%c0, %c0_1, %c0_2, %c0_3] : memref<2x10x10x256xf32, #tpu.memory_space<vmem>>, vector<2x8x8x256xf32>
    %4 = vector.shape_cast %3 : vector<2x8x8x256xf32> to vector<128x256xf32>
    %5 = arith.truncf %4 : vector<128x256xf32> to vector<128x256xbf16>
    %c0_4 = arith.constant 0 : index
    %c0_5 = arith.constant 0 : index
    %c0_6 = arith.constant 0 : index
    %c0_7 = arith.constant 0 : index
    %6 = vector.load %arg2[%c0_4, %c0_5, %c0_6, %c0_7] : memref<1x9x256x256xbf16, #tpu.memory_space<vmem>>, vector<1x1x256x256xbf16>
    %7 = vector.shape_cast %6 : vector<1x1x256x256xbf16> to vector<256x256xbf16>
    %cst = arith.constant dense<0.000000e+00> : vector<128x256xf32>
    %8 = tpu.matmul %5, %7, %cst {dimension_numbers = #tpu.dot_dimension_numbers<[1], [0], [0], [1], [0, 0, 1, 1], [], []>} : vector<128x256xbf16>, vector<256x256xbf16>, vector<128x256xf32> -> vector<128x256xf32>
    %c0_8 = arith.constant 0 : index
    %c0_9 = arith.constant 0 : index
    %c1 = arith.constant 1 : index
    %c0_10 = arith.constant 0 : index
    %9 = vector.load %arg7[%c0_8, %c0_9, %c1, %c0_10] : memref<2x10x10x256xf32, #tpu.memory_space<vmem>>, vector<2x8x8x256xf32>
    %10 = vector.shape_cast %9 : vector<2x8x8x256xf32> to vector<128x256xf32>
    %11 = arith.truncf %10 : vector<128x256xf32> to vector<128x256xbf16>
    %c0_11 = arith.constant 0 : index
    %c1_12 = arith.constant 1 : index
    %c0_13 = arith.constant 0 : index
    %c0_14 = arith.constant 0 : index
    %12 = vector.load %arg2[%c0_11, %c1_12, %c0_13, %c0_14] : memref<1x9x256x256xbf16, #tpu.memory_space<vmem>>, vector<1x1x256x256xbf16>
    %13 = vector.shape_cast %12 : vector<1x1x256x256xbf16> to vector<256x256xbf16>
    %cst_15 = arith.constant dense<0.000000e+00> : vector<128x256xf32>
    %14 = tpu.matmul %11, %13, %cst_15 {dimension_numbers = #tpu.dot_dimension_numbers<[1], [0], [0], [1], [0, 0, 1, 1], [], []>} : vector<128x256xbf16>, vector<256x256xbf16>, vector<128x256xf32> -> vector<128x256xf32>
    %15 = arith.addf %8, %14 : vector<128x256xf32>
    %c0_16 = arith.constant 0 : index
    %c0_17 = arith.constant 0 : index
    %c2 = arith.constant 2 : index
    %c0_18 = arith.constant 0 : index
    %16 = vector.load %arg7[%c0_16, %c0_17, %c2, %c0_18] : memref<2x10x10x256xf32, #tpu.memory_space<vmem>>, vector<2x8x8x256xf32>
    %17 = vector.shape_cast %16 : vector<2x8x8x256xf32> to vector<128x256xf32>
    %18 = arith.truncf %17 : vector<128x256xf32> to vector<128x256xbf16>
    %c0_19 = arith.constant 0 : index
    %c2_20 = arith.constant 2 : index
    %c0_21 = arith.constant 0 : index
    %c0_22 = arith.constant 0 : index
    %19 = vector.load %arg2[%c0_19, %c2_20, %c0_21, %c0_22] : memref<1x9x256x256xbf16, #tpu.memory_space<vmem>>, vector<1x1x256x256xbf16>
    %20 = vector.shape_cast %19 : vector<1x1x256x256xbf16> to vector<256x256xbf16>
    %cst_23 = arith.constant dense<0.000000e+00> : vector<128x256xf32>
    %21 = tpu.matmul %18, %20, %cst_23 {dimension_numbers = #tpu.dot_dimension_numbers<[1], [0], [0], [1], [0, 0, 1, 1], [], []>} : vector<128x256xbf16>, vector<256x256xbf16>, vector<128x256xf32> -> vector<128x256xf32>
    %22 = arith.addf %15, %21 : vector<128x256xf32>
    %c0_24 = arith.constant 0 : index
    %c1_25 = arith.constant 1 : index
    %c0_26 = arith.constant 0 : index
    %c0_27 = arith.constant 0 : index
    %23 = vector.load %arg7[%c0_24, %c1_25, %c0_26, %c0_27] : memref<2x10x10x256xf32, #tpu.memory_space<vmem>>, vector<2x8x8x256xf32>
    %24 = vector.shape_cast %23 : vector<2x8x8x256xf32> to vector<128x256xf32>
    %25 = arith.truncf %24 : vector<128x256xf32> to vector<128x256xbf16>
    %c0_28 = arith.constant 0 : index
    %c3 = arith.constant 3 : index
    %c0_29 = arith.constant 0 : index
    %c0_30 = arith.constant 0 : index
    %26 = vector.load %arg2[%c0_28, %c3, %c0_29, %c0_30] : memref<1x9x256x256xbf16, #tpu.memory_space<vmem>>, vector<1x1x256x256xbf16>
    %27 = vector.shape_cast %26 : vector<1x1x256x256xbf16> to vector<256x256xbf16>
    %cst_31 = arith.constant dense<0.000000e+00> : vector<128x256xf32>
    %28 = tpu.matmul %25, %27, %cst_31 {dimension_numbers = #tpu.dot_dimension_numbers<[1], [0], [0], [1], [0, 0, 1, 1], [], []>} : vector<128x256xbf16>, vector<256x256xbf16>, vector<128x256xf32> -> vector<128x256xf32>
    %29 = arith.addf %22, %28 : vector<128x256xf32>
    %c0_32 = arith.constant 0 : index
    %c1_33 = arith.constant 1 : index
    %c1_34 = arith.constant 1 : index
    %c0_35 = arith.constant 0 : index
    %30 = vector.load %arg7[%c0_32, %c1_33, %c1_34, %c0_35] : memref<2x10x10x256xf32, #tpu.memory_space<vmem>>, vector<2x8x8x256xf32>
    %31 = vector.shape_cast %30 : vector<2x8x8x256xf32> to vector<128x256xf32>
    %32 = arith.truncf %31 : vector<128x256xf32> to vector<128x256xbf16>
    %c0_36 = arith.constant 0 : index
    %c4 = arith.constant 4 : index
    %c0_37 = arith.constant 0 : index
    %c0_38 = arith.constant 0 : index
    %33 = vector.load %arg2[%c0_36, %c4, %c0_37, %c0_38] : memref<1x9x256x256xbf16, #tpu.memory_space<vmem>>, vector<1x1x256x256xbf16>
    %34 = vector.shape_cast %33 : vector<1x1x256x256xbf16> to vector<256x256xbf16>
    %cst_39 = arith.constant dense<0.000000e+00> : vector<128x256xf32>
    %35 = tpu.matmul %32, %34, %cst_39 {dimension_numbers = #tpu.dot_dimension_numbers<[1], [0], [0], [1], [0, 0, 1, 1], [], []>} : vector<128x256xbf16>, vector<256x256xbf16>, vector<128x256xf32> -> vector<128x256xf32>
    %36 = arith.addf %29, %35 : vector<128x256xf32>
    %c0_40 = arith.constant 0 : index
    %c1_41 = arith.constant 1 : index
    %c2_42 = arith.constant 2 : index
    %c0_43 = arith.constant 0 : index
    %37 = vector.load %arg7[%c0_40, %c1_41, %c2_42, %c0_43] : memref<2x10x10x256xf32, #tpu.memory_space<vmem>>, vector<2x8x8x256xf32>
    %38 = vector.shape_cast %37 : vector<2x8x8x256xf32> to vector<128x256xf32>
    %39 = arith.truncf %38 : vector<128x256xf32> to vector<128x256xbf16>
    %c0_44 = arith.constant 0 : index
    %c5 = arith.constant 5 : index
    %c0_45 = arith.constant 0 : index
    %c0_46 = arith.constant 0 : index
    %40 = vector.load %arg2[%c0_44, %c5, %c0_45, %c0_46] : memref<1x9x256x256xbf16, #tpu.memory_space<vmem>>, vector<1x1x256x256xbf16>
    %41 = vector.shape_cast %40 : vector<1x1x256x256xbf16> to vector<256x256xbf16>
    %cst_47 = arith.constant dense<0.000000e+00> : vector<128x256xf32>
    %42 = tpu.matmul %39, %41, %cst_47 {dimension_numbers = #tpu.dot_dimension_numbers<[1], [0], [0], [1], [0, 0, 1, 1], [], []>} : vector<128x256xbf16>, vector<256x256xbf16>, vector<128x256xf32> -> vector<128x256xf32>
    %43 = arith.addf %36, %42 : vector<128x256xf32>
    %c0_48 = arith.constant 0 : index
    %c2_49 = arith.constant 2 : index
    %c0_50 = arith.constant 0 : index
    %c0_51 = arith.constant 0 : index
    %44 = vector.load %arg7[%c0_48, %c2_49, %c0_50, %c0_51] : memref<2x10x10x256xf32, #tpu.memory_space<vmem>>, vector<2x8x8x256xf32>
    %45 = vector.shape_cast %44 : vector<2x8x8x256xf32> to vector<128x256xf32>
    %46 = arith.truncf %45 : vector<128x256xf32> to vector<128x256xbf16>
    %c0_52 = arith.constant 0 : index
    %c6 = arith.constant 6 : index
    %c0_53 = arith.constant 0 : index
    %c0_54 = arith.constant 0 : index
    %47 = vector.load %arg2[%c0_52, %c6, %c0_53, %c0_54] : memref<1x9x256x256xbf16, #tpu.memory_space<vmem>>, vector<1x1x256x256xbf16>
    %48 = vector.shape_cast %47 : vector<1x1x256x256xbf16> to vector<256x256xbf16>
    %cst_55 = arith.constant dense<0.000000e+00> : vector<128x256xf32>
    %49 = tpu.matmul %46, %48, %cst_55 {dimension_numbers = #tpu.dot_dimension_numbers<[1], [0], [0], [1], [0, 0, 1, 1], [], []>} : vector<128x256xbf16>, vector<256x256xbf16>, vector<128x256xf32> -> vector<128x256xf32>
    %50 = arith.addf %43, %49 : vector<128x256xf32>
    %c0_56 = arith.constant 0 : index
    %c2_57 = arith.constant 2 : index
    %c1_58 = arith.constant 1 : index
    %c0_59 = arith.constant 0 : index
    %51 = vector.load %arg7[%c0_56, %c2_57, %c1_58, %c0_59] : memref<2x10x10x256xf32, #tpu.memory_space<vmem>>, vector<2x8x8x256xf32>
    %52 = vector.shape_cast %51 : vector<2x8x8x256xf32> to vector<128x256xf32>
    %53 = arith.truncf %52 : vector<128x256xf32> to vector<128x256xbf16>
    %c0_60 = arith.constant 0 : index
    %c7 = arith.constant 7 : index
    %c0_61 = arith.constant 0 : index
    %c0_62 = arith.constant 0 : index
    %54 = vector.load %arg2[%c0_60, %c7, %c0_61, %c0_62] : memref<1x9x256x256xbf16, #tpu.memory_space<vmem>>, vector<1x1x256x256xbf16>
    %55 = vector.shape_cast %54 : vector<1x1x256x256xbf16> to vector<256x256xbf16>
    %cst_63 = arith.constant dense<0.000000e+00> : vector<128x256xf32>
    %56 = tpu.matmul %53, %55, %cst_63 {dimension_numbers = #tpu.dot_dimension_numbers<[1], [0], [0], [1], [0, 0, 1, 1], [], []>} : vector<128x256xbf16>, vector<256x256xbf16>, vector<128x256xf32> -> vector<128x256xf32>
    %57 = arith.addf %50, %56 : vector<128x256xf32>
    %c0_64 = arith.constant 0 : index
    %c2_65 = arith.constant 2 : index
    %c2_66 = arith.constant 2 : index
    %c0_67 = arith.constant 0 : index
    %58 = vector.load %arg7[%c0_64, %c2_65, %c2_66, %c0_67] : memref<2x10x10x256xf32, #tpu.memory_space<vmem>>, vector<2x8x8x256xf32>
    %59 = vector.shape_cast %58 : vector<2x8x8x256xf32> to vector<128x256xf32>
    %60 = arith.truncf %59 : vector<128x256xf32> to vector<128x256xbf16>
    %c0_68 = arith.constant 0 : index
    %c8 = arith.constant 8 : index
    %c0_69 = arith.constant 0 : index
    %c0_70 = arith.constant 0 : index
    %61 = vector.load %arg2[%c0_68, %c8, %c0_69, %c0_70] : memref<1x9x256x256xbf16, #tpu.memory_space<vmem>>, vector<1x1x256x256xbf16>
    %62 = vector.shape_cast %61 : vector<1x1x256x256xbf16> to vector<256x256xbf16>
    %cst_71 = arith.constant dense<0.000000e+00> : vector<128x256xf32>
    %63 = tpu.matmul %60, %62, %cst_71 {dimension_numbers = #tpu.dot_dimension_numbers<[1], [0], [0], [1], [0, 0, 1, 1], [], []>} : vector<128x256xbf16>, vector<256x256xbf16>, vector<128x256xf32> -> vector<128x256xf32>
    %64 = arith.addf %57, %63 : vector<128x256xf32>
    %c0_72 = arith.constant 0 : index
    %c0_73 = arith.constant 0 : index
    %c0_74 = arith.constant 0 : index
    %65 = vector.load %arg3[%c0_72, %c0_73, %c0_74] : memref<1x1x256xf32, #tpu.memory_space<vmem>>, vector<1x1x256xf32>
    %66 = vector.shape_cast %65 : vector<1x1x256xf32> to vector<1x256xf32>
    %67 = vector.broadcast %66 : vector<1x256xf32> to vector<128x256xf32>
    %68 = arith.addf %64, %67 : vector<128x256xf32>
    %cst_75 = arith.constant 0.000000e+00 : f32
    %69 = vector.broadcast %cst_75 : f32 to vector<128x256xf32>
    %70 = arith.maximumf %68, %69 : vector<128x256xf32>
    %c2_i32 = arith.constant 2 : i32
    %71 = arith.cmpi sge, %arg0, %c2_i32 : i32
    %c2_i32_76 = arith.constant 2 : i32
    %c0_i32_77 = arith.constant 0 : i32
    %72 = arith.cmpi eq, %c2_i32_76, %c0_i32_77 : i32
    %c1_i32 = arith.constant 1 : i32
    %73 = arith.select %72, %c1_i32, %c2_i32_76 : i32
    %74 = arith.remsi %arg0, %73 : i32
    %c0_i32_78 = arith.constant 0 : i32
    %75 = arith.cmpi ne, %74, %c0_i32_78 : i32
    %c0_i32_79 = arith.constant 0 : i32
    %76 = arith.cmpi slt, %74, %c0_i32_79 : i32
    %c0_i32_80 = arith.constant 0 : i32
    %77 = arith.cmpi slt, %73, %c0_i32_80 : i32
    %78 = arith.xori %76, %77 : i1
    %79 = arith.andi %78, %75 : i1
    %80 = arith.addi %74, %73 : i32
    %81 = arith.select %79, %80, %74 : i32
    %c0_i32_81 = arith.constant 0 : i32
    %82 = arith.cmpi eq, %81, %c0_i32_81 : i32
    %83 = arith.andi %71, %82 : i1
    %c0_82 = arith.constant 0 : index
    %c0_83 = arith.constant 0 : index
    %84 = vector.load %arg8[%c0_82, %c0_83] : memref<128x256xf32, #tpu.memory_space<vmem>>, vector<128x256xf32>
    %cst_84 = arith.constant 0.000000e+00 : f32
    %85 = vector.broadcast %cst_84 : f32 to vector<128x256xf32>
    %86 = arith.select %83, %84, %85 : vector<128x256xf32>
    %87 = arith.addf %70, %86 : vector<128x256xf32>
    %c0_85 = arith.constant 0 : index
    %c0_86 = arith.constant 0 : index
    %c0_87 = arith.constant 0 : index
    %88 = vector.load %arg4[%c0_85, %c0_86, %c0_87] : memref<1x1x256xf32, #tpu.memory_space<vmem>>, vector<1x1x256xf32>
    %89 = vector.shape_cast %88 : vector<1x1x256xf32> to vector<1x256xf32>
    %c0_88 = arith.constant 0 : index
    %c0_89 = arith.constant 0 : index
    %c0_90 = arith.constant 0 : index
    %90 = vector.load %arg5[%c0_88, %c0_89, %c0_90] : memref<1x1x256xf32, #tpu.memory_space<vmem>>, vector<1x1x256xf32>
    %91 = vector.shape_cast %90 : vector<1x1x256xf32> to vector<1x256xf32>
    %cst_91 = arith.constant dense<0.000000e+00> : vector<256xf32>
    %92 = vector.multi_reduction <add>, %87, %cst_91 [0] : vector<128x256xf32> to vector<256xf32>
    %93 = vector.shape_cast %92 : vector<256xf32> to vector<1x256xf32>
    %cst_92 = arith.constant 1.280000e+02 : f32
    %94 = vector.broadcast %cst_92 : f32 to vector<1x256xf32>
    %95 = arith.divf %93, %94 : vector<1x256xf32>
    %96 = vector.broadcast %95 : vector<1x256xf32> to vector<128x256xf32>
    %97 = arith.subf %87, %96 : vector<128x256xf32>
    %98 = arith.mulf %97, %97 : vector<128x256xf32>
    %cst_93 = arith.constant dense<0.000000e+00> : vector<256xf32>
    %99 = vector.multi_reduction <add>, %98, %cst_93 [0] : vector<128x256xf32> to vector<256xf32>
    %100 = vector.shape_cast %99 : vector<256xf32> to vector<1x256xf32>
    %cst_94 = arith.constant 1.280000e+02 : f32
    %101 = vector.broadcast %cst_94 : f32 to vector<1x256xf32>
    %102 = arith.divf %100, %101 : vector<1x256xf32>
    %103 = vector.broadcast %89 : vector<1x256xf32> to vector<128x256xf32>
    %104 = arith.mulf %103, %97 : vector<128x256xf32>
    %cst_95 = arith.constant 9.99999974E-6 : f32
    %105 = vector.broadcast %cst_95 : f32 to vector<1x256xf32>
    %106 = arith.addf %102, %105 : vector<1x256xf32>
    %107 = math.rsqrt %106 : vector<1x256xf32>
    %108 = vector.broadcast %107 : vector<1x256xf32> to vector<128x256xf32>
    %109 = arith.mulf %104, %108 : vector<128x256xf32>
    %110 = vector.broadcast %91 : vector<1x256xf32> to vector<128x256xf32>
    %111 = arith.addf %109, %110 : vector<128x256xf32>
    %112 = vector.shape_cast %111 : vector<128x256xf32> to vector<2x8x8x256xf32>
    %c0_96 = arith.constant 0 : index
    %c1_97 = arith.constant 1 : index
    %c1_98 = arith.constant 1 : index
    %c0_99 = arith.constant 0 : index
    %113 = vector.load %arg7[%c0_96, %c1_97, %c1_98, %c0_99] : memref<2x10x10x256xf32, #tpu.memory_space<vmem>>, vector<2x8x8x256xf32>
    tpu.vector_store %arg7[%c0_96, %c1_97, %c1_98, %c0_99], %112 {strides = array<i32>} : memref<2x10x10x256xf32, #tpu.memory_space<vmem>>, vector<2x8x8x256xf32>,
    %c2_i32_100 = arith.constant 2 : i32
    %c0_i32_101 = arith.constant 0 : i32
    %114 = arith.cmpi eq, %c2_i32_100, %c0_i32_101 : i32
    %c1_i32_102 = arith.constant 1 : i32
    %115 = arith.select %114, %c1_i32_102, %c2_i32_100 : i32
    %116 = arith.remsi %arg0, %115 : i32
    %c0_i32_103 = arith.constant 0 : i32
    %117 = arith.cmpi ne, %116, %c0_i32_103 : i32
    %c0_i32_104 = arith.constant 0 : i32
    %118 = arith.cmpi slt, %116, %c0_i32_104 : i32
    %c0_i32_105 = arith.constant 0 : i32
    %119 = arith.cmpi slt, %115, %c0_i32_105 : i32
    %120 = arith.xori %118, %119 : i1
    %121 = arith.andi %120, %117 : i1
    %122 = arith.addi %116, %115 : i32
    %123 = arith.select %121, %122, %116 : i32
    %c0_i32_106 = arith.constant 0 : i32
    %124 = arith.cmpi eq, %123, %c0_i32_106 : i32
    %125 = arith.extui %124 : i1 to i32
    %c0_i32_107 = arith.constant 0 : i32
    %126 = arith.cmpi ne, %125, %c0_i32_107 : i32
    scf.if %126 {
      %c0_109 = arith.constant 0 : index
      %c0_110 = arith.constant 0 : index
      %130 = vector.load %arg8[%c0_109, %c0_110] : memref<128x256xf32, #tpu.memory_space<vmem>>, vector<128x256xf32>
      tpu.vector_store %arg8[%c0_109, %c0_110], %111 {strides = array<i32>} : memref<128x256xf32, #tpu.memory_space<vmem>>, vector<128x256xf32>,
    } else {
    }
    %c20_i32 = arith.constant 20 : i32
    %127 = arith.cmpi eq, %arg0, %c20_i32 : i32
    %128 = arith.extui %127 : i1 to i32
    %c0_i32_108 = arith.constant 0 : i32
    %129 = arith.cmpi ne, %128, %c0_i32_108 : i32
    scf.if %129 {
      %c0_109 = arith.constant 0 : index
      %c0_110 = arith.constant 0 : index
      %c0_111 = arith.constant 0 : index
      %c0_112 = arith.constant 0 : index
      %130 = vector.load %arg7[%c0_109, %c0_110, %c0_111, %c0_112] : memref<2x10x10x256xf32, #tpu.memory_space<vmem>>, vector<2x10x10x256xf32>
      %c0_113 = arith.constant 0 : index
      %c0_114 = arith.constant 0 : index
      %c0_115 = arith.constant 0 : index
      %c0_116 = arith.constant 0 : index
      %131 = vector.load %arg6[%c0_113, %c0_114, %c0_115, %c0_116] : memref<2x10x10x256xf32, #tpu.memory_space<vmem>>, vector<2x10x10x256xf32>
      tpu.vector_store %arg6[%c0_113, %c0_114, %c0_115, %c0_116], %130 {strides = array<i32>} : memref<2x10x10x256xf32, #tpu.memory_space<vmem>>, vector<2x10x10x256xf32>,
    } else {
    }
    return
  }
  func.func @transform_0(%arg0: i32) -> (i32, i32, i32, i32) {
    %c0_i32 = arith.constant 0 : i32
    %c0_i32_0 = arith.constant 0 : i32
    %c0_i32_1 = arith.constant 0 : i32
    %c0_i32_2 = arith.constant 0 : i32
    %c0_i32_3 = arith.constant 0 : i32
    return %c0_i32, %c0_i32_0, %c0_i32_1, %c0_i32_2 : i32, i32, i32, i32
  }
  func.func @transform_1(%arg0: i32) -> (i32, i32, i32, i32) {
    %c0_i32 = arith.constant 0 : i32
    %c0_i32_0 = arith.constant 0 : i32
    %c0_i32_1 = arith.constant 0 : i32
    %c0_i32_2 = arith.constant 0 : i32
    return %arg0, %c0_i32, %c0_i32_0, %c0_i32_1 : i32, i32, i32, i32
  }
  func.func @transform_2(%arg0: i32) -> (i32, i32, i32) {
    %c0_i32 = arith.constant 0 : i32
    %c0_i32_0 = arith.constant 0 : i32
    %c0_i32_1 = arith.constant 0 : i32
    return %arg0, %c0_i32, %c0_i32_0 : i32, i32, i32
  }
  func.func @transform_3(%arg0: i32) -> (i32, i32, i32) {
    %c0_i32 = arith.constant 0 : i32
    %c0_i32_0 = arith.constant 0 : i32
    %c0_i32_1 = arith.constant 0 : i32
    return %arg0, %c0_i32, %c0_i32_0 : i32, i32, i32
  }
  func.func @transform_4(%arg0: i32) -> (i32, i32, i32) {
    %c0_i32 = arith.constant 0 : i32
    %c0_i32_0 = arith.constant 0 : i32
    %c0_i32_1 = arith.constant 0 : i32
    return %arg0, %c0_i32, %c0_i32_0 : i32, i32, i32
  }
  func.func @transform_5(%arg0: i32) -> (i32, i32, i32, i32) {
    %c0_i32 = arith.constant 0 : i32
    %c0_i32_0 = arith.constant 0 : i32
    %c0_i32_1 = arith.constant 0 : i32
    %c0_i32_2 = arith.constant 0 : i32
    %c0_i32_3 = arith.constant 0 : i32
    return %c0_i32, %c0_i32_0, %c0_i32_1, %c0_i32_2 : i32, i32, i32, i32
  }
}

module attributes {stable_mosaic.version = 11 : i64} {
  func.func @_heads_kernel(%arg0: i32, %arg1: memref<2x10x10x256xf32, #tpu.memory_space<vmem>>, %arg2: memref<9x256x4xf32, #tpu.memory_space<vmem>>, %arg3: memref<1x4xf32, #tpu.memory_space<vmem>>, %arg4: memref<1x4xf32, #tpu.memory_space<vmem>>, %arg5: memref<1x4xf32, #tpu.memory_space<vmem>>, %arg6: memref<128x64xf32, #tpu.memory_space<vmem>>, %arg7: memref<1x64xf32, #tpu.memory_space<vmem>>, %arg8: memref<128x64xf32, #tpu.memory_space<vmem>>, %arg9: memref<1x64xf32, #tpu.memory_space<vmem>>, %arg10: memref<1x64xf32, #tpu.memory_space<vmem>>, %arg11: memref<1x1xf32, #tpu.memory_space<vmem>>, %arg12: memref<2x64xf32, #tpu.memory_space<vmem>>, %arg13: memref<2x1xf32, #tpu.memory_space<vmem>>) attributes {dimension_semantics = [#tpu.dimension_semantics<arbitrary>], iteration_bounds = array<i64: 1>, scalar_prefetch = 0 : i64, scratch_operands = 0 : i64, tpu.core_type = #tpu.core_type<tc>, window_params = [{pipeline_mode = #tpu.pipeline_mode<synchronous>, transform_indices = @transform_0, window_bounds = array<i64: 2, 10, 10, 256>}, {pipeline_mode = #tpu.pipeline_mode<synchronous>, transform_indices = @transform_1, window_bounds = array<i64: 9, 256, 4>}, {pipeline_mode = #tpu.pipeline_mode<synchronous>, transform_indices = @transform_2, window_bounds = array<i64: 1, 4>}, {pipeline_mode = #tpu.pipeline_mode<synchronous>, transform_indices = @transform_3, window_bounds = array<i64: 1, 4>}, {pipeline_mode = #tpu.pipeline_mode<synchronous>, transform_indices = @transform_4, window_bounds = array<i64: 1, 4>}, {pipeline_mode = #tpu.pipeline_mode<synchronous>, transform_indices = @transform_5, window_bounds = array<i64: 128, 64>}, {pipeline_mode = #tpu.pipeline_mode<synchronous>, transform_indices = @transform_6, window_bounds = array<i64: 1, 64>}, {pipeline_mode = #tpu.pipeline_mode<synchronous>, transform_indices = @transform_7, window_bounds = array<i64: 128, 64>}, {pipeline_mode = #tpu.pipeline_mode<synchronous>, transform_indices = @transform_8, window_bounds = array<i64: 1, 64>}, {pipeline_mode = #tpu.pipeline_mode<synchronous>, transform_indices = @transform_9, window_bounds = array<i64: 1, 64>}, {pipeline_mode = #tpu.pipeline_mode<synchronous>, transform_indices = @transform_10, window_bounds = array<i64: 1, 1>}, {pipeline_mode = #tpu.pipeline_mode<synchronous>, transform_indices = @transform_11, window_bounds = array<i64: 2, 64>}, {pipeline_mode = #tpu.pipeline_mode<synchronous>, transform_indices = @transform_12, window_bounds = array<i64: 2, 1>}]} {
    %c0 = arith.constant 0 : index
    %c0_0 = arith.constant 0 : index
    %c0_1 = arith.constant 0 : index
    %c0_2 = arith.constant 0 : index
    %0 = vector.load %arg1[%c0, %c0_0, %c0_1, %c0_2] : memref<2x10x10x256xf32, #tpu.memory_space<vmem>>, vector<2x8x8x256xf32>
    %1 = vector.shape_cast %0 : vector<2x8x8x256xf32> to vector<128x256xf32>
    %c0_3 = arith.constant 0 : index
    %c0_4 = arith.constant 0 : index
    %c0_5 = arith.constant 0 : index
    %2 = vector.load %arg2[%c0_3, %c0_4, %c0_5] : memref<9x256x4xf32, #tpu.memory_space<vmem>>, vector<1x256x4xf32>
    %3 = vector.shape_cast %2 : vector<1x256x4xf32> to vector<256x4xf32>
    %cst = arith.constant dense<0.000000e+00> : vector<128x4xf32>
    %4 = tpu.matmul %1, %3, %cst {dimension_numbers = #tpu.dot_dimension_numbers<[1], [0], [0], [1], [0, 0, 1, 1], [], []>} : vector<128x256xf32>, vector<256x4xf32>, vector<128x4xf32> -> vector<128x4xf32>
    %c0_6 = arith.constant 0 : index
    %c0_7 = arith.constant 0 : index
    %c1 = arith.constant 1 : index
    %c0_8 = arith.constant 0 : index
    %5 = vector.load %arg1[%c0_6, %c0_7, %c1, %c0_8] : memref<2x10x10x256xf32, #tpu.memory_space<vmem>>, vector<2x8x8x256xf32>
    %6 = vector.shape_cast %5 : vector<2x8x8x256xf32> to vector<128x256xf32>
    %c1_9 = arith.constant 1 : index
    %c0_10 = arith.constant 0 : index
    %c0_11 = arith.constant 0 : index
    %7 = vector.load %arg2[%c1_9, %c0_10, %c0_11] : memref<9x256x4xf32, #tpu.memory_space<vmem>>, vector<1x256x4xf32>
    %8 = vector.shape_cast %7 : vector<1x256x4xf32> to vector<256x4xf32>
    %cst_12 = arith.constant dense<0.000000e+00> : vector<128x4xf32>
    %9 = tpu.matmul %6, %8, %cst_12 {dimension_numbers = #tpu.dot_dimension_numbers<[1], [0], [0], [1], [0, 0, 1, 1], [], []>} : vector<128x256xf32>, vector<256x4xf32>, vector<128x4xf32> -> vector<128x4xf32>
    %10 = arith.addf %4, %9 : vector<128x4xf32>
    %c0_13 = arith.constant 0 : index
    %c0_14 = arith.constant 0 : index
    %c2 = arith.constant 2 : index
    %c0_15 = arith.constant 0 : index
    %11 = vector.load %arg1[%c0_13, %c0_14, %c2, %c0_15] : memref<2x10x10x256xf32, #tpu.memory_space<vmem>>, vector<2x8x8x256xf32>
    %12 = vector.shape_cast %11 : vector<2x8x8x256xf32> to vector<128x256xf32>
    %c2_16 = arith.constant 2 : index
    %c0_17 = arith.constant 0 : index
    %c0_18 = arith.constant 0 : index
    %13 = vector.load %arg2[%c2_16, %c0_17, %c0_18] : memref<9x256x4xf32, #tpu.memory_space<vmem>>, vector<1x256x4xf32>
    %14 = vector.shape_cast %13 : vector<1x256x4xf32> to vector<256x4xf32>
    %cst_19 = arith.constant dense<0.000000e+00> : vector<128x4xf32>
    %15 = tpu.matmul %12, %14, %cst_19 {dimension_numbers = #tpu.dot_dimension_numbers<[1], [0], [0], [1], [0, 0, 1, 1], [], []>} : vector<128x256xf32>, vector<256x4xf32>, vector<128x4xf32> -> vector<128x4xf32>
    %16 = arith.addf %10, %15 : vector<128x4xf32>
    %c0_20 = arith.constant 0 : index
    %c1_21 = arith.constant 1 : index
    %c0_22 = arith.constant 0 : index
    %c0_23 = arith.constant 0 : index
    %17 = vector.load %arg1[%c0_20, %c1_21, %c0_22, %c0_23] : memref<2x10x10x256xf32, #tpu.memory_space<vmem>>, vector<2x8x8x256xf32>
    %18 = vector.shape_cast %17 : vector<2x8x8x256xf32> to vector<128x256xf32>
    %c3 = arith.constant 3 : index
    %c0_24 = arith.constant 0 : index
    %c0_25 = arith.constant 0 : index
    %19 = vector.load %arg2[%c3, %c0_24, %c0_25] : memref<9x256x4xf32, #tpu.memory_space<vmem>>, vector<1x256x4xf32>
    %20 = vector.shape_cast %19 : vector<1x256x4xf32> to vector<256x4xf32>
    %cst_26 = arith.constant dense<0.000000e+00> : vector<128x4xf32>
    %21 = tpu.matmul %18, %20, %cst_26 {dimension_numbers = #tpu.dot_dimension_numbers<[1], [0], [0], [1], [0, 0, 1, 1], [], []>} : vector<128x256xf32>, vector<256x4xf32>, vector<128x4xf32> -> vector<128x4xf32>
    %22 = arith.addf %16, %21 : vector<128x4xf32>
    %c0_27 = arith.constant 0 : index
    %c1_28 = arith.constant 1 : index
    %c1_29 = arith.constant 1 : index
    %c0_30 = arith.constant 0 : index
    %23 = vector.load %arg1[%c0_27, %c1_28, %c1_29, %c0_30] : memref<2x10x10x256xf32, #tpu.memory_space<vmem>>, vector<2x8x8x256xf32>
    %24 = vector.shape_cast %23 : vector<2x8x8x256xf32> to vector<128x256xf32>
    %c4 = arith.constant 4 : index
    %c0_31 = arith.constant 0 : index
    %c0_32 = arith.constant 0 : index
    %25 = vector.load %arg2[%c4, %c0_31, %c0_32] : memref<9x256x4xf32, #tpu.memory_space<vmem>>, vector<1x256x4xf32>
    %26 = vector.shape_cast %25 : vector<1x256x4xf32> to vector<256x4xf32>
    %cst_33 = arith.constant dense<0.000000e+00> : vector<128x4xf32>
    %27 = tpu.matmul %24, %26, %cst_33 {dimension_numbers = #tpu.dot_dimension_numbers<[1], [0], [0], [1], [0, 0, 1, 1], [], []>} : vector<128x256xf32>, vector<256x4xf32>, vector<128x4xf32> -> vector<128x4xf32>
    %28 = arith.addf %22, %27 : vector<128x4xf32>
    %c0_34 = arith.constant 0 : index
    %c1_35 = arith.constant 1 : index
    %c2_36 = arith.constant 2 : index
    %c0_37 = arith.constant 0 : index
    %29 = vector.load %arg1[%c0_34, %c1_35, %c2_36, %c0_37] : memref<2x10x10x256xf32, #tpu.memory_space<vmem>>, vector<2x8x8x256xf32>
    %30 = vector.shape_cast %29 : vector<2x8x8x256xf32> to vector<128x256xf32>
    %c5 = arith.constant 5 : index
    %c0_38 = arith.constant 0 : index
    %c0_39 = arith.constant 0 : index
    %31 = vector.load %arg2[%c5, %c0_38, %c0_39] : memref<9x256x4xf32, #tpu.memory_space<vmem>>, vector<1x256x4xf32>
    %32 = vector.shape_cast %31 : vector<1x256x4xf32> to vector<256x4xf32>
    %cst_40 = arith.constant dense<0.000000e+00> : vector<128x4xf32>
    %33 = tpu.matmul %30, %32, %cst_40 {dimension_numbers = #tpu.dot_dimension_numbers<[1], [0], [0], [1], [0, 0, 1, 1], [], []>} : vector<128x256xf32>, vector<256x4xf32>, vector<128x4xf32> -> vector<128x4xf32>
    %34 = arith.addf %28, %33 : vector<128x4xf32>
    %c0_41 = arith.constant 0 : index
    %c2_42 = arith.constant 2 : index
    %c0_43 = arith.constant 0 : index
    %c0_44 = arith.constant 0 : index
    %35 = vector.load %arg1[%c0_41, %c2_42, %c0_43, %c0_44] : memref<2x10x10x256xf32, #tpu.memory_space<vmem>>, vector<2x8x8x256xf32>
    %36 = vector.shape_cast %35 : vector<2x8x8x256xf32> to vector<128x256xf32>
    %c6 = arith.constant 6 : index
    %c0_45 = arith.constant 0 : index
    %c0_46 = arith.constant 0 : index
    %37 = vector.load %arg2[%c6, %c0_45, %c0_46] : memref<9x256x4xf32, #tpu.memory_space<vmem>>, vector<1x256x4xf32>
    %38 = vector.shape_cast %37 : vector<1x256x4xf32> to vector<256x4xf32>
    %cst_47 = arith.constant dense<0.000000e+00> : vector<128x4xf32>
    %39 = tpu.matmul %36, %38, %cst_47 {dimension_numbers = #tpu.dot_dimension_numbers<[1], [0], [0], [1], [0, 0, 1, 1], [], []>} : vector<128x256xf32>, vector<256x4xf32>, vector<128x4xf32> -> vector<128x4xf32>
    %40 = arith.addf %34, %39 : vector<128x4xf32>
    %c0_48 = arith.constant 0 : index
    %c2_49 = arith.constant 2 : index
    %c1_50 = arith.constant 1 : index
    %c0_51 = arith.constant 0 : index
    %41 = vector.load %arg1[%c0_48, %c2_49, %c1_50, %c0_51] : memref<2x10x10x256xf32, #tpu.memory_space<vmem>>, vector<2x8x8x256xf32>
    %42 = vector.shape_cast %41 : vector<2x8x8x256xf32> to vector<128x256xf32>
    %c7 = arith.constant 7 : index
    %c0_52 = arith.constant 0 : index
    %c0_53 = arith.constant 0 : index
    %43 = vector.load %arg2[%c7, %c0_52, %c0_53] : memref<9x256x4xf32, #tpu.memory_space<vmem>>, vector<1x256x4xf32>
    %44 = vector.shape_cast %43 : vector<1x256x4xf32> to vector<256x4xf32>
    %cst_54 = arith.constant dense<0.000000e+00> : vector<128x4xf32>
    %45 = tpu.matmul %42, %44, %cst_54 {dimension_numbers = #tpu.dot_dimension_numbers<[1], [0], [0], [1], [0, 0, 1, 1], [], []>} : vector<128x256xf32>, vector<256x4xf32>, vector<128x4xf32> -> vector<128x4xf32>
    %46 = arith.addf %40, %45 : vector<128x4xf32>
    %c0_55 = arith.constant 0 : index
    %c2_56 = arith.constant 2 : index
    %c2_57 = arith.constant 2 : index
    %c0_58 = arith.constant 0 : index
    %47 = vector.load %arg1[%c0_55, %c2_56, %c2_57, %c0_58] : memref<2x10x10x256xf32, #tpu.memory_space<vmem>>, vector<2x8x8x256xf32>
    %48 = vector.shape_cast %47 : vector<2x8x8x256xf32> to vector<128x256xf32>
    %c8 = arith.constant 8 : index
    %c0_59 = arith.constant 0 : index
    %c0_60 = arith.constant 0 : index
    %49 = vector.load %arg2[%c8, %c0_59, %c0_60] : memref<9x256x4xf32, #tpu.memory_space<vmem>>, vector<1x256x4xf32>
    %50 = vector.shape_cast %49 : vector<1x256x4xf32> to vector<256x4xf32>
    %cst_61 = arith.constant dense<0.000000e+00> : vector<128x4xf32>
    %51 = tpu.matmul %48, %50, %cst_61 {dimension_numbers = #tpu.dot_dimension_numbers<[1], [0], [0], [1], [0, 0, 1, 1], [], []>} : vector<128x256xf32>, vector<256x4xf32>, vector<128x4xf32> -> vector<128x4xf32>
    %52 = arith.addf %46, %51 : vector<128x4xf32>
    %c0_62 = arith.constant 0 : index
    %c0_63 = arith.constant 0 : index
    %53 = vector.load %arg3[%c0_62, %c0_63] : memref<1x4xf32, #tpu.memory_space<vmem>>, vector<1x4xf32>
    %54 = vector.broadcast %53 : vector<1x4xf32> to vector<128x4xf32>
    %55 = arith.addf %52, %54 : vector<128x4xf32>
    %cst_64 = arith.constant 0.000000e+00 : f32
    %56 = vector.broadcast %cst_64 : f32 to vector<128x4xf32>
    %57 = arith.maximumf %55, %56 : vector<128x4xf32>
    %c0_65 = arith.constant 0 : index
    %c0_66 = arith.constant 0 : index
    %58 = vector.load %arg4[%c0_65, %c0_66] : memref<1x4xf32, #tpu.memory_space<vmem>>, vector<1x4xf32>
    %c0_67 = arith.constant 0 : index
    %c0_68 = arith.constant 0 : index
    %59 = vector.load %arg5[%c0_67, %c0_68] : memref<1x4xf32, #tpu.memory_space<vmem>>, vector<1x4xf32>
    %cst_69 = arith.constant dense<0.000000e+00> : vector<4xf32>
    %60 = vector.multi_reduction <add>, %57, %cst_69 [0] : vector<128x4xf32> to vector<4xf32>
    %61 = vector.shape_cast %60 : vector<4xf32> to vector<1x4xf32>
    %cst_70 = arith.constant 1.280000e+02 : f32
    %62 = vector.broadcast %cst_70 : f32 to vector<1x4xf32>
    %63 = arith.divf %61, %62 : vector<1x4xf32>
    %64 = vector.broadcast %63 : vector<1x4xf32> to vector<128x4xf32>
    %65 = arith.subf %57, %64 : vector<128x4xf32>
    %66 = arith.mulf %65, %65 : vector<128x4xf32>
    %cst_71 = arith.constant dense<0.000000e+00> : vector<4xf32>
    %67 = vector.multi_reduction <add>, %66, %cst_71 [0] : vector<128x4xf32> to vector<4xf32>
    %68 = vector.shape_cast %67 : vector<4xf32> to vector<1x4xf32>
    %cst_72 = arith.constant 1.280000e+02 : f32
    %69 = vector.broadcast %cst_72 : f32 to vector<1x4xf32>
    %70 = arith.divf %68, %69 : vector<1x4xf32>
    %71 = vector.broadcast %58 : vector<1x4xf32> to vector<128x4xf32>
    %72 = arith.mulf %71, %65 : vector<128x4xf32>
    %cst_73 = arith.constant 9.99999974E-6 : f32
    %73 = vector.broadcast %cst_73 : f32 to vector<1x4xf32>
    %74 = arith.addf %70, %73 : vector<1x4xf32>
    %75 = math.rsqrt %74 : vector<1x4xf32>
    %76 = vector.broadcast %75 : vector<1x4xf32> to vector<128x4xf32>
    %77 = arith.mulf %72, %76 : vector<128x4xf32>
    %78 = vector.broadcast %59 : vector<1x4xf32> to vector<128x4xf32>
    %79 = arith.addf %77, %78 : vector<128x4xf32>
    %c0_74 = arith.constant 0 : index
    %c0_75 = arith.constant 0 : index
    %80 = vector.load %arg6[%c0_74, %c0_75] : memref<128x64xf32, #tpu.memory_space<vmem>>, vector<128x64xf32>
    %c0_76 = arith.constant 0 : index
    %c0_77 = arith.constant 0 : index
    %81 = vector.load %arg7[%c0_76, %c0_77] : memref<1x64xf32, #tpu.memory_space<vmem>>, vector<1x64xf32>
    %82 = vector.extract_strided_slice %79 {offsets = [0, 0], sizes = [128, 1], strides = [1, 1]} : vector<128x4xf32> to vector<128x1xf32>
    %83 = vector.shape_cast %82 : vector<128x1xf32> to vector<2x64x1xf32>
    %84 = vector.extract_strided_slice %80 {offsets = [0, 0], sizes = [64, 64], strides = [1, 1]} : vector<128x64xf32> to vector<64x64xf32>
    %85 = vector.shape_cast %84 : vector<64x64xf32> to vector<1x64x64xf32>
    %86 = vector.broadcast %83 : vector<2x64x1xf32> to vector<2x64x64xf32>
    %87 = vector.broadcast %85 : vector<1x64x64xf32> to vector<2x64x64xf32>
    %88 = arith.mulf %86, %87 : vector<2x64x64xf32>
    %89 = vector.extract_strided_slice %79 {offsets = [0, 1], sizes = [128, 1], strides = [1, 1]} : vector<128x4xf32> to vector<128x1xf32>
    %90 = vector.shape_cast %89 : vector<128x1xf32> to vector<2x64x1xf32>
    %91 = vector.extract_strided_slice %80 {offsets = [64, 0], sizes = [64, 64], strides = [1, 1]} : vector<128x64xf32> to vector<64x64xf32>
    %92 = vector.shape_cast %91 : vector<64x64xf32> to vector<1x64x64xf32>
    %93 = vector.broadcast %90 : vector<2x64x1xf32> to vector<2x64x64xf32>
    %94 = vector.broadcast %92 : vector<1x64x64xf32> to vector<2x64x64xf32>
    %95 = arith.mulf %93, %94 : vector<2x64x64xf32>
    %96 = arith.addf %88, %95 : vector<2x64x64xf32>
    %cst_78 = arith.constant dense<0.000000e+00> : vector<2x64xf32>
    %97 = vector.multi_reduction <add>, %96, %cst_78 [1] : vector<2x64x64xf32> to vector<2x64xf32>
    %98 = vector.broadcast %81 : vector<1x64xf32> to vector<2x64xf32>
    %99 = arith.addf %97, %98 : vector<2x64xf32>
    %cst_79 = arith.constant dense<0xFF800000> : vector<2xf32>
    %100 = vector.multi_reduction <maximumf>, %99, %cst_79 [1] : vector<2x64xf32> to vector<2xf32>
    %101 = vector.shape_cast %100 : vector<2xf32> to vector<2x1xf32>
    %102 = vector.broadcast %101 : vector<2x1xf32> to vector<2x64xf32>
    %103 = arith.subf %99, %102 : vector<2x64xf32>
    %104 = math.exp %103 : vector<2x64xf32>
    %cst_80 = arith.constant dense<0.000000e+00> : vector<2xf32>
    %105 = vector.multi_reduction <add>, %104, %cst_80 [1] : vector<2x64xf32> to vector<2xf32>
    %106 = vector.shape_cast %105 : vector<2xf32> to vector<2x1xf32>
    %107 = vector.broadcast %106 : vector<2x1xf32> to vector<2x64xf32>
    %108 = arith.divf %104, %107 : vector<2x64xf32>
    %c0_81 = arith.constant 0 : index
    %c0_82 = arith.constant 0 : index
    %109 = vector.load %arg12[%c0_81, %c0_82] : memref<2x64xf32, #tpu.memory_space<vmem>>, vector<2x64xf32>
    tpu.vector_store %arg12[%c0_81, %c0_82], %108 {strides = array<i32>} : memref<2x64xf32, #tpu.memory_space<vmem>>, vector<2x64xf32>,
    %c0_83 = arith.constant 0 : index
    %c0_84 = arith.constant 0 : index
    %110 = vector.load %arg8[%c0_83, %c0_84] : memref<128x64xf32, #tpu.memory_space<vmem>>, vector<128x64xf32>
    %c0_85 = arith.constant 0 : index
    %c0_86 = arith.constant 0 : index
    %111 = vector.load %arg9[%c0_85, %c0_86] : memref<1x64xf32, #tpu.memory_space<vmem>>, vector<1x64xf32>
    %112 = vector.extract_strided_slice %79 {offsets = [0, 2], sizes = [128, 1], strides = [1, 1]} : vector<128x4xf32> to vector<128x1xf32>
    %113 = vector.shape_cast %112 : vector<128x1xf32> to vector<2x64x1xf32>
    %114 = vector.extract_strided_slice %110 {offsets = [0, 0], sizes = [64, 64], strides = [1, 1]} : vector<128x64xf32> to vector<64x64xf32>
    %115 = vector.shape_cast %114 : vector<64x64xf32> to vector<1x64x64xf32>
    %116 = vector.broadcast %113 : vector<2x64x1xf32> to vector<2x64x64xf32>
    %117 = vector.broadcast %115 : vector<1x64x64xf32> to vector<2x64x64xf32>
    %118 = arith.mulf %116, %117 : vector<2x64x64xf32>
    %119 = vector.extract_strided_slice %79 {offsets = [0, 3], sizes = [128, 1], strides = [1, 1]} : vector<128x4xf32> to vector<128x1xf32>
    %120 = vector.shape_cast %119 : vector<128x1xf32> to vector<2x64x1xf32>
    %121 = vector.extract_strided_slice %110 {offsets = [64, 0], sizes = [64, 64], strides = [1, 1]} : vector<128x64xf32> to vector<64x64xf32>
    %122 = vector.shape_cast %121 : vector<64x64xf32> to vector<1x64x64xf32>
    %123 = vector.broadcast %120 : vector<2x64x1xf32> to vector<2x64x64xf32>
    %124 = vector.broadcast %122 : vector<1x64x64xf32> to vector<2x64x64xf32>
    %125 = arith.mulf %123, %124 : vector<2x64x64xf32>
    %126 = arith.addf %118, %125 : vector<2x64x64xf32>
    %cst_87 = arith.constant dense<0.000000e+00> : vector<2x64xf32>
    %127 = vector.multi_reduction <add>, %126, %cst_87 [1] : vector<2x64x64xf32> to vector<2x64xf32>
    %128 = vector.broadcast %111 : vector<1x64xf32> to vector<2x64xf32>
    %129 = arith.addf %127, %128 : vector<2x64xf32>
    %cst_88 = arith.constant 0.000000e+00 : f32
    %130 = vector.broadcast %cst_88 : f32 to vector<2x64xf32>
    %131 = arith.maximumf %129, %130 : vector<2x64xf32>
    %c0_89 = arith.constant 0 : index
    %c0_90 = arith.constant 0 : index
    %132 = vector.load %arg10[%c0_89, %c0_90] : memref<1x64xf32, #tpu.memory_space<vmem>>, vector<1x64xf32>
    %133 = vector.broadcast %132 : vector<1x64xf32> to vector<2x64xf32>
    %134 = arith.mulf %131, %133 : vector<2x64xf32>
    %cst_91 = arith.constant dense<0.000000e+00> : vector<2xf32>
    %135 = vector.multi_reduction <add>, %134, %cst_91 [1] : vector<2x64xf32> to vector<2xf32>
    %136 = vector.shape_cast %135 : vector<2xf32> to vector<2x1xf32>
    %c0_92 = arith.constant 0 : index
    %c0_93 = arith.constant 0 : index
    %137 = vector.load %arg11[%c0_92, %c0_93] : memref<1x1xf32, #tpu.memory_space<vmem>>, vector<1x1xf32>
    %138 = vector.broadcast %137 : vector<1x1xf32> to vector<2x1xf32>
    %139 = arith.addf %136, %138 : vector<2x1xf32>
    %140 = math.tanh %139 : vector<2x1xf32>
    %c0_94 = arith.constant 0 : index
    %c0_95 = arith.constant 0 : index
    %141 = vector.load %arg13[%c0_94, %c0_95] : memref<2x1xf32, #tpu.memory_space<vmem>>, vector<2x1xf32>
    tpu.vector_store %arg13[%c0_94, %c0_95], %140 {strides = array<i32>} : memref<2x1xf32, #tpu.memory_space<vmem>>, vector<2x1xf32>,
    return
  }
  func.func @transform_0(%arg0: i32) -> (i32, i32, i32, i32) {
    %c0_i32 = arith.constant 0 : i32
    %c0_i32_0 = arith.constant 0 : i32
    %c0_i32_1 = arith.constant 0 : i32
    %c0_i32_2 = arith.constant 0 : i32
    %c0_i32_3 = arith.constant 0 : i32
    return %c0_i32, %c0_i32_0, %c0_i32_1, %c0_i32_2 : i32, i32, i32, i32
  }
  func.func @transform_1(%arg0: i32) -> (i32, i32, i32) {
    %c0_i32 = arith.constant 0 : i32
    %c0_i32_0 = arith.constant 0 : i32
    %c0_i32_1 = arith.constant 0 : i32
    %c0_i32_2 = arith.constant 0 : i32
    return %c0_i32, %c0_i32_0, %c0_i32_1 : i32, i32, i32
  }
  func.func @transform_2(%arg0: i32) -> (i32, i32) {
    %c0_i32 = arith.constant 0 : i32
    %c0_i32_0 = arith.constant 0 : i32
    %c0_i32_1 = arith.constant 0 : i32
    return %c0_i32, %c0_i32_0 : i32, i32
  }
  func.func @transform_3(%arg0: i32) -> (i32, i32) {
    %c0_i32 = arith.constant 0 : i32
    %c0_i32_0 = arith.constant 0 : i32
    %c0_i32_1 = arith.constant 0 : i32
    return %c0_i32, %c0_i32_0 : i32, i32
  }
  func.func @transform_4(%arg0: i32) -> (i32, i32) {
    %c0_i32 = arith.constant 0 : i32
    %c0_i32_0 = arith.constant 0 : i32
    %c0_i32_1 = arith.constant 0 : i32
    return %c0_i32, %c0_i32_0 : i32, i32
  }
  func.func @transform_5(%arg0: i32) -> (i32, i32) {
    %c0_i32 = arith.constant 0 : i32
    %c0_i32_0 = arith.constant 0 : i32
    %c0_i32_1 = arith.constant 0 : i32
    return %c0_i32, %c0_i32_0 : i32, i32
  }
  func.func @transform_6(%arg0: i32) -> (i32, i32) {
    %c0_i32 = arith.constant 0 : i32
    %c0_i32_0 = arith.constant 0 : i32
    %c0_i32_1 = arith.constant 0 : i32
    return %c0_i32, %c0_i32_0 : i32, i32
  }
  func.func @transform_7(%arg0: i32) -> (i32, i32) {
    %c0_i32 = arith.constant 0 : i32
    %c0_i32_0 = arith.constant 0 : i32
    %c0_i32_1 = arith.constant 0 : i32
    return %c0_i32, %c0_i32_0 : i32, i32
  }
  func.func @transform_8(%arg0: i32) -> (i32, i32) {
    %c0_i32 = arith.constant 0 : i32
    %c0_i32_0 = arith.constant 0 : i32
    %c0_i32_1 = arith.constant 0 : i32
    return %c0_i32, %c0_i32_0 : i32, i32
  }
  func.func @transform_9(%arg0: i32) -> (i32, i32) {
    %c0_i32 = arith.constant 0 : i32
    %c0_i32_0 = arith.constant 0 : i32
    %c0_i32_1 = arith.constant 0 : i32
    return %c0_i32, %c0_i32_0 : i32, i32
  }
  func.func @transform_10(%arg0: i32) -> (i32, i32) {
    %c0_i32 = arith.constant 0 : i32
    %c0_i32_0 = arith.constant 0 : i32
    %c0_i32_1 = arith.constant 0 : i32
    return %c0_i32, %c0_i32_0 : i32, i32
  }
  func.func @transform_11(%arg0: i32) -> (i32, i32) {
    %c0_i32 = arith.constant 0 : i32
    %c0_i32_0 = arith.constant 0 : i32
    %c0_i32_1 = arith.constant 0 : i32
    return %c0_i32, %c0_i32_0 : i32, i32
  }
  func.func @transform_12(%arg0: i32) -> (i32, i32) {
    %c0_i32 = arith.constant 0 : i32
    %c0_i32_0 = arith.constant 0 : i32
    %c0_i32_1 = arith.constant 0 : i32
    return %c0_i32, %c0_i32_0 : i32, i32
  }
}

</mosaic_0001>

<bundles_post_ra>
// kernel: net_forward.2
= control target key start
LH: loop header
LB: loop body
LE: loop exit
PB: predicated region body
PF: predicated region fallthrough
CT: control target
= control target key end

     0   :  { %s9726_s0 = inlined_call_operand.vmem [shape: f32[2,10,10,256], index: 0, kind: input, shape index: {}]   ;;  %s9727_s1 = inlined_call_operand.hbm [shape: bf16[21,9,256,256], index: 1, kind: input, shape index: {}]   ;;  %s9728_s2 = inlined_call_operand.hbm [shape: f32[21,1,256], index: 2, kind: input, shape index: {}]   ;;  %s9729_s3 = inlined_call_operand.hbm [shape: f32[21,1,256], index: 3, kind: input, shape index: {}]   ;;  %s9730_s4 = inlined_call_operand.hbm [shape: f32[21,1,256], index: 4, kind: input, shape index: {}]   ;;  %s9731_s5 = inlined_call_operand.vmem [shape: f32[2,10,10,256], index: 5, kind: output, shape index: {}]  }
   0x1   :  { %9735 = sst [smem:[#allocation14_spill]] %s9727_s1 }
   0x2   :  { %10 = vsyncpa [#allocation5], 0 }
   0x3   :  { %12 = vsyncpa [#allocation5 + $0x1], 0 }
   0x4   :  { %13 = vsyncpa [#allocation7], 0 }
   0x5   :  { %15 = vsyncpa [#allocation7 + $0x1], 0 }
   0x6   :  { %16 = vsyncpa [#allocation10], 0 }
   0x7   :  { %18 = vsyncpa [#allocation10 + $0x1], 0  ;;  %s7880_s18 = smov 0   ;;  %s7882_s19 = smov 0  }
   0x8   :  { %s7884_s20 = smov 0   ;;  %s7886_s21 = smov 0  }
   0x9 LB: > { %s7899_s22 = sadd.s32 4294967295, %s7841_s21   ;;  %s7902_s23 = sadd.s32 1, %s7841_s21   ;;  %s7841_s21 = sphi %s7886_s21, %s9749_s21   ;;  %s7837_s20 = sphi %s7884_s20, %s9748_s20   ;;  %s7833_s19 = sphi %s7882_s19, %s9747_s19   ;;  %s7829_s18 = sphi %s7880_s18, %s9746_s18  }
   0xa   : > { %s49_s24 = ssub.s32 %s7841_s21, %s7902_s23  ;;  %s52_s25 = sadd.s32 1, %s7837_s20 }
   0xb   : > { %p50_p0 = scmp.eq.s32.totalorder %s49_s24, 0  ;;  %p59_p1 = scmp.ne.s32.totalorder %s7837_s20, %s7833_s19 }
   0xc   : > { %p60_p2 = scmp.eq.s32.totalorder %s7841_s21, 0  ;;  %p65_p3 = scmp.ne.s32.totalorder %s7833_s19, %s7829_s18 }
   0xd   : > { %s7912_s26 = scalar_select %p50_p0, %s7837_s20, %s52_s25  }
   0xe   : > { %p61_p4 = por %p60_p2, %p59_p1  ;;  %p66_p5 = scmp.eq.s32.totalorder %s7899_s22, 0 }
   0xf   : > { %p7111_p6 = scmp.lt.s32.totalorder %s7841_s21, 21  ;;  %s7921_s28 = sand.u32 1, %s7837_s20  }
  0x10   : > { %p7916_p7 = por %p66_p5, %p65_p3  ;;  %s212_s30 = sand.u32 1, %s7841_s21  }
  0x11   : > { %p7923_p8 = pnand %p7111_p6, %p61_p4  ;;  %s7929_s6 = sshll.u32 %s7921_s28, 1 }
  0x12   : > { %s9736_s27 = scalar_select %p7916_p7, 1, 0 }
  0x13   : > { %s9737_s29 = scalar_select %p7923_p8, 1, 0 }
  0x14   : > { %s7932_s7 = sshll.u32 %s7841_s21, 5  ;;  %s216_s8 = scalar_lea.vmem [#allocation6], %s7929_s6 }
  0x15   : > { %s224_s9 = sshll.u32 %s216_s8, 4  ;;  %s7939_s12 = scalar_lea.hbm %s9728_s2, %s7932_s7  ;;  %s7941_s9 = int_to_ptr.vmem [resolvable:$true] %s224_s9 }
  0x16   : > { %s7943_s13 = scalar_lea.sflag [#allocation7], %s212_s30  ;;  %s7679_s14 = scalar_lea.hbm %s7939_s12, 32 }
  0x17   : > { %p7680_p9 = scmp.ne.s32.totalorder %s7939_s12, %s7679_s14  ;;  %p7949_p10 = pneg %p7923_p8 }
  0x18   : > { %s7684_s18 = scalar_lea.hbm %s9728_s2, 672  ;;  %p7685_p13 = scmp.lt.u32.totalorder %s7939_s12, %s9728_s2 }
  0x19   : > { %p7682_p11 = pnand %p7949_p10, %p7680_p9  ;;  %p7686_p0 = scmp.lt.u32.totalorder %s7684_s18, %s7679_s14 }
  0x1a   : > { %p7688_p2 = scmp.lt.u32.totalorder %s7679_s14, %s7939_s12 }
  0x1b   : > { %p7683_p12 = pneg %p7682_p11  ;;  %p7687_p1 = por %p7686_p0, %p7685_p13 }
  0x1d   : > { %p7689_p3 = por %p7688_p2, %p7687_p1 }
  0x1f   : > { %p7690_p4 = pnand %p7689_p3, %p7683_p12 }
  0x21   : > { %7693 = shalt.err (!%p7690_p4)
}
  0x22   : > { %s7694_s30 = scalar_lea.vmem %s7941_s9, 32  ;;  %s7843_s8 = smov [#allocation6]  }
  0x23   : > { %p7695_p5 = scmp.ne.s32.totalorder %s7941_s9, %s7694_s30  ;;  %s7699_s10 = sshll.u32 %s7843_s8, 4  ;;  %s7700_s10 = int_to_ptr.vmem [resolvable:$false] %s7699_s10 }
  0x24   : > { %s7701_s11 = scalar_lea.vmem %s7700_s10, 64  ;;  %p7702_p11 = scmp.lt.s32.totalorder %s7941_s9, %s7700_s10 }
  0x25   : > { %p7697_p6 = pnand %p7695_p5, %p7949_p10  ;;  %p7703_p7 = scmp.lt.s32.totalorder %s7701_s11, %s7694_s30 }
  0x27   : > { %p7698_p9 = pneg %p7697_p6  ;;  %p7704_p13 = por %p7703_p7, %p7702_p11 }
  0x29   : > { %p7705_p0 = pnand %p7704_p13, %p7698_p9 }
  0x2b   : > { %7708 = shalt.err (!%p7705_p0)
}
  0x2c   : > { %7104 = dma.hbm_to_vmem [thread:$0]  (!%p7923_p8), %s7939_s12, 32, %s7941_s9, %s7943_s13  }
  0x2d   : > { %p6239_p12 = scmp.ge.s32.totalorder %s7841_s21, 1  ;;  %p267_p1 = scmp.lt.s32.totalorder %s7841_s21, 22 }
  0x2e   : > { %s7087_s14 = smul.u32 2304, %s7921_s28  ;;  %s9740_s1 = sld [smem:[#allocation14_spill]] }
  0x2f   : > { %p7976_p2 = pnand %p6239_p12, %p267_p1  ;;  %s7088_s17 = smul.u32 36864, %s7841_s21 }
  0x30   : > { %s195_s30 = scalar_lea.vmem [#allocation4], %s7087_s14  ;;  %s192_s9 = scalar_lea.sflag [#allocation5], %s7921_s28 }
  0x31   : > { %s9739_s16 = scalar_select %p7976_p2, 1, 0 }
  0x32   : > { %s202_s8 = sshll.u32 %s195_s30, 4  ;;  %s7986_s8 = int_to_ptr.vmem [resolvable:$true] %s202_s8 }
  0x34   : > { %s7984_s25 = scalar_lea.hbm %s9740_s1, %s7088_s17  ;;  %s7714_s11 = scalar_lea.hbm %s9740_s1, 774144 }
  0x35   : > { %s7709_s12 = scalar_lea.hbm %s7984_s25, 36864  ;;  %p7715_p5 = scmp.lt.u32.totalorder %s7984_s25, %s9740_s1 }
  0x36   : > { %p7710_p7 = scmp.ne.s32.totalorder %s7984_s25, %s7709_s12  ;;  %p7716_p6 = scmp.lt.u32.totalorder %s7714_s11, %s7709_s12 }
  0x37   : > { %p7718_p11 = scmp.lt.u32.totalorder %s7709_s12, %s7984_s25 }
  0x38   : > { %p7712_p3 = pnand %p7710_p7, %p7949_p10  ;;  %p7717_p9 = por %p7716_p6, %p7715_p5 }
  0x3a   : > { %p7713_p4 = pneg %p7712_p3  ;;  %p7719_p13 = por %p7718_p11, %p7717_p9 }
  0x3c   : > { %p7720_p0 = pnand %p7719_p13, %p7713_p4 }
  0x3e   : > { %7723 = shalt.err (!%p7720_p0)
}
  0x3f   : > { %s7724_s14 = scalar_lea.vmem %s7986_s8, 36864  ;;  %s7844_s24 = smov [#allocation4]  }
  0x40   : > { %p7725_p12 = scmp.ne.s32.totalorder %s7986_s8, %s7724_s14  ;;  %s7729_s30 = sshll.u32 %s7844_s24, 4  ;;  %s7730_s30 = int_to_ptr.vmem [resolvable:$false] %s7729_s30 }
  0x41   : > { %s7731_s21 = scalar_lea.vmem %s7730_s30, 73728  ;;  %p7732_p3 = scmp.lt.s32.totalorder %s7986_s8, %s7730_s30 }
  0x42   : > { %p7727_p1 = pnand %p7725_p12, %p7949_p10  ;;  %p7733_p2 = scmp.lt.s32.totalorder %s7731_s21, %s7724_s14 }
  0x44   : > { %p7728_p7 = pneg %p7727_p1  ;;  %p7734_p5 = por %p7733_p2, %p7732_p3 }
  0x46   : > { %p7735_p6 = pnand %p7734_p5, %p7728_p7 }
  0x48   : > { %7738 = shalt.err (!%p7735_p6)
}
  0x49   : > { %s7845_s12 = smov 128   ;;  %s7846_s10 = smov 8  }
  0x4a   : > { %7101 = dma.hbm_to_vmem [thread:$0]  (!%p7923_p8), %s7984_s25, 36864, %s7986_s8, %s192_s9, %s7845_s12, %s7845_s12, %s7846_s10  }
  0x4b   : > { %s8016_s18 = scalar_lea.hbm %s9729_s3, %s7932_s7  ;;  %s235_s14 = scalar_lea.vmem [#allocation8], %s7929_s6 }
  0x4c   : > { %s243_s24 = sshll.u32 %s235_s14, 4  ;;  %s7739_s30 = scalar_lea.hbm %s8016_s18, 32  ;;  %s244_s24 = int_to_ptr.vmem [resolvable:$true] %s243_s24 }
  0x4d   : > { %p7740_p2 = scmp.ne.s32.totalorder %s8016_s18, %s7739_s30  ;;  %s7744_s25 = scalar_lea.hbm %s9729_s3, 672 }
  0x4e   : > { %p7745_p11 = scmp.lt.u32.totalorder %s8016_s18, %s9729_s3  ;;  %p7746_p13 = scmp.lt.u32.totalorder %s7744_s25, %s7739_s30 }
  0x4f   : > { %p7742_p4 = pnand %p7740_p2, %p7949_p10  ;;  %p7748_p12 = scmp.lt.u32.totalorder %s7739_s30, %s8016_s18 }
  0x50   : > { %p7747_p0 = por %p7746_p13, %p7745_p11 }
  0x51   : > { %p7743_p9 = pneg %p7742_p4 }
  0x52   : > { %p7749_p1 = por %p7748_p12, %p7747_p0 }
  0x54   : > { %p7750_p7 = pnand %p7749_p1, %p7743_p9 }
  0x56   : > { %7753 = shalt.err (!%p7750_p7)
}
  0x57   : > { %s7754_s12 = scalar_lea.vmem %s244_s24, 32  ;;  %s7847_s10 = smov [#allocation8]  }
  0x58   : > { %p7755_p3 = scmp.ne.s32.totalorder %s244_s24, %s7754_s12  ;;  %s7759_s11 = sshll.u32 %s7847_s10, 4  ;;  %s7760_s11 = int_to_ptr.vmem [resolvable:$false] %s7759_s11 }
  0x59   : > { %s7761_s1 = scalar_lea.vmem %s7760_s11, 64  ;;  %p7762_p2 = scmp.lt.s32.totalorder %s244_s24, %s7760_s11 }
  0x5a   : > { %p7757_p5 = pnand %p7755_p3, %p7949_p10  ;;  %p7763_p4 = scmp.lt.s32.totalorder %s7761_s1, %s7754_s12 }
  0x5c   : > { %p7758_p6 = pneg %p7757_p5  ;;  %p7764_p8 = por %p7763_p4, %p7762_p2 }
  0x5e   : > { %p7765_p11 = pnand %p7764_p8, %p7758_p6 }
  0x60   : > { %7768 = shalt.err (!%p7765_p11)
}
  0x61   : > { %p9741_p13 = scmp.ne.s32.totalorder %s9737_s29, 0  ;;  %s8041_s30 = scalar_lea.hbm %s9730_s4, %s7932_s7 }
  0x62   : > { %s254_s21 = scalar_lea.vmem [#allocation9], %s7929_s6  ;;  %s251_s8 = scalar_lea.sflag [#allocation10], %s7921_s28 }
  0x63   : > { %7107 = dma.hbm_to_vmem [thread:$0]  (!%p9741_p13), %s8016_s18, 32, %s244_s24, %s7943_s13  }
  0x64   : > { %s262_s25 = sshll.u32 %s254_s21, 4  ;;  %s7769_s9 = scalar_lea.hbm %s8041_s30, 32  ;;  %s263_s25 = int_to_ptr.vmem [resolvable:$true] %s262_s25 }
  0x65   : > { %p7770_p8 = scmp.ne.s32.totalorder %s8041_s30, %s7769_s9  ;;  %s7774_s18 = scalar_lea.hbm %s9730_s4, 672 }
  0x66   : > { %p7775_p12 = scmp.lt.u32.totalorder %s8041_s30, %s9730_s4  ;;  %p7776_p1 = scmp.lt.u32.totalorder %s7774_s18, %s7769_s9 }
  0x67   : > { %p7772_p9 = pnand %p7770_p8, %p7949_p10  ;;  %p7778_p3 = scmp.lt.u32.totalorder %s7769_s9, %s8041_s30 }
  0x68   : > { %p7777_p7 = por %p7776_p1, %p7775_p12 }
  0x69   : > { %p7773_p0 = pneg %p7772_p9 }
  0x6a   : > { %p7779_p5 = por %p7778_p3, %p7777_p7 }
  0x6c   : > { %p7780_p6 = pnand %p7779_p5, %p7773_p0 }
  0x6e   : > { %7783 = shalt.err (!%p7780_p6)
}
  0x6f   : > { %s7784_s28 = scalar_lea.vmem %s263_s25, 32  ;;  %s7848_s6 = smov [#allocation9]  }
  0x70   : > { %p7785_p2 = scmp.ne.s32.totalorder %s263_s25, %s7784_s28  ;;  %s7789_s10 = sshll.u32 %s7848_s6, 4  ;;  %s7790_s10 = int_to_ptr.vmem [resolvable:$false] %s7789_s10 }
  0x71   : > { %s7791_s11 = scalar_lea.vmem %s7790_s10, 64  ;;  %p7792_p8 = scmp.lt.s32.totalorder %s263_s25, %s7790_s10 }
  0x72   : > { %p7787_p4 = pnand %p7785_p2, %p7949_p10  ;;  %p7793_p9 = scmp.lt.s32.totalorder %s7791_s11, %s7784_s28 }
  0x74   : > { %p7788_p11 = pneg %p7787_p4  ;;  %p7794_p13 = por %p7793_p9, %p7792_p8 }
  0x76   : > { %p7795_p1 = pnand %p7794_p13, %p7788_p11 }
  0x78   : > { %7798 = shalt.err (!%p7795_p1)
}
  0x79   : > { %p9742_p12 = scmp.ne.s32.totalorder %s9737_s29, 0  ;;  %p9743_p0 = scmp.ne.s32.totalorder %s9739_s16, 0 }
  0x7a   : > { %s273_s15 = sand.u32 (!%p9743_p0), 1, %s7833_s19   ;;  %p9744_p10 = scmp.ne.s32.totalorder (!%p9743_p0), %s9736_s27, 0 }
  0x7b   : > { %7110 = dma.hbm_to_vmem [thread:$0]  (!%p9742_p12), %s8041_s30, 32, %s263_s25, %s251_s8  }
  0x7c   : > { %271 = sbr.rel (%p9743_p0) target bundleno = 964 (0x3c4), region = 40  ;;  %s274_s17 = scalar_lea.sflag (!%p9743_p0), [#allocation5], %s273_s15 }
  0x7d   : > { %s7089_s1 = smul.u32 (!%p9743_p0), 2304, %s273_s15 }
  0x7f   : > { %s8065_s14 = scalar_lea.vmem (!%p9743_p0), [#allocation4], %s7089_s1 }
  0x83   : > { %7816 = dma.done.wait (%p9744_p10), %s274_s17, 36864  }
  0x84   : > { %7818 = vsyncadd (%p9744_p10), %s274_s17, 4294930432  ;;  %s282_s29 = sand.u32 1, %s7899_s22   ;;  %s8072_s21 = sshll.u32 %s273_s15, 1 }
  0x85   : > { %s283_s16 = scalar_lea.sflag [#allocation7], %s282_s29  ;;  %s286_s30 = scalar_lea.vmem [#allocation6], %s8072_s21 }
  0x86   : > { %7820 = dma.done.wait (%p9744_p10), %s283_s16, 64  }
  0x87   : > { %7822 = vsyncadd (%p9744_p10), %s283_s16, 4294967232  ;;  %s295_s25 = scalar_lea.vmem [#allocation8], %s8072_s21  ;;  %s301_s8 = scalar_lea.sflag [#allocation10], %s273_s15 }
  0x88   : > { %s304_s9 = scalar_lea.vmem [#allocation9], %s8072_s21 }
  0x89   : > { %7824 = dma.done.wait (%p9744_p10), %s301_s8, 32  }
  0x8a   : > { %7826 = vsyncadd (%p9744_p10), %s301_s8, 4294967264  ;;  %p6243_p13 = scmp.ne.s32.totalorder %s7899_s22, 0 }
  0x8b   : > { %v345_v0 = vld [vmem:[%s9726_s0] sm:$0xff] (!%p6243_p13)  ;;  %v346_v1 = vld [vmem:[%s9726_s0 + $0x8] sm:$0xff] (!%p6243_p13)  ;;  %v347_v2 = vld [vmem:[%s9726_s0 + $0x10] sm:$0x3] (!%p6243_p13)  ;;  %v7849_v6 = vmov (!%p6243_p13), 0.0  }
  0x8c   : > { %344 = sbr.rel (%p6243_p13) target bundleno = 196 (0xc4), region = 60  ;;  %425 = vst [vmem:[#allocation2] sm:$0xff] (!%p6243_p13), %v345_v0  ;;  %426 = vst [vmem:[#allocation2 + $0x8] sm:$0xff] (!%p6243_p13), %v346_v1  ;;  %v348_v3 = vld [vmem:[%s9726_s0 + $0x18] sm:$0x3] (!%p6243_p13)  ;;  %v349_v4 = vld [vmem:[%s9726_s0 + $0x20] sm:$0xff] (!%p6243_p13) }
  0x8d   : > { %427 = vst [vmem:[#allocation2 + $0x10] sm:$0x3] (!%p6243_p13), %v347_v2  ;;  %v350_v5 = vld [vmem:[%s9726_s0 + $0x28] sm:$0xff] (!%p6243_p13)  ;;  %505 = vst [vmem:[#allocation3] sm:$0xff] (!%p6243_p13), %v7849_v6  ;;  %v351_v7 = vld [vmem:[%s9726_s0 + $0x30] sm:$0x3] (!%p6243_p13) }
  0x8e   : > { %506 = vst [vmem:[#allocation3 + $0x8] sm:$0xff] (!%p6243_p13), %v7849_v6  ;;  %507 = vst [vmem:[#allocation3 + $0x10] sm:$0xff] (!%p6243_p13), %v7849_v6  ;;  %v352_v8 = vld [vmem:[%s9726_s0 + $0x38] sm:$0x3] (!%p6243_p13)  ;;  %v353_v9 = vld [vmem:[%s9726_s0 + $0x40] sm:$0xff] (!%p6243_p13) }
  0x8f   : > { %508 = vst [vmem:[#allocation3 + $0x18] sm:$0xff] (!%p6243_p13), %v7849_v6  ;;  %509 = vst [vmem:[#allocation3 + $0x20] sm:$0xff] (!%p6243_p13), %v7849_v6  ;;  %v354_v10 = vld [vmem:[%s9726_s0 + $0x48] sm:$0xff] (!%p6243_p13)  ;;  %v355_v11 = vld [vmem:[%s9726_s0 + $0x50] sm:$0x3] (!%p6243_p13) }
  0x90   : > { %510 = vst [vmem:[#allocation3 + $0x28] sm:$0xff] (!%p6243_p13), %v7849_v6  ;;  %511 = vst [vmem:[#allocation3 + $0x30] sm:$0xff] (!%p6243_p13), %v7849_v6  ;;  %v356_v12 = vld [vmem:[%s9726_s0 + $0x58] sm:$0x3] (!%p6243_p13)  ;;  %v357_v13 = vld [vmem:[%s9726_s0 + $0x60] sm:$0xff] (!%p6243_p13) }
  0x91   : > { %512 = vst [vmem:[#allocation3 + $0x38] sm:$0xff] (!%p6243_p13), %v7849_v6  ;;  %513 = vst [vmem:[#allocation3 + $0x40] sm:$0xff] (!%p6243_p13), %v7849_v6  ;;  %v358_v14 = vld [vmem:[%s9726_s0 + $0x68] sm:$0xff] (!%p6243_p13)  ;;  %v359_v15 = vld [vmem:[%s9726_s0 + $0x70] sm:$0x3] (!%p6243_p13) }
  0x92   : > { %514 = vst [vmem:[#allocation3 + $0x48] sm:$0xff] (!%p6243_p13), %v7849_v6  ;;  %515 = vst [vmem:[#allocation3 + $0x50] sm:$0xff] (!%p6243_p13), %v7849_v6  ;;  %v360_v16 = vld [vmem:[%s9726_s0 + $0x78] sm:$0x3] (!%p6243_p13)  ;;  %v361_v17 = vld [vmem:[%s9726_s0 + $0x80] sm:$0xff] (!%p6243_p13) }
  0x93   : > { %516 = vst [vmem:[#allocation3 + $0x58] sm:$0xff] %v7849_v6  ;;  %517 = vst [vmem:[#allocation3 + $0x60] sm:$0xff] %v7849_v6  ;;  %v362_v18 = vld [vmem:[%s9726_s0 + $0x88] sm:$0xff]  ;;  %v363_v19 = vld [vmem:[%s9726_s0 + $0x90] sm:$0x3] }
  0x94   : > { %518 = vst [vmem:[#allocation3 + $0x68] sm:$0xff] %v7849_v6  ;;  %519 = vst [vmem:[#allocation3 + $0x70] sm:$0xff] %v7849_v6  ;;  %v364_v20 = vld [vmem:[%s9726_s0 + $0x98] sm:$0x3]  ;;  %v365_v21 = vld [vmem:[%s9726_s0 + $0xa0] sm:$0xff] }
  0x95   : > { %520 = vst [vmem:[#allocation3 + $0x78] sm:$0xff] %v7849_v6  ;;  %521 = vst [vmem:[#allocation3 + $0x80] sm:$0xff] %v7849_v6  ;;  %v366_v22 = vld [vmem:[%s9726_s0 + $0xa8] sm:$0xff]  ;;  %v367_v23 = vld [vmem:[%s9726_s0 + $0xb0] sm:$0x3] }
  0x96   : > { %522 = vst [vmem:[#allocation3 + $0x88] sm:$0xff] %v7849_v6  ;;  %523 = vst [vmem:[#allocation3 + $0x90] sm:$0xff] %v7849_v6  ;;  %v368_v24 = vld [vmem:[%s9726_s0 + $0xb8] sm:$0x3]  ;;  %v369_v25 = vld [vmem:[%s9726_s0 + $0xc0] sm:$0xff] }
  0x97   : > { %524 = vst [vmem:[#allocation3 + $0x98] sm:$0xff] %v7849_v6  ;;  %525 = vst [vmem:[#allocation3 + $0xa0] sm:$0xff] %v7849_v6  ;;  %v370_v26 = vld [vmem:[%s9726_s0 + $0xc8] sm:$0xff]  ;;  %v371_v27 = vld [vmem:[%s9726_s0 + $0xd0] sm:$0x3] }
  0x98   : > { %526 = vst [vmem:[#allocation3 + $0xa8] sm:$0xff] %v7849_v6  ;;  %527 = vst [vmem:[#allocation3 + $0xb0] sm:$0xff] %v7849_v6  ;;  %v372_v28 = vld [vmem:[%s9726_s0 + $0xd8] sm:$0x3]  ;;  %v373_v29 = vld [vmem:[%s9726_s0 + $0xe0] sm:$0xff] }
  0x99   : > { %528 = vst [vmem:[#allocation3 + $0xb8] sm:$0xff] %v7849_v6  ;;  %529 = vst [vmem:[#allocation3 + $0xc0] sm:$0xff] %v7849_v6  ;;  %v374_v30 = vld [vmem:[%s9726_s0 + $0xe8] sm:$0xff]  ;;  %v375_v31 = vld [vmem:[%s9726_s0 + $0xf0] sm:$0x3] }
  0x9a   : > { %530 = vst [vmem:[#allocation3 + $0xc8] sm:$0xff] %v7849_v6  ;;  %531 = vst [vmem:[#allocation3 + $0xd0] sm:$0xff] %v7849_v6  ;;  %v376_v32 = vld [vmem:[%s9726_s0 + $0xf8] sm:$0x3]  ;;  %v377_v33 = vld [vmem:[%s9726_s0 + $0x100] sm:$0xff] }
  0x9b   : > { %532 = vst [vmem:[#allocation3 + $0xd8] sm:$0xff] %v7849_v6  ;;  %533 = vst [vmem:[#allocation3 + $0xe0] sm:$0xff] %v7849_v6  ;;  %v378_v34 = vld [vmem:[%s9726_s0 + $0x108] sm:$0xff]  ;;  %v379_v35 = vld [vmem:[%s9726_s0 + $0x110] sm:$0x3] }
  0x9c   : > { %534 = vst [vmem:[#allocation3 + $0xe8] sm:$0xff] %v7849_v6  ;;  %535 = vst [vmem:[#allocation3 + $0xf0] sm:$0xff] %v7849_v6  ;;  %v380_v36 = vld [vmem:[%s9726_s0 + $0x118] sm:$0x3]  ;;  %v381_v37 = vld [vmem:[%s9726_s0 + $0x120] sm:$0xff] }
  0x9d   : > { %536 = vst [vmem:[#allocation3 + $0xf8] sm:$0xff] %v7849_v6  ;;  %428 = vst [vmem:[#allocation2 + $0x18] sm:$0x3] %v348_v3  ;;  %v382_v38 = vld [vmem:[%s9726_s0 + $0x128] sm:$0xff]  ;;  %v383_v39 = vld [vmem:[%s9726_s0 + $0x130] sm:$0x3] }
  0x9e   : > { %429 = vst [vmem:[#allocation2 + $0x20] sm:$0xff] %v349_v4  ;;  %430 = vst [vmem:[#allocation2 + $0x28] sm:$0xff] %v350_v5  ;;  %v384_v40 = vld [vmem:[%s9726_s0 + $0x138] sm:$0x3]  ;;  %v385_v41 = vld [vmem:[%s9726_s0 + $0x140] sm:$0xff] }
  0x9f   : > { %431 = vst [vmem:[#allocation2 + $0x30] sm:$0x3] %v351_v7  ;;  %432 = vst [vmem:[#allocation2 + $0x38] sm:$0x3] %v352_v8  ;;  %v386_v42 = vld [vmem:[%s9726_s0 + $0x148] sm:$0xff]  ;;  %v389_v45 = vld [vmem:[%s9726_s0 + $0x160] sm:$0xff] }
  0xa0   : > { %433 = vst [vmem:[#allocation2 + $0x40] sm:$0xff] %v353_v9  ;;  %434 = vst [vmem:[#allocation2 + $0x48] sm:$0xff] %v354_v10  ;;  %v387_v43 = vld [vmem:[%s9726_s0 + $0x150] sm:$0x3]  ;;  %v388_v44 = vld [vmem:[%s9726_s0 + $0x158] sm:$0x3] }
  0xa1   : > { %435 = vst [vmem:[#allocation2 + $0x50] sm:$0x3] %v355_v11  ;;  %436 = vst [vmem:[#allocation2 + $0x58] sm:$0x3] %v356_v12  ;;  %v390_v46 = vld [vmem:[%s9726_s0 + $0x168] sm:$0xff]  ;;  %v393_v49 = vld [vmem:[%s9726_s0 + $0x180] sm:$0xff] }
  0xa2   : > { %437 = vst [vmem:[#allocation2 + $0x60] sm:$0xff] %v357_v13  ;;  %438 = vst [vmem:[#allocation2 + $0x68] sm:$0xff] %v358_v14  ;;  %v391_v47 = vld [vmem:[%s9726_s0 + $0x170] sm:$0x3]  ;;  %v392_v48 = vld [vmem:[%s9726_s0 + $0x178] sm:$0x3] }
  0xa3   : > { %439 = vst [vmem:[#allocation2 + $0x70] sm:$0x3] %v359_v15  ;;  %440 = vst [vmem:[#allocation2 + $0x78] sm:$0x3] %v360_v16  ;;  %v394_v50 = vld [vmem:[%s9726_s0 + $0x188] sm:$0xff]  ;;  %v397_v53 = vld [vmem:[%s9726_s0 + $0x1a0] sm:$0xff] }
  0xa4   : > { %441 = vst [vmem:[#allocation2 + $0x80] sm:$0xff] %v361_v17  ;;  %442 = vst [vmem:[#allocation2 + $0x88] sm:$0xff] %v362_v18  ;;  %v395_v51 = vld [vmem:[%s9726_s0 + $0x190] sm:$0x3]  ;;  %v396_v52 = vld [vmem:[%s9726_s0 + $0x198] sm:$0x3] }
  0xa5   : > { %443 = vst [vmem:[#allocation2 + $0x90] sm:$0x3] %v363_v19  ;;  %444 = vst [vmem:[#allocation2 + $0x98] sm:$0x3] %v364_v20  ;;  %v398_v54 = vld [vmem:[%s9726_s0 + $0x1a8] sm:$0xff]  ;;  %v401_v57 = vld [vmem:[%s9726_s0 + $0x1c0] sm:$0xff] }
  0xa6   : > { %445 = vst [vmem:[#allocation2 + $0xa0] sm:$0xff] %v365_v21  ;;  %446 = vst [vmem:[#allocation2 + $0xa8] sm:$0xff] %v366_v22  ;;  %v399_v55 = vld [vmem:[%s9726_s0 + $0x1b0] sm:$0x3]  ;;  %v400_v56 = vld [vmem:[%s9726_s0 + $0x1b8] sm:$0x3] }
  0xa7   : > { %447 = vst [vmem:[#allocation2 + $0xb0] sm:$0x3] %v367_v23  ;;  %448 = vst [vmem:[#allocation2 + $0xb8] sm:$0x3] %v368_v24  ;;  %v402_v58 = vld [vmem:[%s9726_s0 + $0x1c8] sm:$0xff]  ;;  %v405_v61 = vld [vmem:[%s9726_s0 + $0x1e0] sm:$0xff] }
  0xa8   : > { %449 = vst [vmem:[#allocation2 + $0xc0] sm:$0xff] %v369_v25  ;;  %450 = vst [vmem:[#allocation2 + $0xc8] sm:$0xff] %v370_v26  ;;  %v403_v59 = vld [vmem:[%s9726_s0 + $0x1d0] sm:$0x3]  ;;  %v404_v60 = vld [vmem:[%s9726_s0 + $0x1d8] sm:$0x3] }
  0xa9   : > { %451 = vst [vmem:[#allocation2 + $0xd0] sm:$0x3] %v371_v27  ;;  %452 = vst [vmem:[#allocation2 + $0xd8] sm:$0x3] %v372_v28  ;;  %v406_v62 = vld [vmem:[%s9726_s0 + $0x1e8] sm:$0xff]  ;;  %v409_v1 = vld [vmem:[%s9726_s0 + $0x200] sm:$0xff] }
  0xaa   : > { %453 = vst [vmem:[#allocation2 + $0xe0] sm:$0xff] %v373_v29  ;;  %454 = vst [vmem:[#allocation2 + $0xe8] sm:$0xff] %v374_v30  ;;  %v407_v63 = vld [vmem:[%s9726_s0 + $0x1f0] sm:$0x3]  ;;  %v408_v0 = vld [vmem:[%s9726_s0 + $0x1f8] sm:$0x3] }
  0xab   : > { %455 = vst [vmem:[#allocation2 + $0xf0] sm:$0x3] %v375_v31  ;;  %456 = vst [vmem:[#allocation2 + $0xf8] sm:$0x3] %v376_v32  ;;  %v410_v2 = vld [vmem:[%s9726_s0 + $0x208] sm:$0xff]  ;;  %v413_v5 = vld [vmem:[%s9726_s0 + $0x220] sm:$0xff] }
  0xac   : > { %457 = vst [vmem:[#allocation2 + $0x100] sm:$0xff] %v377_v33  ;;  %458 = vst [vmem:[#allocation2 + $0x108] sm:$0xff] %v378_v34  ;;  %v411_v3 = vld [vmem:[%s9726_s0 + $0x210] sm:$0x3]  ;;  %v412_v4 = vld [vmem:[%s9726_s0 + $0x218] sm:$0x3] }
  0xad   : > { %459 = vst [vmem:[#allocation2 + $0x110] sm:$0x3] %v379_v35  ;;  %460 = vst [vmem:[#allocation2 + $0x118] sm:$0x3] %v380_v36  ;;  %v414_v6 = vld [vmem:[%s9726_s0 + $0x228] sm:$0xff]  ;;  %v417_v9 = vld [vmem:[%s9726_s0 + $0x240] sm:$0xff] }
  0xae   : > { %461 = vst [vmem:[#allocation2 + $0x120] sm:$0xff] %v381_v37  ;;  %462 = vst [vmem:[#allocation2 + $0x128] sm:$0xff] %v382_v38  ;;  %v415_v7 = vld [vmem:[%s9726_s0 + $0x230] sm:$0x3]  ;;  %v416_v8 = vld [vmem:[%s9726_s0 + $0x238] sm:$0x3] }
  0xaf   : > { %463 = vst [vmem:[#allocation2 + $0x130] sm:$0x3] %v383_v39  ;;  %464 = vst [vmem:[#allocation2 + $0x138] sm:$0x3] %v384_v40  ;;  %v418_v10 = vld [vmem:[%s9726_s0 + $0x248] sm:$0xff]  ;;  %v421_v13 = vld [vmem:[%s9726_s0 + $0x260] sm:$0xff] }
  0xb0   : > { %465 = vst [vmem:[#allocation2 + $0x140] sm:$0xff] %v385_v41  ;;  %466 = vst [vmem:[#allocation2 + $0x148] sm:$0xff] %v386_v42  ;;  %v419_v11 = vld [vmem:[%s9726_s0 + $0x250] sm:$0x3]  ;;  %v420_v12 = vld [vmem:[%s9726_s0 + $0x258] sm:$0x3] }
  0xb1   : > { %467 = vst [vmem:[#allocation2 + $0x150] sm:$0x3] %v387_v43  ;;  %468 = vst [vmem:[#allocation2 + $0x158] sm:$0x3] %v388_v44  ;;  %v422_v14 = vld [vmem:[%s9726_s0 + $0x268] sm:$0xff] }
  0xb2   : > { %469 = vst [vmem:[#allocation2 + $0x160] sm:$0xff] %v389_v45  ;;  %470 = vst [vmem:[#allocation2 + $0x168] sm:$0xff] %v390_v46  ;;  %v423_v15 = vld [vmem:[%s9726_s0 + $0x270] sm:$0x3]  ;;  %v424_v16 = vld [vmem:[%s9726_s0 + $0x278] sm:$0x3] }
  0xb3   : > { %471 = vst [vmem:[#allocation2 + $0x170] sm:$0x3] %v391_v47  ;;  %472 = vst [vmem:[#allocation2 + $0x178] sm:$0x3] %v392_v48 }
  0xb4   : > { %473 = vst [vmem:[#allocation2 + $0x180] sm:$0xff] %v393_v49  ;;  %474 = vst [vmem:[#allocation2 + $0x188] sm:$0xff] %v394_v50 }
  0xb5   : > { %475 = vst [vmem:[#allocation2 + $0x190] sm:$0x3] %v395_v51  ;;  %476 = vst [vmem:[#allocation2 + $0x198] sm:$0x3] %v396_v52 }
  0xb6   : > { %477 = vst [vmem:[#allocation2 + $0x1a0] sm:$0xff] %v397_v53  ;;  %478 = vst [vmem:[#allocation2 + $0x1a8] sm:$0xff] %v398_v54 }
  0xb7   : > { %479 = vst [vmem:[#allocation2 + $0x1b0] sm:$0x3] %v399_v55  ;;  %480 = vst [vmem:[#allocation2 + $0x1b8] sm:$0x3] %v400_v56 }
  0xb8   : > { %481 = vst [vmem:[#allocation2 + $0x1c0] sm:$0xff] %v401_v57  ;;  %482 = vst [vmem:[#allocation2 + $0x1c8] sm:$0xff] %v402_v58 }
  0xb9   : > { %483 = vst [vmem:[#allocation2 + $0x1d0] sm:$0x3] %v403_v59  ;;  %484 = vst [vmem:[#allocation2 + $0x1d8] sm:$0x3] %v404_v60 }
  0xba   : > { %485 = vst [vmem:[#allocation2 + $0x1e0] sm:$0xff] %v405_v61  ;;  %486 = vst [vmem:[#allocation2 + $0x1e8] sm:$0xff] %v406_v62 }
  0xbb   : > { %487 = vst [vmem:[#allocation2 + $0x1f0] sm:$0x3] %v407_v63  ;;  %488 = vst [vmem:[#allocation2 + $0x1f8] sm:$0x3] %v408_v0 }
  0xbc   : > { %489 = vst [vmem:[#allocation2 + $0x200] sm:$0xff] %v409_v1  ;;  %490 = vst [vmem:[#allocation2 + $0x208] sm:$0xff] %v410_v2 }
  0xbd   : > { %491 = vst [vmem:[#allocation2 + $0x210] sm:$0x3] %v411_v3  ;;  %492 = vst [vmem:[#allocation2 + $0x218] sm:$0x3] %v412_v4 }
  0xbe   : > { %493 = vst [vmem:[#allocation2 + $0x220] sm:$0xff] %v413_v5  ;;  %494 = vst [vmem:[#allocation2 + $0x228] sm:$0xff] %v414_v6 }
  0xbf   : > { %495 = vst [vmem:[#allocation2 + $0x230] sm:$0x3] %v415_v7  ;;  %496 = vst [vmem:[#allocation2 + $0x238] sm:$0x3] %v416_v8 }
  0xc0   : > { %497 = vst [vmem:[#allocation2 + $0x240] sm:$0xff] %v417_v9  ;;  %498 = vst [vmem:[#allocation2 + $0x248] sm:$0xff] %v418_v10 }
  0xc1   : > { %499 = vst [vmem:[#allocation2 + $0x250] sm:$0x3] %v419_v11  ;;  %500 = vst [vmem:[#allocation2 + $0x258] sm:$0x3] %v420_v12 }
  0xc2   : > { %501 = vst [vmem:[#allocation2 + $0x260] sm:$0xff] %v421_v13  ;;  %502 = vst [vmem:[#allocation2 + $0x268] sm:$0xff] %v422_v14 }
  0xc3   : > { %503 = vst [vmem:[#allocation2 + $0x270] sm:$0x3] %v423_v15  ;;  %504 = vst [vmem:[#allocation2 + $0x278] sm:$0x3] %v424_v16 }
  0xc4 PF: > { %v7147_v17 = vld [vmem:[%s8065_s14 + $0x104] ss:$8 sps:$4 sm:$0xff]   ;;  %v7151_v19 = vld [vmem:[%s8065_s14 + $0x100] ss:$8 sps:$4 sm:$0xff]   ;;  %v7153_v21 = vld [vmem:[%s8065_s14 + $0x114] ss:$8 sps:$4 sm:$0xff]  }
  0xc5   : > { %v7149_v18 = vld [vmem:[%s8065_s14 + $0x404] ss:$8 sps:$4 sm:$0xff]   ;;  %1083 = vmatprep.subr.bf16.mxu1 %v7147_v17  ;;  %v7152_v20 = vld [vmem:[%s8065_s14 + $0x400] ss:$8 sps:$4 sm:$0xff]   ;;  %v7155_v22 = vld [vmem:[%s8065_s14 + $0x414] ss:$8 sps:$4 sm:$0xff]  }
  0xc6   : > { %2932 = vmatprep.subr.bf16.mxu0 %v7149_v18  ;;  %1084 = vmatpush1.bf16.msra.mxu1 %v7151_v19  ;;  %v7157_v23 = vld [vmem:[%s8065_s14 + $0x110] ss:$8 sps:$4 sm:$0xff]   ;;  %v7159_v25 = vld [vmem:[%s8065_s14 + $0x124] ss:$8 sps:$4 sm:$0xff]   ;;  %v7163_v27 = vld [vmem:[%s8065_s14 + $0x120] ss:$8 sps:$4 sm:$0xff]  }
  0xc7   : > { %2933 = vmatpush1.bf16.msra.mxu0 %v7152_v20  ;;  %1085 = vmatprep.subr.bf16.mxu1 %v7153_v21  ;;  %v7158_v24 = vld [vmem:[%s8065_s14 + $0x410] ss:$8 sps:$4 sm:$0xff]   ;;  %v7161_v26 = vld [vmem:[%s8065_s14 + $0x424] ss:$8 sps:$4 sm:$0xff]   ;;  %v7164_v28 = vld [vmem:[%s8065_s14 + $0x420] ss:$8 sps:$4 sm:$0xff]  }
  0xc8   : > { %2934 = vmatprep.subr.bf16.mxu0 %v7155_v22  ;;  %v7165_v29 = vld [vmem:[%s8065_s14 + $0x134] ss:$8 sps:$4 sm:$0xff]   ;;  %v7169_v31 = vld [vmem:[%s8065_s14 + $0x130] ss:$8 sps:$4 sm:$0xff]   ;;  %v7171_v33 = vld [vmem:[%s8065_s14 + $0x144] ss:$8 sps:$4 sm:$0xff]  }
  0xc9   : > { %v7167_v30 = vld [vmem:[%s8065_s14 + $0x434] ss:$8 sps:$4 sm:$0xff]   ;;  %v7170_v32 = vld [vmem:[%s8065_s14 + $0x430] ss:$8 sps:$4 sm:$0xff]   ;;  %v7173_v34 = vld [vmem:[%s8065_s14 + $0x444] ss:$8 sps:$4 sm:$0xff]  }
  0xca   : > { %1086 = vmatpush1.bf16.msra.mxu1 %v7157_v23  ;;  %v7175_v35 = vld [vmem:[%s8065_s14 + $0x140] ss:$8 sps:$4 sm:$0xff]   ;;  %v7177_v37 = vld [vmem:[%s8065_s14 + $0x154] ss:$8 sps:$4 sm:$0xff]   ;;  %v7181_v39 = vld [vmem:[%s8065_s14 + $0x150] ss:$8 sps:$4 sm:$0xff]  }
  0xcb   : > { %2935 = vmatpush1.bf16.msra.mxu0 %v7158_v24  ;;  %1087 = vmatprep.subr.bf16.mxu1 %v7159_v25  ;;  %v7176_v36 = vld [vmem:[%s8065_s14 + $0x440] ss:$8 sps:$4 sm:$0xff]   ;;  %v7179_v38 = vld [vmem:[%s8065_s14 + $0x454] ss:$8 sps:$4 sm:$0xff]   ;;  %v7182_v40 = vld [vmem:[%s8065_s14 + $0x450] ss:$8 sps:$4 sm:$0xff]  }
  0xcc   : > { %2936 = vmatprep.subr.bf16.mxu0 %v7161_v26  ;;  %v7183_v41 = vld [vmem:[%s8065_s14 + $0x164] ss:$8 sps:$4 sm:$0xff]   ;;  %v7187_v43 = vld [vmem:[%s8065_s14 + $0x160] ss:$8 sps:$4 sm:$0xff]   ;;  %v7189_v45 = vld [vmem:[%s8065_s14 + $0x174] ss:$8 sps:$4 sm:$0xff]  }
  0xcd   : > { %v7185_v42 = vld [vmem:[%s8065_s14 + $0x464] ss:$8 sps:$4 sm:$0xff]   ;;  %v7188_v44 = vld [vmem:[%s8065_s14 + $0x460] ss:$8 sps:$4 sm:$0xff]   ;;  %v7191_v46 = vld [vmem:[%s8065_s14 + $0x474] ss:$8 sps:$4 sm:$0xff]  }
  0xce   : > { %1088 = vmatpush1.bf16.msra.mxu1 %v7163_v27  ;;  %v7193_v47 = vld [vmem:[%s8065_s14 + $0x170] ss:$8 sps:$4 sm:$0xff]   ;;  %v7195_v49 = vld [vmem:[%s8065_s14 + $0x184] ss:$8 sps:$4 sm:$0xff]   ;;  %v7199_v51 = vld [vmem:[%s8065_s14 + $0x180] ss:$8 sps:$4 sm:$0xff]  }
  0xcf   : > { %2937 = vmatpush1.bf16.msra.mxu0 %v7164_v28  ;;  %1089 = vmatprep.subr.bf16.mxu1 %v7165_v29  ;;  %v7194_v48 = vld [vmem:[%s8065_s14 + $0x470] ss:$8 sps:$4 sm:$0xff]   ;;  %v7197_v50 = vld [vmem:[%s8065_s14 + $0x484] ss:$8 sps:$4 sm:$0xff]   ;;  %v7200_v52 = vld [vmem:[%s8065_s14 + $0x480] ss:$8 sps:$4 sm:$0xff]  }
  0xd0   : > { %2938 = vmatprep.subr.bf16.mxu0 %v7167_v30  ;;  %v7201_v53 = vld [vmem:[%s8065_s14 + $0x194] ss:$8 sps:$4 sm:$0xff]   ;;  %v7205_v55 = vld [vmem:[%s8065_s14 + $0x190] ss:$8 sps:$4 sm:$0xff]   ;;  %v7207_v57 = vld [vmem:[%s8065_s14 + $0x1a4] ss:$8 sps:$4 sm:$0xff]  }
  0xd1   : > { %v7203_v54 = vld [vmem:[%s8065_s14 + $0x494] ss:$8 sps:$4 sm:$0xff]   ;;  %v7206_v56 = vld [vmem:[%s8065_s14 + $0x490] ss:$8 sps:$4 sm:$0xff]   ;;  %v7209_v58 = vld [vmem:[%s8065_s14 + $0x4a4] ss:$8 sps:$4 sm:$0xff]  }
  0xd2   : > { %1090 = vmatpush1.bf16.msra.mxu1 %v7169_v31  ;;  %v7211_v59 = vld [vmem:[%s8065_s14 + $0x1a0] ss:$8 sps:$4 sm:$0xff]   ;;  %v7213_v61 = vld [vmem:[%s8065_s14 + $0x1b4] ss:$8 sps:$4 sm:$0xff]   ;;  %vm745_vm0 = vcmask 1046528   ;;  %vm1597_vm1 = vcmask 1045504  }
  0xd3   : > { %2939 = vmatpush1.bf16.msra.mxu0 %v7170_v32  ;;  %1091 = vmatprep.subr.bf16.mxu1 %v7171_v33  ;;  %v7212_v60 = vld [vmem:[%s8065_s14 + $0x4a0] ss:$8 sps:$4 sm:$0xff]   ;;  %v7215_v62 = vld [vmem:[%s8065_s14 + $0x4b4] ss:$8 sps:$4 sm:$0xff]   ;;  %v7217_v63 = vld [vmem:[%s8065_s14 + $0x1b0] ss:$8 sps:$4 sm:$0xff]  }
  0xd4   : > { %2940 = vmatprep.subr.bf16.mxu0 %v7173_v34  ;;  %v7218_v0 = vld [vmem:[%s8065_s14 + $0x4b0] ss:$8 sps:$4 sm:$0xff]   ;;  %v618_v1 = vld [vmem:[#allocation2 + $0x8] sm:$0xfe]  ;;  %v7225_v21 = vld [vmem:[%s8065_s14 + $0x1d4] ss:$8 sps:$4 sm:$0xff]  }
  0xd5   : > { %v7219_v2 = vld [vmem:[%s8065_s14 + $0x1c4] ss:$8 sps:$4 sm:$0xff]   ;;  %v620_v4 = vld [vmem:[#allocation2 + $0x18] sm:$0x1]  ;;  %v749_v7 = vrot.slane %v618_v1, 1  ;;  %p5371_p7 = scmp.lt.s32.totalorder %s7899_s22, 0 }
  0xd6   : > { %1092 = vmatpush1.bf16.msra.mxu1 %v7175_v35  ;;  %v7221_v3 = vld [vmem:[%s8065_s14 + $0x4c4] ss:$8 sps:$4 sm:$0xff]   ;;  %v624_v6 = vld [vmem:[#allocation2 + $0x38] sm:$0x1]  ;;  %v750_v8 = vrot.slane %v620_v4, 1  ;;  %p5370_p5 = scmp.ge.s32.totalorder %s7899_s22, 2 }
  0xd7   : > { %2941 = vmatpush1.bf16.msra.mxu0 %v7176_v36  ;;  %1093 = vmatprep.subr.bf16.mxu1 %v7177_v37  ;;  %v622_v5 = vld [vmem:[#allocation2 + $0x28] sm:$0xfe]  ;;  %v756_v10 = vrot.slane %v624_v6, 1  ;;  %v2470_v12 = vld [vmem:[#allocation2 + $0x38] sm:$0x1] }
  0xd8   : > { %2942 = vmatprep.subr.bf16.mxu0 %v7179_v38  ;;  %v755_v9 = vrot.slane %v622_v5, 1  ;;  %v2468_v11 = vld [vmem:[#allocation2 + $0x28] sm:$0xfe]  ;;  %v2474_v14 = vld [vmem:[#allocation2 + $0x58] sm:$0x1]  ;;  %v751_v17 = vsel %vm745_vm0, %v749_v7, %v750_v8  ;;  %v2599_v20 = vrot.slane %v2470_v12, 1 }
  0xd9   : > { %v2472_v13 = vld [vmem:[#allocation2 + $0x48] sm:$0xfe]  ;;  %v2598_v19 = vrot.slane %v2468_v11, 1  ;;  %v7227_v22 = vld [vmem:[%s8065_s14 + $0x4d4] ss:$8 sps:$4 sm:$0xff]   ;;  %v2605_v25 = vrot.slane %v2474_v14, 1 }
  0xda   : > { %1094 = vmatpush1.bf16.msra.mxu1 %v7181_v39  ;;  %v7223_v15 = vld [vmem:[%s8065_s14 + $0x1c0] ss:$8 sps:$4 sm:$0xff]   ;;  %v757_v18 = vsel %vm745_vm0, %v755_v9, %v756_v10  ;;  %v2604_v24 = vrot.slane %v2472_v13, 1  ;;  %v619_v29 = vld [vmem:[#allocation2 + $0x10] sm:$0x1] }
  0xdb   : > { %2943 = vmatpush1.bf16.msra.mxu0 %v7182_v40  ;;  %1095 = vmatprep.subr.bf16.mxu1 %v7183_v41  ;;  %v7224_v16 = vld [vmem:[%s8065_s14 + $0x4c0] ss:$8 sps:$4 sm:$0xff]   ;;  %v875_v23 = vpack.c.bf16 %v757_v18, %v751_v17  ;;  %v2600_v26 = vsel %vm745_vm0, %v2598_v19, %v2599_v20  ;;  %v7229_v31 = vld [vmem:[%s8065_s14 + $0x1d0] ss:$8 sps:$4 sm:$0xff]   ;;  %v7231_v39 = vld [vmem:[%s8065_s14 + $0x1e4] ss:$8 sps:$4 sm:$0xff]  }
  0xdc   : > { %2944 = vmatprep.subr.bf16.mxu0 %v7185_v42  ;;  %v617_v27 = vld [vmem:[#allocation2] sm:$0xfe]  ;;  %v2606_v28 = vsel %vm745_vm0, %v2604_v24, %v2605_v25  ;;  %v7230_v32 = vld [vmem:[%s8065_s14 + $0x4d0] ss:$8 sps:$4 sm:$0xff]   ;;  %v747_v42 = vrot.slane %v619_v29, 1 }
  0xdd   : > { %v621_v30 = vld [vmem:[#allocation2 + $0x20] sm:$0xfe]  ;;  %1115 = vmatprep.mubr.bf16.mxu1 %v875_v23  ;;  %v2724_v33 = vpack.c.bf16 %v2606_v28, %v2600_v26  ;;  %v623_v34 = vld [vmem:[#allocation2 + $0x30] sm:$0x1]  ;;  %v746_v41 = vrot.slane %v617_v27, 1 }
  0xde   : > { %1096 = vmatpush1.bf16.msra.mxu1 %v7187_v43  ;;  %v2467_v35 = vld [vmem:[#allocation2 + $0x20] sm:$0xfe]  ;;  %v2469_v36 = vld [vmem:[#allocation2 + $0x30] sm:$0x1]  ;;  %v752_v43 = vrot.slane %v621_v30, 1 }
  0xdf   : > { %2945 = vmatpush1.bf16.msra.mxu0 %v7188_v44  ;;  %1097 = vmatprep.subr.bf16.mxu1 %v7189_v45  ;;  %v2471_v37 = vld [vmem:[#allocation2 + $0x40] sm:$0xfe]  ;;  %v2473_v38 = vld [vmem:[#allocation2 + $0x50] sm:$0x1]  ;;  %v753_v44 = vrot.slane %v623_v34, 1 }
  0xe0   : > { %2946 = vmatprep.subr.bf16.mxu0 %v7191_v46  ;;  %v7233_v40 = vld [vmem:[%s8065_s14 + $0x4e4] ss:$8 sps:$4 sm:$0xff]   ;;  %v7235_v45 = vld [vmem:[%s8065_s14 + $0x1e0] ss:$8 sps:$4 sm:$0xff]   ;;  %2964 = vmatprep.mubr.bf16.mxu0 %v2724_v33  ;;  %v7241_v1 = vld [vmem:[%s8065_s14 + $0x1f0] ss:$8 sps:$4 sm:$0xff]  }
  0xe1   : > { %v7236_v46 = vld [vmem:[%s8065_s14 + $0x4e0] ss:$8 sps:$4 sm:$0xff]   ;;  %v2482_v4 = vld [vmem:[#allocation2 + $0x98] sm:$0x1]  ;;  %v627_v12 = vld [vmem:[#allocation2 + $0x50] sm:$0x1] }
  0xe2   : > { %1098 = vmatpush1.bf16.msra.mxu1 %v7193_v47  ;;  %v2595_v47 = vrot.slane %v2467_v35, 1  ;;  %v2617_v10 = vrot.slane %v2482_v4, 1  ;;  %v625_v11 = vld [vmem:[#allocation2 + $0x40] sm:$0xfe]  ;;  %v759_v19 = vrot.slane %v627_v12, 1 }
  0xe3   : > { %2947 = vmatpush1.bf16.msra.mxu0 %v7194_v48  ;;  %1099 = vmatprep.subr.bf16.mxu1 %v7195_v49  ;;  %v2596_v48 = vrot.slane %v2469_v36, 1  ;;  %v2601_v49 = vrot.slane %v2471_v37, 1  ;;  %v7245_v14 = vld [vmem:[%s8065_s14 + $0x4] ss:$8 sps:$4 sm:$0xff]   ;;  %v758_v18 = vrot.slane %v625_v11, 1 }
  0xe4   : > { %2948 = vmatprep.subr.bf16.mxu0 %v7197_v50  ;;  %v2602_v50 = vrot.slane %v2473_v38, 1  ;;  %v7248_v17 = vld [vmem:[%s8065_s14 + $0x504] ss:$8 sps:$4 sm:$0xff]   ;;  %v2477_v28 = vld [vmem:[#allocation2 + $0x70] sm:$0x1] }
  0xe5   : > { %v2597_v7 = vsel %vm745_vm0, %v2595_v47, %v2596_v48  ;;  %v2475_v27 = vld [vmem:[#allocation2 + $0x60] sm:$0xfe]  ;;  %v2608_v33 = vrot.slane %v2477_v28, 1  ;;  %v7251_v36 = vld [vmem:[%s8065_s14 + $0x14] ss:$8 sps:$4 sm:$0xff]  }
  0xe6   : > { %1100 = vmatpush1.bf16.msra.mxu1 %v7199_v51  ;;  %v7237_v51 = vld [vmem:[%s8065_s14 + $0x1f4] ss:$8 sps:$4 sm:$0xff]   ;;  %v2603_v8 = vsel %vm745_vm0, %v2601_v49, %v2602_v50  ;;  %v2479_v29 = vld [vmem:[#allocation2 + $0x80] sm:$0xfe]  ;;  %v634_v49 = vld [vmem:[#allocation2 + $0x88] sm:$0xfe] }
  0xe7   : > { %2949 = vmatpush1.bf16.msra.mxu0 %v7200_v52  ;;  %1101 = vmatprep.subr.bf16.mxu1 %v7201_v53  ;;  %v7239_v52 = vld [vmem:[%s8065_s14 + $0x4f4] ss:$8 sps:$4 sm:$0xff]   ;;  %v626_v53 = vld [vmem:[#allocation2 + $0x48] sm:$0xfe]  ;;  %v2723_v23 = vpack.c.bf16 %v2603_v8, %v2597_v7  ;;  %v2613_v34 = vrot.slane %v2479_v29, 1 }
  0xe8   : > { %2950 = vmatprep.subr.bf16.mxu0 %v7203_v54  ;;  %v628_v54 = vld [vmem:[#allocation2 + $0x58] sm:$0x1]  ;;  %v7246_v35 = vld [vmem:[%s8065_s14 + $0x500] ss:$8 sps:$4 sm:$0xff]   ;;  %v7254_v38 = vld [vmem:[%s8065_s14 + $0x514] ss:$8 sps:$4 sm:$0xff]  }
  0xe9   : > { %v7260_v48 = vld [vmem:[%s8065_s14 + $0x524] ss:$8 sps:$4 sm:$0xff]   ;;  %v636_v50 = vld [vmem:[#allocation2 + $0x98] sm:$0x1]  ;;  %v635_v8 = vld [vmem:[#allocation2 + $0x90] sm:$0x1] }
  0xea   : > { %1102 = vmatpush1.bf16.msra.mxu1 %v7205_v55  ;;  %v630_v55 = vld [vmem:[#allocation2 + $0x68] sm:$0xfe]  ;;  %v633_v7 = vld [vmem:[#allocation2 + $0x80] sm:$0xfe]  ;;  %v639_v12 = vld [vmem:[#allocation2 + $0xb0] sm:$0x1] }
  0xeb   : > { %2951 = vmatpush1.bf16.msra.mxu0 %v7206_v56  ;;  %1103 = vmatprep.subr.bf16.mxu1 %v7207_v57  ;;  %v632_v56 = vld [vmem:[#allocation2 + $0x78] sm:$0x1]  ;;  %v761_v57 = vrot.slane %v626_v53, 1  ;;  %v773_v53 = vrot.slane %v634_v49, 1  ;;  %v637_v11 = vld [vmem:[#allocation2 + $0xa0] sm:$0xfe] }
  0xec   : > { %2952 = vmatprep.subr.bf16.mxu0 %v7209_v58  ;;  %v762_v58 = vrot.slane %v628_v54, 1  ;;  %v774_v54 = vrot.slane %v636_v50, 1  ;;  %v2489_v28 = vld [vmem:[#allocation2 + $0xd0] sm:$0x1] }
  0xed   : > { %v7273_v50 = vld [vmem:[%s8065_s14 + $0x50] ss:$8 sps:$4 sm:$0xff]  }
  0xee   : > { %1104 = vmatpush1.bf16.msra.mxu1 %v7211_v59  ;;  %v767_v59 = vrot.slane %v630_v55, 1  ;;  %v763_v24 = vsel %vm745_vm0, %v761_v57, %v762_v58  ;;  %v2484_v57 = vld [vmem:[#allocation2 + $0xa8] sm:$0xfe] }
  0xef   : > { %2953 = vmatpush1.bf16.msra.mxu0 %v7212_v60  ;;  %1105 = vmatprep.subr.bf16.mxu1 %v7213_v61  ;;  %v748_v60 = vsel %vm745_vm0, %v746_v41, %v747_v42  ;;  %v754_v61 = vsel %vm745_vm0, %v752_v43, %v753_v44  ;;  %v760_v43 = vsel %vm745_vm0, %v758_v18, %v759_v19  ;;  %v7264_v18 = vld [vmem:[%s8065_s14 + $0x530] ss:$8 sps:$4 sm:$0xff]  }
  0xf0   : > { %2954 = vmatprep.subr.bf16.mxu0 %v7215_v62  ;;  %v768_v62 = vrot.slane %v632_v56, 1  ;;  %v874_v13 = vpack.c.bf16 %v754_v61, %v748_v60  ;;  %v7258_v61 = vld [vmem:[%s8065_s14 + $0x520] ss:$8 sps:$4 sm:$0xff]  }
  0xf2   : > { %1106 = vmatpush1.bf16.msra.mxu1 %v7217_v63  ;;  %v2476_v63 = vld [vmem:[#allocation2 + $0x68] sm:$0xfe]  ;;  %v769_v25 = vsel %vm745_vm0, %v767_v59, %v768_v62  ;;  %v2486_v62 = vld [vmem:[#allocation2 + $0xb8] sm:$0x1] }
  0xf3   : > { %2955 = vmatpush1.bf16.msra.mxu0 %v7218_v0  ;;  %1107 = vmatprep.subr.bf16.mxu1 %v7219_v2  ;;  %v2478_v0 = vld [vmem:[#allocation2 + $0x78] sm:$0x1]  ;;  %v2610_v5 = vrot.slane %v2476_v63, 1  ;;  %v877_v41 = vpack.c.bf16 %v769_v25, %v763_v24  ;;  %v7255_v59 = vld [vmem:[%s8065_s14 + $0x20] ss:$8 sps:$4 sm:$0xff]  }
  0xf4   : > { %2956 = vmatprep.subr.bf16.mxu0 %v7221_v3  ;;  %v7242_v2 = vld [vmem:[%s8065_s14 + $0x4f0] ss:$8 sps:$4 sm:$0xff]   ;;  %v2480_v3 = vld [vmem:[#allocation2 + $0x88] sm:$0xfe]  ;;  %v2611_v6 = vrot.slane %v2478_v0, 1 }
  0xf5   : > { %v2616_v9 = vrot.slane %v2480_v3, 1  ;;  %v2488_v63 = vld [vmem:[#allocation2 + $0xc8] sm:$0xfe]  ;;  %v2490_v0 = vld [vmem:[#allocation2 + $0xd8] sm:$0x1]  ;;  %v775_v3 = vsel %vm745_vm0, %v773_v53, %v774_v54 }
  0xf6   : > { %1108 = vmatpush1.bf16.msra.mxu1 %v7223_v15  ;;  %v629_v15 = vld [vmem:[#allocation2 + $0x60] sm:$0xfe]  ;;  %v2612_v26 = vsel %vm745_vm0, %v2610_v5, %v2611_v6  ;;  %v2622_v5 = vrot.slane %v2484_v57, 1  ;;  %v2623_v6 = vrot.slane %v2486_v62, 1  ;;  %v2485_v25 = vld [vmem:[#allocation2 + $0xb0] sm:$0x1] }
  0xf7   : > { %2957 = vmatpush1.bf16.msra.mxu0 %v7224_v16  ;;  %1109 = vmatprep.subr.bf16.mxu1 %v7225_v21  ;;  %v631_v16 = vld [vmem:[#allocation2 + $0x70] sm:$0x1]  ;;  %v764_v20 = vrot.slane %v629_v15, 1  ;;  %v2618_v30 = vsel %vm745_vm0, %v2616_v9, %v2617_v10  ;;  %v2628_v9 = vrot.slane %v2488_v63, 1  ;;  %v2629_v10 = vrot.slane %v2490_v0, 1 }
  0xf8   : > { %2958 = vmatprep.subr.bf16.mxu0 %v7227_v22  ;;  %v765_v21 = vrot.slane %v631_v16, 1  ;;  %v7243_v22 = vld [vmem:[%s8065_s14] ss:$8 sps:$4 sm:$0xff]   ;;  %v2726_v42 = vpack.c.bf16 %v2618_v30, %v2612_v26  ;;  %v771_v15 = vrot.slane %v635_v8, 1  ;;  %v776_v16 = vrot.slane %v637_v11, 1 }
  0xf9   : > { %v2483_v24 = vld [vmem:[#allocation2 + $0xa0] sm:$0xfe]  ;;  %v2620_v30 = vrot.slane %v2485_v25, 1  ;;  %v2492_v53 = vld [vmem:[#allocation2 + $0xe8] sm:$0xfe] }
  0xfa   : > { %1110 = vmatpush1.bf16.msra.mxu1 %v7229_v31  ;;  %v2481_v31 = vld [vmem:[#allocation2 + $0x90] sm:$0x1]  ;;  %v766_v44 = vsel %vm745_vm0, %v764_v20, %v765_v21  ;;  %v2630_v20 = vsel %vm745_vm0, %v2628_v9, %v2629_v10  ;;  %v777_v21 = vrot.slane %v639_v12, 1  ;;  %v2487_v26 = vld [vmem:[#allocation2 + $0xc0] sm:$0xfe]  ;;  %v2619_v29 = vrot.slane %v2483_v24, 1 }
  0xfb   : > { %2959 = vmatpush1.bf16.msra.mxu0 %v7230_v32  ;;  %1111 = vmatprep.subr.bf16.mxu1 %v7231_v39  ;;  %v2607_v32 = vrot.slane %v2475_v27, 1  ;;  %v2614_v37 = vrot.slane %v2481_v31, 1  ;;  %v7249_v39 = vld [vmem:[%s8065_s14 + $0x10] ss:$8 sps:$4 sm:$0xff]   ;;  %v876_v58 = vpack.c.bf16 %v766_v44, %v760_v43  ;;  %v2625_v31 = vrot.slane %v2487_v26, 1 }
  0xfc   : > { %2960 = vmatprep.subr.bf16.mxu0 %v7233_v40  ;;  %v7252_v40 = vld [vmem:[%s8065_s14 + $0x510] ss:$8 sps:$4 sm:$0xff]   ;;  %v778_v27 = vsel %vm745_vm0, %v776_v16, %v777_v21  ;;  %v642_v43 = vld [vmem:[#allocation2 + $0xc8] sm:$0xfe]  ;;  %v641_v63 = vld [vmem:[#allocation2 + $0xc0] sm:$0xfe] }
  0xfd   : > { %v2615_v47 = vsel %vm745_vm0, %v2613_v34, %v2614_v37  ;;  %v7272_v34 = vld [vmem:[%s8065_s14 + $0x544] ss:$8 sps:$4 sm:$0xff]   ;;  %v7270_v37 = vld [vmem:[%s8065_s14 + $0x540] ss:$8 sps:$4 sm:$0xff]   ;;  %v644_v44 = vld [vmem:[#allocation2 + $0xd8] sm:$0x1] }
  0xfe   : > { %1112 = vmatpush1.bf16.msra.mxu1 %v7235_v45  ;;  %v7257_v45 = vld [vmem:[%s8065_s14 + $0x24] ss:$8 sps:$4 sm:$0xff]   ;;  %v2494_v54 = vld [vmem:[#allocation2 + $0xf8] sm:$0x1]  ;;  %v643_v0 = vld [vmem:[#allocation2 + $0xd0] sm:$0x1] }
  0xff   : > { %2961 = vmatpush1.bf16.msra.mxu0 %v7236_v46  ;;  %1113 = vmatprep.subr.bf16.mxu1 %v7237_v51  ;;  %v2609_v46 = vsel %vm745_vm0, %v2607_v32, %v2608_v33  ;;  %v638_v51 = vld [vmem:[#allocation2 + $0xa8] sm:$0xfe]  ;;  %v2626_v33 = vrot.slane %v2489_v28, 1  ;;  %v2498_v57 = vld [vmem:[#allocation2 + $0x118] sm:$0x1] }
 0x100   : > { %2962 = vmatprep.subr.bf16.mxu0 %v7239_v52  ;;  %v640_v52 = vld [vmem:[#allocation2 + $0xb8] sm:$0x1]  ;;  %v779_v55 = vrot.slane %v638_v51, 1  ;;  %v2725_v60 = vpack.c.bf16 %v2615_v47, %v2609_v46  ;;  %v7269_v32 = vld [vmem:[%s8065_s14 + $0x44] ss:$8 sps:$4 sm:$0xff]   ;;  %v785_v47 = vrot.slane %v642_v43, 1 }
 0x101   : > { %v780_v56 = vrot.slane %v640_v52, 1  ;;  %v648_v46 = vld [vmem:[#allocation2 + $0xf8] sm:$0x1]  ;;  %v2641_v62 = vrot.slane %v2498_v57, 1  ;;  %v7279_v10 = vld [vmem:[%s8065_s14 + $0x60] ss:$8 sps:$4 sm:$0xff]  }
 0x102   : > { %1114 = vmatpush1.bf16.msra.mxu1 %v7241_v1  ;;  %v7263_v1 = vld [vmem:[%s8065_s14 + $0x34] ss:$8 sps:$4 sm:$0xff]   ;;  %v7276_v51 = vld [vmem:[%s8065_s14 + $0x550] ss:$8 sps:$4 sm:$0xff]   ;;  %v792_v52 = vrot.slane %v648_v46, 1 }
 0x103   : > { %2963 = vmatpush1.bf16.msra.mxu0 %v7242_v2  ;;  %1356 = vmatprep.subr.bf16.mxu1 %v7245_v14  ;;  %v7266_v2 = vld [vmem:[%s8065_s14 + $0x534] ss:$8 sps:$4 sm:$0xff]   ;;  %v781_v4 = vsel %vm745_vm0, %v779_v55, %v780_v56  ;;  %v770_v14 = vrot.slane %v633_v7, 1  ;;  %v2496_v56 = vld [vmem:[#allocation2 + $0x108] sm:$0xfe] }
 0x104   : > { %3542 = vmatprep.subr.bf16.mxu0 %v7248_v17  ;;  %v7261_v17 = vld [vmem:[%s8065_s14 + $0x30] ss:$8 sps:$4 sm:$0xff]   ;;  %v879_v19 = vpack.c.bf16 %v781_v4, %v775_v3  ;;  %v645_v3 = vld [vmem:[#allocation2 + $0xe0] sm:$0xfe]  ;;  %v2504_v43 = vld [vmem:[#allocation2 + $0x188] sm:$0xfe] }
 0x105   : > { %1116 = vmatmul.mubr.bf16.vlgmr.msra.gmra.mrb[0].mxu1 %v874_v13  ;;  %v2624_v13 = vsel %vm745_vm0, %v2622_v5, %v2623_v6  ;;  %v647_v4 = vld [vmem:[#allocation2 + $0xf0] sm:$0x1]  ;;  %v782_v5 = vrot.slane %v641_v63, 1  ;;  %v783_v6 = vrot.slane %v643_v0, 1  ;;  %v788_v8 = vrot.slane %v645_v3, 1 }
 0x106   : > { %2965 = vmatmul.mubr.bf16.vlgmr.msra.gmra.mrb[0].mxu0 %v2723_v23  ;;  %1357 = vmatpush1.bf16.msra.mxu1 %v7243_v22  ;;  %v2728_v22 = vpack.c.bf16 %v2630_v20, %v2624_v13  ;;  %v772_v23 = vsel %vm745_vm0, %v770_v14, %v771_v15  ;;  %v789_v9 = vrot.slane %v647_v4, 1  ;;  %v7281_v11 = vld [vmem:[%s8065_s14 + $0x64] ss:$8 sps:$4 sm:$0xff]   ;;  %v2493_v15 = vld [vmem:[#allocation2 + $0xf0] sm:$0x1] }
 0x107   : > { %3543 = vmatpush1.bf16.msra.mxu0 %v7246_v35  ;;  %1358 = vmatprep.subr.bf16.mxu1 %v7251_v36  ;;  %v7267_v35 = vld [vmem:[%s8065_s14 + $0x40] ss:$8 sps:$4 sm:$0xff]   ;;  %v2621_v36 = vsel %vm745_vm0, %v2619_v29, %v2620_v30  ;;  %v784_v13 = vsel %vm745_vm0, %v782_v5, %v783_v6  ;;  %v2632_v20 = vrot.slane %v2493_v15, 1  ;;  %v7284_v25 = vld [vmem:[%s8065_s14 + $0x564] ss:$8 sps:$4 sm:$0xff]  }
 0x108   : > { %3544 = vmatprep.subr.bf16.mxu0 %v7254_v38  ;;  %1125 = vmatprep.mubr.bf16.mxu1 %v877_v41  ;;  %v878_v38 = vpack.c.bf16 %v778_v27, %v772_v23  ;;  %v7278_v41 = vld [vmem:[%s8065_s14 + $0x554] ss:$8 sps:$4 sm:$0xff]   ;;  %v2491_v14 = vld [vmem:[#allocation2 + $0xe0] sm:$0xfe]  ;;  %v7285_v27 = vld [vmem:[%s8065_s14 + $0x70] ss:$8 sps:$4 sm:$0xff]  }
 0x109   : > { %2974 = vmatprep.mubr.bf16.mxu0 %v2726_v42  ;;  %v2495_v16 = vld [vmem:[#allocation2 + $0x100] sm:$0xfe]  ;;  %v7287_v29 = vld [vmem:[%s8065_s14 + $0x74] ss:$8 sps:$4 sm:$0xff]   ;;  %v2501_v3 = vld [vmem:[#allocation2 + $0x170] sm:$0x1] }
 0x10a   : > { %1359 = vmatpush1.bf16.msra.mxu1 %v7249_v39  ;;  %v2627_v39 = vsel %vm745_vm0, %v2625_v31, %v2626_v33  ;;  %v2637_v21 = vrot.slane %v2495_v16, 1  ;;  %v7282_v24 = vld [vmem:[%s8065_s14 + $0x560] ss:$8 sps:$4 sm:$0xff]   ;;  %v7288_v31 = vld [vmem:[%s8065_s14 + $0x570] ss:$8 sps:$4 sm:$0xff]  }
 0x10b   : > { %3545 = vmatpush1.bf16.msra.mxu0 %v7252_v40  ;;  %1360 = vmatprep.subr.bf16.mxu1 %v7257_v45  ;;  %v7275_v40 = vld [vmem:[%s8065_s14 + $0x54] ss:$8 sps:$4 sm:$0xff]   ;;  %v2727_v42 = vpack.c.bf16 %v2627_v39, %v2621_v36  ;;  %v646_v45 = vld [vmem:[#allocation2 + $0xe8] sm:$0xfe]  ;;  %v656_v36 = vld [vmem:[#allocation2 + $0x178] sm:$0x1] }
 0x10c   : > { %3546 = vmatprep.subr.bf16.mxu0 %v7260_v48  ;;  %v786_v48 = vrot.slane %v644_v44, 1  ;;  %v791_v49 = vrot.slane %v646_v45, 1  ;;  %v650_v33 = vld [vmem:[#allocation2 + $0x148] sm:$0xfe]  ;;  %v2506_v44 = vld [vmem:[#allocation2 + $0x198] sm:$0x1] }
 0x10d   : > { %1126 = vmatmul.mubr.bf16.gmra.mrb[4].mxu1 %v876_v58  ;;  %v2634_v58 = vrot.slane %v2492_v53, 1  ;;  %v2653_v53 = vrot.slane %v2506_v44, 1  ;;  %v7293_v63 = vld [vmem:[%s8065_s14 + $0x84] ss:$8 sps:$4 sm:$0xff]   ;;  %v2505_v6 = vld [vmem:[#allocation2 + $0x190] sm:$0x1] }
 0x10e   : > { %2975 = vmatmul.mubr.bf16.gmra.mrb[4].mxu0 %v2725_v60  ;;  %1361 = vmatpush1.bf16.msra.mxu1 %v7255_v59  ;;  %v787_v55 = vsel %vm745_vm0, %v785_v47, %v786_v48  ;;  %v2635_v59 = vrot.slane %v2494_v54, 1  ;;  %v793_v60 = vsel %vm745_vm0, %v791_v49, %v792_v52  ;;  %v649_v49 = vld [vmem:[#allocation2 + $0x140] sm:$0xfe]  ;;  %v2652_v52 = vrot.slane %v2504_v43, 1  ;;  %v7297_v15 = vld [vmem:[%s8065_s14 + $0x90] ss:$8 sps:$4 sm:$0xff]  }
 0x10f   : > { %3547 = vmatpush1.bf16.msra.mxu0 %v7258_v61  ;;  %1362 = vmatprep.subr.bf16.mxu1 %v7263_v1  ;;  %v2640_v61 = vrot.slane %v2496_v56, 1  ;;  %v881_v1 = vpack.c.bf16 %v793_v60, %v787_v55  ;;  %v653_v54 = vld [vmem:[#allocation2 + $0x160] sm:$0xfe]  ;;  %v655_v55 = vld [vmem:[#allocation2 + $0x170] sm:$0x1]  ;;  %v794_v57 = vrot.slane %v649_v49, 1 }
 0x110   : > { %3548 = vmatprep.subr.bf16.mxu0 %v7266_v2  ;;  %1135 = vmatprep.mubr.bf16.mxu1 %v879_v19  ;;  %v2636_v2 = vsel %vm745_vm0, %v2634_v58, %v2635_v59  ;;  %v2631_v19 = vrot.slane %v2491_v14, 1  ;;  %v800_v59 = vrot.slane %v653_v54, 1  ;;  %v2654_v60 = vsel %vm745_vm0, %v2652_v52, %v2653_v53  ;;  %v2503_v4 = vld [vmem:[#allocation2 + $0x180] sm:$0xfe]  ;;  %v7299_v16 = vld [vmem:[%s8065_s14 + $0x94] ss:$8 sps:$4 sm:$0xff]  }
 0x111   : > { %2984 = vmatprep.mubr.bf16.mxu0 %v2728_v22  ;;  %v2642_v7 = vsel %vm745_vm0, %v2640_v61, %v2641_v62  ;;  %v801_v61 = vrot.slane %v655_v55, 1  ;;  %v7291_v62 = vld [vmem:[%s8065_s14 + $0x80] ss:$8 sps:$4 sm:$0xff]   ;;  %v663_v44 = vld [vmem:[#allocation2 + $0x1b0] sm:$0x1] }
 0x112   : > { %1363 = vmatpush1.bf16.msra.mxu1 %v7261_v17  ;;  %v2730_v12 = vpack.c.bf16 %v2642_v7, %v2636_v2  ;;  %v790_v17 = vsel %vm745_vm0, %v788_v8, %v789_v9  ;;  %v2633_v26 = vsel %vm745_vm0, %v2631_v19, %v2632_v20  ;;  %v2499_v2 = vld [vmem:[#allocation2 + $0x160] sm:$0xfe]  ;;  %v2644_v8 = vrot.slane %v2501_v3, 1  ;;  %v7302_v19 = vld [vmem:[%s8065_s14 + $0x594] ss:$8 sps:$4 sm:$0xff]  }
 0x113   : > { %3549 = vmatpush1.bf16.msra.mxu0 %v7264_v18  ;;  %1364 = vmatprep.subr.bf16.mxu1 %v7269_v32  ;;  %v2497_v18 = vld [vmem:[#allocation2 + $0x110] sm:$0x1]  ;;  %v880_v22 = vpack.c.bf16 %v790_v17, %v784_v13  ;;  %v7290_v32 = vld [vmem:[%s8065_s14 + $0x574] ss:$8 sps:$4 sm:$0xff]   ;;  %v802_v5 = vsel %vm745_vm0, %v800_v59, %v801_v61  ;;  %v2643_v7 = vrot.slane %v2499_v2, 1  ;;  %v2649_v9 = vrot.slane %v2503_v4, 1 }
 0x114   : > { %3550 = vmatprep.subr.bf16.mxu0 %v7272_v34  ;;  %v2638_v23 = vrot.slane %v2497_v18, 1  ;;  %v652_v34 = vld [vmem:[#allocation2 + $0x158] sm:$0x1]  ;;  %v7296_v13 = vld [vmem:[%s8065_s14 + $0x584] ss:$8 sps:$4 sm:$0xff]   ;;  %v813_v49 = vrot.slane %v663_v44, 1 }
 0x115   : > { %1136 = vmatmul.mubr.bf16.gmra.mrb[8].mxu1 %v878_v38  ;;  %v798_v38 = vrot.slane %v652_v34, 1  ;;  %v2645_v14 = vsel %vm745_vm0, %v2643_v7, %v2644_v8  ;;  %v7300_v18 = vld [vmem:[%s8065_s14 + $0x590] ss:$8 sps:$4 sm:$0xff]   ;;  %v661_v43 = vld [vmem:[#allocation2 + $0x1a0] sm:$0xfe] }
 0x116   : > { %2985 = vmatmul.mubr.bf16.gmra.mrb[8].mxu0 %v2727_v42  ;;  %1365 = vmatpush1.bf16.msra.mxu1 %v7267_v35  ;;  %v2639_v28 = vsel %vm745_vm0, %v2637_v21, %v2638_v23  ;;  %v654_v35 = vld [vmem:[#allocation2 + $0x168] sm:$0xfe]  ;;  %v2502_v42 = vld [vmem:[#allocation2 + $0x178] sm:$0x1]  ;;  %v2507_v54 = vld [vmem:[#allocation2 + $0x1a0] sm:$0xfe] }
 0x117   : > { %3551 = vmatpush1.bf16.msra.mxu0 %v7270_v37  ;;  %1366 = vmatprep.subr.bf16.mxu1 %v7275_v40  ;;  %v2729_v30 = vpack.c.bf16 %v2639_v28, %v2633_v26  ;;  %v797_v37 = vrot.slane %v650_v33, 1  ;;  %v803_v39 = vrot.slane %v654_v35, 1  ;;  %v804_v40 = vrot.slane %v656_v36, 1  ;;  %v658_v21 = vld [vmem:[#allocation2 + $0x188] sm:$0xfe] }
 0x118   : > { %3552 = vmatprep.subr.bf16.mxu0 %v7278_v41  ;;  %1145 = vmatprep.mubr.bf16.mxu1 %v881_v1  ;;  %v2500_v41 = vld [vmem:[#allocation2 + $0x168] sm:$0xfe]  ;;  %v2647_v48 = vrot.slane %v2502_v42, 1  ;;  %v2514_v33 = vld [vmem:[#allocation2 + $0x1d8] sm:$0x1]  ;;  %v2655_v59 = vrot.slane %v2507_v54, 1 }
 0x119   : > { %2994 = vmatprep.mubr.bf16.mxu0 %v2730_v12  ;;  %v799_v45 = vsel %vm745_vm0, %v797_v37, %v798_v38  ;;  %v805_v46 = vsel %vm745_vm0, %v803_v39, %v804_v40  ;;  %v2646_v47 = vrot.slane %v2500_v41, 1  ;;  %v7294_v12 = vld [vmem:[%s8065_s14 + $0x580] ss:$8 sps:$4 sm:$0xff]   ;;  %v2665_v38 = vrot.slane %v2514_v33, 1  ;;  %v659_v40 = vld [vmem:[#allocation2 + $0x190] sm:$0x1] }
 0x11a   : > { %1367 = vmatpush1.bf16.msra.mxu1 %v7273_v50  ;;  %v651_v50 = vld [vmem:[#allocation2 + $0x150] sm:$0x1]  ;;  %v662_v23 = vld [vmem:[#allocation2 + $0x1a8] sm:$0xfe]  ;;  %v657_v39 = vld [vmem:[#allocation2 + $0x180] sm:$0xfe] }
 0x11b   : > { %3553 = vmatpush1.bf16.msra.mxu0 %v7276_v51  ;;  %1368 = vmatprep.subr.bf16.mxu1 %v7281_v11  ;;  %v883_v51 = vpack.c.bf16 %v805_v46, %v799_v45  ;;  %v2648_v56 = vsel %vm745_vm0, %v2646_v47, %v2647_v48  ;;  %v795_v58 = vrot.slane %v651_v50, 1  ;;  %v2650_v11 = vrot.slane %v2505_v6, 1  ;;  %v7303_v50 = vld [vmem:[%s8065_s14 + $0xa0] ss:$8 sps:$4 sm:$0xff]   ;;  %v2509_v55 = vld [vmem:[#allocation2 + $0x1b0] sm:$0x1] }
 0x11c   : > { %3554 = vmatprep.subr.bf16.mxu0 %v7284_v25  ;;  %v2732_v0 = vpack.c.bf16 %v2654_v60, %v2648_v56  ;;  %v809_v25 = vrot.slane %v658_v21, 1  ;;  %v806_v45 = vrot.slane %v657_v39, 1  ;;  %v807_v46 = vrot.slane %v659_v40, 1  ;;  %v2511_v56 = vld [vmem:[#allocation2 + $0x1c0] sm:$0xfe] }
 0x11d   : > { %1146 = vmatmul.mubr.bf16.gmra.mrb[12].mxu1 %v880_v22  ;;  %v796_v1 = vsel %vm745_vm0, %v794_v57, %v795_v58  ;;  %v2651_v17 = vsel %vm745_vm0, %v2649_v9, %v2650_v11  ;;  %v660_v22 = vld [vmem:[#allocation2 + $0x198] sm:$0x1]  ;;  %v812_v48 = vrot.slane %v661_v43, 1  ;;  %v2513_v58 = vld [vmem:[#allocation2 + $0x1d0] sm:$0x1]  ;;  %v2656_v60 = vrot.slane %v2509_v55, 1 }
 0x11e   : > { %1369 = vmatpush1.bf16.msra.mxu1 %v7279_v10  ;;  %2995 = vmatmul.mubr.bf16.gmra.mrb[12].mxu0 %v2729_v30  ;;  %v882_v10 = vpack.c.bf16 %v802_v5, %v796_v1  ;;  %v2731_v20 = vpack.c.bf16 %v2651_v17, %v2645_v14  ;;  %v810_v26 = vrot.slane %v660_v22, 1  ;;  %v2510_v30 = vld [vmem:[#allocation2 + $0x1b8] sm:$0x1]  ;;  %v808_v53 = vsel %vm745_vm0, %v806_v45, %v807_v46  ;;  %v7308_v1 = vld [vmem:[%s8065_s14 + $0x5a4] ss:$8 sps:$4 sm:$0xff]  }
 0x11f   : > { %3555 = vmatpush1.bf16.msra.mxu0 %v7282_v24  ;;  %1370 = vmatprep.subr.bf16.mxu1 %v7287_v29  ;;  %v664_v24 = vld [vmem:[#allocation2 + $0x1b8] sm:$0x1]  ;;  %v2508_v29 = vld [vmem:[#allocation2 + $0x1a8] sm:$0xfe]  ;;  %v2659_v35 = vrot.slane %v2510_v30, 1  ;;  %v814_v57 = vsel %vm745_vm0, %v812_v48, %v813_v49  ;;  %v2661_v61 = vrot.slane %v2511_v56, 1  ;;  %v2657_v2 = vsel %vm745_vm0, %v2655_v59, %v2656_v60 }
 0x120   : > { %3556 = vmatprep.subr.bf16.mxu0 %v7290_v32  ;;  %1155 = vmatprep.mubr.bf16.mxu1 %v883_v51  ;;  %v816_v28 = vrot.slane %v664_v24, 1  ;;  %v2512_v32 = vld [vmem:[#allocation2 + $0x1c8] sm:$0xfe]  ;;  %v2658_v34 = vrot.slane %v2508_v29, 1  ;;  %v7309_v3 = vld [vmem:[%s8065_s14 + $0xb0] ss:$8 sps:$4 sm:$0xff]  }
 0x121   : > { %3004 = vmatprep.mubr.bf16.mxu0 %v2732_v0  ;;  %v2664_v37 = vrot.slane %v2512_v32, 1  ;;  %v7305_v51 = vld [vmem:[%s8065_s14 + $0xa4] ss:$8 sps:$4 sm:$0xff]   ;;  %v7306_v0 = vld [vmem:[%s8065_s14 + $0x5a0] ss:$8 sps:$4 sm:$0xff]  }
 0x122   : > { %1371 = vmatpush1.bf16.msra.mxu1 %v7285_v27  ;;  %v815_v27 = vrot.slane %v662_v23, 1  ;;  %v2660_v42 = vsel %vm745_vm0, %v2658_v34, %v2659_v35  ;;  %v7311_v5 = vld [vmem:[%s8065_s14 + $0xb4] ss:$8 sps:$4 sm:$0xff]   ;;  %v7312_v7 = vld [vmem:[%s8065_s14 + $0x5b0] ss:$8 sps:$4 sm:$0xff]  }
 0x123   : > { %3557 = vmatpush1.bf16.msra.mxu0 %v7288_v31  ;;  %1372 = vmatprep.subr.bf16.mxu1 %v7293_v63  ;;  %v811_v31 = vsel %vm745_vm0, %v809_v25, %v810_v26  ;;  %v2666_v47 = vsel %vm745_vm0, %v2664_v37, %v2665_v38  ;;  %v2662_v63 = vrot.slane %v2513_v58, 1  ;;  %v7314_v8 = vld [vmem:[%s8065_s14 + $0x5b4] ss:$8 sps:$4 sm:$0xff]   ;;  %v666_v9 = vld [vmem:[#allocation2 + $0x1c8] sm:$0xfe] }
 0x124   : > { %3558 = vmatprep.subr.bf16.mxu0 %v7296_v13  ;;  %v817_v36 = vsel %vm745_vm0, %v815_v27, %v816_v28  ;;  %v2734_v52 = vpack.c.bf16 %v2666_v47, %v2660_v42  ;;  %v670_v11 = vld [vmem:[#allocation2 + $0x1e8] sm:$0xfe]  ;;  %v821_v13 = vrot.slane %v666_v9, 1  ;;  %v665_v25 = vld [vmem:[#allocation2 + $0x1c0] sm:$0xfe] }
 0x125   : > { %1156 = vmatmul.mubr.bf16.gmra.mrb[16].mxu1 %v882_v10  ;;  %v885_v41 = vpack.c.bf16 %v817_v36, %v811_v31  ;;  %v2663_v4 = vsel %vm745_vm0, %v2661_v61, %v2662_v63  ;;  %v668_v10 = vld [vmem:[#allocation2 + $0x1d8] sm:$0x1]  ;;  %v2516_v17 = vld [vmem:[#allocation2 + $0x1e8] sm:$0xfe]  ;;  %v667_v26 = vld [vmem:[#allocation2 + $0x1d0] sm:$0x1] }
 0x126   : > { %1373 = vmatpush1.bf16.msra.mxu1 %v7291_v62  ;;  %3005 = vmatmul.mubr.bf16.gmra.mrb[16].mxu0 %v2731_v20  ;;  %v884_v62 = vpack.c.bf16 %v814_v57, %v808_v53  ;;  %v2733_v6 = vpack.c.bf16 %v2663_v4, %v2657_v2  ;;  %v822_v14 = vrot.slane %v668_v10, 1  ;;  %v2522_v20 = vld [vmem:[#allocation2 + $0x218] sm:$0x1]  ;;  %v2670_v23 = vrot.slane %v2516_v17, 1  ;;  %v669_v30 = vld [vmem:[#allocation2 + $0x1e0] sm:$0xfe] }
 0x127   : > { %3559 = vmatpush1.bf16.msra.mxu0 %v7294_v12  ;;  %1374 = vmatprep.subr.bf16.mxu1 %v7299_v16  ;;  %v672_v12 = vld [vmem:[#allocation2 + $0x1f8] sm:$0x1]  ;;  %v2677_v29 = vrot.slane %v2522_v20, 1  ;;  %v671_v31 = vld [vmem:[#allocation2 + $0x1f0] sm:$0x1]  ;;  %v818_v33 = vrot.slane %v665_v25, 1 }
 0x128   : > { %3560 = vmatprep.subr.bf16.mxu0 %v7302_v19  ;;  %1165 = vmatprep.mubr.bf16.mxu1 %v885_v41  ;;  %v828_v16 = vrot.slane %v672_v12, 1  ;;  %v2520_v19 = vld [vmem:[#allocation2 + $0x208] sm:$0xfe]  ;;  %v823_v21 = vsel %vm745_vm0, %v821_v13, %v822_v14  ;;  %v819_v34 = vrot.slane %v667_v26, 1  ;;  %v824_v35 = vrot.slane %v669_v30, 1 }
 0x129   : > { %3014 = vmatprep.mubr.bf16.mxu0 %v2734_v52  ;;  %v2676_v28 = vrot.slane %v2520_v19, 1  ;;  %v825_v37 = vrot.slane %v671_v31, 1  ;;  %v7315_v38 = vld [vmem:[%s8065_s14 + $0xc0] ss:$8 sps:$4 sm:$0xff]   ;;  %v7317_v39 = vld [vmem:[%s8065_s14 + $0xc4] ss:$8 sps:$4 sm:$0xff]  }
 0x12a   : > { %1375 = vmatpush1.bf16.msra.mxu1 %v7297_v15  ;;  %v827_v15 = vrot.slane %v670_v11, 1  ;;  %v820_v41 = vsel %vm745_vm0, %v818_v33, %v819_v34  ;;  %v2515_v42 = vld [vmem:[#allocation2 + $0x1e0] sm:$0xfe]  ;;  %v2517_v43 = vld [vmem:[#allocation2 + $0x1f0] sm:$0x1] }
 0x12b   : > { %3561 = vmatpush1.bf16.msra.mxu0 %v7300_v18  ;;  %1376 = vmatprep.subr.bf16.mxu1 %v7305_v51  ;;  %v2518_v18 = vld [vmem:[#allocation2 + $0x1f8] sm:$0x1]  ;;  %v2678_v36 = vsel %vm745_vm0, %v2676_v28, %v2677_v29  ;;  %v2519_v44 = vld [vmem:[#allocation2 + $0x200] sm:$0xfe]  ;;  %v826_v45 = vsel %vm745_vm0, %v824_v35, %v825_v37  ;;  %v2521_v46 = vld [vmem:[#allocation2 + $0x210] sm:$0x1] }
 0x12c   : > { %3562 = vmatprep.subr.bf16.mxu0 %v7308_v1  ;;  %v829_v22 = vsel %vm745_vm0, %v827_v15, %v828_v16  ;;  %v2671_v24 = vrot.slane %v2518_v18, 1  ;;  %v2667_v47 = vrot.slane %v2515_v42, 1  ;;  %v2668_v48 = vrot.slane %v2517_v43, 1  ;;  %v7318_v52 = vld [vmem:[%s8065_s14 + $0x5c0] ss:$8 sps:$4 sm:$0xff]  }
 0x12d   : > { %1166 = vmatmul.mubr.bf16.gmra.mrb[20].mxu1 %v884_v62  ;;  %v887_v27 = vpack.c.bf16 %v829_v22, %v823_v21  ;;  %v2673_v49 = vrot.slane %v2519_v44, 1  ;;  %v2674_v51 = vrot.slane %v2521_v46, 1  ;;  %v7320_v53 = vld [vmem:[%s8065_s14 + $0x5c4] ss:$8 sps:$4 sm:$0xff]   ;;  %v7321_v55 = vld [vmem:[%s8065_s14 + $0xd0] ss:$8 sps:$4 sm:$0xff]  }
 0x12e   : > { %1377 = vmatpush1.bf16.msra.mxu1 %v7303_v50  ;;  %3015 = vmatmul.mubr.bf16.gmra.mrb[20].mxu0 %v2733_v6  ;;  %v2672_v32 = vsel %vm745_vm0, %v2670_v23, %v2671_v24  ;;  %v886_v50 = vpack.c.bf16 %v826_v45, %v820_v41  ;;  %v2669_v54 = vsel %vm745_vm0, %v2667_v47, %v2668_v48  ;;  %v7323_v56 = vld [vmem:[%s8065_s14 + $0xd4] ss:$8 sps:$4 sm:$0xff]   ;;  %v7324_v58 = vld [vmem:[%s8065_s14 + $0x5d0] ss:$8 sps:$4 sm:$0xff]   ;;  %v674_v61 = vld [vmem:[#allocation2 + $0x208] sm:$0xfe] }
 0x12f   : > { %3563 = vmatpush1.bf16.msra.mxu0 %v7306_v0  ;;  %1378 = vmatprep.subr.bf16.mxu1 %v7311_v5  ;;  %v2736_v40 = vpack.c.bf16 %v2678_v36, %v2672_v32  ;;  %v2675_v57 = vsel %vm745_vm0, %v2673_v49, %v2674_v51  ;;  %v7326_v59 = vld [vmem:[%s8065_s14 + $0x5d4] ss:$8 sps:$4 sm:$0xff]   ;;  %v676_v62 = vld [vmem:[#allocation2 + $0x218] sm:$0x1]  ;;  %v678_v63 = vld [vmem:[#allocation2 + $0x228] sm:$0xfe] }
 0x130   : > { %3564 = vmatprep.subr.bf16.mxu0 %v7314_v8  ;;  %1175 = vmatprep.mubr.bf16.mxu1 %v887_v27  ;;  %v2735_v60 = vpack.c.bf16 %v2675_v57, %v2669_v54  ;;  %v680_v0 = vld [vmem:[#allocation2 + $0x238] sm:$0x1]  ;;  %v833_v1 = vrot.slane %v674_v61, 1  ;;  %v834_v2 = vrot.slane %v676_v62, 1  ;;  %v2524_v5 = vld [vmem:[#allocation2 + $0x228] sm:$0xfe] }
 0x131   : > { %3024 = vmatprep.mubr.bf16.mxu0 %v2736_v40  ;;  %v840_v4 = vrot.slane %v680_v0, 1  ;;  %v2526_v6 = vld [vmem:[#allocation2 + $0x238] sm:$0x1]  ;;  %v2528_v8 = vld [vmem:[#allocation2 + $0x248] sm:$0xfe]  ;;  %v2682_v10 = vrot.slane %v2524_v5, 1 }
 0x132   : > { %1379 = vmatpush1.bf16.msra.mxu1 %v7309_v3  ;;  %v839_v3 = vrot.slane %v678_v63, 1  ;;  %v2530_v9 = vld [vmem:[#allocation2 + $0x258] sm:$0x1]  ;;  %v2683_v11 = vrot.slane %v2526_v6, 1  ;;  %v2688_v13 = vrot.slane %v2528_v8, 1  ;;  %v538_v49 = vld [vmem:[#allocation2 + $0x8] sm:$0xff] }
 0x133   : > { %3565 = vmatpush1.bf16.msra.mxu0 %v7312_v7  ;;  %1380 = vmatprep.subr.bf16.mxu1 %v7317_v39  ;;  %v835_v7 = vsel %vm745_vm0, %v833_v1, %v834_v2  ;;  %v2689_v14 = vrot.slane %v2530_v9, 1  ;;  %v673_v15 = vld [vmem:[#allocation2 + $0x200] sm:$0xfe]  ;;  %v675_v16 = vld [vmem:[#allocation2 + $0x210] sm:$0x1] }
 0x134   : > { %3566 = vmatprep.subr.bf16.mxu0 %v7320_v53  ;;  %v841_v12 = vsel %vm745_vm0, %v839_v3, %v840_v4  ;;  %v2684_v18 = vsel %vm745_vm0, %v2682_v10, %v2683_v11  ;;  %v677_v19 = vld [vmem:[#allocation2 + $0x220] sm:$0xfe]  ;;  %v679_v20 = vld [vmem:[#allocation2 + $0x230] sm:$0x1]  ;;  %v830_v21 = vrot.slane %v673_v15, 1  ;;  %v831_v22 = vrot.slane %v675_v16, 1 }
 0x135   : > { %1176 = vmatmul.mubr.bf16.gmra.mrb[24].mxu1 %v886_v50  ;;  %v889_v17 = vpack.c.bf16 %v841_v12, %v835_v7  ;;  %v2690_v23 = vsel %vm745_vm0, %v2688_v13, %v2689_v14  ;;  %v836_v24 = vrot.slane %v677_v19, 1  ;;  %v837_v25 = vrot.slane %v679_v20, 1  ;;  %v7327_v26 = vld [vmem:[%s8065_s14 + $0xe0] ss:$8 sps:$4 sm:$0xff]   ;;  %v7329_v27 = vld [vmem:[%s8065_s14 + $0xe4] ss:$8 sps:$4 sm:$0xff]  }
 0x136   : > { %1381 = vmatpush1.bf16.msra.mxu1 %v7315_v38  ;;  %3025 = vmatmul.mubr.bf16.gmra.mrb[24].mxu0 %v2735_v60  ;;  %v2738_v28 = vpack.c.bf16 %v2690_v23, %v2684_v18  ;;  %v832_v29 = vsel %vm745_vm0, %v830_v21, %v831_v22  ;;  %v2523_v30 = vld [vmem:[#allocation2 + $0x220] sm:$0xfe]  ;;  %v2525_v31 = vld [vmem:[#allocation2 + $0x230] sm:$0x1]  ;;  %v7335_v45 = vld [vmem:[%s8065_s14 + $0xf4] ss:$8 sps:$4 sm:$0xff]  }
 0x137   : > { %3567 = vmatpush1.bf16.msra.mxu0 %v7318_v52  ;;  %1382 = vmatprep.subr.bf16.mxu1 %v7323_v56  ;;  %v2527_v32 = vld [vmem:[#allocation2 + $0x240] sm:$0xfe]  ;;  %v838_v33 = vsel %vm745_vm0, %v836_v24, %v837_v25  ;;  %v2529_v34 = vld [vmem:[#allocation2 + $0x250] sm:$0x1]  ;;  %v2679_v35 = vrot.slane %v2523_v30, 1  ;;  %v2680_v36 = vrot.slane %v2525_v31, 1 }
 0x138   : > { %3568 = vmatprep.subr.bf16.mxu0 %v7326_v59  ;;  %1185 = vmatprep.mubr.bf16.mxu1 %v889_v17  ;;  %v2685_v37 = vrot.slane %v2527_v32, 1  ;;  %v888_v38 = vpack.c.bf16 %v838_v33, %v832_v29  ;;  %v2686_v39 = vrot.slane %v2529_v34, 1  ;;  %v7330_v40 = vld [vmem:[%s8065_s14 + $0x5e0] ss:$8 sps:$4 sm:$0xff]   ;;  %v7332_v41 = vld [vmem:[%s8065_s14 + $0x5e4] ss:$8 sps:$4 sm:$0xff]  }
 0x139   : > { %3034 = vmatprep.mubr.bf16.mxu0 %v2738_v28  ;;  %v2681_v42 = vsel %vm745_vm0, %v2679_v35, %v2680_v36  ;;  %v7333_v43 = vld [vmem:[%s8065_s14 + $0xf0] ss:$8 sps:$4 sm:$0xff]   ;;  %v7338_v48 = vld [vmem:[%s8065_s14 + $0x5f4] ss:$8 sps:$4 sm:$0xff]   ;;  %v540_v50 = vld [vmem:[#allocation2 + $0x28] sm:$0xff] }
 0x13a   : > { %1383 = vmatpush1.bf16.msra.mxu1 %v7321_v55  ;;  %v2687_v44 = vsel %vm745_vm0, %v2685_v37, %v2686_v39  ;;  %v7336_v47 = vld [vmem:[%s8065_s14 + $0x5f0] ss:$8 sps:$4 sm:$0xff]   ;;  %v3078_v51 = vld [vmem:[#allocation2 + $0x28] sm:$0xfc]  ;;  %v570_v53 = vpack.c.bf16 %v540_v50, %v538_v49  ;;  %v537_v60 = vld [vmem:[#allocation2] sm:$0xff] }
 0x13b   : > { %3569 = vmatpush1.bf16.msra.mxu0 %v7324_v58  ;;  %1384 = vmatprep.subr.bf16.mxu1 %v7329_v27  ;;  %v2737_v46 = vpack.c.bf16 %v2687_v44, %v2681_v42  ;;  %v3080_v52 = vld [vmem:[#allocation2 + $0x38] sm:$0x3]  ;;  %v3082_v54 = vld [vmem:[#allocation2 + $0x48] sm:$0xfc]  ;;  %v3208_v56 = vrot.slane %v3078_v51, 2  ;;  %v539_v61 = vld [vmem:[#allocation2 + $0x20] sm:$0xff] }
 0x13c   : > { %3570 = vmatprep.subr.bf16.mxu0 %v7332_v41  ;;  %v3084_v55 = vld [vmem:[#allocation2 + $0x58] sm:$0x3]  ;;  %v3209_v57 = vrot.slane %v3080_v52, 2  ;;  %v3214_v58 = vrot.slane %v3082_v54, 2  ;;  %v569_v63 = vpack.c.bf16 %v539_v61, %v537_v60  ;;  %v7339_v0 = vld [vmem:[%s8065_s14 + $0x200] ss:$8 sps:$4 sm:$0xff]  }
 0x13d   : > { %1186 = vmatmul.mubr.bf16.gmra.mrb[28].mxu1 %v888_v38  ;;  %v3215_v59 = vrot.slane %v3084_v55, 2  ;;  %v7341_v1 = vld [vmem:[%s8065_s14 + $0x204] ss:$8 sps:$4 sm:$0xff]   ;;  %v3079_v4 = vld [vmem:[#allocation2 + $0x30] sm:$0x3] }
 0x13e   : > { %1385 = vmatpush1.bf16.msra.mxu1 %v7327_v26  ;;  %3035 = vmatmul.mubr.bf16.gmra.mrb[28].mxu0 %v2737_v46  ;;  %v3210_v62 = vsel %vm1597_vm1, %v3208_v56, %v3209_v57  ;;  %v3077_v3 = vld [vmem:[#allocation2 + $0x20] sm:$0xfc]  ;;  %v3083_v7 = vld [vmem:[#allocation2 + $0x50] sm:$0x3]  ;;  %v3206_v9 = vrot.slane %v3079_v4, 2  ;;  %v542_v20 = vld [vmem:[#allocation2 + $0x48] sm:$0xff] }
 0x13f   : > { %3571 = vmatpush1.bf16.msra.mxu0 %v7330_v40  ;;  %1386 = vmatprep.subr.bf16.mxu1 %v7335_v45  ;;  %v3216_v2 = vsel %vm1597_vm1, %v3214_v58, %v3215_v59  ;;  %v3081_v5 = vld [vmem:[#allocation2 + $0x40] sm:$0xfc]  ;;  %v3205_v8 = vrot.slane %v3077_v3, 2  ;;  %v3212_v11 = vrot.slane %v3083_v7, 2  ;;  %v7345_v15 = vld [vmem:[%s8065_s14 + $0x210] ss:$8 sps:$4 sm:$0xff]  }
 0x140   : > { %3572 = vmatprep.subr.bf16.mxu0 %v7338_v48  ;;  %1388 = vmatprep.mubr.bf16.mxu1 %v570_v53  ;;  %v3334_v6 = vpack.c.bf16 %v3216_v2, %v3210_v62  ;;  %v3211_v10 = vrot.slane %v3081_v5, 2  ;;  %v7342_v12 = vld [vmem:[%s8065_s14 + $0x600] ss:$8 sps:$4 sm:$0xff]   ;;  %v7344_v13 = vld [vmem:[%s8065_s14 + $0x604] ss:$8 sps:$4 sm:$0xff]  }
 0x141   : > { %v3207_v14 = vsel %vm1597_vm1, %v3205_v8, %v3206_v9  ;;  %v7347_v17 = vld [vmem:[%s8065_s14 + $0x214] ss:$8 sps:$4 sm:$0xff]   ;;  %v7348_v21 = vld [vmem:[%s8065_s14 + $0x610] ss:$8 sps:$4 sm:$0xff]   ;;  %v544_v22 = vld [vmem:[#allocation2 + $0x68] sm:$0xff] }
 0x142   : > { %1387 = vmatpush1.bf16.msra.mxu1 %v7333_v43  ;;  %3574 = vmatprep.mubr.bf16.mxu0 %v3334_v6  ;;  %v3213_v16 = vsel %vm1597_vm1, %v3211_v10, %v3212_v11  ;;  %v7350_v19 = vld [vmem:[%s8065_s14 + $0x614] ss:$8 sps:$4 sm:$0xff]   ;;  %v3086_v23 = vld [vmem:[#allocation2 + $0x68] sm:$0xfc]  ;;  %v3088_v24 = vld [vmem:[#allocation2 + $0x78] sm:$0x3]  ;;  %v8530_v25 = vpack.c.bf16 %v544_v22, %v542_v20 }
 0x143   : > { %3573 = vmatpush1.bf16.msra.mxu0 %v7336_v47  ;;  %1935 = vmatprep.subr.bf16.mxu1 %v7341_v1  ;;  %v3333_v18 = vpack.c.bf16 %v3213_v16, %v3207_v14  ;;  %v3090_v26 = vld [vmem:[#allocation2 + $0x88] sm:$0xfc]  ;;  %v3092_v27 = vld [vmem:[#allocation2 + $0x98] sm:$0x3]  ;;  %v3220_v28 = vrot.slane %v3086_v23, 2  ;;  %v3221_v29 = vrot.slane %v3088_v24, 2 }
 0x144   : > { %3929 = vmatprep.subr.bf16.mxu0 %v7344_v13  ;;  %v3226_v30 = vrot.slane %v3090_v26, 2  ;;  %v3227_v31 = vrot.slane %v3092_v27, 2  ;;  %v541_v32 = vld [vmem:[#allocation2 + $0x40] sm:$0xff]  ;;  %v3087_v40 = vld [vmem:[#allocation2 + $0x70] sm:$0x3]  ;;  %v546_v57 = vld [vmem:[#allocation2 + $0x88] sm:$0xff] }
 0x145   : > { %1389 = vmatmul.mubr.bf16.vlgmr.msra.gmra.mrb[0].mxu1 %v569_v63  ;;  %v543_v33 = vld [vmem:[#allocation2 + $0x60] sm:$0xff]  ;;  %v3222_v34 = vsel %vm1597_vm1, %v3220_v28, %v3221_v29  ;;  %v3091_v43 = vld [vmem:[#allocation2 + $0x90] sm:$0x3]  ;;  %v3218_v45 = vrot.slane %v3087_v40, 2  ;;  %v7359_v53 = vld [vmem:[%s8065_s14 + $0x234] ss:$8 sps:$4 sm:$0xff]  }
 0x146   : > { %1936 = vmatpush1.bf16.msra.mxu1 %v7339_v0  ;;  %3575 = vmatmul.mubr.bf16.vlgmr.msra.gmra.mrb[0].mxu0 %v3333_v18  ;;  %v8534_v35 = vpack.c.bf16 %v543_v33, %v541_v32  ;;  %v7351_v36 = vld [vmem:[%s8065_s14 + $0x220] ss:$8 sps:$4 sm:$0xff]   ;;  %v7353_v37 = vld [vmem:[%s8065_s14 + $0x224] ss:$8 sps:$4 sm:$0xff]   ;;  %v3228_v38 = vsel %vm1597_vm1, %v3226_v30, %v3227_v31  ;;  %v3224_v47 = vrot.slane %v3091_v43, 2 }
 0x147   : > { %1937 = vmatprep.subr.bf16.mxu1 %v7347_v17  ;;  %3930 = vmatpush1.bf16.msra.mxu0 %v7342_v12  ;;  %v3085_v39 = vld [vmem:[#allocation2 + $0x60] sm:$0xfc]  ;;  %v3336_v42 = vpack.c.bf16 %v3228_v38, %v3222_v34  ;;  %v7357_v51 = vld [vmem:[%s8065_s14 + $0x230] ss:$8 sps:$4 sm:$0xff]   ;;  %v7362_v56 = vld [vmem:[%s8065_s14 + $0x634] ss:$8 sps:$4 sm:$0xff]  }
 0x148   : > { %3931 = vmatprep.subr.bf16.mxu0 %v7350_v19  ;;  %1398 = vmatprep.mubr.bf16.mxu1 %v8530_v25  ;;  %v3089_v41 = vld [vmem:[#allocation2 + $0x80] sm:$0xfc]  ;;  %v3217_v44 = vrot.slane %v3085_v39, 2  ;;  %v7360_v55 = vld [vmem:[%s8065_s14 + $0x630] ss:$8 sps:$4 sm:$0xff]   ;;  %v548_v58 = vld [vmem:[#allocation2 + $0xa8] sm:$0xff] }
 0x149   : > { %v3223_v46 = vrot.slane %v3089_v41, 2  ;;  %v7354_v48 = vld [vmem:[%s8065_s14 + $0x620] ss:$8 sps:$4 sm:$0xff]   ;;  %v7356_v49 = vld [vmem:[%s8065_s14 + $0x624] ss:$8 sps:$4 sm:$0xff]   ;;  %3584 = vmatprep.mubr.bf16.mxu0 %v3336_v42  ;;  %v8548_v61 = vpack.c.bf16 %v548_v58, %v546_v57 }
 0x14a   : > { %1938 = vmatpush1.bf16.msra.mxu1 %v7345_v15  ;;  %v3219_v50 = vsel %vm1597_vm1, %v3217_v44, %v3218_v45  ;;  %v3094_v59 = vld [vmem:[#allocation2 + $0xa8] sm:$0xfc]  ;;  %v3096_v60 = vld [vmem:[#allocation2 + $0xb8] sm:$0x3]  ;;  %v545_v4 = vld [vmem:[#allocation2 + $0x80] sm:$0xff] }
 0x14b   : > { %1939 = vmatprep.subr.bf16.mxu1 %v7353_v37  ;;  %3932 = vmatpush1.bf16.msra.mxu0 %v7348_v21  ;;  %v3225_v52 = vsel %vm1597_vm1, %v3223_v46, %v3224_v47  ;;  %v3098_v62 = vld [vmem:[#allocation2 + $0xc8] sm:$0xfc]  ;;  %v3100_v63 = vld [vmem:[#allocation2 + $0xd8] sm:$0x3]  ;;  %v3232_v0 = vrot.slane %v3094_v59, 2  ;;  %v3233_v1 = vrot.slane %v3096_v60, 2 }
 0x14c   : > { %3933 = vmatprep.subr.bf16.mxu0 %v7356_v49  ;;  %v3335_v54 = vpack.c.bf16 %v3225_v52, %v3219_v50  ;;  %v3238_v2 = vrot.slane %v3098_v62, 2  ;;  %v3239_v3 = vrot.slane %v3100_v63, 2  ;;  %v547_v5 = vld [vmem:[#allocation2 + $0xa0] sm:$0xff]  ;;  %v3095_v12 = vld [vmem:[#allocation2 + $0xb0] sm:$0x3]  ;;  %v550_v30 = vld [vmem:[#allocation2 + $0xc8] sm:$0xff] }
 0x14d   : > { %1399 = vmatmul.mubr.bf16.gmra.mrb[4].mxu1 %v8534_v35  ;;  %v3234_v6 = vsel %vm1597_vm1, %v3232_v0, %v3233_v1  ;;  %v8552_v7 = vpack.c.bf16 %v547_v5, %v545_v4  ;;  %v7363_v8 = vld [vmem:[%s8065_s14 + $0x240] ss:$8 sps:$4 sm:$0xff]   ;;  %v7365_v9 = vld [vmem:[%s8065_s14 + $0x244] ss:$8 sps:$4 sm:$0xff]   ;;  %v3099_v15 = vld [vmem:[#allocation2 + $0xd0] sm:$0x3] }
 0x14e   : > { %1940 = vmatpush1.bf16.msra.mxu1 %v7351_v36  ;;  %3585 = vmatmul.mubr.bf16.gmra.mrb[4].mxu0 %v3335_v54  ;;  %v3240_v10 = vsel %vm1597_vm1, %v3238_v2, %v3239_v3  ;;  %v3093_v11 = vld [vmem:[#allocation2 + $0xa0] sm:$0xfc]  ;;  %v3230_v17 = vrot.slane %v3095_v12, 2  ;;  %v3236_v19 = vrot.slane %v3099_v15, 2  ;;  %v7369_v23 = vld [vmem:[%s8065_s14 + $0x250] ss:$8 sps:$4 sm:$0xff]  }
 0x14f   : > { %3934 = vmatpush1.bf16.msra.mxu0 %v7354_v48  ;;  %1941 = vmatprep.subr.bf16.mxu1 %v7359_v53  ;;  %v3097_v13 = vld [vmem:[#allocation2 + $0xc0] sm:$0xfc]  ;;  %v3338_v14 = vpack.c.bf16 %v3240_v10, %v3234_v6  ;;  %v3229_v16 = vrot.slane %v3093_v11, 2  ;;  %v7371_v26 = vld [vmem:[%s8065_s14 + $0x254] ss:$8 sps:$4 sm:$0xff]   ;;  %v552_v31 = vld [vmem:[#allocation2 + $0xe8] sm:$0xff] }
 0x150   : > { %3935 = vmatprep.subr.bf16.mxu0 %v7362_v56  ;;  %1408 = vmatprep.mubr.bf16.mxu1 %v8548_v61  ;;  %v3235_v18 = vrot.slane %v3097_v13, 2  ;;  %v7366_v20 = vld [vmem:[%s8065_s14 + $0x640] ss:$8 sps:$4 sm:$0xff]   ;;  %v7368_v21 = vld [vmem:[%s8065_s14 + $0x644] ss:$8 sps:$4 sm:$0xff]   ;;  %v8566_v34 = vpack.c.bf16 %v552_v31, %v550_v30 }
 0x151   : > { %3594 = vmatprep.mubr.bf16.mxu0 %v3338_v14  ;;  %v3231_v22 = vsel %vm1597_vm1, %v3229_v16, %v3230_v17  ;;  %v7372_v28 = vld [vmem:[%s8065_s14 + $0x650] ss:$8 sps:$4 sm:$0xff]   ;;  %v7374_v29 = vld [vmem:[%s8065_s14 + $0x654] ss:$8 sps:$4 sm:$0xff]   ;;  %v3102_v32 = vld [vmem:[#allocation2 + $0xe8] sm:$0xfc] }
 0x152   : > { %1942 = vmatpush1.bf16.msra.mxu1 %v7357_v51  ;;  %v3237_v24 = vsel %vm1597_vm1, %v3235_v18, %v3236_v19  ;;  %v3104_v33 = vld [vmem:[#allocation2 + $0xf8] sm:$0x3]  ;;  %v3106_v36 = vld [vmem:[#allocation2 + $0x108] sm:$0xfc]  ;;  %v3244_v38 = vrot.slane %v3102_v32, 2  ;;  %v549_v42 = vld [vmem:[#allocation2 + $0xc0] sm:$0xff] }
 0x153   : > { %3936 = vmatpush1.bf16.msra.mxu0 %v7360_v55  ;;  %1943 = vmatprep.subr.bf16.mxu1 %v7365_v9  ;;  %v3337_v27 = vpack.c.bf16 %v3237_v24, %v3231_v22  ;;  %v3108_v37 = vld [vmem:[#allocation2 + $0x118] sm:$0x3]  ;;  %v3245_v39 = vrot.slane %v3104_v33, 2  ;;  %v3250_v40 = vrot.slane %v3106_v36, 2  ;;  %v551_v43 = vld [vmem:[#allocation2 + $0xe0] sm:$0xff]  ;;  %v554_v4 = vld [vmem:[#allocation2 + $0x148] sm:$0xff] }
 0x154   : > { %3937 = vmatprep.subr.bf16.mxu0 %v7368_v21  ;;  %v3251_v41 = vrot.slane %v3108_v37, 2  ;;  %v8570_v45 = vpack.c.bf16 %v551_v43, %v549_v42  ;;  %v7375_v46 = vld [vmem:[%s8065_s14 + $0x260] ss:$8 sps:$4 sm:$0xff]   ;;  %v7377_v47 = vld [vmem:[%s8065_s14 + $0x264] ss:$8 sps:$4 sm:$0xff]  }
 0x155   : > { %1409 = vmatmul.mubr.bf16.gmra.mrb[8].mxu1 %v8552_v7  ;;  %v3246_v44 = vsel %vm1597_vm1, %v3244_v38, %v3245_v39  ;;  %v3101_v49 = vld [vmem:[#allocation2 + $0xe0] sm:$0xfc]  ;;  %v3103_v50 = vld [vmem:[#allocation2 + $0xf0] sm:$0x3]  ;;  %v7383_v0 = vld [vmem:[%s8065_s14 + $0x274] ss:$8 sps:$4 sm:$0xff]  }
 0x156   : > { %1944 = vmatpush1.bf16.msra.mxu1 %v7363_v8  ;;  %3595 = vmatmul.mubr.bf16.gmra.mrb[8].mxu0 %v3337_v27  ;;  %v3252_v48 = vsel %vm1597_vm1, %v3250_v40, %v3251_v41  ;;  %v3105_v51 = vld [vmem:[#allocation2 + $0x100] sm:$0xfc]  ;;  %v3107_v53 = vld [vmem:[#allocation2 + $0x110] sm:$0x3]  ;;  %v3241_v54 = vrot.slane %v3101_v49, 2  ;;  %v3242_v55 = vrot.slane %v3103_v50, 2 }
 0x157   : > { %3938 = vmatpush1.bf16.msra.mxu0 %v7366_v20  ;;  %1945 = vmatprep.subr.bf16.mxu1 %v7371_v26  ;;  %v3340_v52 = vpack.c.bf16 %v3252_v48, %v3246_v44  ;;  %v3247_v56 = vrot.slane %v3105_v51, 2  ;;  %v3248_v57 = vrot.slane %v3107_v53, 2  ;;  %v7378_v58 = vld [vmem:[%s8065_s14 + $0x660] ss:$8 sps:$4 sm:$0xff]   ;;  %v7380_v59 = vld [vmem:[%s8065_s14 + $0x664] ss:$8 sps:$4 sm:$0xff]  }
 0x158   : > { %3939 = vmatprep.subr.bf16.mxu0 %v7374_v29  ;;  %1418 = vmatprep.mubr.bf16.mxu1 %v8566_v34  ;;  %v3243_v60 = vsel %vm1597_vm1, %v3241_v54, %v3242_v55  ;;  %v7381_v62 = vld [vmem:[%s8065_s14 + $0x270] ss:$8 sps:$4 sm:$0xff]   ;;  %v7386_v3 = vld [vmem:[%s8065_s14 + $0x674] ss:$8 sps:$4 sm:$0xff]   ;;  %v556_v5 = vld [vmem:[#allocation2 + $0x168] sm:$0xff] }
 0x159   : > { %3604 = vmatprep.mubr.bf16.mxu0 %v3340_v52  ;;  %v3249_v63 = vsel %vm1597_vm1, %v3247_v56, %v3248_v57  ;;  %v7384_v2 = vld [vmem:[%s8065_s14 + $0x670] ss:$8 sps:$4 sm:$0xff]   ;;  %v3110_v6 = vld [vmem:[#allocation2 + $0x168] sm:$0xfc]  ;;  %v578_v9 = vpack.c.bf16 %v556_v5, %v554_v4  ;;  %v553_v16 = vld [vmem:[#allocation2 + $0x140] sm:$0xff] }
 0x15a   : > { %1946 = vmatpush1.bf16.msra.mxu1 %v7369_v23  ;;  %v3339_v1 = vpack.c.bf16 %v3249_v63, %v3243_v60  ;;  %v3112_v8 = vld [vmem:[#allocation2 + $0x178] sm:$0x3]  ;;  %v3114_v10 = vld [vmem:[#allocation2 + $0x188] sm:$0xfc]  ;;  %v3256_v12 = vrot.slane %v3110_v6, 2  ;;  %v555_v17 = vld [vmem:[#allocation2 + $0x160] sm:$0xff] }
 0x15b   : > { %3940 = vmatpush1.bf16.msra.mxu0 %v7372_v28  ;;  %1947 = vmatprep.subr.bf16.mxu1 %v7377_v47  ;;  %v3116_v11 = vld [vmem:[#allocation2 + $0x198] sm:$0x3]  ;;  %v3257_v13 = vrot.slane %v3112_v8, 2  ;;  %v3262_v14 = vrot.slane %v3114_v10, 2  ;;  %v577_v19 = vpack.c.bf16 %v555_v17, %v553_v16  ;;  %v7387_v20 = vld [vmem:[%s8065_s14 + $0x280] ss:$8 sps:$4 sm:$0xff]  }
 0x15c   : > { %3941 = vmatprep.subr.bf16.mxu0 %v7380_v59  ;;  %v3263_v15 = vrot.slane %v3116_v11, 2  ;;  %v7389_v21 = vld [vmem:[%s8065_s14 + $0x284] ss:$8 sps:$4 sm:$0xff]   ;;  %v3111_v24 = vld [vmem:[#allocation2 + $0x170] sm:$0x3] }
 0x15d   : > { %1419 = vmatmul.mubr.bf16.gmra.mrb[12].mxu1 %v8570_v45  ;;  %v3258_v18 = vsel %vm1597_vm1, %v3256_v12, %v3257_v13  ;;  %v3109_v23 = vld [vmem:[#allocation2 + $0x160] sm:$0xfc]  ;;  %v3115_v28 = vld [vmem:[#allocation2 + $0x190] sm:$0x3]  ;;  %v3254_v30 = vrot.slane %v3111_v24, 2  ;;  %v558_v44 = vld [vmem:[#allocation2 + $0x188] sm:$0xff] }
 0x15e   : > { %1948 = vmatpush1.bf16.msra.mxu1 %v7375_v46  ;;  %3605 = vmatmul.mubr.bf16.gmra.mrb[12].mxu0 %v3339_v1  ;;  %v3264_v22 = vsel %vm1597_vm1, %v3262_v14, %v3263_v15  ;;  %v3113_v26 = vld [vmem:[#allocation2 + $0x180] sm:$0xfc]  ;;  %v3253_v29 = vrot.slane %v3109_v23, 2  ;;  %v3260_v32 = vrot.slane %v3115_v28, 2  ;;  %v7393_v38 = vld [vmem:[%s8065_s14 + $0x290] ss:$8 sps:$4 sm:$0xff]  }
 0x15f   : > { %3942 = vmatpush1.bf16.msra.mxu0 %v7378_v58  ;;  %1949 = vmatprep.subr.bf16.mxu1 %v7383_v0  ;;  %v3342_v27 = vpack.c.bf16 %v3264_v22, %v3258_v18  ;;  %v3259_v31 = vrot.slane %v3113_v26, 2  ;;  %v7390_v33 = vld [vmem:[%s8065_s14 + $0x680] ss:$8 sps:$4 sm:$0xff]   ;;  %v7392_v36 = vld [vmem:[%s8065_s14 + $0x684] ss:$8 sps:$4 sm:$0xff]  }
 0x160   : > { %3943 = vmatprep.subr.bf16.mxu0 %v7386_v3  ;;  %1428 = vmatprep.mubr.bf16.mxu1 %v578_v9  ;;  %v3255_v37 = vsel %vm1597_vm1, %v3253_v29, %v3254_v30  ;;  %v7395_v40 = vld [vmem:[%s8065_s14 + $0x294] ss:$8 sps:$4 sm:$0xff]   ;;  %v7396_v42 = vld [vmem:[%s8065_s14 + $0x690] ss:$8 sps:$4 sm:$0xff]   ;;  %v560_v46 = vld [vmem:[#allocation2 + $0x1a8] sm:$0xff] }
 0x161   : > { %3614 = vmatprep.mubr.bf16.mxu0 %v3342_v27  ;;  %v3261_v39 = vsel %vm1597_vm1, %v3259_v31, %v3260_v32  ;;  %v7398_v43 = vld [vmem:[%s8065_s14 + $0x694] ss:$8 sps:$4 sm:$0xff]   ;;  %v3118_v47 = vld [vmem:[#allocation2 + $0x1a8] sm:$0xfc]  ;;  %v3120_v48 = vld [vmem:[#allocation2 + $0x1b8] sm:$0x3]  ;;  %v8596_v49 = vpack.c.bf16 %v560_v46, %v558_v44 }
 0x162   : > { %1950 = vmatpush1.bf16.msra.mxu1 %v7381_v62  ;;  %v3341_v41 = vpack.c.bf16 %v3261_v39, %v3255_v37  ;;  %v3122_v50 = vld [vmem:[#allocation2 + $0x1c8] sm:$0xfc]  ;;  %v3124_v51 = vld [vmem:[#allocation2 + $0x1d8] sm:$0x3]  ;;  %v3268_v52 = vrot.slane %v3118_v47, 2  ;;  %v3269_v53 = vrot.slane %v3120_v48, 2 }
 0x163   : > { %3944 = vmatpush1.bf16.msra.mxu0 %v7384_v2  ;;  %1951 = vmatprep.subr.bf16.mxu1 %v7389_v21  ;;  %v3274_v54 = vrot.slane %v3122_v50, 2  ;;  %v3275_v55 = vrot.slane %v3124_v51, 2  ;;  %v557_v56 = vld [vmem:[#allocation2 + $0x180] sm:$0xff]  ;;  %v3119_v1 = vld [vmem:[#allocation2 + $0x1b0] sm:$0x3] }
 0x164   : > { %3945 = vmatprep.subr.bf16.mxu0 %v7392_v36  ;;  %v559_v57 = vld [vmem:[#allocation2 + $0x1a0] sm:$0xff]  ;;  %v3270_v58 = vsel %vm1597_vm1, %v3268_v52, %v3269_v53  ;;  %v3123_v4 = vld [vmem:[#allocation2 + $0x1d0] sm:$0x3]  ;;  %v3266_v6 = vrot.slane %v3119_v1, 2  ;;  %v7407_v15 = vld [vmem:[%s8065_s14 + $0x2b4] ss:$8 sps:$4 sm:$0xff]  }
 0x165   : > { %1429 = vmatmul.mubr.bf16.gmra.mrb[16].mxu1 %v577_v19  ;;  %v8600_v59 = vpack.c.bf16 %v559_v57, %v557_v56  ;;  %v7399_v60 = vld [vmem:[%s8065_s14 + $0x2a0] ss:$8 sps:$4 sm:$0xff]   ;;  %v7401_v62 = vld [vmem:[%s8065_s14 + $0x2a4] ss:$8 sps:$4 sm:$0xff]   ;;  %v3276_v63 = vsel %vm1597_vm1, %v3274_v54, %v3275_v55  ;;  %v3272_v9 = vrot.slane %v3123_v4, 2 }
 0x166   : > { %1952 = vmatpush1.bf16.msra.mxu1 %v7387_v20  ;;  %3615 = vmatmul.mubr.bf16.gmra.mrb[16].mxu0 %v3341_v41  ;;  %v3117_v0 = vld [vmem:[#allocation2 + $0x1a0] sm:$0xfc]  ;;  %v3344_v3 = vpack.c.bf16 %v3276_v63, %v3270_v58  ;;  %v7405_v13 = vld [vmem:[%s8065_s14 + $0x2b0] ss:$8 sps:$4 sm:$0xff]   ;;  %v7410_v18 = vld [vmem:[%s8065_s14 + $0x6b4] ss:$8 sps:$4 sm:$0xff]  }
 0x167   : > { %3946 = vmatpush1.bf16.msra.mxu0 %v7390_v33  ;;  %1953 = vmatprep.subr.bf16.mxu1 %v7395_v40  ;;  %v3121_v2 = vld [vmem:[#allocation2 + $0x1c0] sm:$0xfc]  ;;  %v3265_v5 = vrot.slane %v3117_v0, 2  ;;  %v7408_v17 = vld [vmem:[%s8065_s14 + $0x6b0] ss:$8 sps:$4 sm:$0xff]   ;;  %v562_v19 = vld [vmem:[#allocation2 + $0x1c8] sm:$0xff] }
 0x168   : > { %3947 = vmatprep.subr.bf16.mxu0 %v7398_v43  ;;  %1438 = vmatprep.mubr.bf16.mxu1 %v8596_v49  ;;  %v3271_v8 = vrot.slane %v3121_v2, 2  ;;  %v7402_v10 = vld [vmem:[%s8065_s14 + $0x6a0] ss:$8 sps:$4 sm:$0xff]   ;;  %v7404_v11 = vld [vmem:[%s8065_s14 + $0x6a4] ss:$8 sps:$4 sm:$0xff]  }
 0x169   : > { %3624 = vmatprep.mubr.bf16.mxu0 %v3344_v3  ;;  %v3267_v12 = vsel %vm1597_vm1, %v3265_v5, %v3266_v6  ;;  %v564_v20 = vld [vmem:[#allocation2 + $0x1e8] sm:$0xff]  ;;  %v3128_v22 = vld [vmem:[#allocation2 + $0x1f8] sm:$0x3]  ;;  %v561_v31 = vld [vmem:[#allocation2 + $0x1c0] sm:$0xff] }
 0x16a   : > { %1954 = vmatpush1.bf16.msra.mxu1 %v7393_v38  ;;  %v3273_v14 = vsel %vm1597_vm1, %v3271_v8, %v3272_v9  ;;  %v3126_v21 = vld [vmem:[#allocation2 + $0x1e8] sm:$0xfc]  ;;  %v8614_v23 = vpack.c.bf16 %v564_v20, %v562_v19  ;;  %v3132_v26 = vld [vmem:[#allocation2 + $0x218] sm:$0x3]  ;;  %v3281_v28 = vrot.slane %v3128_v22, 2  ;;  %v563_v32 = vld [vmem:[#allocation2 + $0x1e0] sm:$0xff] }
 0x16b   : > { %3948 = vmatpush1.bf16.msra.mxu0 %v7396_v42  ;;  %1955 = vmatprep.subr.bf16.mxu1 %v7401_v62  ;;  %v3343_v16 = vpack.c.bf16 %v3273_v14, %v3267_v12  ;;  %v3130_v24 = vld [vmem:[#allocation2 + $0x208] sm:$0xfc]  ;;  %v3280_v27 = vrot.slane %v3126_v21, 2  ;;  %v3287_v30 = vrot.slane %v3132_v26, 2  ;;  %v8618_v36 = vpack.c.bf16 %v563_v32, %v561_v31  ;;  %v3125_v40 = vld [vmem:[#allocation2 + $0x1e0] sm:$0xfc] }
 0x16c   : > { %3949 = vmatprep.subr.bf16.mxu0 %v7404_v11  ;;  %v3286_v29 = vrot.slane %v3130_v24, 2  ;;  %v7411_v37 = vld [vmem:[%s8065_s14 + $0x2c0] ss:$8 sps:$4 sm:$0xff]   ;;  %v7413_v38 = vld [vmem:[%s8065_s14 + $0x2c4] ss:$8 sps:$4 sm:$0xff]   ;;  %v3277_v46 = vrot.slane %v3125_v40, 2 }
 0x16d   : > { %1439 = vmatmul.mubr.bf16.gmra.mrb[20].mxu1 %v8600_v59  ;;  %v3282_v33 = vsel %vm1597_vm1, %v3280_v27, %v3281_v28  ;;  %v3127_v41 = vld [vmem:[#allocation2 + $0x1f0] sm:$0x3]  ;;  %v3129_v42 = vld [vmem:[#allocation2 + $0x200] sm:$0xfc]  ;;  %v7419_v56 = vld [vmem:[%s8065_s14 + $0x2d4] ss:$8 sps:$4 sm:$0xff]  }
 0x16e   : > { %1956 = vmatpush1.bf16.msra.mxu1 %v7399_v60  ;;  %3625 = vmatmul.mubr.bf16.gmra.mrb[20].mxu0 %v3343_v16  ;;  %v3288_v39 = vsel %vm1597_vm1, %v3286_v29, %v3287_v30  ;;  %v3131_v44 = vld [vmem:[#allocation2 + $0x210] sm:$0x3]  ;;  %v3278_v47 = vrot.slane %v3127_v41, 2  ;;  %v3283_v48 = vrot.slane %v3129_v42, 2  ;;  %v7414_v51 = vld [vmem:[%s8065_s14 + $0x6c0] ss:$8 sps:$4 sm:$0xff]  }
 0x16f   : > { %3950 = vmatpush1.bf16.msra.mxu0 %v7402_v10  ;;  %1957 = vmatprep.subr.bf16.mxu1 %v7407_v15  ;;  %v3346_v43 = vpack.c.bf16 %v3288_v39, %v3282_v33  ;;  %v3284_v50 = vrot.slane %v3131_v44, 2  ;;  %v7416_v52 = vld [vmem:[%s8065_s14 + $0x6c4] ss:$8 sps:$4 sm:$0xff]   ;;  %v7417_v54 = vld [vmem:[%s8065_s14 + $0x2d0] ss:$8 sps:$4 sm:$0xff]  }
 0x170   : > { %3951 = vmatprep.subr.bf16.mxu0 %v7410_v18  ;;  %1448 = vmatprep.mubr.bf16.mxu1 %v8614_v23  ;;  %v3279_v53 = vsel %vm1597_vm1, %v3277_v46, %v3278_v47  ;;  %v7420_v58 = vld [vmem:[%s8065_s14 + $0x6d0] ss:$8 sps:$4 sm:$0xff]   ;;  %v7422_v60 = vld [vmem:[%s8065_s14 + $0x6d4] ss:$8 sps:$4 sm:$0xff]   ;;  %v566_v62 = vld [vmem:[#allocation2 + $0x208] sm:$0xff] }
 0x171   : > { %3634 = vmatprep.mubr.bf16.mxu0 %v3346_v43  ;;  %v3285_v55 = vsel %vm1597_vm1, %v3283_v48, %v3284_v50  ;;  %v568_v63 = vld [vmem:[#allocation2 + $0x228] sm:$0xff]  ;;  %v3136_v1 = vld [vmem:[#allocation2 + $0x238] sm:$0x3]  ;;  %v565_v10 = vld [vmem:[#allocation2 + $0x200] sm:$0xff] }
 0x172   : > { %1958 = vmatpush1.bf16.msra.mxu1 %v7405_v13  ;;  %v3345_v57 = vpack.c.bf16 %v3285_v55, %v3279_v53  ;;  %v3134_v0 = vld [vmem:[#allocation2 + $0x228] sm:$0xfc]  ;;  %v8632_v2 = vpack.c.bf16 %v568_v63, %v566_v62  ;;  %v3140_v4 = vld [vmem:[#allocation2 + $0x258] sm:$0x3]  ;;  %v3293_v6 = vrot.slane %v3136_v1, 2  ;;  %v567_v11 = vld [vmem:[#allocation2 + $0x220] sm:$0xff] }
 0x173   : > { %3952 = vmatpush1.bf16.msra.mxu0 %v7408_v17  ;;  %1959 = vmatprep.subr.bf16.mxu1 %v7413_v38  ;;  %v3138_v3 = vld [vmem:[#allocation2 + $0x248] sm:$0xfc]  ;;  %v3292_v5 = vrot.slane %v3134_v0, 2  ;;  %v3299_v9 = vrot.slane %v3140_v4, 2  ;;  %v8636_v13 = vpack.c.bf16 %v567_v11, %v565_v10  ;;  %v3133_v17 = vld [vmem:[#allocation2 + $0x220] sm:$0xfc] }
 0x174   : > { %3953 = vmatprep.subr.bf16.mxu0 %v7416_v52  ;;  %v3298_v8 = vrot.slane %v3138_v3, 2  ;;  %v7423_v14 = vld [vmem:[%s8065_s14 + $0x2e0] ss:$8 sps:$4 sm:$0xff]   ;;  %v7425_v15 = vld [vmem:[%s8065_s14 + $0x2e4] ss:$8 sps:$4 sm:$0xff]   ;;  %v3289_v22 = vrot.slane %v3133_v17, 2 }
 0x175   : > { %1449 = vmatmul.mubr.bf16.gmra.mrb[24].mxu1 %v8618_v36  ;;  %v3294_v12 = vsel %vm1597_vm1, %v3292_v5, %v3293_v6  ;;  %v3135_v18 = vld [vmem:[#allocation2 + $0x230] sm:$0x3]  ;;  %v3137_v19 = vld [vmem:[#allocation2 + $0x240] sm:$0xfc]  ;;  %v7431_v33 = vld [vmem:[%s8065_s14 + $0x2f4] ss:$8 sps:$4 sm:$0xff]  }
 0x176   : > { %1960 = vmatpush1.bf16.msra.mxu1 %v7411_v37  ;;  %3635 = vmatmul.mubr.bf16.gmra.mrb[24].mxu0 %v3345_v57  ;;  %v3300_v16 = vsel %vm1597_vm1, %v3298_v8, %v3299_v9  ;;  %v3139_v21 = vld [vmem:[#allocation2 + $0x250] sm:$0x3]  ;;  %v3290_v24 = vrot.slane %v3135_v18, 2  ;;  %v3295_v26 = vrot.slane %v3137_v19, 2  ;;  %v7426_v28 = vld [vmem:[%s8065_s14 + $0x6e0] ss:$8 sps:$4 sm:$0xff]  }
 0x177   : > { %3954 = vmatpush1.bf16.msra.mxu0 %v7414_v51  ;;  %1961 = vmatprep.subr.bf16.mxu1 %v7419_v56  ;;  %v3348_v20 = vpack.c.bf16 %v3300_v16, %v3294_v12  ;;  %v3296_v27 = vrot.slane %v3139_v21, 2  ;;  %v7428_v29 = vld [vmem:[%s8065_s14 + $0x6e4] ss:$8 sps:$4 sm:$0xff]   ;;  %v7429_v31 = vld [vmem:[%s8065_s14 + $0x2f0] ss:$8 sps:$4 sm:$0xff]  }
 0x178   : > { %3955 = vmatprep.subr.bf16.mxu0 %v7422_v60  ;;  %1458 = vmatprep.mubr.bf16.mxu1 %v8632_v2  ;;  %v3291_v30 = vsel %vm1597_vm1, %v3289_v22, %v3290_v24  ;;  %v7432_v38 = vld [vmem:[%s8065_s14 + $0x6f0] ss:$8 sps:$4 sm:$0xff]   ;;  %v7434_v39 = vld [vmem:[%s8065_s14 + $0x6f4] ss:$8 sps:$4 sm:$0xff]   ;;  %v1470_v40 = vld [vmem:[#allocation2 + $0x8] sm:$0xfc] }
 0x179   : > { %3644 = vmatprep.mubr.bf16.mxu0 %v3348_v20  ;;  %v3297_v32 = vsel %vm1597_vm1, %v3295_v26, %v3296_v27  ;;  %v1472_v41 = vld [vmem:[#allocation2 + $0x18] sm:$0x3]  ;;  %v1474_v42 = vld [vmem:[#allocation2 + $0x28] sm:$0xfc]  ;;  %v1601_v44 = vrot.slane %v1470_v40, 2 }
 0x17a   : > { %1962 = vmatpush1.bf16.msra.mxu1 %v7417_v54  ;;  %v3347_v37 = vpack.c.bf16 %v3297_v32, %v3291_v30  ;;  %v1476_v43 = vld [vmem:[#allocation2 + $0x38] sm:$0x3]  ;;  %v1602_v46 = vrot.slane %v1472_v41, 2  ;;  %v1607_v47 = vrot.slane %v1474_v42, 2  ;;  %v1469_v50 = vld [vmem:[#allocation2] sm:$0xfc] }
 0x17b   : > { %3956 = vmatpush1.bf16.msra.mxu0 %v7420_v58  ;;  %1963 = vmatprep.subr.bf16.mxu1 %v7425_v15  ;;  %v1608_v48 = vrot.slane %v1476_v43, 2  ;;  %v1471_v51 = vld [vmem:[#allocation2 + $0x10] sm:$0x3]  ;;  %v1473_v52 = vld [vmem:[#allocation2 + $0x20] sm:$0xfc]  ;;  %v1598_v56 = vrot.slane %v1469_v50, 2 }
 0x17c   : > { %3957 = vmatprep.subr.bf16.mxu0 %v7428_v29  ;;  %v1475_v53 = vld [vmem:[#allocation2 + $0x30] sm:$0x3]  ;;  %v1603_v54 = vsel %vm1597_vm1, %v1601_v44, %v1602_v46  ;;  %v1599_v57 = vrot.slane %v1471_v51, 2  ;;  %v1604_v60 = vrot.slane %v1473_v52, 2  ;;  %v7440_v0 = vld [vmem:[%s8065_s14 + $0x704] ss:$8 sps:$4 sm:$0xff]  }
 0x17d   : > { %1459 = vmatmul.mubr.bf16.gmra.mrb[28].mxu1 %v8636_v13  ;;  %v1609_v55 = vsel %vm1597_vm1, %v1607_v47, %v1608_v48  ;;  %v1605_v62 = vrot.slane %v1475_v53, 2  ;;  %v7435_v3 = vld [vmem:[%s8065_s14 + $0x300] ss:$8 sps:$4 sm:$0xff]   ;;  %v7443_v6 = vld [vmem:[%s8065_s14 + $0x314] ss:$8 sps:$4 sm:$0xff]  }
 0x17e   : > { %1964 = vmatpush1.bf16.msra.mxu1 %v7423_v14  ;;  %3645 = vmatmul.mubr.bf16.gmra.mrb[28].mxu0 %v3347_v37  ;;  %v1727_v58 = vpack.c.bf16 %v1609_v55, %v1603_v54  ;;  %v1600_v63 = vsel %vm1597_vm1, %v1598_v56, %v1599_v57  ;;  %v7438_v4 = vld [vmem:[%s8065_s14 + $0x700] ss:$8 sps:$4 sm:$0xff]   ;;  %v7441_v8 = vld [vmem:[%s8065_s14 + $0x310] ss:$8 sps:$4 sm:$0xff]   ;;  %v7446_v10 = vld [vmem:[%s8065_s14 + $0x714] ss:$8 sps:$4 sm:$0xff]  }
 0x17f   : > { %3958 = vmatpush1.bf16.msra.mxu0 %v7426_v28  ;;  %1965 = vmatprep.subr.bf16.mxu1 %v7431_v33  ;;  %v1606_v1 = vsel %vm1597_vm1, %v1604_v60, %v1605_v62  ;;  %v7444_v9 = vld [vmem:[%s8065_s14 + $0x710] ss:$8 sps:$4 sm:$0xff]   ;;  %v1478_v11 = vld [vmem:[#allocation2 + $0x48] sm:$0xfc]  ;;  %v1477_v20 = vld [vmem:[#allocation2 + $0x40] sm:$0xfc] }
 0x180   : > { %3959 = vmatprep.subr.bf16.mxu0 %v7434_v39  ;;  %3961 = vmatprep.mubr.bf16.mxu0 %v8530_v25  ;;  %v7437_v25 = vld [vmem:[%s8065_s14 + $0x304] ss:$8 sps:$4 sm:$0xff]   ;;  %v1726_v5 = vpack.c.bf16 %v1606_v1, %v1600_v63  ;;  %v1480_v12 = vld [vmem:[#allocation2 + $0x58] sm:$0x3]  ;;  %v1613_v16 = vrot.slane %v1478_v11, 2  ;;  %v1610_v26 = vrot.slane %v1477_v20, 2 }
 0x181   : > { %1967 = vmatprep.mubr.bf16.mxu1 %v1727_v58  ;;  %v1482_v14 = vld [vmem:[#allocation2 + $0x68] sm:$0xfc]  ;;  %v1484_v15 = vld [vmem:[#allocation2 + $0x78] sm:$0x3]  ;;  %v1614_v17 = vrot.slane %v1480_v12, 2 }
 0x182   : > { %1966 = vmatpush1.bf16.msra.mxu1 %v7429_v31  ;;  %v1619_v18 = vrot.slane %v1482_v14, 2  ;;  %v1620_v19 = vrot.slane %v1484_v15, 2  ;;  %v1479_v21 = vld [vmem:[#allocation2 + $0x50] sm:$0x3]  ;;  %v1481_v24 = vld [vmem:[#allocation2 + $0x60] sm:$0xfc] }
 0x183   : > { %3960 = vmatpush1.bf16.msra.mxu0 %v7432_v38  ;;  %2322 = vmatprep.subr.bf16.mxu1 %v7437_v25  ;;  %v1615_v22 = vsel %vm1597_vm1, %v1613_v16, %v1614_v17  ;;  %v1611_v27 = vrot.slane %v1479_v21, 2  ;;  %v1616_v29 = vrot.slane %v1481_v24, 2  ;;  %v7447_v31 = vld [vmem:[%s8065_s14 + $0x320] ss:$8 sps:$4 sm:$0xff]   ;;  %v7449_v37 = vld [vmem:[%s8065_s14 + $0x324] ss:$8 sps:$4 sm:$0xff]  }
 0x184   : > { %4539 = vmatprep.subr.bf16.mxu0 %v7440_v0  ;;  %v1621_v28 = vsel %vm1597_vm1, %v1619_v18, %v1620_v19  ;;  %v7450_v39 = vld [vmem:[%s8065_s14 + $0x720] ss:$8 sps:$4 sm:$0xff]   ;;  %v7452_v40 = vld [vmem:[%s8065_s14 + $0x724] ss:$8 sps:$4 sm:$0xff]   ;;  %v7453_v42 = vld [vmem:[%s8065_s14 + $0x330] ss:$8 sps:$4 sm:$0xff]  }
 0x185   : > { %1968 = vmatmul.mubr.bf16.vlgmr.msra.gmra.mrb[0].mxu1 %v1726_v5  ;;  %v1729_v32 = vpack.c.bf16 %v1621_v28, %v1615_v22  ;;  %v1612_v33 = vsel %vm1597_vm1, %v1610_v26, %v1611_v27  ;;  %v7456_v43 = vld [vmem:[%s8065_s14 + $0x730] ss:$8 sps:$4 sm:$0xff]   ;;  %v7458_v44 = vld [vmem:[%s8065_s14 + $0x734] ss:$8 sps:$4 sm:$0xff]   ;;  %v1486_v46 = vld [vmem:[#allocation2 + $0x88] sm:$0xfc] }
 0x186   : > { %3962 = vmatmul.mubr.bf16.vlgmr.msra.gmra.mrb[0].mxu0 %v8534_v35  ;;  %2323 = vmatpush1.bf16.msra.mxu1 %v7435_v3  ;;  %v1483_v35 = vld [vmem:[#allocation2 + $0x70] sm:$0x3]  ;;  %v1488_v47 = vld [vmem:[#allocation2 + $0x98] sm:$0x3]  ;;  %v1490_v48 = vld [vmem:[#allocation2 + $0xa8] sm:$0xfc] }
 0x187   : > { %4540 = vmatpush1.bf16.msra.mxu0 %v7438_v4  ;;  %2324 = vmatprep.subr.bf16.mxu1 %v7443_v6  ;;  %v1617_v30 = vrot.slane %v1483_v35, 2  ;;  %v1492_v50 = vld [vmem:[#allocation2 + $0xb8] sm:$0x3]  ;;  %v1625_v51 = vrot.slane %v1486_v46, 2  ;;  %v1626_v52 = vrot.slane %v1488_v47, 2  ;;  %v1631_v53 = vrot.slane %v1490_v48, 2 }
 0x188   : > { %4541 = vmatprep.subr.bf16.mxu0 %v7446_v10  ;;  %3971 = vmatprep.mubr.bf16.mxu0 %v8548_v61  ;;  %v7455_v61 = vld [vmem:[%s8065_s14 + $0x334] ss:$8 sps:$4 sm:$0xff]   ;;  %v1632_v54 = vrot.slane %v1492_v50, 2  ;;  %v1485_v55 = vld [vmem:[#allocation2 + $0x80] sm:$0xfc]  ;;  %v8692_v24 = vld [vmem:[#allocation2 + $0x108] sm:$0xff] }
 0x189   : > { %v1618_v38 = vsel %vm1597_vm1, %v1616_v29, %v1617_v30  ;;  %1977 = vmatprep.mubr.bf16.mxu1 %v1729_v32  ;;  %v1487_v56 = vld [vmem:[#allocation2 + $0x90] sm:$0x3]  ;;  %v1627_v57 = vsel %vm1597_vm1, %v1625_v51, %v1626_v52  ;;  %v1622_v60 = vrot.slane %v1485_v55, 2  ;;  %v7459_v1 = vld [vmem:[%s8065_s14 + $0x340] ss:$8 sps:$4 sm:$0xff]  }
 0x18a   : > { %2325 = vmatpush1.bf16.msra.mxu1 %v7441_v8  ;;  %v1728_v41 = vpack.c.bf16 %v1618_v38, %v1612_v33  ;;  %v1491_v58 = vld [vmem:[#allocation2 + $0xb0] sm:$0x3]  ;;  %v1623_v62 = vrot.slane %v1487_v56, 2  ;;  %v1633_v25 = vsel %vm1597_vm1, %v1631_v53, %v1632_v54  ;;  %v7462_v6 = vld [vmem:[%s8065_s14 + $0x740] ss:$8 sps:$4 sm:$0xff]  }
 0x18b   : > { %4542 = vmatpush1.bf16.msra.mxu0 %v7444_v9  ;;  %2326 = vmatprep.subr.bf16.mxu1 %v7449_v37  ;;  %v1629_v0 = vrot.slane %v1491_v58, 2  ;;  %v1731_v3 = vpack.c.bf16 %v1633_v25, %v1627_v57  ;;  %v7464_v8 = vld [vmem:[%s8065_s14 + $0x744] ss:$8 sps:$4 sm:$0xff]   ;;  %v7467_v10 = vld [vmem:[%s8065_s14 + $0x354] ss:$8 sps:$4 sm:$0xff]  }
 0x18c   : > { %4543 = vmatprep.subr.bf16.mxu0 %v7452_v40  ;;  %v1624_v4 = vsel %vm1597_vm1, %v1622_v60, %v1623_v62  ;;  %v7465_v11 = vld [vmem:[%s8065_s14 + $0x350] ss:$8 sps:$4 sm:$0xff]   ;;  %v7470_v14 = vld [vmem:[%s8065_s14 + $0x754] ss:$8 sps:$4 sm:$0xff]   ;;  %v1494_v15 = vld [vmem:[#allocation2 + $0xc8] sm:$0xfc] }
 0x18d   : > { %1978 = vmatmul.mubr.bf16.gmra.mrb[4].mxu1 %v1728_v41  ;;  %v7468_v12 = vld [vmem:[%s8065_s14 + $0x750] ss:$8 sps:$4 sm:$0xff]   ;;  %v1498_v17 = vld [vmem:[#allocation2 + $0xe8] sm:$0xfc]  ;;  %v1637_v19 = vrot.slane %v1494_v15, 2  ;;  %v8697_v38 = vld [vmem:[#allocation2 + $0x100] sm:$0xff] }
 0x18e   : > { %3972 = vmatmul.mubr.bf16.gmra.mrb[4].mxu0 %v8552_v7  ;;  %2327 = vmatpush1.bf16.msra.mxu1 %v7447_v31  ;;  %v1489_v7 = vld [vmem:[#allocation2 + $0xa0] sm:$0xfc]  ;;  %v1496_v16 = vld [vmem:[#allocation2 + $0xd8] sm:$0x3]  ;;  %v1643_v21 = vrot.slane %v1498_v17, 2 }
 0x18f   : > { %4544 = vmatpush1.bf16.msra.mxu0 %v7450_v39  ;;  %2328 = vmatprep.subr.bf16.mxu1 %v7455_v61  ;;  %v1628_v63 = vrot.slane %v1489_v7, 2  ;;  %v1500_v18 = vld [vmem:[#allocation2 + $0xf8] sm:$0x3]  ;;  %v1638_v20 = vrot.slane %v1496_v16, 2  ;;  %v1493_v35 = vld [vmem:[#allocation2 + $0xc0] sm:$0xfc] }
 0x190   : > { %4545 = vmatprep.subr.bf16.mxu0 %v7458_v44  ;;  %3981 = vmatprep.mubr.bf16.mxu0 %v8566_v34  ;;  %v7461_v34 = vld [vmem:[%s8065_s14 + $0x344] ss:$8 sps:$4 sm:$0xff]   ;;  %v1644_v22 = vrot.slane %v1500_v18, 2  ;;  %v1495_v28 = vld [vmem:[#allocation2 + $0xd0] sm:$0x3]  ;;  %v1634_v32 = vrot.slane %v1493_v35, 2 }
 0x191   : > { %v1630_v5 = vsel %vm1597_vm1, %v1628_v63, %v1629_v0  ;;  %1987 = vmatprep.mubr.bf16.mxu1 %v1731_v3  ;;  %v1639_v26 = vsel %vm1597_vm1, %v1637_v19, %v1638_v20  ;;  %v1497_v29 = vld [vmem:[#allocation2 + $0xe0] sm:$0xfc]  ;;  %v1499_v30 = vld [vmem:[#allocation2 + $0xf0] sm:$0x3]  ;;  %v1635_v33 = vrot.slane %v1495_v28, 2 }
 0x192   : > { %2329 = vmatpush1.bf16.msra.mxu1 %v7453_v42  ;;  %v1730_v9 = vpack.c.bf16 %v1630_v5, %v1624_v4  ;;  %v1645_v31 = vsel %vm1597_vm1, %v1643_v21, %v1644_v22  ;;  %v1640_v37 = vrot.slane %v1497_v29, 2  ;;  %v1641_v40 = vrot.slane %v1499_v30, 2  ;;  %v7471_v41 = vld [vmem:[%s8065_s14 + $0x360] ss:$8 sps:$4 sm:$0xff]   ;;  %v7473_v61 = vld [vmem:[%s8065_s14 + $0x364] ss:$8 sps:$4 sm:$0xff]  }
 0x193   : > { %4546 = vmatpush1.bf16.msra.mxu0 %v7456_v43  ;;  %2330 = vmatprep.subr.bf16.mxu1 %v7461_v34  ;;  %v1733_v39 = vpack.c.bf16 %v1645_v31, %v1639_v26  ;;  %v3702_v42 = vld [vmem:[#allocation2 + $0x120] sm:$0xff]  ;;  %v1636_v43 = vsel %vm1597_vm1, %v1634_v32, %v1635_v33  ;;  %v7477_v51 = vld [vmem:[%s8065_s14 + $0x370] ss:$8 sps:$4 sm:$0xff]   ;;  %v7479_v52 = vld [vmem:[%s8065_s14 + $0x374] ss:$8 sps:$4 sm:$0xff]  }
 0x194   : > { %4547 = vmatprep.subr.bf16.mxu0 %v7464_v8  ;;  %v3726_v44 = vpack.c.bf16 %v3702_v42, %v8697_v38  ;;  %v7474_v46 = vld [vmem:[%s8065_s14 + $0x760] ss:$8 sps:$4 sm:$0xff]   ;;  %v1642_v47 = vsel %vm1597_vm1, %v1640_v37, %v1641_v40  ;;  %v7476_v48 = vld [vmem:[%s8065_s14 + $0x764] ss:$8 sps:$4 sm:$0xff]   ;;  %v7480_v53 = vld [vmem:[%s8065_s14 + $0x770] ss:$8 sps:$4 sm:$0xff]  }
 0x195   : > { %1988 = vmatmul.mubr.bf16.gmra.mrb[8].mxu1 %v1730_v9  ;;  %v1732_v50 = vpack.c.bf16 %v1642_v47, %v1636_v43  ;;  %v7482_v54 = vld [vmem:[%s8065_s14 + $0x774] ss:$8 sps:$4 sm:$0xff]   ;;  %v1502_v55 = vld [vmem:[#allocation2 + $0x148] sm:$0xfc]  ;;  %v1504_v56 = vld [vmem:[#allocation2 + $0x158] sm:$0x3] }
 0x196   : > { %3982 = vmatmul.mubr.bf16.gmra.mrb[8].mxu0 %v8570_v45  ;;  %2331 = vmatpush1.bf16.msra.mxu1 %v7459_v1  ;;  %v3703_v45 = vld [vmem:[#allocation2 + $0x128] sm:$0xff]  ;;  %v1508_v7 = vld [vmem:[#allocation2 + $0x178] sm:$0x3]  ;;  %v1649_v58 = vrot.slane %v1502_v55, 2  ;;  %v1650_v60 = vrot.slane %v1504_v56, 2 }
 0x197   : > { %4548 = vmatpush1.bf16.msra.mxu0 %v7462_v6  ;;  %2332 = vmatprep.subr.bf16.mxu1 %v7467_v10  ;;  %v3727_v27 = vpack.c.bf16 %v3703_v45, %v8692_v24  ;;  %v1506_v57 = vld [vmem:[#allocation2 + $0x168] sm:$0xfc]  ;;  %v1656_v25 = vrot.slane %v1508_v7, 2  ;;  %v1501_v63 = vld [vmem:[#allocation2 + $0x140] sm:$0xfc] }
 0x198   : > { %4549 = vmatprep.subr.bf16.mxu0 %v7470_v14  ;;  %1997 = vmatprep.mubr.bf16.mxu1 %v1733_v39  ;;  %v1655_v62 = vrot.slane %v1506_v57, 2  ;;  %v1503_v0 = vld [vmem:[#allocation2 + $0x150] sm:$0x3]  ;;  %v1651_v1 = vsel %vm1597_vm1, %v1649_v58, %v1650_v60  ;;  %v1505_v3 = vld [vmem:[#allocation2 + $0x160] sm:$0xfc]  ;;  %v1646_v34 = vrot.slane %v1501_v63, 2 }
 0x199   : > { %3991 = vmatprep.mubr.bf16.mxu0 %v3727_v27  ;;  %v1507_v4 = vld [vmem:[#allocation2 + $0x170] sm:$0x3]  ;;  %v1647_v5 = vrot.slane %v1503_v0, 2  ;;  %v1652_v8 = vrot.slane %v1505_v3, 2  ;;  %v7485_v10 = vld [vmem:[%s8065_s14 + $0x384] ss:$8 sps:$4 sm:$0xff]  }
 0x19a   : > { %2333 = vmatpush1.bf16.msra.mxu1 %v7465_v11  ;;  %v1657_v6 = vsel %vm1597_vm1, %v1655_v62, %v1656_v25  ;;  %v1653_v9 = vrot.slane %v1507_v4, 2  ;;  %v7486_v14 = vld [vmem:[%s8065_s14 + $0x780] ss:$8 sps:$4 sm:$0xff]   ;;  %v7488_v16 = vld [vmem:[%s8065_s14 + $0x784] ss:$8 sps:$4 sm:$0xff]  }
 0x19b   : > { %4550 = vmatpush1.bf16.msra.mxu0 %v7468_v12  ;;  %2334 = vmatprep.subr.bf16.mxu1 %v7473_v61  ;;  %v1735_v11 = vpack.c.bf16 %v1657_v6, %v1651_v1  ;;  %v1648_v12 = vsel %vm1597_vm1, %v1646_v34, %v1647_v5  ;;  %v7489_v18 = vld [vmem:[%s8065_s14 + $0x390] ss:$8 sps:$4 sm:$0xff]   ;;  %v7491_v19 = vld [vmem:[%s8065_s14 + $0x394] ss:$8 sps:$4 sm:$0xff]   ;;  %v1510_v22 = vld [vmem:[#allocation2 + $0x188] sm:$0xfc] }
 0x19c   : > { %4551 = vmatprep.subr.bf16.mxu0 %v7476_v48  ;;  %v1654_v15 = vsel %vm1597_vm1, %v1652_v8, %v1653_v9  ;;  %v7492_v20 = vld [vmem:[%s8065_s14 + $0x790] ss:$8 sps:$4 sm:$0xff]   ;;  %v7494_v21 = vld [vmem:[%s8065_s14 + $0x794] ss:$8 sps:$4 sm:$0xff]   ;;  %v1514_v35 = vld [vmem:[#allocation2 + $0x1a8] sm:$0xfc] }
 0x19d   : > { %1998 = vmatmul.mubr.bf16.gmra.mrb[12].mxu1 %v1732_v50  ;;  %v1734_v17 = vpack.c.bf16 %v1654_v15, %v1648_v12  ;;  %v1512_v45 = vld [vmem:[#allocation2 + $0x198] sm:$0x3]  ;;  %v1667_v28 = vrot.slane %v1514_v35, 2  ;;  %v1509_v30 = vld [vmem:[#allocation2 + $0x180] sm:$0xfc] }
 0x19e   : > { %3992 = vmatmul.mubr.bf16.gmra.mrb[12].mxu0 %v3726_v44  ;;  %2335 = vmatpush1.bf16.msra.mxu1 %v7471_v41  ;;  %v1516_v26 = vld [vmem:[#allocation2 + $0x1b8] sm:$0x3]  ;;  %v1662_v27 = vrot.slane %v1512_v45, 2  ;;  %v1511_v31 = vld [vmem:[#allocation2 + $0x190] sm:$0x3]  ;;  %v1658_v37 = vrot.slane %v1509_v30, 2 }
 0x19f   : > { %4552 = vmatpush1.bf16.msra.mxu0 %v7474_v46  ;;  %2336 = vmatprep.subr.bf16.mxu1 %v7479_v52  ;;  %v1668_v29 = vrot.slane %v1516_v26, 2  ;;  %v1513_v32 = vld [vmem:[#allocation2 + $0x1a0] sm:$0xfc]  ;;  %v1515_v33 = vld [vmem:[#allocation2 + $0x1b0] sm:$0x3]  ;;  %v1659_v39 = vrot.slane %v1511_v31, 2 }
 0x1a0   : > { %4553 = vmatprep.subr.bf16.mxu0 %v7482_v54  ;;  %4001 = vmatprep.mubr.bf16.mxu0 %v8596_v49  ;;  %v7483_v49 = vld [vmem:[%s8065_s14 + $0x380] ss:$8 sps:$4 sm:$0xff]   ;;  %v1664_v41 = vrot.slane %v1513_v32, 2  ;;  %v1665_v61 = vrot.slane %v1515_v33, 2  ;;  %v7497_v43 = vld [vmem:[%s8065_s14 + $0x3a4] ss:$8 sps:$4 sm:$0xff]  }
 0x1a1   : > { %2007 = vmatprep.mubr.bf16.mxu1 %v1735_v11  ;;  %v1669_v40 = vsel %vm1597_vm1, %v1667_v28, %v1668_v29  ;;  %v7495_v42 = vld [vmem:[%s8065_s14 + $0x3a0] ss:$8 sps:$4 sm:$0xff]   ;;  %v1660_v46 = vsel %vm1597_vm1, %v1658_v37, %v1659_v39  ;;  %v7500_v50 = vld [vmem:[%s8065_s14 + $0x7a4] ss:$8 sps:$4 sm:$0xff]   ;;  %v7501_v52 = vld [vmem:[%s8065_s14 + $0x3b0] ss:$8 sps:$4 sm:$0xff]  }
 0x1a2   : > { %2337 = vmatpush1.bf16.msra.mxu1 %v7477_v51  ;;  %v7498_v47 = vld [vmem:[%s8065_s14 + $0x7a0] ss:$8 sps:$4 sm:$0xff]   ;;  %v1666_v48 = vsel %vm1597_vm1, %v1664_v41, %v1665_v61  ;;  %v7504_v54 = vld [vmem:[%s8065_s14 + $0x7b0] ss:$8 sps:$4 sm:$0xff]   ;;  %v7506_v55 = vld [vmem:[%s8065_s14 + $0x7b4] ss:$8 sps:$4 sm:$0xff]  }
 0x1a3   : > { %4554 = vmatpush1.bf16.msra.mxu0 %v7480_v53  ;;  %2338 = vmatprep.subr.bf16.mxu1 %v7485_v10  ;;  %v1736_v51 = vpack.c.bf16 %v1666_v48, %v1660_v46  ;;  %v7503_v53 = vld [vmem:[%s8065_s14 + $0x3b4] ss:$8 sps:$4 sm:$0xff]   ;;  %v1518_v56 = vld [vmem:[#allocation2 + $0x1c8] sm:$0xfc]  ;;  %v1520_v57 = vld [vmem:[#allocation2 + $0x1d8] sm:$0x3] }
 0x1a4   : > { %4555 = vmatprep.subr.bf16.mxu0 %v7488_v16  ;;  %v1524_v7 = vld [vmem:[#allocation2 + $0x1f8] sm:$0x3]  ;;  %v1673_v58 = vrot.slane %v1518_v56, 2  ;;  %v1674_v60 = vrot.slane %v1520_v57, 2  ;;  %v1517_v25 = vld [vmem:[#allocation2 + $0x1c0] sm:$0xfc] }
 0x1a5   : > { %2008 = vmatmul.mubr.bf16.gmra.mrb[16].mxu1 %v1734_v17  ;;  %v1680_v62 = vrot.slane %v1524_v7, 2  ;;  %v1519_v63 = vld [vmem:[#allocation2 + $0x1d0] sm:$0x3]  ;;  %v1521_v1 = vld [vmem:[#allocation2 + $0x1e0] sm:$0xfc]  ;;  %v1670_v4 = vrot.slane %v1517_v25, 2 }
 0x1a6   : > { %4002 = vmatmul.mubr.bf16.gmra.mrb[16].mxu0 %v8600_v59  ;;  %2339 = vmatpush1.bf16.msra.mxu1 %v7483_v49  ;;  %v1661_v59 = vrot.slane %v1510_v22, 2  ;;  %v1675_v0 = vsel %vm1597_vm1, %v1673_v58, %v1674_v60  ;;  %v1523_v3 = vld [vmem:[#allocation2 + $0x1f0] sm:$0x3]  ;;  %v1671_v34 = vrot.slane %v1519_v63, 2  ;;  %v1676_v6 = vrot.slane %v1521_v1, 2  ;;  %v3719_v29 = vld [vmem:[#allocation2 + $0x268] sm:$0xff] }
 0x1a7   : > { %4011 = vmatprep.mubr.bf16.mxu0 %v8614_v23  ;;  %4556 = vmatpush1.bf16.msra.mxu0 %v7486_v14  ;;  %v1677_v8 = vrot.slane %v1523_v3, 2  ;;  %v7507_v9 = vld [vmem:[%s8065_s14 + $0x3c0] ss:$8 sps:$4 sm:$0xff]   ;;  %v7509_v49 = vld [vmem:[%s8065_s14 + $0x3c4] ss:$8 sps:$4 sm:$0xff]  }
 0x1a8   : > { %2340 = vmatprep.subr.bf16.mxu1 %v7491_v19  ;;  %4557 = vmatprep.subr.bf16.mxu0 %v7494_v21  ;;  %v1663_v23 = vsel %vm1597_vm1, %v1661_v59, %v1662_v27  ;;  %v1672_v11 = vsel %vm1597_vm1, %v1670_v4, %v1671_v34  ;;  %v7510_v12 = vld [vmem:[%s8065_s14 + $0x7c0] ss:$8 sps:$4 sm:$0xff]   ;;  %v7512_v15 = vld [vmem:[%s8065_s14 + $0x7c4] ss:$8 sps:$4 sm:$0xff]   ;;  %v7513_v17 = vld [vmem:[%s8065_s14 + $0x3d0] ss:$8 sps:$4 sm:$0xff]  }
 0x1a9   : > { %v1737_v44 = vpack.c.bf16 %v1669_v40, %v1663_v23  ;;  %v1678_v14 = vsel %vm1597_vm1, %v1676_v6, %v1677_v8  ;;  %v7516_v19 = vld [vmem:[%s8065_s14 + $0x7d0] ss:$8 sps:$4 sm:$0xff]   ;;  %v1526_v21 = vld [vmem:[#allocation2 + $0x208] sm:$0xfc]  ;;  %v1525_v30 = vld [vmem:[#allocation2 + $0x200] sm:$0xfc] }
 0x1aa   : > { %2341 = vmatpush1.bf16.msra.mxu1 %v7489_v18  ;;  %v1738_v16 = vpack.c.bf16 %v1678_v14, %v1672_v11  ;;  %v7515_v18 = vld [vmem:[%s8065_s14 + $0x3d4] ss:$8 sps:$4 sm:$0xff]   ;;  %v1528_v22 = vld [vmem:[#allocation2 + $0x218] sm:$0x3]  ;;  %v1530_v45 = vld [vmem:[#allocation2 + $0x228] sm:$0xfc] }
 0x1ab   : > { %4558 = vmatpush1.bf16.msra.mxu0 %v7492_v20  ;;  %2342 = vmatprep.subr.bf16.mxu1 %v7497_v43  ;;  %v7518_v20 = vld [vmem:[%s8065_s14 + $0x7d4] ss:$8 sps:$4 sm:$0xff]   ;;  %v1685_v35 = vrot.slane %v1526_v21, 2  ;;  %v1686_v26 = vrot.slane %v1528_v22, 2  ;;  %v1691_v59 = vrot.slane %v1530_v45, 2  ;;  %v8752_v27 = vld [vmem:[#allocation2 + $0x248] sm:$0xff] }
 0x1ac   : > { %2017 = vmatprep.mubr.bf16.mxu1 %v1737_v44  ;;  %4559 = vmatprep.subr.bf16.mxu0 %v7500_v50  ;;  %v1527_v31 = vld [vmem:[#allocation2 + $0x210] sm:$0x3]  ;;  %v3735_v32 = vpack.c.bf16 %v3719_v29, %v8752_v27  ;;  %v1529_v33 = vld [vmem:[#allocation2 + $0x220] sm:$0xfc]  ;;  %v1682_v39 = vrot.slane %v1525_v30, 2  ;;  %v2082_v58 = vld [vmem:[#allocation2 + $0x28] sm:$0xff] }
 0x1ad   : > { %2018 = vmatmul.mubr.bf16.gmra.mrb[20].mxu1 %v1736_v51  ;;  %v1687_v23 = vsel %vm1597_vm1, %v1685_v35, %v1686_v26  ;;  %v1531_v37 = vld [vmem:[#allocation2 + $0x230] sm:$0x3]  ;;  %v1683_v40 = vrot.slane %v1527_v31, 2  ;;  %v1688_v61 = vrot.slane %v1529_v33, 2  ;;  %v7519_v43 = vld [vmem:[%s8065_s14 + $0x3e0] ss:$8 sps:$4 sm:$0xff]  }
 0x1ae   : > { %4012 = vmatmul.mubr.bf16.gmra.mrb[20].mxu0 %v8618_v36  ;;  %2343 = vmatpush1.bf16.msra.mxu1 %v7495_v42  ;;  %v1522_v36 = vld [vmem:[#allocation2 + $0x1e8] sm:$0xfc]  ;;  %v1689_v42 = vrot.slane %v1531_v37, 2  ;;  %v8760_v48 = vld [vmem:[#allocation2 + $0x240] sm:$0xff]  ;;  %v7525_v56 = vld [vmem:[%s8065_s14 + $0x3f0] ss:$8 sps:$4 sm:$0xff]  }
 0x1af   : > { %4021 = vmatprep.mubr.bf16.mxu0 %v8632_v2  ;;  %4560 = vmatpush1.bf16.msra.mxu0 %v7498_v47  ;;  %v1679_v2 = vrot.slane %v1522_v36, 2  ;;  %v1684_v46 = vsel %vm1597_vm1, %v1682_v39, %v1683_v40  ;;  %v7521_v47 = vld [vmem:[%s8065_s14 + $0x3e4] ss:$8 sps:$4 sm:$0xff]   ;;  %v7527_v57 = vld [vmem:[%s8065_s14 + $0x3f4] ss:$8 sps:$4 sm:$0xff]  }
 0x1b0   : > { %2344 = vmatprep.subr.bf16.mxu1 %v7503_v53  ;;  %4561 = vmatprep.subr.bf16.mxu0 %v7506_v55  ;;  %v3718_v50 = vld [vmem:[#allocation2 + $0x260] sm:$0xff]  ;;  %v1690_v51 = vsel %vm1597_vm1, %v1688_v61, %v1689_v42  ;;  %v7528_v36 = vld [vmem:[%s8065_s14 + $0x7f0] ss:$8 sps:$4 sm:$0xff]   ;;  %v7530_v7 = vld [vmem:[%s8065_s14 + $0x7f4] ss:$8 sps:$4 sm:$0xff]  }
 0x1b1   : > { %v1681_v5 = vsel %vm1597_vm1, %v1679_v2, %v1680_v62  ;;  %v7522_v53 = vld [vmem:[%s8065_s14 + $0x7e0] ss:$8 sps:$4 sm:$0xff]   ;;  %v7524_v55 = vld [vmem:[%s8065_s14 + $0x7e4] ss:$8 sps:$4 sm:$0xff]   ;;  %v4077_v25 = vld [vmem:[#allocation2 + $0x58] sm:$0x1] }
 0x1b2   : > { %2345 = vmatpush1.bf16.msra.mxu1 %v7501_v52  ;;  %v1739_v10 = vpack.c.bf16 %v1681_v5, %v1675_v0  ;;  %v3734_v52 = vpack.c.bf16 %v3718_v50, %v8760_v48  ;;  %v2084_v60 = vld [vmem:[#allocation2 + $0x48] sm:$0xff]  ;;  %v4081_v0 = vld [vmem:[#allocation2 + $0x78] sm:$0x1]  ;;  %v4206_v3 = vrot.slane %v4077_v25, 1  ;;  %v2081_v5 = vld [vmem:[#allocation2 + $0x20] sm:$0xff] }
 0x1b3   : > { %4562 = vmatpush1.bf16.msra.mxu0 %v7504_v54  ;;  %2346 = vmatprep.subr.bf16.mxu1 %v7509_v49  ;;  %v1740_v54 = vpack.c.bf16 %v1690_v51, %v1684_v46  ;;  %v4075_v2 = vld [vmem:[#allocation2 + $0x48] sm:$0xfe]  ;;  %v2114_v62 = vpack.c.bf16 %v2084_v60, %v2082_v58  ;;  %v4212_v34 = vrot.slane %v4081_v0, 1  ;;  %v2083_v6 = vld [vmem:[#allocation2 + $0x40] sm:$0xff]  ;;  %v4076_v49 = vld [vmem:[#allocation2 + $0x50] sm:$0x1] }
 0x1b4   : > { %2027 = vmatprep.mubr.bf16.mxu1 %v1739_v10  ;;  %4563 = vmatprep.subr.bf16.mxu0 %v7512_v15  ;;  %v4079_v63 = vld [vmem:[#allocation2 + $0x68] sm:$0xfe]  ;;  %v4205_v1 = vrot.slane %v4075_v2, 1  ;;  %v2113_v8 = vpack.c.bf16 %v2083_v6, %v2081_v5  ;;  %v4078_v10 = vld [vmem:[#allocation2 + $0x60] sm:$0xfe] }
 0x1b5   : > { %2028 = vmatmul.mubr.bf16.gmra.mrb[24].mxu1 %v1738_v16  ;;  %v4211_v4 = vrot.slane %v4079_v63, 1  ;;  %v4080_v14 = vld [vmem:[#allocation2 + $0x70] sm:$0x1]  ;;  %v4203_v16 = vrot.slane %v4076_v49, 1  ;;  %v7533_v21 = vld [vmem:[%s8065_s14 + $0x804] ss:$8 sps:$4 sm:$0xff]  }
 0x1b6   : > { %4022 = vmatmul.mubr.bf16.gmra.mrb[24].mxu0 %v8636_v13  ;;  %2347 = vmatpush1.bf16.msra.mxu1 %v7507_v9  ;;  %v1532_v13 = vld [vmem:[#allocation2 + $0x238] sm:$0x3]  ;;  %v4074_v9 = vld [vmem:[#allocation2 + $0x40] sm:$0xfe]  ;;  %v4207_v11 = vsel %vm745_vm0, %v4205_v1, %v4206_v3  ;;  %v7536_v35 = vld [vmem:[%s8065_s14 + $0x814] ss:$8 sps:$4 sm:$0xff]  }
 0x1b7   : > { %4564 = vmatpush1.bf16.msra.mxu0 %v7510_v12  ;;  %2348 = vmatprep.subr.bf16.mxu1 %v7515_v18  ;;  %v1692_v28 = vrot.slane %v1532_v13, 2  ;;  %v4213_v12 = vsel %vm745_vm0, %v4211_v4, %v4212_v34  ;;  %v4202_v15 = vrot.slane %v4074_v9, 1  ;;  %v4208_v18 = vrot.slane %v4078_v10, 1  ;;  %v7534_v13 = vld [vmem:[%s8065_s14 + $0x810] ss:$8 sps:$4 sm:$0xff]   ;;  %v2086_v26 = vld [vmem:[#allocation2 + $0x68] sm:$0xff] }
 0x1b8   : > { %4565 = vmatprep.subr.bf16.mxu0 %v7518_v20  ;;  %4031 = vmatprep.mubr.bf16.mxu0 %v3735_v32  ;;  %v7531_v20 = vld [vmem:[%s8065_s14 + $0x800] ss:$8 sps:$4 sm:$0xff]   ;;  %v4085_v31 = vld [vmem:[#allocation2 + $0x98] sm:$0x1]  ;;  %v7542_v60 = vld [vmem:[%s8065_s14 + $0x834] ss:$8 sps:$4 sm:$0xff]  }
 0x1b9   : > { %v1693_v41 = vsel %vm1597_vm1, %v1691_v59, %v1692_v28  ;;  %v4204_v22 = vsel %vm745_vm0, %v4202_v15, %v4203_v16  ;;  %v2088_v59 = vld [vmem:[#allocation2 + $0x88] sm:$0xff]  ;;  %v4089_v32 = vld [vmem:[#allocation2 + $0xb8] sm:$0x1]  ;;  %v4218_v37 = vrot.slane %v4085_v31, 1  ;;  %v2085_v40 = vld [vmem:[#allocation2 + $0x60] sm:$0xff] }
 0x1ba   : > { %2349 = vmatpush1.bf16.msra.mxu1 %v7513_v17  ;;  %v1741_v44 = vpack.c.bf16 %v1693_v41, %v1687_v23  ;;  %v4331_v17 = vpack.c.bf16 %v4213_v12, %v4207_v11  ;;  %v2116_v29 = vpack.c.bf16 %v2088_v59, %v2086_v26  ;;  %v4083_v30 = vld [vmem:[#allocation2 + $0x88] sm:$0xfe]  ;;  %v4224_v41 = vrot.slane %v4089_v32, 1  ;;  %v2087_v61 = vld [vmem:[#allocation2 + $0x80] sm:$0xff]  ;;  %v4093_v0 = vld [vmem:[#allocation2 + $0xd8] sm:$0x1] }
 0x1bb   : > { %4566 = vmatpush1.bf16.msra.mxu0 %v7516_v19  ;;  %2350 = vmatprep.subr.bf16.mxu1 %v7521_v47  ;;  %v4209_v19 = vrot.slane %v4080_v14, 1  ;;  %v4087_v23 = vld [vmem:[#allocation2 + $0xa8] sm:$0xfe]  ;;  %v4217_v33 = vrot.slane %v4083_v30, 1  ;;  %v4082_v42 = vld [vmem:[#allocation2 + $0x80] sm:$0xfe] }
 0x1bc   : > { %2037 = vmatprep.mubr.bf16.mxu1 %v1741_v44  ;;  %4567 = vmatprep.subr.bf16.mxu0 %v7524_v55  ;;  %v4223_v39 = vrot.slane %v4087_v23, 1  ;;  %v4086_v46 = vld [vmem:[#allocation2 + $0xa0] sm:$0xfe]  ;;  %v4088_v47 = vld [vmem:[#allocation2 + $0xb0] sm:$0x1]  ;;  %v4214_v50 = vrot.slane %v4082_v42, 1 }
 0x1bd   : > { %2038 = vmatmul.mubr.bf16.gmra.mrb[28].mxu1 %v1740_v54  ;;  %v4210_v45 = vsel %vm745_vm0, %v4208_v18, %v4209_v19  ;;  %v4219_v44 = vsel %vm745_vm0, %v4217_v33, %v4218_v37  ;;  %v4220_v54 = vrot.slane %v4086_v46, 1  ;;  %v4221_v55 = vrot.slane %v4088_v47, 1  ;;  %v7537_v58 = vld [vmem:[%s8065_s14 + $0x820] ss:$8 sps:$4 sm:$0xff]   ;;  %v7540_v1 = vld [vmem:[%s8065_s14 + $0x830] ss:$8 sps:$4 sm:$0xff]  }
 0x1be   : > { %4032 = vmatmul.mubr.bf16.gmra.mrb[28].mxu0 %v3734_v52  ;;  %2351 = vmatpush1.bf16.msra.mxu1 %v7519_v43  ;;  %v4330_v28 = vpack.c.bf16 %v4210_v45, %v4204_v22  ;;  %v4084_v43 = vld [vmem:[#allocation2 + $0x90] sm:$0x1]  ;;  %v4225_v52 = vsel %vm745_vm0, %v4223_v39, %v4224_v41  ;;  %v2090_v2 = vld [vmem:[#allocation2 + $0xa8] sm:$0xff]  ;;  %v4097_v34 = vld [vmem:[#allocation2 + $0xf8] sm:$0x1]  ;;  %v4230_v6 = vrot.slane %v4093_v0, 1 }
 0x1bf   : > { %4568 = vmatpush1.bf16.msra.mxu0 %v7522_v53  ;;  %2352 = vmatprep.subr.bf16.mxu1 %v7527_v57  ;;  %v4215_v51 = vrot.slane %v4084_v43, 1  ;;  %v2115_v53 = vpack.c.bf16 %v2087_v61, %v2085_v40  ;;  %v2092_v25 = vld [vmem:[#allocation2 + $0xc8] sm:$0xff]  ;;  %v4236_v9 = vrot.slane %v4097_v34, 1  ;;  %v2089_v49 = vld [vmem:[#allocation2 + $0xa0] sm:$0xff]  ;;  %v4092_v14 = vld [vmem:[#allocation2 + $0xd0] sm:$0x1] }
 0x1c0   : > { %4569 = vmatprep.subr.bf16.mxu0 %v7530_v7  ;;  %2354 = vmatprep.mubr.bf16.mxu1 %v2114_v62  ;;  %v4222_v7 = vsel %vm745_vm0, %v4220_v54, %v4221_v55  ;;  %v4091_v63 = vld [vmem:[#allocation2 + $0xc8] sm:$0xfe]  ;;  %v2118_v3 = vpack.c.bf16 %v2092_v25, %v2090_v2  ;;  %v2091_v10 = vld [vmem:[#allocation2 + $0xc0] sm:$0xff]  ;;  %v4096_v16 = vld [vmem:[#allocation2 + $0xf0] sm:$0x1]  ;;  %v4227_v19 = vrot.slane %v4092_v14, 1 }
 0x1c1   : > { %4571 = vmatprep.mubr.bf16.mxu0 %v4331_v17  ;;  %v4216_v57 = vsel %vm745_vm0, %v4214_v50, %v4215_v51  ;;  %v4095_v4 = vld [vmem:[#allocation2 + $0xe8] sm:$0xfe]  ;;  %v4229_v5 = vrot.slane %v4091_v63, 1  ;;  %v4090_v11 = vld [vmem:[#allocation2 + $0xc0] sm:$0xfe]  ;;  %v2117_v22 = vpack.c.bf16 %v2091_v10, %v2089_v49  ;;  %v4233_v45 = vrot.slane %v4096_v16, 1 }
 0x1c2   : > { %2353 = vmatpush1.bf16.msra.mxu1 %v7525_v56  ;;  %v4333_v56 = vpack.c.bf16 %v4225_v52, %v4219_v44  ;;  %v4332_v62 = vpack.c.bf16 %v4222_v7, %v4216_v57  ;;  %v4094_v15 = vld [vmem:[#allocation2 + $0xe0] sm:$0xfe]  ;;  %v4226_v18 = vrot.slane %v4090_v11, 1  ;;  %v7548_v59 = vld [vmem:[%s8065_s14 + $0x854] ss:$8 sps:$4 sm:$0xff]   ;;  %v2098_v2 = vld [vmem:[#allocation2 + $0x168] sm:$0xff] }
 0x1c3   : > { %4570 = vmatpush1.bf16.msra.mxu0 %v7528_v36  ;;  %6799 = vmatprep.subr.bf16.mxu1 %v7533_v21  ;;  %v7539_v36 = vld [vmem:[%s8065_s14 + $0x824] ss:$8 sps:$4 sm:$0xff]   ;;  %v4231_v12 = vsel %vm745_vm0, %v4229_v5, %v4230_v6  ;;  %v7543_v26 = vld [vmem:[%s8065_s14 + $0x840] ss:$8 sps:$4 sm:$0xff]   ;;  %v4101_v23 = vld [vmem:[#allocation2 + $0x118] sm:$0x1] }
 0x1c4   : > { %5149 = vmatprep.subr.bf16.mxu0 %v7533_v21  ;;  %v4099_v31 = vld [vmem:[#allocation2 + $0x108] sm:$0xfe]  ;;  %v4105_v37 = vld [vmem:[#allocation2 + $0x138] sm:$0x1]  ;;  %v4242_v40 = vrot.slane %v4101_v23, 1  ;;  %v2093_v61 = vld [vmem:[#allocation2 + $0xe0] sm:$0xff] }
 0x1c5   : > { %2355 = vmatmul.mubr.bf16.vlgmr.msra.gmra.mrb[0].mxu1 %v2113_v8  ;;  %v4235_v8 = vrot.slane %v4095_v4, 1  ;;  %v4103_v32 = vld [vmem:[#allocation2 + $0x128] sm:$0xfe]  ;;  %v4241_v39 = vrot.slane %v4099_v31, 1  ;;  %v4248_v42 = vrot.slane %v4105_v37, 1  ;;  %v2119_v7 = vpack.c.bf16 %v8697_v38, %v2093_v61 }
 0x1c6   : > { %6815 = vmatpush1.bf16.msra.mxu1 %v7531_v20  ;;  %4572 = vmatmul.mubr.bf16.vlgmr.msra.gmra.mrb[0].mxu0 %v4330_v28  ;;  %v2094_v28 = vld [vmem:[#allocation2 + $0xe8] sm:$0xff]  ;;  %v4247_v41 = vrot.slane %v4103_v32, 1  ;;  %v4098_v43 = vld [vmem:[#allocation2 + $0x100] sm:$0xfe]  ;;  %v4100_v44 = vld [vmem:[#allocation2 + $0x110] sm:$0x1] }
 0x1c7   : > { %6800 = vmatprep.subr.bf16.mxu1 %v7536_v35  ;;  %5150 = vmatpush1.bf16.msra.mxu0 %v7531_v20  ;;  %v4237_v17 = vsel %vm745_vm0, %v4235_v8, %v4236_v9  ;;  %v4232_v20 = vrot.slane %v4094_v15, 1  ;;  %v2120_v30 = vpack.c.bf16 %v8692_v24, %v2094_v28  ;;  %v4243_v24 = vsel %vm745_vm0, %v4241_v39, %v4242_v40  ;;  %v4102_v46 = vld [vmem:[#allocation2 + $0x120] sm:$0xfe]  ;;  %v4104_v47 = vld [vmem:[#allocation2 + $0x130] sm:$0x1] }
 0x1c8   : > { %2364 = vmatprep.mubr.bf16.mxu1 %v2116_v29  ;;  %5151 = vmatprep.subr.bf16.mxu0 %v7536_v35  ;;  %v4335_v21 = vpack.c.bf16 %v4237_v17, %v4231_v12  ;;  %v4228_v35 = vsel %vm745_vm0, %v4226_v18, %v4227_v19  ;;  %v4238_v50 = vrot.slane %v4098_v43, 1  ;;  %v4239_v51 = vrot.slane %v4100_v44, 1  ;;  %v7546_v52 = vld [vmem:[%s8065_s14 + $0x850] ss:$8 sps:$4 sm:$0xff]   ;;  %v7554_v25 = vld [vmem:[%s8065_s14 + $0x874] ss:$8 sps:$4 sm:$0xff]  }
 0x1c9   : > { %4581 = vmatprep.mubr.bf16.mxu0 %v4333_v56  ;;  %v4234_v29 = vsel %vm745_vm0, %v4232_v20, %v4233_v45  ;;  %v4244_v54 = vrot.slane %v4102_v46, 1  ;;  %v4245_v55 = vrot.slane %v4104_v47, 1  ;;  %v4107_v0 = vld [vmem:[#allocation2 + $0x188] sm:$0xfe]  ;;  %v4113_v34 = vld [vmem:[#allocation2 + $0x1b8] sm:$0x1] }
 0x1ca   : > { %6816 = vmatpush1.bf16.msra.mxu1 %v7534_v13  ;;  %v4334_v33 = vpack.c.bf16 %v4234_v29, %v4228_v35  ;;  %v4240_v57 = vsel %vm745_vm0, %v4238_v50, %v4239_v51  ;;  %v4253_v5 = vrot.slane %v4107_v0, 1  ;;  %v4260_v38 = vrot.slane %v4113_v34, 1  ;;  %v2097_v9 = vld [vmem:[#allocation2 + $0x160] sm:$0xff]  ;;  %v4108_v10 = vld [vmem:[#allocation2 + $0x190] sm:$0x1]  ;;  %v2104_v29 = vld [vmem:[#allocation2 + $0x1c8] sm:$0xff] }
 0x1cb   : > { %5152 = vmatpush1.bf16.msra.mxu0 %v7534_v13  ;;  %6801 = vmatprep.subr.bf16.mxu1 %v7539_v36  ;;  %v7545_v13 = vld [vmem:[%s8065_s14 + $0x844] ss:$8 sps:$4 sm:$0xff]   ;;  %v4112_v14 = vld [vmem:[#allocation2 + $0x1b0] sm:$0x1]  ;;  %v4251_v16 = vrot.slane %v4108_v10, 1 }
 0x1cc   : > { %5153 = vmatprep.subr.bf16.mxu0 %v7539_v36  ;;  %v7551_v36 = vld [vmem:[%s8065_s14 + $0x864] ss:$8 sps:$4 sm:$0xff]   ;;  %v4257_v20 = vrot.slane %v4112_v14, 1  ;;  %v7555_v28 = vld [vmem:[%s8065_s14 + $0x880] ss:$8 sps:$4 sm:$0xff]  }
 0x1cd   : > { %2365 = vmatmul.mubr.bf16.gmra.mrb[4].mxu1 %v2115_v53  ;;  %v4249_v53 = vsel %vm745_vm0, %v4247_v41, %v4248_v42  ;;  %v4106_v49 = vld [vmem:[#allocation2 + $0x180] sm:$0xfe]  ;;  %v4117_v31 = vld [vmem:[#allocation2 + $0x1d8] sm:$0x1]  ;;  %v4119_v32 = vld [vmem:[#allocation2 + $0x1e8] sm:$0xfe] }
 0x1ce   : > { %4582 = vmatmul.mubr.bf16.gmra.mrb[4].mxu0 %v4332_v62  ;;  %6817 = vmatpush1.bf16.msra.mxu1 %v7537_v58  ;;  %v4337_v56 = vpack.c.bf16 %v4249_v53, %v4243_v24  ;;  %v2100_v62 = vld [vmem:[#allocation2 + $0x188] sm:$0xff]  ;;  %v4110_v12 = vld [vmem:[#allocation2 + $0x1a0] sm:$0xfe]  ;;  %v4250_v15 = vrot.slane %v4106_v49, 1  ;;  %v4266_v39 = vrot.slane %v4117_v31, 1  ;;  %v4271_v61 = vrot.slane %v4119_v32, 1 }
 0x1cf   : > { %5154 = vmatpush1.bf16.msra.mxu0 %v7537_v58  ;;  %6802 = vmatprep.subr.bf16.mxu1 %v7542_v60  ;;  %v4246_v58 = vsel %vm745_vm0, %v4244_v54, %v4245_v55  ;;  %v2122_v63 = vpack.c.bf16 %v2100_v62, %v2098_v2  ;;  %v2099_v18 = vld [vmem:[#allocation2 + $0x180] sm:$0xff]  ;;  %v4256_v19 = vrot.slane %v4110_v12, 1  ;;  %v7560_v41 = vld [vmem:[%s8065_s14 + $0x894] ss:$8 sps:$4 sm:$0xff]   ;;  %v4116_v24 = vld [vmem:[#allocation2 + $0x1d0] sm:$0x1] }
 0x1d0   : > { %5155 = vmatprep.subr.bf16.mxu0 %v7542_v60  ;;  %2374 = vmatprep.mubr.bf16.mxu1 %v2118_v3  ;;  %v7549_v60 = vld [vmem:[%s8065_s14 + $0x860] ss:$8 sps:$4 sm:$0xff]   ;;  %v4336_v4 = vpack.c.bf16 %v4246_v58, %v4240_v57  ;;  %v4252_v45 = vsel %vm745_vm0, %v4250_v15, %v4251_v16  ;;  %v7557_v35 = vld [vmem:[%s8065_s14 + $0x884] ss:$8 sps:$4 sm:$0xff]   ;;  %v4120_v47 = vld [vmem:[#allocation2 + $0x1f0] sm:$0x1] }
 0x1d1   : > { %4591 = vmatprep.mubr.bf16.mxu0 %v4335_v21  ;;  %v4111_v3 = vld [vmem:[#allocation2 + $0x1a8] sm:$0xfe]  ;;  %v7552_v21 = vld [vmem:[%s8065_s14 + $0x870] ss:$8 sps:$4 sm:$0xff]   ;;  %v4114_v43 = vld [vmem:[#allocation2 + $0x1c0] sm:$0xfe] }
 0x1d2   : > { %6818 = vmatpush1.bf16.msra.mxu1 %v7540_v1  ;;  %v4259_v8 = vrot.slane %v4111_v3, 1  ;;  %v4118_v46 = vld [vmem:[#allocation2 + $0x1e0] sm:$0xfe]  ;;  %v4262_v51 = vrot.slane %v4114_v43, 1  ;;  %v4269_v57 = vrot.slane %v4120_v47, 1  ;;  %v2106_v58 = vld [vmem:[#allocation2 + $0x1e8] sm:$0xff] }
 0x1d3   : > { %5156 = vmatpush1.bf16.msra.mxu0 %v7540_v1  ;;  %6803 = vmatprep.subr.bf16.mxu1 %v7545_v13  ;;  %v4109_v1 = vld [vmem:[#allocation2 + $0x198] sm:$0x1]  ;;  %v4268_v53 = vrot.slane %v4118_v46, 1  ;;  %v2101_v55 = vld [vmem:[#allocation2 + $0x1a0] sm:$0xff]  ;;  %v2108_v62 = vld [vmem:[#allocation2 + $0x208] sm:$0xff] }
 0x1d4   : > { %5157 = vmatprep.subr.bf16.mxu0 %v7545_v13  ;;  %v4254_v6 = vrot.slane %v4109_v1, 1  ;;  %v4261_v17 = vsel %vm745_vm0, %v4259_v8, %v4260_v38  ;;  %v4258_v13 = vsel %vm745_vm0, %v4256_v19, %v4257_v20  ;;  %v7561_v1 = vld [vmem:[%s8065_s14 + $0x8a0] ss:$8 sps:$4 sm:$0xff]   ;;  %v2126_v8 = vpack.c.bf16 %v2108_v62, %v2106_v58  ;;  %v4124_v12 = vld [vmem:[#allocation2 + $0x210] sm:$0x1] }
 0x1d5   : > { %2375 = vmatmul.mubr.bf16.gmra.mrb[8].mxu1 %v2117_v22  ;;  %v4338_v40 = vpack.c.bf16 %v4258_v13, %v4252_v45  ;;  %v4270_v2 = vsel %vm745_vm0, %v4268_v53, %v4269_v57  ;;  %v4127_v3 = vld [vmem:[#allocation2 + $0x228] sm:$0xfe]  ;;  %v4122_v49 = vld [vmem:[#allocation2 + $0x200] sm:$0xfe]  ;;  %v4128_v15 = vld [vmem:[#allocation2 + $0x230] sm:$0x1] }
 0x1d6   : > { %2384 = vmatprep.mubr.bf16.mxu1 %v2120_v30  ;;  %4592 = vmatmul.mubr.bf16.gmra.mrb[8].mxu0 %v4334_v33  ;;  %v4255_v11 = vsel %vm745_vm0, %v4253_v5, %v4254_v6  ;;  %v4115_v30 = vld [vmem:[#allocation2 + $0x1c8] sm:$0xfe]  ;;  %v4121_v33 = vld [vmem:[#allocation2 + $0x1f8] sm:$0x1]  ;;  %v7566_v6 = vld [vmem:[%s8065_s14 + $0x8b4] ss:$8 sps:$4 sm:$0xff]  }
 0x1d7   : > { %6819 = vmatpush1.bf16.msra.mxu1 %v7543_v26  ;;  %5158 = vmatpush1.bf16.msra.mxu0 %v7543_v26  ;;  %v4339_v22 = vpack.c.bf16 %v4261_v17, %v4255_v11  ;;  %v2102_v26 = vld [vmem:[#allocation2 + $0x1a8] sm:$0xff]  ;;  %v4265_v37 = vrot.slane %v4115_v30, 1  ;;  %v4272_v42 = vrot.slane %v4121_v33, 1  ;;  %v4283_v38 = vrot.slane %v4127_v3, 1  ;;  %v4126_v14 = vld [vmem:[#allocation2 + $0x220] sm:$0xfe] }
 0x1d8   : > { %6804 = vmatprep.subr.bf16.mxu1 %v7548_v59  ;;  %5159 = vmatprep.subr.bf16.mxu0 %v7548_v59  ;;  %v2121_v59 = vpack.c.bf16 %v2099_v18, %v2097_v9  ;;  %v2124_v23 = vpack.c.bf16 %v2104_v29, %v2102_v26  ;;  %v4274_v17 = vrot.slane %v4122_v49, 1  ;;  %v4275_v18 = vrot.slane %v4124_v12, 1  ;;  %v7564_v20 = vld [vmem:[%s8065_s14 + $0x8b0] ss:$8 sps:$4 sm:$0xff]   ;;  %v2107_v13 = vld [vmem:[#allocation2 + $0x200] sm:$0xff]  ;;  %v2110_v26 = vld [vmem:[#allocation2 + $0x228] sm:$0xff] }
 0x1d9   : > { %4601 = vmatprep.mubr.bf16.mxu0 %v4337_v56  ;;  %v4267_v44 = vsel %vm745_vm0, %v4265_v37, %v4266_v39  ;;  %v4273_v50 = vsel %vm745_vm0, %v4271_v61, %v4272_v42  ;;  %v2103_v56 = vld [vmem:[#allocation2 + $0x1c0] sm:$0xff]  ;;  %v4280_v19 = vrot.slane %v4126_v14, 1  ;;  %v4281_v45 = vrot.slane %v4128_v15, 1  ;;  %v4133_v29 = vld [vmem:[#allocation2 + $0x258] sm:$0x1] }
 0x1da   : > { %v4341_v54 = vpack.c.bf16 %v4273_v50, %v4267_v44  ;;  %v2123_v0 = vpack.c.bf16 %v2103_v56, %v2101_v55  ;;  %v4135_v30 = vld [vmem:[#allocation2 + $0x268] sm:$0xfe]  ;;  %v4290_v33 = vrot.slane %v4133_v29, 1  ;;  %v4132_v61 = vld [vmem:[#allocation2 + $0x250] sm:$0x1]  ;;  %v2128_v43 = vpack.c.bf16 %v8752_v27, %v2110_v26  ;;  %v2109_v57 = vld [vmem:[#allocation2 + $0x220] sm:$0xff] }
 0x1db   : > { %6820 = vmatpush1.bf16.msra.mxu1 %v7546_v52  ;;  %5160 = vmatpush1.bf16.msra.mxu0 %v7546_v52  ;;  %v4263_v52 = vrot.slane %v4116_v24, 1  ;;  %v4282_v31 = vsel %vm745_vm0, %v4280_v19, %v4281_v45  ;;  %v4295_v37 = vrot.slane %v4135_v30, 1  ;;  %v7567_v42 = vld [vmem:[%s8065_s14 + $0x8c0] ss:$8 sps:$4 sm:$0xff]   ;;  %v4136_v46 = vld [vmem:[#allocation2 + $0x270] sm:$0x1] }
 0x1dc   : > { %6805 = vmatprep.subr.bf16.mxu1 %v7551_v36  ;;  %5161 = vmatprep.subr.bf16.mxu0 %v7551_v36  ;;  %v7558_v36 = vld [vmem:[%s8065_s14 + $0x890] ss:$8 sps:$4 sm:$0xff]   ;;  %v4134_v24 = vld [vmem:[#allocation2 + $0x260] sm:$0xfe]  ;;  %v7572_v50 = vld [vmem:[%s8065_s14 + $0x8d4] ss:$8 sps:$4 sm:$0xff]  }
 0x1dd   : > { %2385 = vmatmul.mubr.bf16.gmra.mrb[12].mxu1 %v2119_v7  ;;  %v7563_v7 = vld [vmem:[%s8065_s14 + $0x8a4] ss:$8 sps:$4 sm:$0xff]   ;;  %v4287_v53 = vrot.slane %v4132_v61, 1  ;;  %v4293_v55 = vrot.slane %v4136_v46, 1  ;;  %v7570_v27 = vld [vmem:[%s8065_s14 + $0x8d0] ss:$8 sps:$4 sm:$0xff]  }
 0x1de   : > { %2394 = vmatprep.mubr.bf16.mxu1 %v2122_v63  ;;  %4602 = vmatmul.mubr.bf16.gmra.mrb[12].mxu0 %v4336_v4  ;;  %v4125_v63 = vld [vmem:[#allocation2 + $0x218] sm:$0x1]  ;;  %v7575_v58 = vld [vmem:[%s8065_s14 + $0x8e4] ss:$8 sps:$4 sm:$0xff]   ;;  %v7573_v49 = vld [vmem:[%s8065_s14 + $0x8e0] ss:$8 sps:$4 sm:$0xff]  }
 0x1df   : > { %6821 = vmatpush1.bf16.msra.mxu1 %v7549_v60  ;;  %5162 = vmatpush1.bf16.msra.mxu0 %v7549_v60  ;;  %v4264_v60 = vsel %vm745_vm0, %v4262_v51, %v4263_v52  ;;  %v4129_v4 = vld [vmem:[#allocation2 + $0x238] sm:$0x1]  ;;  %v4278_v5 = vrot.slane %v4125_v63, 1  ;;  %v4684_v14 = vld [vmem:[#allocation2 + $0x40] sm:$0xfc] }
 0x1e0   : > { %6806 = vmatprep.subr.bf16.mxu1 %v7554_v25  ;;  %5163 = vmatprep.subr.bf16.mxu0 %v7554_v25  ;;  %v4123_v25 = vld [vmem:[#allocation2 + $0x208] sm:$0xfe]  ;;  %v4284_v9 = vrot.slane %v4129_v4, 1  ;;  %v4340_v10 = vpack.c.bf16 %v4270_v2, %v4264_v60  ;;  %v4691_v2 = vld [vmem:[#allocation2 + $0x78] sm:$0x3] }
 0x1e1   : > { %4611 = vmatprep.mubr.bf16.mxu0 %v4339_v22  ;;  %v4277_v34 = vrot.slane %v4123_v25, 1  ;;  %v2105_v22 = vld [vmem:[#allocation2 + $0x1e0] sm:$0xff]  ;;  %v4689_v60 = vld [vmem:[#allocation2 + $0x68] sm:$0xfc]  ;;  %v4719_v3 = vld [vmem:[#allocation2 + $0x198] sm:$0x3] }
 0x1e2   : > { %v4285_v16 = vsel %vm745_vm0, %v4283_v38, %v4284_v9  ;;  %v2125_v39 = vpack.c.bf16 %v2107_v13, %v2105_v22  ;;  %v4821_v63 = vrot.slane %v4689_v60, 2  ;;  %v4864_v38 = vrot.slane %v4719_v3, 2  ;;  %v4686_v15 = vld [vmem:[#allocation2 + $0x50] sm:$0x3]  ;;  %v4688_v19 = vld [vmem:[#allocation2 + $0x60] sm:$0xfc] }
 0x1e3   : > { %6822 = vmatpush1.bf16.msra.mxu1 %v7552_v21  ;;  %5164 = vmatpush1.bf16.msra.mxu0 %v7552_v21  ;;  %v4279_v11 = vsel %vm745_vm0, %v4277_v34, %v4278_v5  ;;  %v4721_v5 = vld [vmem:[#allocation2 + $0x1a8] sm:$0xfc]  ;;  %v2127_v9 = vpack.c.bf16 %v8760_v48, %v2109_v57  ;;  %v4813_v22 = vrot.slane %v4686_v15, 2  ;;  %v4818_v13 = vrot.slane %v4688_v19, 2  ;;  %v4716_v26 = vld [vmem:[#allocation2 + $0x180] sm:$0xfc] }
 0x1e4   : > { %6807 = vmatprep.subr.bf16.mxu1 %v7557_v35  ;;  %5165 = vmatprep.subr.bf16.mxu0 %v7557_v35  ;;  %v4343_v21 = vpack.c.bf16 %v4285_v16, %v4279_v11  ;;  %v7569_v35 = vld [vmem:[%s8065_s14 + $0x8c4] ss:$8 sps:$4 sm:$0xff]   ;;  %v4869_v11 = vrot.slane %v4721_v5, 2  ;;  %v7578_v16 = vld [vmem:[%s8065_s14 + $0x8f4] ss:$8 sps:$4 sm:$0xff]  }
 0x1e5   : > { %2395 = vmatmul.mubr.bf16.gmra.mrb[16].mxu1 %v2121_v59  ;;  %v4276_v59 = vsel %vm745_vm0, %v4274_v17, %v4275_v18  ;;  %v4720_v29 = vld [vmem:[#allocation2 + $0x1a0] sm:$0xfc]  ;;  %v4722_v30 = vld [vmem:[#allocation2 + $0x1b0] sm:$0x3]  ;;  %v4697_v61 = vld [vmem:[#allocation2 + $0xa8] sm:$0xfc] }
 0x1e6   : > { %2404 = vmatprep.mubr.bf16.mxu1 %v2124_v23  ;;  %4612 = vmatmul.mubr.bf16.gmra.mrb[16].mxu0 %v4338_v40  ;;  %v4137_v23 = vld [vmem:[#allocation2 + $0x278] sm:$0x1]  ;;  %v4342_v47 = vpack.c.bf16 %v4282_v31, %v4276_v59  ;;  %v4718_v59 = vld [vmem:[#allocation2 + $0x190] sm:$0x3]  ;;  %v4860_v31 = vrot.slane %v4716_v26, 2 }
 0x1e7   : > { %6823 = vmatpush1.bf16.msra.mxu1 %v7555_v28  ;;  %5166 = vmatpush1.bf16.msra.mxu0 %v7555_v28  ;;  %v4131_v28 = vld [vmem:[#allocation2 + $0x248] sm:$0xfe]  ;;  %v4296_v40 = vrot.slane %v4137_v23, 1  ;;  %v4861_v23 = vrot.slane %v4718_v59, 2  ;;  %v4703_v19 = vld [vmem:[#allocation2 + $0xd8] sm:$0x3] }
 0x1e8   : > { %6808 = vmatprep.subr.bf16.mxu1 %v7560_v41  ;;  %5167 = vmatprep.subr.bf16.mxu0 %v7560_v41  ;;  %v4289_v32 = vrot.slane %v4131_v28, 1  ;;  %v4130_v41 = vld [vmem:[#allocation2 + $0x240] sm:$0xfe]  ;;  %v4733_v59 = vld [vmem:[#allocation2 + $0x208] sm:$0xfc] }
 0x1e9   : > { %4621 = vmatprep.mubr.bf16.mxu0 %v4341_v54  ;;  %v4297_v51 = vsel %vm745_vm0, %v4295_v37, %v4296_v40  ;;  %v4286_v52 = vrot.slane %v4130_v41, 1  ;;  %v4292_v54 = vrot.slane %v4134_v24, 1  ;;  %v4866_v37 = vrot.slane %v4720_v29, 2  ;;  %v4693_v40 = vld [vmem:[#allocation2 + $0x88] sm:$0xfc] }
 0x1ea   : > { %v4291_v44 = vsel %vm745_vm0, %v4289_v32, %v4290_v33  ;;  %v7576_v32 = vld [vmem:[%s8065_s14 + $0x8f0] ss:$8 sps:$4 sm:$0xff]   ;;  %v4862_v24 = vsel %vm1597_vm1, %v4860_v31, %v4861_v23  ;;  %v4737_v31 = vld [vmem:[#allocation2 + $0x228] sm:$0xfc]  ;;  %s5372_s14 = ssub.s32 0, %s7899_s22 }
 0x1eb   : > { %6824 = vmatpush1.bf16.msra.mxu1 %v7558_v36  ;;  %5168 = vmatpush1.bf16.msra.mxu0 %v7558_v36  ;;  %v4345_v56 = vpack.c.bf16 %v4297_v51, %v4291_v44  ;;  %v4685_v36 = vld [vmem:[#allocation2 + $0x48] sm:$0xfc]  ;;  %v4288_v4 = vsel %vm745_vm0, %v4286_v52, %v4287_v53  ;;  %v4294_v34 = vsel %vm745_vm0, %v4292_v54, %v4293_v55  ;;  %v4695_v41 = vld [vmem:[#allocation2 + $0x98] sm:$0x3]  ;;  %s6788_s12 = smin.u32 %s7899_s22, %s5372_s14 }
 0x1ec   : > { %6809 = vmatprep.subr.bf16.mxu1 %v7563_v7  ;;  %5169 = vmatprep.subr.bf16.mxu0 %v7563_v7  ;;  %v4687_v7 = vld [vmem:[#allocation2 + $0x58] sm:$0x3]  ;;  %v4815_v62 = vrot.slane %v4685_v36, 2  ;;  %v4344_v45 = vpack.c.bf16 %v4294_v34, %v4288_v4  ;;  %v4828_v44 = vrot.slane %v4695_v41, 2  ;;  %v4725_v51 = vld [vmem:[#allocation2 + $0x1c8] sm:$0xfc] }
 0x1ed   : > { %2405 = vmatmul.mubr.bf16.gmra.mrb[20].mxu1 %v2123_v0  ;;  %v4816_v25 = vrot.slane %v4687_v7, 2  ;;  %v4822_v0 = vrot.slane %v4691_v2, 2  ;;  %v4727_v52 = vld [vmem:[#allocation2 + $0x1d8] sm:$0x3]  ;;  %v4729_v55 = vld [vmem:[#allocation2 + $0x1e8] sm:$0xfc] }
 0x1ee   : > { %2414 = vmatprep.mubr.bf16.mxu1 %v2126_v8  ;;  %4622 = vmatmul.mubr.bf16.gmra.mrb[20].mxu0 %v4340_v10  ;;  %v4876_v57 = vrot.slane %v4727_v52, 2  ;;  %v4692_v2 = vld [vmem:[#allocation2 + $0x80] sm:$0xfc]  ;;  %v4739_v23 = vld [vmem:[#allocation2 + $0x238] sm:$0x3]  ;;  %s5374_s13 = sand.u32 1, %s6788_s12  }
 0x1ef   : > { %6825 = vmatpush1.bf16.msra.mxu1 %v7561_v1  ;;  %5170 = vmatpush1.bf16.msra.mxu0 %v7561_v1  ;;  %v4717_v1 = vld [vmem:[#allocation2 + $0x188] sm:$0xfc]  ;;  %v4817_v10 = vsel %vm1597_vm1, %v4815_v62, %v4816_v25  ;;  %v4823_v17 = vsel %vm1597_vm1, %v4821_v63, %v4822_v0  ;;  %v4694_v62 = vld [vmem:[#allocation2 + $0x90] sm:$0x3]  ;;  %v4696_v0 = vld [vmem:[#allocation2 + $0xa0] sm:$0xfc] }
 0x1f0   : > { %6810 = vmatprep.subr.bf16.mxu1 %v7566_v6  ;;  %5171 = vmatprep.subr.bf16.mxu0 %v7566_v6  ;;  %v4723_v6 = vld [vmem:[#allocation2 + $0x1b8] sm:$0x3]  ;;  %v4863_v8 = vrot.slane %v4717_v1, 2  ;;  %v4941_v33 = vpack.c.bf16 %v4823_v17, %v4817_v10  ;;  %v4698_v1 = vld [vmem:[#allocation2 + $0xb0] sm:$0x3]  ;;  %v4824_v3 = vrot.slane %v4692_v2, 2 }
 0x1f1   : > { %4631 = vmatprep.mubr.bf16.mxu0 %v4343_v21  ;;  %v4870_v12 = vrot.slane %v4723_v6, 2  ;;  %v4812_v21 = vrot.slane %v4684_v14, 2  ;;  %v4825_v4 = vrot.slane %v4694_v62, 2  ;;  %v4830_v6 = vrot.slane %v4696_v0, 2  ;;  %v4713_v0 = vld [vmem:[#allocation2 + $0x128] sm:$0xfc] }
 0x1f2   : > { %v4865_v18 = vsel %vm1597_vm1, %v4863_v8, %v4864_v38  ;;  %v4831_v8 = vrot.slane %v4698_v1, 2  ;;  %v4724_v38 = vld [vmem:[#allocation2 + $0x1c0] sm:$0xfc]  ;;  %v4894_v41 = vrot.slane %v4739_v23, 2  ;;  %v4715_v1 = vld [vmem:[#allocation2 + $0x138] sm:$0x3] }
 0x1f3   : > { %6826 = vmatpush1.bf16.msra.mxu1 %v7564_v20  ;;  %5172 = vmatpush1.bf16.msra.mxu0 %v7564_v20  ;;  %v4690_v20 = vld [vmem:[#allocation2 + $0x70] sm:$0x3]  ;;  %v4871_v48 = vsel %vm1597_vm1, %v4869_v11, %v4870_v12  ;;  %v4814_v53 = vsel %vm1597_vm1, %v4812_v21, %v4813_v22  ;;  %v4728_v11 = vld [vmem:[#allocation2 + $0x1e0] sm:$0xfc]  ;;  %v4872_v14 = vrot.slane %v4724_v38, 2  ;;  %v4826_v29 = vsel %vm1597_vm1, %v4824_v3, %v4825_v4  ;;  %s5375_s18 = ssub.s32 0, %s5374_s13 }
 0x1f4   : > { %6811 = vmatprep.subr.bf16.mxu1 %v7569_v35  ;;  %5173 = vmatprep.subr.bf16.mxu0 %v7569_v35  ;;  %v4819_v35 = vrot.slane %v4690_v20, 2  ;;  %v4949_v28 = vpack.c.bf16 %v4871_v48, %v4865_v18  ;;  %v4730_v12 = vld [vmem:[#allocation2 + $0x1f0] sm:$0x3]  ;;  %v4701_v18 = vld [vmem:[#allocation2 + $0xc8] sm:$0xfc]  ;;  %s9751_s18 = smov (!%p5371_p7, %s5375_s18), %s5374_s13 }
 0x1f5   : > { %2415 = vmatmul.mubr.bf16.gmra.mrb[24].mxu1 %v2125_v39  ;;  %v4867_v39 = vrot.slane %v4722_v30, 2  ;;  %v4879_v17 = vrot.slane %v4730_v12, 2  ;;  %v4705_v20 = vld [vmem:[#allocation2 + $0xe8] sm:$0xfc]  ;;  %v4707_v21 = vld [vmem:[#allocation2 + $0xf8] sm:$0x3]  ;;  %v4832_v30 = vsel %vm1597_vm1, %v4830_v6, %v4831_v8 }
 0x1f6   : > { %2424 = vmatprep.mubr.bf16.mxu1 %v2128_v43  ;;  %4632 = vmatmul.mubr.bf16.gmra.mrb[24].mxu0 %v4342_v47  ;;  %v4827_v43 = vrot.slane %v4693_v40, 2  ;;  %v4833_v47 = vrot.slane %v4697_v61, 2  ;;  %v4820_v54 = vsel %vm1597_vm1, %v4818_v13, %v4819_v35  ;;  %v4839_v22 = vrot.slane %v4701_v18, 2  ;;  %v4700_v61 = vld [vmem:[#allocation2 + $0xc0] sm:$0xfc]  ;;  %p6790_p3 = scmp.lt.s32.totalorder %s9751_s18, 0 }
 0x1f7   : > { %6827 = vmatpush1.bf16.msra.mxu1 %v7567_v42  ;;  %5174 = vmatpush1.bf16.msra.mxu0 %v7567_v42  ;;  %v4699_v42 = vld [vmem:[#allocation2 + $0xb8] sm:$0x3]  ;;  %v4868_v46 = vsel %vm1597_vm1, %v4866_v37, %v4867_v39  ;;  %v4940_v34 = vpack.c.bf16 %v4820_v54, %v4814_v53  ;;  %v4845_v35 = vrot.slane %v4705_v20, 2  ;;  %v4846_v26 = vrot.slane %v4707_v21, 2  ;;  %v4741_v38 = vld [vmem:[#allocation2 + $0x248] sm:$0xfc] }
 0x1f8   : > { %6812 = vmatprep.subr.bf16.mxu1 %v7572_v50  ;;  %5175 = vmatprep.subr.bf16.mxu0 %v7572_v50  ;;  %v4834_v50 = vrot.slane %v4699_v42, 2  ;;  %v4829_v36 = vsel %vm1597_vm1, %v4827_v43, %v4828_v44  ;;  %v4948_v25 = vpack.c.bf16 %v4868_v46, %v4862_v24  ;;  %v4893_v40 = vrot.slane %v4737_v31, 2  ;;  %v4702_v42 = vld [vmem:[#allocation2 + $0xd0] sm:$0x3]  ;;  %v4704_v24 = vld [vmem:[#allocation2 + $0xe0] sm:$0xfc] }
 0x1f9   : > { %4641 = vmatprep.mubr.bf16.mxu0 %v4345_v56  ;;  %v4875_v56 = vrot.slane %v4725_v51, 2  ;;  %v4847_v39 = vsel %vm1597_vm1, %v4845_v35, %v4846_v26  ;;  %v4706_v46 = vld [vmem:[#allocation2 + $0xf0] sm:$0x3]  ;;  %v4942_v51 = vpack.c.bf16 %v4832_v30, %v4826_v29  ;;  %v4842_v53 = vrot.slane %v4704_v24, 2  ;;  %v4747_v12 = vld [vmem:[#allocation2 + $0x278] sm:$0x3] }
 0x1fa   : > { %v4835_v7 = vsel %vm1597_vm1, %v4833_v47, %v4834_v50  ;;  %v4836_v47 = vrot.slane %v4700_v61, 2  ;;  %v4837_v50 = vrot.slane %v4702_v42, 2  ;;  %v4895_v52 = vsel %vm1597_vm1, %v4893_v40, %v4894_v41  ;;  %v4708_v20 = vld [vmem:[#allocation2 + $0x100] sm:$0xfc]  ;;  %v4710_v21 = vld [vmem:[#allocation2 + $0x110] sm:$0x3] }
 0x1fb   : > { %6828 = vmatpush1.bf16.msra.mxu1 %v7570_v27  ;;  %5176 = vmatpush1.bf16.msra.mxu0 %v7570_v27  ;;  %v4731_v27 = vld [vmem:[#allocation2 + $0x1f8] sm:$0x3]  ;;  %v4877_v63 = vsel %vm1597_vm1, %v4875_v56, %v4876_v57  ;;  %v4843_v54 = vrot.slane %v4706_v46, 2  ;;  %v4857_v6 = vrot.slane %v4713_v0, 2  ;;  %v4858_v8 = vrot.slane %v4715_v1, 2  ;;  %s5381_s24 = sadd.s32 2, %s9751_s18 }
 0x1fc   : > { %6813 = vmatprep.subr.bf16.mxu1 %v7575_v58  ;;  %5177 = vmatprep.subr.bf16.mxu0 %v7575_v58  ;;  %v4881_v58 = vrot.slane %v4729_v55, 2  ;;  %v4882_v60 = vrot.slane %v4731_v27, 2  ;;  %v4732_v55 = vld [vmem:[#allocation2 + $0x200] sm:$0xfc]  ;;  %v4734_v27 = vld [vmem:[#allocation2 + $0x210] sm:$0x3]  ;;  %s9753_s24 = smov (!%p6790_p3, %s5381_s24), %s9751_s18 }
 0x1fd   : > { %2425 = vmatmul.mubr.bf16.gmra.mrb[28].mxu1 %v2127_v9  ;;  %v4726_v9 = vld [vmem:[#allocation2 + $0x1d0] sm:$0x3]  ;;  %v4848_v35 = vrot.slane %v4708_v20, 2  ;;  %v4849_v26 = vrot.slane %v4710_v21, 2  ;;  %v4740_v31 = vld [vmem:[#allocation2 + $0x240] sm:$0xfc] }
 0x1fe   : > { %5221 = vmatprep.mubr.bf16.mxu1 %v4949_v28  ;;  %4642 = vmatmul.mubr.bf16.gmra.mrb[28].mxu0 %v4344_v45  ;;  %v4883_v5 = vsel %vm1597_vm1, %v4881_v58, %v4882_v60  ;;  %v4873_v15 = vrot.slane %v4726_v9, 2  ;;  %v4840_v45 = vrot.slane %v4703_v19, 2  ;;  %v4735_v28 = vld [vmem:[#allocation2 + $0x218] sm:$0x3]  ;;  %v4884_v58 = vrot.slane %v4732_v55, 2  ;;  %p5383_p6 = scmp.eq.s32.totalorder %s9753_s24, 0 }
 0x1ff   : > { %6829 = vmatpush1.bf16.msra.mxu1 %v7573_v49  ;;  %5178 = vmatpush1.bf16.msra.mxu0 %v7573_v49  ;;  %v4943_v49 = vpack.c.bf16 %v4835_v7, %v4829_v36  ;;  %v4951_v10 = vpack.c.bf16 %v4883_v5, %v4877_v63  ;;  %v4736_v36 = vld [vmem:[#allocation2 + $0x220] sm:$0xfc]  ;;  %v4738_v7 = vld [vmem:[#allocation2 + $0x230] sm:$0x3]  ;;  %v4885_v60 = vrot.slane %v4734_v27, 2  ;;  %v4906_v19 = vrot.slane %v4747_v12, 2 }
 0x200   : > { %6814 = vmatprep.subr.bf16.mxu1 %v7578_v16  ;;  %5179 = vmatprep.subr.bf16.mxu0 %v7578_v16  ;;  %v4878_v16 = vrot.slane %v4728_v11, 2  ;;  %v4874_v48 = vsel %vm1597_vm1, %v4872_v14, %v4873_v15  ;;  %v4841_v37 = vsel %vm1597_vm1, %v4839_v22, %v4840_v45  ;;  %v4890_v2 = vrot.slane %v4736_v36, 2  ;;  %v4711_v63 = vld [vmem:[#allocation2 + $0x118] sm:$0x3]  ;;  %v4745_v11 = vld [vmem:[#allocation2 + $0x268] sm:$0xfc]  ;;  %p8877_p2 = pnand %p5383_p6, %p5370_p5 }
 0x201   : > { %5181 = vmatprep.mubr.bf16.mxu0 %v4941_v33  ;;  %v4888_v33 = vrot.slane %v4735_v28, 2  ;;  %v4945_v56 = vpack.c.bf16 %v4847_v39, %v4841_v37  ;;  %v4891_v62 = vrot.slane %v4738_v7, 2  ;;  %v4852_v4 = vrot.slane %v4711_v63, 2  ;;  %v4743_v9 = vld [vmem:[#allocation2 + $0x258] sm:$0x3]  ;;  %p6792_p11 = scmp.ne.s32.totalorder %s9753_s24, 0 }
 0x202   : > { %v4880_v13 = vsel %vm1597_vm1, %v4878_v16, %v4879_v17  ;;  %v4899_v14 = vrot.slane %v4741_v38, 2  ;;  %v4900_v15 = vrot.slane %v4743_v9, 2  ;;  %v4859_v17 = vsel %vm1597_vm1, %v4857_v6, %v4858_v8  ;;  %v4742_v23 = vld [vmem:[#allocation2 + $0x250] sm:$0x3]  ;;  %v4744_v37 = vld [vmem:[#allocation2 + $0x260] sm:$0xfc] }
 0x203   : > { %6830 = vmatpush1.bf16.msra.mxu1 %v7576_v32  ;;  %5180 = vmatpush1.bf16.msra.mxu0 %v7576_v32  ;;  %v4887_v32 = vrot.slane %v4733_v59, 2  ;;  %v4950_v43 = vpack.c.bf16 %v4880_v13, %v4874_v48  ;;  %v4892_v5 = vsel %vm1597_vm1, %v4890_v2, %v4891_v62  ;;  %v4905_v18 = vrot.slane %v4745_v11, 2  ;;  %v4712_v48 = vld [vmem:[#allocation2 + $0x120] sm:$0xfc]  ;;  %v4714_v13 = vld [vmem:[#allocation2 + $0x130] sm:$0x3] }
 0x204   : > { %v4901_v45 = vsel %vm1597_vm1, %v4899_v14, %v4900_v15  ;;  %v4854_v29 = vrot.slane %v4712_v48, 2  ;;  %v4855_v30 = vrot.slane %v4714_v13, 2  ;;  %v4746_v39 = vld [vmem:[#allocation2 + $0x270] sm:$0x3]  ;;  %v4896_v40 = vrot.slane %v4740_v31, 2 }
 0x205   : > { %v4889_v44 = vsel %vm1597_vm1, %v4887_v32, %v4888_v33  ;;  %v4907_v28 = vsel %vm1597_vm1, %v4905_v18, %v4906_v19  ;;  %v4897_v41 = vrot.slane %v4742_v23, 2  ;;  %v4902_v61 = vrot.slane %v4744_v37, 2  ;;  %s6791_s28 = scalar_select %p8877_p2, 0, 1 }
 0x206   : > { %5222 = vmatmul.mubr.bf16.vlgmr.msra.gmra.mrb[32].mxu1 %v4948_v25  ;;  %5182 = vmatmul.mubr.bf16.vlgmr.msra.gmra.mrb[0].mxu0 %v4940_v34  ;;  %v4953_v57 = vpack.c.bf16 %v4895_v52, %v4889_v44  ;;  %v4709_v25 = vld [vmem:[#allocation2 + $0x108] sm:$0xfc]  ;;  %v4886_v34 = vsel %vm1597_vm1, %v4884_v58, %v4885_v60  ;;  %v4955_v33 = vpack.c.bf16 %v4907_v28, %v4901_v45  ;;  %v4903_v42 = vrot.slane %v4746_v39, 2 }
 0x207   : > { %5231 = vmatprep.mubr.bf16.mxu1 %v4951_v10  ;;  %5191 = vmatprep.mubr.bf16.mxu0 %v4943_v49  ;;  %v4851_v3 = vrot.slane %v4709_v25, 2  ;;  %v4838_v49 = vsel %vm1597_vm1, %v4836_v47, %v4837_v50  ;;  %v4844_v10 = vsel %vm1597_vm1, %v4842_v53, %v4843_v54  ;;  %v4952_v22 = vpack.c.bf16 %v4892_v5, %v4886_v34  ;;  %p7579_p4 = scmp.eq.s32.totalorder %s6791_s28, 1 }
 0x208   : > { %v4944_v59 = vpack.c.bf16 %v4844_v10, %v4838_v49  ;;  %v4904_v44 = vsel %vm1597_vm1, %v4902_v61, %v4903_v42  ;;  %v4850_v24 = vsel %vm1597_vm1, %v4848_v35, %v4849_v26  ;;  %v4856_v46 = vsel %vm1597_vm1, %v4854_v29, %v4855_v30 }
 0x209   : > { %v4853_v16 = vsel %vm1597_vm1, %v4851_v3, %v4852_v4  ;;  %v4946_v50 = vpack.c.bf16 %v4856_v46, %v4850_v24  ;;  %s8917_s27 = scalar_select %p7579_p4, 255, 0  ;;  %v5296_v23 = vlaneseq }
 0x20a   : > { %v4947_v32 = vpack.c.bf16 %v4859_v17, %v4853_v16 }
 0x20e   : > { %5232 = vmatmul.mubr.bf16.gmra.mrb[36].mxu1 %v4950_v43  ;;  %5192 = vmatmul.mubr.bf16.gmra.mrb[4].mxu0 %v4942_v51  ;;  %v4898_v43 = vsel %vm1597_vm1, %v4896_v40, %v4897_v41  ;;  %v5297_v40 = vshrl.u32 %v5296_v23, 7  ;;  %v7581_v23 = vld [vmem:[#allocation3] sm:%s8917_s27] }
 0x20f   : > { %5241 = vmatprep.mubr.bf16.mxu1 %v4953_v57  ;;  %5201 = vmatprep.mubr.bf16.mxu0 %v4945_v56  ;;  %v4954_v47 = vpack.c.bf16 %v4904_v44, %v4898_v43 }
 0x216   : > { %5242 = vmatmul.mubr.bf16.gmra.mrb[40].mxu1 %v4952_v22  ;;  %5202 = vmatmul.mubr.bf16.gmra.mrb[8].mxu0 %v4944_v59 }
 0x217   : > { %5251 = vmatprep.mubr.bf16.mxu1 %v4955_v33  ;;  %5211 = vmatprep.mubr.bf16.mxu0 %v4947_v32 }
 0x21e   : > { %5252 = vmatmul.mubr.bf16.gmra.mrb[44].mxu1 %v4954_v47  ;;  %5212 = vmatmul.mubr.bf16.gmra.mrb[12].mxu0 %v4946_v50  ;;  %v8939_v50 = vsub.s32 0, %v5297_v40 }
 0x298   : > { %v8883_v51 = vpop.f32.mrb[0].mxu1 }
 0x299   : > { %v8885_v52 = vpop.f32.mrb[1].mxu1 }
 0x29a   : > { %v8887_v53 = vpop.f32.mrb[2].mxu1 }
 0x29b   : > { %v8889_v54 = vpop.f32.mrb[3].mxu1 }
 0x2a0   : > { %v8891_v55 = vpop.f32.mrb[4].mxu1 }
 0x2a1   : > { %v8893_v27 = vpop.f32.mrb[5].mxu1 }
 0x2a2   : > { %v8895_v56 = vpop.f32.mrb[6].mxu1 }
 0x2a3   : > { %v8897_v57 = vpop.f32.mrb[7].mxu1 }
 0x2a8   : > { %v8899_v36 = vpop.f32.mrb[8].mxu1 }
 0x2a9   : > { %v8901_v7 = vpop.f32.mrb[9].mxu1 }
 0x2aa   : > { %v8903_v58 = vpop.f32.mrb[10].mxu1 }
 0x2ab   : > { %v8905_v60 = vpop.f32.mrb[11].mxu1 }
 0x2b0   : > { %v8907_v2 = vpop.f32.mrb[12].mxu1 }
 0x2b1   : > { %v8909_v62 = vpop.f32.mrb[13].mxu1 }
 0x2b2   : > { %v8911_v25 = vpop.f32.mrb[14].mxu1 }
 0x2b3   : > { %v8913_v63 = vpop.f32.mrb[15].mxu1 }
 0x2b8   : > { %v2396_v0 = vpop.f32.mrb[16].mxu1 }
 0x2b9   : > { %v2398_v1 = vpop.f32.mrb[17].mxu1  ;;  %v4613_v3 = vpop.f32.mrb[16].mxu0 }
 0x2ba   : > { %v2400_v4 = vpop.f32.mrb[18].mxu1  ;;  %v6847_v34 = vadd.f32 %v4613_v3, %v2396_v0  ;;  %v4615_v5 = vpop.f32.mrb[17].mxu0  ;;  %v5294_v3 = vld [vmem:[%s286_s30] sm:$0x3] }
 0x2bb   : > { %v2402_v6 = vpop.f32.mrb[19].mxu1  ;;  %v6849_v8 = vadd.f32 %v4615_v5, %v2398_v1  ;;  %v4617_v38 = vpop.f32.mrb[18].mxu0 }
 0x2bc   : > { %v6851_v9 = vadd.f32 %v4617_v38, %v2400_v4  ;;  %v4619_v49 = vpop.f32.mrb[19].mxu0  ;;  %v8945_v4 = vsub.s32 1, %v5297_v40 }
 0x2bd   : > { %v8915_v10 = vadd.f32 %v4619_v49, %v2402_v6  ;;  %v8950_v6 = vrot.slane %v5294_v3, %v8939_v50 }
 0x2be   : > { %v8953_v49 = vrot.slane %v5294_v3, %v8945_v4 }
 0x2c0   : > { %v2406_v11 = vpop.f32.mrb[20].mxu1 }
 0x2c1   : > { %v2408_v12 = vpop.f32.mrb[21].mxu1  ;;  %v4623_v14 = vpop.f32.mrb[20].mxu0 }
 0x2c2   : > { %v2410_v15 = vpop.f32.mrb[22].mxu1  ;;  %v8919_v16 = vadd.f32 %v4623_v14, %v2406_v11  ;;  %v4625_v17 = vpop.f32.mrb[21].mxu0 }
 0x2c3   : > { %v2412_v18 = vpop.f32.mrb[23].mxu1  ;;  %v8921_v19 = vadd.f32 %v4625_v17, %v2408_v12  ;;  %v4627_v20 = vpop.f32.mrb[22].mxu0 }
 0x2c4   : > { %v8923_v21 = vadd.f32 %v4627_v20, %v2410_v15  ;;  %v4629_v22 = vpop.f32.mrb[23].mxu0 }
 0x2c5   : > { %v8925_v45 = vadd.f32 %v4629_v22, %v2412_v18 }
 0x2c8   : > { %v2416_v48 = vpop.f32.mrb[24].mxu1 }
 0x2c9   : > { %v2418_v13 = vpop.f32.mrb[25].mxu1  ;;  %v4633_v35 = vpop.f32.mrb[24].mxu0 }
 0x2ca   : > { %v2420_v26 = vpop.f32.mrb[26].mxu1  ;;  %v8927_v59 = vadd.f32 %v4633_v35, %v2416_v48  ;;  %v4635_v28 = vpop.f32.mrb[25].mxu0 }
 0x2cb   : > { %v2422_v29 = vpop.f32.mrb[27].mxu1  ;;  %v8929_v30 = vadd.f32 %v4635_v28, %v2418_v13  ;;  %v4637_v31 = vpop.f32.mrb[26].mxu0 }
 0x2cc   : > { %v8931_v32 = vadd.f32 %v4637_v31, %v2420_v26  ;;  %v4639_v33 = vpop.f32.mrb[27].mxu0 }
 0x2cd   : > { %v8933_v37 = vadd.f32 %v4639_v33, %v2422_v29 }
 0x2d0   : > { %v2426_v39 = vpop.f32.mrb[28].mxu1 }
 0x2d1   : > { %v2428_v41 = vpop.f32.mrb[29].mxu1  ;;  %v4643_v61 = vpop.f32.mrb[28].mxu0 }
 0x2d2   : > { %v2430_v42 = vpop.f32.mrb[30].mxu1  ;;  %v8935_v43 = vadd.f32 %v4643_v61, %v2426_v39  ;;  %v4645_v44 = vpop.f32.mrb[29].mxu0  ;;  %v7590_v39 = vld [vmem:[#allocation3 + $0x88] sm:%s8917_s27] }
 0x2d3   : > { %v2432_v24 = vpop.f32.mrb[31].mxu1  ;;  %v8937_v46 = vadd.f32 %v4645_v44, %v2428_v41  ;;  %v4647_v47 = vpop.f32.mrb[30].mxu0  ;;  %v7587_v61 = vld [vmem:[#allocation3 + $0x8] sm:%s8917_s27]  ;;  %v7596_v44 = vld [vmem:[#allocation3 + $0x90] sm:%s8917_s27] }
 0x2d4   : > { %v8941_v0 = vadd.f32 %v4647_v47, %v2430_v42  ;;  %v4649_v1 = vpop.f32.mrb[31].mxu0 }
 0x2d5   : > { %v8947_v5 = vadd.f32 %v4649_v1, %v2432_v24  ;;  %v7593_v1 = vld [vmem:[#allocation3 + $0x10] sm:%s8917_s27] }
 0x2d9   : > { %v5223_v38 = vpop.f32.mrb[32].mxu1  ;;  %v5183_v11 = vpop.f32.mrb[0].mxu0 }
 0x2da   : > { %v6848_v12 = vadd.f32 %v6847_v34, %v5223_v38  ;;  %v5225_v14 = vpop.f32.mrb[33].mxu1  ;;  %v6831_v15 = vadd.f32 %v5183_v11, %v8883_v51  ;;  %v5185_v17 = vpop.f32.mrb[1].mxu0  ;;  %v7584_v34 = vld [vmem:[#allocation3 + $0x80] sm:%s8917_s27]  ;;  %v7602_v11 = vld [vmem:[#allocation3 + $0x98] sm:%s8917_s27] }
 0x2db   : > { %v6850_v18 = vadd.f32 %v6849_v8, %v5225_v14  ;;  %v5227_v20 = vpop.f32.mrb[34].mxu1  ;;  %v6832_v48 = vadd.f32 %v5185_v17, %v8885_v52  ;;  %v5187_v13 = vpop.f32.mrb[2].mxu0 }
 0x2dc   : > { %v5322_v22 = vadd.f32 %v6848_v12, %v8950_v6  ;;  %v6852_v35 = vadd.f32 %v6851_v9, %v5227_v20  ;;  %v5229_v26 = vpop.f32.mrb[35].mxu1  ;;  %v5306_v28 = vadd.f32 %v6831_v15, %v8950_v6  ;;  %v6833_v51 = vadd.f32 %v5187_v13, %v8887_v53  ;;  %v5189_v31 = vpop.f32.mrb[3].mxu0  ;;  %v7599_v15 = vld [vmem:[#allocation3 + $0x18] sm:%s8917_s27] }
 0x2dd   : > { %v5323_v29 = vadd.f32 %v6850_v18, %v8953_v49  ;;  %v6854_v8 = vadd.f32 %v8915_v10, %v5229_v26  ;;  %v5307_v52 = vadd.f32 %v6832_v48, %v8953_v49  ;;  %v6834_v40 = vadd.f32 %v5189_v31, %v8889_v54 }
 0x2de   : > { %v5354_v33 = vmax.f32 %v5322_v22, 0.0  ;;  %v5324_v9 = vadd.f32 %v6852_v35, %v8950_v6  ;;  %v5338_v41 = vmax.f32 %v5306_v28, 0.0  ;;  %v5308_v53 = vadd.f32 %v6833_v51, %v8950_v6 }
 0x2df   : > { %v5355_v42 = vmax.f32 %v5323_v29, 0.0  ;;  %v5325_v24 = vadd.f32 %v6854_v8, %v8953_v49  ;;  %v5339_v47 = vmax.f32 %v5307_v52, 0.0  ;;  %v5309_v38 = vadd.f32 %v6834_v40, %v8953_v49 }
 0x2e0   : > { %v8972_v10 = vadd.f32 %v7584_v34, %v5354_v33  ;;  %v5356_v3 = vmax.f32 %v5324_v9, 0.0  ;;  %v8977_v12 = vadd.f32 %v7581_v23, %v5338_v41  ;;  %v5340_v14 = vmax.f32 %v5308_v53, 0.0  ;;  %v7605_v53 = vld [vmem:[#allocation3 + $0x20] sm:%s8917_s27] }
 0x2e1   : > { %v8979_v54 = vadd.f32 %v7590_v39, %v5355_v42  ;;  %v5357_v17 = vmax.f32 %v5325_v24, 0.0  ;;  %v5233_v18 = vpop.f32.mrb[36].mxu1  ;;  %v8982_v20 = vadd.f32 %v7587_v61, %v5339_v47  ;;  %v5341_v48 = vmax.f32 %v5309_v38, 0.0  ;;  %v5193_v13 = vpop.f32.mrb[4].mxu0  ;;  %v7614_v24 = vld [vmem:[#allocation3 + $0xa8] sm:%s8917_s27] }
 0x2e2   : > { %v8984_v22 = vadd.f32 %v7596_v44, %v5356_v3  ;;  %v6856_v35 = vadd.f32 %v8919_v16, %v5233_v18  ;;  %v5235_v26 = vpop.f32.mrb[37].mxu1  ;;  %v8987_v28 = vadd.f32 %v7593_v1, %v5340_v14  ;;  %v6835_v29 = vadd.f32 %v5193_v13, %v8891_v55  ;;  %v5195_v51 = vpop.f32.mrb[5].mxu0  ;;  %v7611_v3 = vld [vmem:[#allocation3 + $0x28] sm:%s8917_s27]  ;;  %v7620_v14 = vld [vmem:[#allocation3 + $0xb0] sm:%s8917_s27] }
 0x2e3   : > { %v8989_v34 = vadd.f32 %v7602_v11, %v5357_v17  ;;  %v6858_v31 = vadd.f32 %v8921_v19, %v5235_v26  ;;  %v5237_v8 = vpop.f32.mrb[38].mxu1  ;;  %v8993_v23 = vadd.f32 %v7599_v15, %v5341_v48  ;;  %v6836_v16 = vadd.f32 %v5195_v51, %v8893_v27  ;;  %v5197_v52 = vpop.f32.mrb[6].mxu0  ;;  %v7608_v19 = vld [vmem:[#allocation3 + $0xa0] sm:%s8917_s27]  ;;  %v7617_v18 = vld [vmem:[#allocation3 + $0x30] sm:%s8917_s27] }
 0x2e4   : > { %v5326_v33 = vadd.f32 %v6856_v35, %v8950_v6  ;;  %v6860_v39 = vadd.f32 %v8923_v21, %v5237_v8  ;;  %v5239_v9 = vpop.f32.mrb[39].mxu1  ;;  %v5487_v55 = vadd.f32 %v8987_v28, %v8977_v12  ;;  %v5310_v40 = vadd.f32 %v6835_v29, %v8950_v6  ;;  %v5199_v42 = vpop.f32.mrb[7].mxu0 }
 0x2e5   : > { %v5327_v41 = vadd.f32 %v6858_v31, %v8953_v49  ;;  %v6837_v61 = vadd.f32 %v5197_v52, %v8895_v56  ;;  %v5508_v27 = vadd.f32 %v8993_v23, %v8982_v20  ;;  %v5311_v21 = vadd.f32 %v6836_v16, %v8953_v49 }
 0x2e6   : > { %v5358_v44 = vmax.f32 %v5326_v33, 0.0  ;;  %v5328_v47 = vadd.f32 %v6860_v39, %v8950_v6  ;;  %v5342_v1 = vmax.f32 %v5310_v40, 0.0  ;;  %v6838_v56 = vadd.f32 %v5199_v42, %v8897_v57  ;;  %v7623_v57 = vld [vmem:[#allocation3 + $0x38] sm:%s8917_s27] }
 0x2e7   : > { %v5359_v38 = vmax.f32 %v5327_v41, 0.0  ;;  %v5312_v11 = vadd.f32 %v6837_v61, %v8950_v6  ;;  %v5343_v17 = vmax.f32 %v5311_v21, 0.0  ;;  %v6862_v13 = vadd.f32 %v8925_v45, %v5239_v9  ;;  %v7626_v41 = vld [vmem:[#allocation3 + $0xb8] sm:%s8917_s27] }
 0x2e8   : > { %v9014_v15 = vadd.f32 %v7608_v19, %v5358_v44  ;;  %v5360_v48 = vmax.f32 %v5328_v47, 0.0  ;;  %v9018_v35 = vadd.f32 %v7605_v53, %v5342_v1  ;;  %v5313_v51 = vadd.f32 %v6838_v56, %v8953_v49  ;;  %v7629_v56 = vld [vmem:[#allocation3 + $0x40] sm:%s8917_s27] }
 0x2e9   : > { %v9020_v26 = vadd.f32 %v7614_v24, %v5359_v38  ;;  %v5344_v29 = vmax.f32 %v5312_v11, 0.0  ;;  %v5243_v31 = vpop.f32.mrb[40].mxu1  ;;  %v9023_v8 = vadd.f32 %v7611_v3, %v5343_v17  ;;  %v5329_v16 = vadd.f32 %v6862_v13, %v8953_v49  ;;  %v5203_v52 = vpop.f32.mrb[8].mxu0 }
 0x2ea   : > { %v9025_v33 = vadd.f32 %v7620_v14, %v5360_v48  ;;  %v6864_v39 = vadd.f32 %v8927_v59, %v5243_v31  ;;  %v5245_v45 = vpop.f32.mrb[41].mxu1  ;;  %v5488_v9 = vadd.f32 %v5487_v55, %v9018_v35  ;;  %v5345_v19 = vmax.f32 %v5313_v51, 0.0  ;;  %v5205_v42 = vpop.f32.mrb[9].mxu0 }
 0x2eb   : > { %v9031_v40 = vadd.f32 %v7617_v18, %v5344_v29  ;;  %v6839_v61 = vadd.f32 %v5203_v52, %v8899_v36  ;;  %v5247_v53 = vpop.f32.mrb[42].mxu1  ;;  %v5509_v44 = vadd.f32 %v5508_v27, %v9023_v8  ;;  %v5361_v21 = vmax.f32 %v5329_v16, 0.0  ;;  %v5207_v47 = vpop.f32.mrb[10].mxu0  ;;  %v7632_v36 = vld [vmem:[#allocation3 + $0xc0] sm:%s8917_s27]  ;;  %v7635_v29 = vld [vmem:[#allocation3 + $0x48] sm:%s8917_s27] }
 0x2ec   : > { %v5330_v24 = vadd.f32 %v6864_v39, %v8950_v6  ;;  %v6840_v59 = vadd.f32 %v5205_v42, %v8901_v7  ;;  %v5249_v55 = vpop.f32.mrb[43].mxu1  ;;  %v9039_v3 = vadd.f32 %v7623_v57, %v5345_v19  ;;  %v6866_v11 = vadd.f32 %v8929_v30, %v5245_v45  ;;  %v5209_v14 = vpop.f32.mrb[11].mxu0  ;;  %v7638_v16 = vld [vmem:[#allocation3 + $0xc8] sm:%s8917_s27] }
 0x2ed   : > { %v5489_v1 = vadd.f32 %v5488_v9, %v9031_v40  ;;  %v5314_v38 = vadd.f32 %v6839_v61, %v8950_v6  ;;  %v9044_v27 = vadd.f32 %v7626_v41, %v5361_v21  ;;  %v6841_v18 = vadd.f32 %v5207_v47, %v8903_v58  ;;  %v7641_v9 = vld [vmem:[#allocation3 + $0x50] sm:%s8917_s27] }
 0x2ee   : > { %v5362_v17 = vmax.f32 %v5330_v24, 0.0  ;;  %v5315_v7 = vadd.f32 %v6840_v59, %v8953_v49  ;;  %v5510_v48 = vadd.f32 %v5509_v44, %v9039_v3  ;;  %v5331_v51 = vadd.f32 %v6866_v11, %v8953_v49 }
 0x2ef   : > { %v5346_v13 = vmax.f32 %v5314_v38, 0.0  ;;  %v6868_v31 = vadd.f32 %v8931_v32, %v5247_v53  ;;  %v5316_v52 = vadd.f32 %v6841_v18, %v8950_v6  ;;  %v6842_v39 = vadd.f32 %v5209_v14, %v8905_v60  ;;  %v7644_v53 = vld [vmem:[#allocation3 + $0xd0] sm:%s8917_s27] }
 0x2f0   : > { %v9053_v30 = vadd.f32 %v7632_v36, %v5362_v17  ;;  %v5347_v57 = vmax.f32 %v5315_v7, 0.0  ;;  %v5363_v58 = vmax.f32 %v5331_v51, 0.0  ;;  %v6870_v41 = vadd.f32 %v8933_v37, %v5249_v55  ;;  %v7647_v36 = vld [vmem:[#allocation3 + $0x58] sm:%s8917_s27] }
 0x2f1   : > { %v9058_v45 = vadd.f32 %v7629_v56, %v5346_v13  ;;  %v5332_v19 = vadd.f32 %v6868_v31, %v8950_v6  ;;  %v5253_v61 = vpop.f32.mrb[44].mxu1  ;;  %v5348_v32 = vmax.f32 %v5316_v52, 0.0  ;;  %v5317_v44 = vadd.f32 %v6842_v39, %v8953_v49  ;;  %v5213_v21 = vpop.f32.mrb[12].mxu0  ;;  %v7650_v7 = vld [vmem:[#allocation3 + $0xd8] sm:%s8917_s27]  ;;  %v7656_v39 = vld [vmem:[#allocation3 + $0xe0] sm:%s8917_s27] }
 0x2f2   : > { %v9063_v42 = vadd.f32 %v7635_v29, %v5347_v57  ;;  %v6872_v60 = vadd.f32 %v8935_v43, %v5253_v61  ;;  %v5255_v24 = vpop.f32.mrb[45].mxu1  ;;  %v9069_v47 = vadd.f32 %v7638_v16, %v5363_v58  ;;  %v5333_v37 = vadd.f32 %v6870_v41, %v8953_v49  ;;  %v5215_v55 = vpop.f32.mrb[13].mxu0 }
 0x2f3   : > { %v5490_v59 = vadd.f32 %v5489_v1, %v9058_v45  ;;  %v5364_v38 = vmax.f32 %v5332_v19, 0.0  ;;  %v5257_v11 = vpop.f32.mrb[46].mxu1  ;;  %v9074_v56 = vadd.f32 %v7641_v9, %v5348_v32  ;;  %v5349_v17 = vmax.f32 %v5317_v44, 0.0  ;;  %v5217_v18 = vpop.f32.mrb[14].mxu0  ;;  %v7653_v9 = vld [vmem:[#allocation3 + $0x60] sm:%s8917_s27] }
 0x2f4   : > { %v5511_v14 = vadd.f32 %v5510_v48, %v9063_v42  ;;  %v6843_v43 = vadd.f32 %v5213_v21, %v8907_v2  ;;  %v5259_v1 = vpop.f32.mrb[47].mxu1  ;;  %v5365_v29 = vmax.f32 %v5333_v37, 0.0  ;;  %v5334_v51 = vadd.f32 %v6872_v60, %v8950_v6  ;;  %v5219_v57 = vpop.f32.mrb[15].mxu0  ;;  %v7665_v37 = vld [vmem:[#allocation3 + $0x70] sm:%s8917_s27] }
 0x2f5   : > { %v9078_v13 = vadd.f32 %v7644_v53, %v5364_v38  ;;  %v6844_v31 = vadd.f32 %v5215_v55, %v8909_v62  ;;  %v5491_v48 = vadd.f32 %v5490_v59, %v9074_v56  ;;  %v9083_v16 = vadd.f32 %v7647_v36, %v5349_v17  ;;  %v7659_v53 = vld [vmem:[#allocation3 + $0x68] sm:%s8917_s27] }
 0x2f6   : > { %v5318_v52 = vadd.f32 %v6843_v43, %v8950_v6  ;;  %v6874_v2 = vadd.f32 %v8937_v46, %v5255_v24  ;;  %v9088_v58 = vadd.f32 %v7650_v7, %v5365_v29  ;;  %v5366_v19 = vmax.f32 %v5334_v51, 0.0  ;;  %v7662_v24 = vld [vmem:[#allocation3 + $0xe8] sm:%s8917_s27]  ;;  %v7671_v51 = vld [vmem:[#allocation3 + $0x78] sm:%s8917_s27] }
 0x2f7   : > { %v5319_v41 = vadd.f32 %v6844_v31, %v8953_v49  ;;  %v6845_v62 = vadd.f32 %v5217_v18, %v8911_v25  ;;  %v5512_v61 = vadd.f32 %v5511_v14, %v9083_v16  ;;  %v6876_v21 = vadd.f32 %v8941_v0, %v5257_v11  ;;  %v7668_v11 = vld [vmem:[#allocation3 + $0xf0] sm:%s8917_s27] }
 0x2f8   : > { %v5350_v32 = vmax.f32 %v5318_v52, 0.0  ;;  %v5335_v44 = vadd.f32 %v6874_v2, %v8953_v49  ;;  %v9097_v60 = vadd.f32 %v7656_v39, %v5366_v19  ;;  %v6846_v38 = vadd.f32 %v5219_v57, %v8913_v63 }
 0x2f9   : > { %v5351_v46 = vmax.f32 %v5319_v41, 0.0  ;;  %v5320_v59 = vadd.f32 %v6845_v62, %v8950_v6  ;;  %v5336_v55 = vadd.f32 %v6876_v21, %v8950_v6  ;;  %v6878_v14 = vadd.f32 %v8947_v5, %v5259_v1  ;;  %v7674_v6 = vld [vmem:[#allocation3 + $0xf8] sm:%s8917_s27] }
 0x2fa   : > { %v5465_v36 = vadd.f32 %v7653_v9, %v5350_v32  ;;  %v5367_v25 = vmax.f32 %v5335_v44, 0.0  ;;  %v5321_v7 = vadd.f32 %v6846_v38, %v8953_v49 }
 0x2fb   : > { %v9105_v17 = vadd.f32 %v7659_v53, %v5351_v46  ;;  %v5352_v0 = vmax.f32 %v5320_v59, 0.0  ;;  %v5368_v29 = vmax.f32 %v5336_v55, 0.0  ;;  %v5337_v63 = vadd.f32 %v6878_v14, %v8953_v49 }
 0x2fc   : > { %v5492_v43 = vadd.f32 %v5491_v48, %v5465_v36  ;;  %v9109_v18 = vadd.f32 %v7662_v24, %v5367_v25  ;;  %v5353_v52 = vmax.f32 %v5321_v7, 0.0 }
 0x2fd   : > { %v5513_v31 = vadd.f32 %v5512_v61, %v9105_v17  ;;  %v5467_v57 = vadd.f32 %v7665_v37, %v5352_v0  ;;  %v5483_v39 = vadd.f32 %v7668_v11, %v5368_v29  ;;  %v5369_v5 = vmax.f32 %v5337_v63, 0.0 }
 0x2fe   : > { %v9115_v2 = vadd.f32 %v7671_v51, %v5353_v52 }
 0x2ff   : > { %v5493_v1 = vadd.f32 %v5492_v43, %v5467_v57  ;;  %v9117_v9 = vadd.f32 %v7674_v6, %v5369_v5 }
 0x300   : > { %v5514_v19 = vadd.f32 %v5513_v31, %v9115_v2 }
 0x301   : > { %v5494_v48 = vadd.f32 %v5493_v1, %v8972_v10 }
 0x302   : > { %v5515_v49 = vadd.f32 %v5514_v19, %v8979_v54 }
 0x303   : > { %v5495_v41 = vadd.f32 %v5494_v48, %v8984_v22 }
 0x304   : > { %v5516_v61 = vadd.f32 %v5515_v49, %v8989_v34 }
 0x305   : > { %v5496_v62 = vadd.f32 %v5495_v41, %v9014_v15 }
 0x306   : > { %v5517_v53 = vadd.f32 %v5516_v61, %v9020_v26 }
 0x307   : > { %v5497_v32 = vadd.f32 %v5496_v62, %v9025_v33 }
 0x308   : > { %v5518_v21 = vadd.f32 %v5517_v53, %v9044_v27 }
 0x309   : > { %v5498_v44 = vadd.f32 %v5497_v32, %v9053_v30 }
 0x30a   : > { %v5519_v24 = vadd.f32 %v5518_v21, %v9069_v47 }
 0x30b   : > { %v5499_v46 = vadd.f32 %v5498_v44, %v9078_v13 }
 0x30c   : > { %v5520_v38 = vadd.f32 %v5519_v24, %v9088_v58 }
 0x30d   : > { %v5500_v59 = vadd.f32 %v5499_v46, %v9097_v60 }
 0x30e   : > { %v5521_v37 = vadd.f32 %v5520_v38, %v9109_v18 }
 0x30f   : > { %v5501_v25 = vadd.f32 %v5500_v59, %v5483_v39 }
 0x310   : > { %v5522_v14 = vadd.f32 %v5521_v37, %v9117_v9 }
 0x311   : > { %v5502_v55 = vrot.slane %v5501_v25, 4 }
 0x312   : > { %v5523_v11 = vrot.slane %v5522_v14, 4 }
 0x313   : > { %v5503_v0 = vadd.f32 %v5502_v55, %v5501_v25 }
 0x314   : > { %v5524_v43 = vadd.f32 %v5523_v11, %v5522_v14 }
 0x315   : > { %v5504_v7 = vrot.slane %v5503_v0, 2 }
 0x316   : > { %v5525_v63 = vrot.slane %v5524_v43, 2 }
 0x317   : > { %v5505_v29 = vadd.f32 %v5504_v7, %v5503_v0 }
 0x318   : > { %v5526_v6 = vadd.f32 %v5525_v63, %v5524_v43 }
 0x319   : > { %v5506_v51 = vrot.slane %v5505_v29, 1 }
 0x31b   : > { %v5507_v31 = vadd.f32 %v5506_v51, %v5505_v29 }
 0x31d   : > { %v5530_v52 = vmul.f32 0.0078125, %v5507_v31 }
 0x31f   : > { %v9136_v5 = vsub.f32 %v8977_v12, %v5530_v52  ;;  %v9139_v1 = vsub.f32 %v8987_v28, %v5530_v52  ;;  %v9142_v48 = vsub.f32 %v9018_v35, %v5530_v52  ;;  %v9145_v19 = vsub.f32 %v9031_v40, %v5530_v52 }
 0x320   : > { %v9148_v41 = vsub.f32 %v9058_v45, %v5530_v52  ;;  %v9151_v49 = vsub.f32 %v9074_v56, %v5530_v52  ;;  %v9153_v62 = vsub.f32 %v5465_v36, %v5530_v52  ;;  %v9155_v61 = vsub.f32 %v5467_v57, %v5530_v52 }
 0x321   : > { %v9158_v12 = vsub.f32 %v8972_v10, %v5530_v52  ;;  %v9161_v28 = vsub.f32 %v8984_v22, %v5530_v52  ;;  %v9164_v35 = vsub.f32 %v9014_v15, %v5530_v52  ;;  %v9167_v40 = vsub.f32 %v9025_v33, %v5530_v52 }
 0x322   : > { %v9170_v45 = vsub.f32 %v9053_v30, %v5530_v52  ;;  %v9173_v56 = vsub.f32 %v9078_v13, %v5530_v52  ;;  %v9176_v36 = vsub.f32 %v9097_v60, %v5530_v52  ;;  %v9178_v10 = vsub.f32 %v5483_v39, %v5530_v52 }
 0x323   : > { %v5564_v22 = vmul.f32 %v9136_v5, %v9136_v5  ;;  %v5566_v15 = vmul.f32 %v9139_v1, %v9139_v1  ;;  %v5527_v57 = vrot.slane %v5526_v6, 1  ;;  %v5568_v33 = vmul.f32 %v9142_v48, %v9142_v48 }
 0x324   : > { %v5570_v13 = vmul.f32 %v9145_v19, %v9145_v19  ;;  %v5572_v60 = vmul.f32 %v9148_v41, %v9148_v41  ;;  %v5574_v21 = vmul.f32 %v9151_v49, %v9151_v49  ;;  %v5576_v46 = vmul.f32 %v9153_v62, %v9153_v62 }
 0x325   : > { %v5596_v30 = vadd.f32 %v5566_v15, %v5564_v22  ;;  %v5528_v32 = vadd.f32 %v5527_v57, %v5526_v6  ;;  %v5582_v43 = vmul.f32 %v9161_v28, %v9161_v28  ;;  %v5586_v6 = vmul.f32 %v9167_v40, %v9167_v40 }
 0x327   : > { %v5597_v53 = vadd.f32 %v5596_v30, %v5568_v33  ;;  %v5531_v44 = vmul.f32 0.0078125, %v5528_v32  ;;  %v5588_v33 = vmul.f32 %v9170_v45, %v9170_v45 }
 0x329   : > { %v5598_v39 = vadd.f32 %v5597_v53, %v5570_v13  ;;  %v9195_v59 = vsub.f32 %v8982_v20, %v5531_v44  ;;  %v9198_v38 = vsub.f32 %v8993_v23, %v5531_v44  ;;  %v9201_v25 = vsub.f32 %v9023_v8, %v5531_v44 }
 0x32a   : > { %v9204_v37 = vsub.f32 %v9039_v3, %v5531_v44  ;;  %v9207_v55 = vsub.f32 %v9063_v42, %v5531_v44  ;;  %v9210_v14 = vsub.f32 %v9083_v16, %v5531_v44  ;;  %v9213_v0 = vsub.f32 %v9105_v17, %v5531_v44 }
 0x32b   : > { %v5599_v24 = vadd.f32 %v5598_v39, %v5572_v60  ;;  %v9216_v11 = vsub.f32 %v9115_v2, %v5531_v44  ;;  %v9219_v23 = vsub.f32 %v8979_v54, %v5531_v44  ;;  %v9222_v8 = vsub.f32 %v8989_v34, %v5531_v44 }
 0x32c   : > { %v9225_v3 = vsub.f32 %v9020_v26, %v5531_v44  ;;  %v9228_v42 = vsub.f32 %v9044_v27, %v5531_v44  ;;  %v9231_v16 = vsub.f32 %v9069_v47, %v5531_v44  ;;  %v9234_v17 = vsub.f32 %v9088_v58, %v5531_v44 }
 0x32d   : > { %v5600_v20 = vadd.f32 %v5599_v24, %v5574_v21  ;;  %v5578_v2 = vmul.f32 %v9155_v61, %v9155_v61  ;;  %v9239_v7 = vsub.f32 %v9109_v18, %v5531_v44  ;;  %v9242_v34 = vsub.f32 %v9117_v9, %v5531_v44 }
 0x32e   : > { %v5565_v26 = vmul.f32 %v9195_v59, %v9195_v59  ;;  %v5567_v27 = vmul.f32 %v9198_v38, %v9198_v38  ;;  %v5580_v47 = vmul.f32 %v9158_v12, %v9158_v12  ;;  %v5569_v18 = vmul.f32 %v9201_v25, %v9201_v25 }
 0x32f   : > { %v5601_v54 = vadd.f32 %v5600_v20, %v5576_v46  ;;  %v5584_v9 = vmul.f32 %v9164_v35, %v9164_v35  ;;  %v5571_v31 = vmul.f32 %v9204_v37, %v9204_v37  ;;  %v5573_v15 = vmul.f32 %v9207_v55, %v9207_v55 }
 0x330   : > { %v5617_v51 = vadd.f32 %v5567_v27, %v5565_v26  ;;  %v5575_v32 = vmul.f32 %v9210_v14, %v9210_v14  ;;  %v5590_v53 = vmul.f32 %v9173_v56, %v9173_v56  ;;  %v5577_v39 = vmul.f32 %v9213_v0, %v9213_v0 }
 0x331   : > { %v5602_v58 = vadd.f32 %v5601_v54, %v5578_v2  ;;  %v5592_v21 = vmul.f32 %v9176_v36, %v9176_v36  ;;  %v5579_v24 = vmul.f32 %v9216_v11, %v9216_v11  ;;  %v5594_v2 = vmul.f32 %v9178_v10, %v9178_v10 }
 0x332   : > { %v5618_v52 = vadd.f32 %v5617_v51, %v5569_v18  ;;  %v5581_v26 = vmul.f32 %v9219_v23, %v9219_v23  ;;  %v5585_v18 = vmul.f32 %v9225_v3, %v9225_v3 }
 0x333   : > { %v5603_v29 = vadd.f32 %v5602_v58, %v5580_v47  ;;  %v5583_v58 = vmul.f32 %v9222_v8, %v9222_v8 }
 0x334   : > { %v5619_v57 = vadd.f32 %v5618_v52, %v5571_v31 }
 0x335   : > { %v5604_v63 = vadd.f32 %v5603_v29, %v5582_v43 }
 0x336   : > { %v5620_v13 = vadd.f32 %v5619_v57, %v5573_v15  ;;  %v5591_v57 = vmul.f32 %v9234_v17, %v9234_v17 }
 0x337   : > { %v5605_v22 = vadd.f32 %v5604_v63, %v5584_v9  ;;  %v5587_v63 = vmul.f32 %v9228_v42, %v9228_v42 }
 0x338   : > { %v5621_v44 = vadd.f32 %v5620_v13, %v5575_v32  ;;  %v5593_v32 = vmul.f32 %v9239_v7, %v9239_v7 }
 0x339   : > { %v5606_v30 = vadd.f32 %v5605_v22, %v5586_v6  ;;  %v5589_v6 = vmul.f32 %v9231_v16, %v9231_v16 }
 0x33a   : > { %v5622_v20 = vadd.f32 %v5621_v44, %v5577_v39 }
 0x33b   : > { %v5607_v60 = vadd.f32 %v5606_v30, %v5588_v33 }
 0x33c   : > { %v5623_v27 = vadd.f32 %v5622_v20, %v5579_v24  ;;  %v9294_v24 = vld [vmem:[%s295_s25] sm:$0x3] }
 0x33d   : > { %v5608_v46 = vadd.f32 %v5607_v60, %v5590_v53  ;;  %v5595_v60 = vmul.f32 %v9242_v34, %v9242_v34 }
 0x33e   : > { %v5624_v43 = vadd.f32 %v5623_v27, %v5581_v26  ;;  %v9300_v26 = vld [vmem:[%s304_s9] sm:$0x3] }
 0x33f   : > { %v5609_v54 = vadd.f32 %v5608_v46, %v5592_v21 }
 0x340   : > { %v5625_v51 = vadd.f32 %v5624_v43, %v5583_v58  ;;  %v5723_v58 = vrot.slane %v9300_v26, %v8939_v50 }
 0x341   : > { %v5610_v47 = vadd.f32 %v5609_v54, %v5594_v2  ;;  %v5644_v54 = vrot.slane %v9294_v24, %v8939_v50 }
 0x342   : > { %v5626_v31 = vadd.f32 %v5625_v51, %v5585_v18 }
 0x343   : > { %v5611_v29 = vrot.slane %v5610_v47, 4  ;;  %v5651_v43 = vmul.f32 %v5644_v54, %v9136_v5  ;;  %v5655_v18 = vmul.f32 %v5644_v54, %v9142_v48  ;;  %v5657_v51 = vmul.f32 %v5644_v54, %v9145_v19 }
 0x344   : > { %v5627_v22 = vadd.f32 %v5626_v31, %v5587_v63  ;;  %v5661_v31 = vmul.f32 %v5644_v54, %v9151_v49  ;;  %v5669_v50 = vmul.f32 %v5644_v54, %v9161_v28  ;;  %v5671_v5 = vmul.f32 %v5644_v54, %v9164_v35 }
 0x345   : > { %v5612_v9 = vadd.f32 %v5611_v29, %v5610_v47  ;;  %v5653_v29 = vmul.f32 %v5644_v54, %v9139_v1  ;;  %v5673_v1 = vmul.f32 %v5644_v54, %v9167_v40  ;;  %v5675_v48 = vmul.f32 %v5644_v54, %v9170_v45 }
 0x346   : > { %v5628_v33 = vadd.f32 %v5627_v22, %v5589_v6  ;;  %v5665_v6 = vmul.f32 %v5644_v54, %v9155_v61  ;;  %v5667_v22 = vmul.f32 %v5644_v54, %v9158_v12  ;;  %v5681_v49 = vmul.f32 %v5644_v54, %v9178_v10 }
 0x347   : > { %v5613_v52 = vrot.slane %v5612_v9, 2 }
 0x348   : > { %v5629_v13 = vadd.f32 %v5628_v33, %v5591_v57 }
 0x349   : > { %v5614_v15 = vadd.f32 %v5613_v52, %v5612_v9  ;;  %v5659_v9 = vmul.f32 %v5644_v54, %v9148_v41  ;;  %v5663_v52 = vmul.f32 %v5644_v54, %v9153_v62  ;;  %v5677_v41 = vmul.f32 %v5644_v54, %v9173_v56 }
 0x34a   : > { %v5630_v39 = vadd.f32 %v5629_v13, %v5593_v32 }
 0x34b   : > { %v5615_v30 = vrot.slane %v5614_v15, 1 }
 0x34c   : > { %v5631_v21 = vadd.f32 %v5630_v39, %v5595_v60 }
 0x34d   : > { %v5616_v53 = vadd.f32 %v5615_v30, %v5614_v15  ;;  %v5679_v15 = vmul.f32 %v5644_v54, %v9176_v36 }
 0x34e   : > { %v5632_v20 = vrot.slane %v5631_v21, 4 }
 0x34f   : > { %v5638_v44 = vmul.f32 0.0078125, %v5616_v53 }
 0x350   : > { %v5633_v2 = vadd.f32 %v5632_v20, %v5631_v21 }
 0x351   : > { %v5683_v46 = vadd.f32 1e-05, %v5638_v44 }
 0x352   : > { %v5634_v27 = vrot.slane %v5633_v2, 2 }
 0x353   : > { %7675 = vrsqrt.f32 %v5683_v46 }
 0x354   : > { %v5635_v47 = vadd.f32 %v5634_v27, %v5633_v2 }
 0x356   : > { %v5636_v63 = vrot.slane %v5635_v47, 1 }
 0x358   : > { %v9320_v62 = vadd.f32 %v5636_v63, %v5635_v47 }
 0x35d   : > { %v7676_v19 = vpop.eup %7675 }
 0x35e   : > { %v5687_v61 = vmul.f32 %v7676_v19, %v5651_v43  ;;  %v5689_v57 = vmul.f32 %v7676_v19, %v5653_v29  ;;  %v5691_v12 = vmul.f32 %v7676_v19, %v5655_v18  ;;  %v5693_v33 = vmul.f32 %v7676_v19, %v5657_v51 }
 0x35f   : > { %v5695_v28 = vmul.f32 %v7676_v19, %v5659_v9  ;;  %v5697_v30 = vmul.f32 %v7676_v19, %v5661_v31  ;;  %v5699_v35 = vmul.f32 %v7676_v19, %v5663_v52  ;;  %v5701_v32 = vmul.f32 %v7676_v19, %v5665_v6 }
 0x360   : > { %v5703_v40 = vmul.f32 %v7676_v19, %v5667_v22  ;;  %v5705_v13 = vmul.f32 %v7676_v19, %v5669_v50  ;;  %v5707_v45 = vmul.f32 %v7676_v19, %v5671_v5  ;;  %v5709_v53 = vmul.f32 %v7676_v19, %v5673_v1 }
 0x361   : > { %v5711_v60 = vmul.f32 %v7676_v19, %v5675_v48  ;;  %v5713_v56 = vmul.f32 %v7676_v19, %v5677_v41  ;;  %v5715_v39 = vmul.f32 %v7676_v19, %v5679_v15  ;;  %v5717_v36 = vmul.f32 %v7676_v19, %v5681_v49 }
 0x362   : > { %v9322_v44 = vadd.f32 %v5723_v58, %v5687_v61  ;;  %v9324_v10 = vadd.f32 %v5723_v58, %v5689_v57  ;;  %v9326_v21 = vadd.f32 %v5723_v58, %v5691_v12  ;;  %v9328_v46 = vadd.f32 %v5723_v58, %v5693_v33 }
 0x363   : > { %v9330_v20 = vadd.f32 %v5723_v58, %v5695_v28  ;;  %v9332_v2 = vadd.f32 %v5723_v58, %v5697_v30  ;;  %v9334_v54 = vadd.f32 %v5723_v58, %v5699_v35  ;;  %v9336_v27 = vadd.f32 %v5723_v58, %v5701_v32 }
 0x364   : > { %v9338_v47 = vadd.f32 %v5723_v58, %v5703_v40  ;;  %v9340_v43 = vadd.f32 %v5723_v58, %v5705_v13  ;;  %v9342_v29 = vadd.f32 %v5723_v58, %v5707_v45  ;;  %v9344_v18 = vadd.f32 %v5723_v58, %v5709_v53  ;;  %5925 = vst [vmem:[#allocation3] sm:$0xff] (!%p6792_p11), %v9322_v44 }
 0x365   : > { %v9346_v51 = vadd.f32 %v5723_v58, %v5711_v60  ;;  %v9348_v9 = vadd.f32 %v5723_v58, %v5713_v56  ;;  %v9350_v63 = vadd.f32 %v5723_v58, %v5715_v39  ;;  %v9352_v31 = vadd.f32 %v5723_v58, %v5717_v36  ;;  %5927 = vst [vmem:[#allocation3 + $0x10] sm:$0xff] (!%p6792_p11), %v9324_v10 }
 0x366   : > { %v5794_v52 = vrot.slane %v9322_v44, 7  ;;  %v5796_v6 = vrot.slane %v9324_v10, 7  ;;  %v5798_v22 = vrot.slane %v9326_v21, 7  ;;  %v5800_v50 = vrot.slane %v9328_v46, 7  ;;  %5929 = vst [vmem:[#allocation3 + $0x20] sm:$0xff] (!%p6792_p11), %v9326_v21  ;;  %5931 = vst [vmem:[#allocation3 + $0x30] sm:$0xff] (!%p6792_p11), %v9328_v46 }
 0x367   : > { %v5802_v5 = vrot.slane %v9330_v20, 7  ;;  %v5804_v1 = vrot.slane %v9332_v2, 7  ;;  %v5806_v48 = vrot.slane %v9334_v54, 7  ;;  %v5808_v19 = vrot.slane %v9336_v27, 7  ;;  %5933 = vst [vmem:[#allocation3 + $0x40] sm:$0xff] (!%p6792_p11), %v9330_v20  ;;  %5935 = vst [vmem:[#allocation3 + $0x50] sm:$0xff] (!%p6792_p11), %v9332_v2 }
 0x368   : > { %v5810_v41 = vrot.slane %v9338_v47, 7  ;;  %v5812_v58 = vrot.slane %v9340_v43, 7  ;;  %v5814_v15 = vrot.slane %v9342_v29, 7  ;;  %v5816_v49 = vrot.slane %v9344_v18, 7  ;;  %5858 = vst [vmem:[#allocation2 + $0x20] sm:$0xfe] %v5794_v52 }
 0x369   : > { %5860 = vst [vmem:[#allocation2 + $0x30] sm:$0x1] %v5794_v52  ;;  %5862 = vst [vmem:[#allocation2 + $0x40] sm:$0xfe] %v5796_v6  ;;  %v5818_v61 = vrot.slane %v9346_v51, 7  ;;  %v5820_v57 = vrot.slane %v9348_v9, 7  ;;  %v5648_v35 = vrot.slane %v9294_v24, %v8945_v4  ;;  %v5727_v32 = vrot.slane %v9300_v26, %v8945_v4 }
 0x36a   : > { %5864 = vst [vmem:[#allocation2 + $0x50] sm:$0x1] %v5796_v6  ;;  %5866 = vst [vmem:[#allocation2 + $0x60] sm:$0xfe] %v5798_v22  ;;  %v5822_v12 = vrot.slane %v9350_v63, 7  ;;  %v5824_v33 = vrot.slane %v9352_v31, 7 }
 0x36b   : > { %5868 = vst [vmem:[#allocation2 + $0x70] sm:$0x1] %v5798_v22  ;;  %5870 = vst [vmem:[#allocation2 + $0x80] sm:$0xfe] %v5800_v50  ;;  %v5639_v28 = vmul.f32 0.0078125, %v9320_v62  ;;  %v5652_v40 = vmul.f32 %v5648_v35, %v9195_v59  ;;  %v5654_v62 = vmul.f32 %v5648_v35, %v9198_v38  ;;  %v5656_v13 = vmul.f32 %v5648_v35, %v9201_v25 }
 0x36c   : > { %5872 = vst [vmem:[#allocation2 + $0x90] sm:$0x1] %v5800_v50  ;;  %5874 = vst [vmem:[#allocation2 + $0xa0] sm:$0xfe] %v5802_v5  ;;  %v5658_v45 = vmul.f32 %v5648_v35, %v9204_v37  ;;  %v5660_v53 = vmul.f32 %v5648_v35, %v9207_v55  ;;  %v5662_v60 = vmul.f32 %v5648_v35, %v9210_v14 }
 0x36d   : > { %5876 = vst [vmem:[#allocation2 + $0xb0] sm:$0x1] %v5802_v5  ;;  %5878 = vst [vmem:[#allocation2 + $0xc0] sm:$0xfe] %v5804_v1  ;;  %v5684_v30 = vadd.f32 1e-05, %v5639_v28  ;;  %v5664_v56 = vmul.f32 %v5648_v35, %v9213_v0  ;;  %v5666_v39 = vmul.f32 %v5648_v35, %v9216_v11  ;;  %v5668_v24 = vmul.f32 %v5648_v35, %v9219_v23 }
 0x36e   : > { %5880 = vst [vmem:[#allocation2 + $0xd0] sm:$0x1] %v5804_v1  ;;  %5882 = vst [vmem:[#allocation2 + $0xe0] sm:$0xfe] %v5806_v48  ;;  %v5670_v4 = vmul.f32 %v5648_v35, %v9222_v8  ;;  %v5672_v59 = vmul.f32 %v5648_v35, %v9225_v3  ;;  %v5674_v38 = vmul.f32 %v5648_v35, %v9228_v42 }
 0x36f   : > { %5884 = vst [vmem:[#allocation2 + $0xf0] sm:$0x1] %v5806_v48  ;;  %5886 = vst [vmem:[#allocation2 + $0x100] sm:$0xfe] %v5808_v19  ;;  %7677 = vrsqrt.f32 %v5684_v30  ;;  %v5676_v25 = vmul.f32 %v5648_v35, %v9231_v16  ;;  %v5678_v37 = vmul.f32 %v5648_v35, %v9234_v17  ;;  %v5680_v55 = vmul.f32 %v5648_v35, %v9239_v7 }
 0x370   : > { %5888 = vst [vmem:[#allocation2 + $0x110] sm:$0x1] %v5808_v19  ;;  %5890 = vst [vmem:[#allocation2 + $0x160] sm:$0xfe] %v5810_v41  ;;  %v5682_v14 = vmul.f32 %v5648_v35, %v9242_v34 }
 0x371   : > { %5892 = vst [vmem:[#allocation2 + $0x170] sm:$0x1] %v5810_v41  ;;  %5894 = vst [vmem:[#allocation2 + $0x180] sm:$0xfe] %v5812_v58 }
 0x372   : > { %5896 = vst [vmem:[#allocation2 + $0x190] sm:$0x1] %v5812_v58  ;;  %5898 = vst [vmem:[#allocation2 + $0x1a0] sm:$0xfe] %v5814_v15 }
 0x373   : > { %5900 = vst [vmem:[#allocation2 + $0x1b0] sm:$0x1] %v5814_v15  ;;  %5902 = vst [vmem:[#allocation2 + $0x1c0] sm:$0xfe] %v5816_v49 }
 0x374   : > { %5904 = vst [vmem:[#allocation2 + $0x1d0] sm:$0x1] %v5816_v49  ;;  %5906 = vst [vmem:[#allocation2 + $0x1e0] sm:$0xfe] %v5818_v61 }
 0x375   : > { %5908 = vst [vmem:[#allocation2 + $0x1f0] sm:$0x1] %v5818_v61  ;;  %5910 = vst [vmem:[#allocation2 + $0x200] sm:$0xfe] %v5820_v57 }
 0x376   : > { %5912 = vst [vmem:[#allocation2 + $0x210] sm:$0x1] %v5820_v57  ;;  %5914 = vst [vmem:[#allocation2 + $0x220] sm:$0xfe] %v5822_v12 }
 0x377   : > { %5916 = vst [vmem:[#allocation2 + $0x230] sm:$0x1] %v5822_v12  ;;  %5918 = vst [vmem:[#allocation2 + $0x240] sm:$0xfe] %v5824_v33 }
 0x378   : > { %5920 = vst [vmem:[#allocation2 + $0x250] sm:$0x1] %v5824_v33  ;;  %5937 = vst [vmem:[#allocation3 + $0x60] sm:$0xff] (!%p6792_p11), %v9334_v54 }
 0x379   : > { %v7678_v26 = vpop.eup %7677  ;;  %5939 = vst [vmem:[#allocation3 + $0x70] sm:$0xff] (!%p6792_p11), %v9336_v27  ;;  %5941 = vst [vmem:[#allocation3 + $0x80] sm:$0xff] (!%p6792_p11), %v9338_v47 }
 0x37a   : > { %v5688_v0 = vmul.f32 %v7678_v26, %v5652_v40  ;;  %v5690_v36 = vmul.f32 %v7678_v26, %v5654_v62  ;;  %v5692_v11 = vmul.f32 %v7678_v26, %v5656_v13  ;;  %v5694_v52 = vmul.f32 %v7678_v26, %v5658_v45  ;;  %5943 = vst [vmem:[#allocation3 + $0x90] sm:$0xff] (!%p6792_p11), %v9340_v43 }
 0x37b   : > { %v5696_v23 = vmul.f32 %v7678_v26, %v5660_v53  ;;  %v5698_v6 = vmul.f32 %v7678_v26, %v5662_v60  ;;  %v5700_v8 = vmul.f32 %v7678_v26, %v5664_v56  ;;  %v5702_v22 = vmul.f32 %v7678_v26, %v5666_v39  ;;  %5945 = vst [vmem:[#allocation3 + $0xa0] sm:$0xff] (!%p6792_p11), %v9342_v29 }
 0x37c   : > { %v5704_v3 = vmul.f32 %v7678_v26, %v5668_v24  ;;  %v5706_v50 = vmul.f32 %v7678_v26, %v5670_v4  ;;  %v5708_v42 = vmul.f32 %v7678_v26, %v5672_v59  ;;  %v5710_v5 = vmul.f32 %v7678_v26, %v5674_v38  ;;  %5947 = vst [vmem:[#allocation3 + $0xb0] sm:$0xff] (!%p6792_p11), %v9344_v18 }
 0x37d   : > { %v5712_v1 = vmul.f32 %v7678_v26, %v5676_v25  ;;  %v5714_v16 = vmul.f32 %v7678_v26, %v5678_v37  ;;  %v5716_v48 = vmul.f32 %v7678_v26, %v5680_v55  ;;  %v5718_v17 = vmul.f32 %v7678_v26, %v5682_v14  ;;  %5949 = vst [vmem:[#allocation3 + $0xc0] sm:$0xff] (!%p6792_p11), %v9346_v51 }
 0x37e   : > { %v9391_v19 = vadd.f32 %v5727_v32, %v5688_v0  ;;  %v9393_v7 = vadd.f32 %v5727_v32, %v5690_v36  ;;  %v9395_v34 = vadd.f32 %v5727_v32, %v5692_v11  ;;  %v9397_v41 = vadd.f32 %v5727_v32, %v5694_v52  ;;  %5951 = vst [vmem:[#allocation3 + $0xd0] sm:$0xff] (!%p6792_p11), %v9348_v9 }
 0x37f   : > { %v9399_v58 = vadd.f32 %v5727_v32, %v5696_v23  ;;  %v9401_v15 = vadd.f32 %v5727_v32, %v5698_v6  ;;  %v9403_v49 = vadd.f32 %v5727_v32, %v5700_v8  ;;  %v9405_v61 = vadd.f32 %v5727_v32, %v5702_v22  ;;  %5953 = vst [vmem:[#allocation3 + $0xe0] sm:$0xff] (!%p6792_p11), %v9350_v63 }
 0x380   : > { %v9407_v57 = vadd.f32 %v5727_v32, %v5704_v3  ;;  %v9409_v12 = vadd.f32 %v5727_v32, %v5706_v50  ;;  %v9411_v33 = vadd.f32 %v5727_v32, %v5708_v42  ;;  %v9413_v28 = vadd.f32 %v5727_v32, %v5710_v5  ;;  %5926 = vst [vmem:[#allocation3 + $0x8] sm:$0xff] (!%p6792_p11), %v9391_v19 }
 0x381   : > { %v9415_v30 = vadd.f32 %v5727_v32, %v5712_v1  ;;  %v9417_v35 = vadd.f32 %v5727_v32, %v5714_v16  ;;  %v9419_v40 = vadd.f32 %v5727_v32, %v5716_v48  ;;  %v9421_v62 = vadd.f32 %v5727_v32, %v5718_v17  ;;  %5928 = vst [vmem:[#allocation3 + $0x18] sm:$0xff] (!%p6792_p11), %v9393_v7 }
 0x382   : > { %v5795_v13 = vrot.slane %v9391_v19, 7  ;;  %v5797_v45 = vrot.slane %v9393_v7, 7  ;;  %v5799_v53 = vrot.slane %v9395_v34, 7  ;;  %v5801_v60 = vrot.slane %v9397_v41, 7  ;;  %5930 = vst [vmem:[#allocation3 + $0x28] sm:$0xff] (!%p6792_p11), %v9395_v34  ;;  %5932 = vst [vmem:[#allocation3 + $0x38] sm:$0xff] (!%p6792_p11), %v9397_v41 }
 0x383   : > { %v5803_v56 = vrot.slane %v9399_v58, 7  ;;  %v5805_v39 = vrot.slane %v9401_v15, 7  ;;  %v5807_v24 = vrot.slane %v9403_v49, 7  ;;  %v5809_v4 = vrot.slane %v9405_v61, 7  ;;  %5934 = vst [vmem:[#allocation3 + $0x48] sm:$0xff] (!%p6792_p11), %v9399_v58  ;;  %5936 = vst [vmem:[#allocation3 + $0x58] sm:$0xff] (!%p6792_p11), %v9401_v15 }
 0x384   : > { %v5811_v59 = vrot.slane %v9407_v57, 7  ;;  %v5813_v32 = vrot.slane %v9409_v12, 7  ;;  %v5815_v38 = vrot.slane %v9411_v33, 7  ;;  %v5817_v26 = vrot.slane %v9413_v28, 7  ;;  %5859 = vst [vmem:[#allocation2 + $0x28] sm:$0xfe] %v5795_v13 }
 0x385   : > { %5861 = vst [vmem:[#allocation2 + $0x38] sm:$0x1] %v5795_v13  ;;  %5863 = vst [vmem:[#allocation2 + $0x48] sm:$0xfe] %v5797_v45  ;;  %v5819_v25 = vrot.slane %v9415_v30, 7  ;;  %v5821_v37 = vrot.slane %v9417_v35, 7 }
 0x386   : > { %5865 = vst [vmem:[#allocation2 + $0x58] sm:$0x1] %v5797_v45  ;;  %5867 = vst [vmem:[#allocation2 + $0x68] sm:$0xfe] %v5799_v53  ;;  %v5823_v55 = vrot.slane %v9419_v40, 7  ;;  %v5825_v14 = vrot.slane %v9421_v62, 7 }
 0x387   : > { %5869 = vst [vmem:[#allocation2 + $0x78] sm:$0x1] %v5799_v53  ;;  %5871 = vst [vmem:[#allocation2 + $0x88] sm:$0xfe] %v5801_v60 }
 0x388   : > { %5873 = vst [vmem:[#allocation2 + $0x98] sm:$0x1] %v5801_v60  ;;  %5875 = vst [vmem:[#allocation2 + $0xa8] sm:$0xfe] %v5803_v56 }
 0x389   : > { %5877 = vst [vmem:[#allocation2 + $0xb8] sm:$0x1] %v5803_v56  ;;  %5879 = vst [vmem:[#allocation2 + $0xc8] sm:$0xfe] %v5805_v39 }
 0x38a   : > { %5881 = vst [vmem:[#allocation2 + $0xd8] sm:$0x1] %v5805_v39  ;;  %5883 = vst [vmem:[#allocation2 + $0xe8] sm:$0xfe] %v5807_v24 }
 0x38b   : > { %5885 = vst [vmem:[#allocation2 + $0xf8] sm:$0x1] %v5807_v24  ;;  %5887 = vst [vmem:[#allocation2 + $0x108] sm:$0xfe] %v5809_v4 }
 0x38c   : > { %5889 = vst [vmem:[#allocation2 + $0x118] sm:$0x1] %v5809_v4  ;;  %5891 = vst [vmem:[#allocation2 + $0x168] sm:$0xfe] %v5811_v59 }
 0x38d   : > { %5893 = vst [vmem:[#allocation2 + $0x178] sm:$0x1] %v5811_v59  ;;  %5895 = vst [vmem:[#allocation2 + $0x188] sm:$0xfe] %v5813_v32 }
 0x38e   : > { %5897 = vst [vmem:[#allocation2 + $0x198] sm:$0x1] %v5813_v32  ;;  %5899 = vst [vmem:[#allocation2 + $0x1a8] sm:$0xfe] %v5815_v38  ;;  %5924 = sbr.rel (%p6792_p11) target bundleno = 922 (0x39a), region = 64 }
 0x38f   : > { %5901 = vst [vmem:[#allocation2 + $0x1b8] sm:$0x1] %v5815_v38  ;;  %5903 = vst [vmem:[#allocation2 + $0x1c8] sm:$0xfe] %v5817_v26 }
 0x390   : > { %5905 = vst [vmem:[#allocation2 + $0x1d8] sm:$0x1] %v5817_v26  ;;  %5907 = vst [vmem:[#allocation2 + $0x1e8] sm:$0xfe] %v5819_v25 }
 0x391   : > { %5909 = vst [vmem:[#allocation2 + $0x1f8] sm:$0x1] %v5819_v25  ;;  %5911 = vst [vmem:[#allocation2 + $0x208] sm:$0xfe] %v5821_v37 }
 0x392   : > { %5913 = vst [vmem:[#allocation2 + $0x218] sm:$0x1] %v5821_v37  ;;  %5915 = vst [vmem:[#allocation2 + $0x228] sm:$0xfe] %v5823_v55 }
 0x393   : > { %5917 = vst [vmem:[#allocation2 + $0x238] sm:$0x1] %v5823_v55  ;;  %5919 = vst [vmem:[#allocation2 + $0x248] sm:$0xfe] %v5825_v14 }
 0x394   : > { %5921 = vst [vmem:[#allocation2 + $0x258] sm:$0x1] %v5825_v14  ;;  %5938 = vst [vmem:[#allocation3 + $0x68] sm:$0xff] (!%p6792_p11), %v9403_v49 }
 0x395   : > { %5940 = vst [vmem:[#allocation3 + $0x78] sm:$0xff] %v9405_v61  ;;  %5942 = vst [vmem:[#allocation3 + $0x88] sm:$0xff] %v9407_v57 }
 0x396   : > { %5944 = vst [vmem:[#allocation3 + $0x98] sm:$0xff] %v9409_v12  ;;  %5946 = vst [vmem:[#allocation3 + $0xa8] sm:$0xff] %v9411_v33 }
 0x397   : > { %5948 = vst [vmem:[#allocation3 + $0xb8] sm:$0xff] %v9413_v28  ;;  %5950 = vst [vmem:[#allocation3 + $0xc8] sm:$0xff] %v9415_v30 }
 0x398   : > { %5952 = vst [vmem:[#allocation3 + $0xd8] sm:$0xff] %v9417_v35  ;;  %5954 = vst [vmem:[#allocation3 + $0xe8] sm:$0xff] %v9419_v40 }
 0x399   : > { %5955 = vst [vmem:[#allocation3 + $0xf0] sm:$0xff] %v9352_v31  ;;  %5956 = vst [vmem:[#allocation3 + $0xf8] sm:$0xff] %v9421_v62 }
 0x39a PF: > { %p6793_p8 = scmp.ne.s32.totalorder %s7899_s22, 20 }
 0x39b   : > { %v5961_v44 = vld [vmem:[#allocation2] sm:$0xff] (!%p6793_p8)  ;;  %v5962_v10 = vld [vmem:[#allocation2 + $0x8] sm:$0xff] (!%p6793_p8)  ;;  %v5963_v21 = vld [vmem:[#allocation2 + $0x10] sm:$0x3] (!%p6793_p8) }
 0x39c   : > { %5960 = sbr.rel (%p6793_p8) target bundleno = 964 (0x3c4), region = 68  ;;  %6041 = vst [vmem:[%s9731_s5] sm:$0xff] (!%p6793_p8), %v5961_v44  ;;  %6042 = vst [vmem:[%s9731_s5 + $0x8] sm:$0xff] (!%p6793_p8), %v5962_v10  ;;  %v5964_v46 = vld [vmem:[#allocation2 + $0x18] sm:$0x3] (!%p6793_p8)  ;;  %v5965_v20 = vld [vmem:[#allocation2 + $0x20] sm:$0xff] (!%p6793_p8) }
 0x39d   : > { %6043 = vst [vmem:[%s9731_s5 + $0x10] sm:$0x3] (!%p6793_p8), %v5963_v21  ;;  %v5966_v2 = vld [vmem:[#allocation2 + $0x28] sm:$0xff] (!%p6793_p8)  ;;  %6044 = vst [vmem:[%s9731_s5 + $0x18] sm:$0x3] (!%p6793_p8), %v5964_v46  ;;  %v5969_v47 = vld [vmem:[#allocation2 + $0x40] sm:$0xff] (!%p6793_p8) }
 0x39e   : > { %6045 = vst [vmem:[%s9731_s5 + $0x20] sm:$0xff] (!%p6793_p8), %v5965_v20  ;;  %6046 = vst [vmem:[%s9731_s5 + $0x28] sm:$0xff] (!%p6793_p8), %v5966_v2  ;;  %v5967_v54 = vld [vmem:[#allocation2 + $0x30] sm:$0x3] (!%p6793_p8)  ;;  %v5968_v27 = vld [vmem:[#allocation2 + $0x38] sm:$0x3] (!%p6793_p8) }
 0x39f   : > { %6047 = vst [vmem:[%s9731_s5 + $0x30] sm:$0x3] (!%p6793_p8), %v5967_v54  ;;  %6048 = vst [vmem:[%s9731_s5 + $0x38] sm:$0x3] (!%p6793_p8), %v5968_v27  ;;  %v5970_v43 = vld [vmem:[#allocation2 + $0x48] sm:$0xff] (!%p6793_p8)  ;;  %v5973_v51 = vld [vmem:[#allocation2 + $0x60] sm:$0xff] (!%p6793_p8) }
 0x3a0   : > { %6049 = vst [vmem:[%s9731_s5 + $0x40] sm:$0xff] (!%p6793_p8), %v5969_v47  ;;  %v5971_v29 = vld [vmem:[#allocation2 + $0x50] sm:$0x3] (!%p6793_p8)  ;;  %v5972_v18 = vld [vmem:[#allocation2 + $0x58] sm:$0x3] (!%p6793_p8)  ;;  %6050 = vst [vmem:[%s9731_s5 + $0x48] sm:$0xff] (!%p6793_p8), %v5970_v43 }
 0x3a1   : > { %6051 = vst [vmem:[%s9731_s5 + $0x50] sm:$0x3] (!%p6793_p8), %v5971_v29  ;;  %6052 = vst [vmem:[%s9731_s5 + $0x58] sm:$0x3] (!%p6793_p8), %v5972_v18  ;;  %v5974_v9 = vld [vmem:[#allocation2 + $0x68] sm:$0xff] (!%p6793_p8)  ;;  %v5977_v0 = vld [vmem:[#allocation2 + $0x80] sm:$0xff] (!%p6793_p8) }
 0x3a2   : > { %v5975_v63 = vld [vmem:[#allocation2 + $0x70] sm:$0x3] (!%p6793_p8)  ;;  %6053 = vst [vmem:[%s9731_s5 + $0x60] sm:$0xff] (!%p6793_p8), %v5973_v51  ;;  %6054 = vst [vmem:[%s9731_s5 + $0x68] sm:$0xff] (!%p6793_p8), %v5974_v9  ;;  %v5976_v31 = vld [vmem:[#allocation2 + $0x78] sm:$0x3] (!%p6793_p8) }
 0x3a3   : > { %6055 = vst [vmem:[%s9731_s5 + $0x70] sm:$0x3] %v5975_v63  ;;  %v5978_v36 = vld [vmem:[#allocation2 + $0x88] sm:$0xff]  ;;  %6056 = vst [vmem:[%s9731_s5 + $0x78] sm:$0x3] %v5976_v31  ;;  %v5981_v23 = vld [vmem:[#allocation2 + $0xa0] sm:$0xff] }
 0x3a4   : > { %6057 = vst [vmem:[%s9731_s5 + $0x80] sm:$0xff] %v5977_v0  ;;  %6058 = vst [vmem:[%s9731_s5 + $0x88] sm:$0xff] %v5978_v36  ;;  %v5979_v11 = vld [vmem:[#allocation2 + $0x90] sm:$0x3]  ;;  %v5980_v52 = vld [vmem:[#allocation2 + $0x98] sm:$0x3] }
 0x3a5   : > { %6059 = vst [vmem:[%s9731_s5 + $0x90] sm:$0x3] %v5979_v11  ;;  %6060 = vst [vmem:[%s9731_s5 + $0x98] sm:$0x3] %v5980_v52  ;;  %v5982_v6 = vld [vmem:[#allocation2 + $0xa8] sm:$0xff]  ;;  %v5985_v3 = vld [vmem:[#allocation2 + $0xc0] sm:$0xff] }
 0x3a6   : > { %6061 = vst [vmem:[%s9731_s5 + $0xa0] sm:$0xff] %v5981_v23  ;;  %v5983_v8 = vld [vmem:[#allocation2 + $0xb0] sm:$0x3]  ;;  %v5984_v22 = vld [vmem:[#allocation2 + $0xb8] sm:$0x3]  ;;  %6062 = vst [vmem:[%s9731_s5 + $0xa8] sm:$0xff] %v5982_v6 }
 0x3a7   : > { %6063 = vst [vmem:[%s9731_s5 + $0xb0] sm:$0x3] %v5983_v8  ;;  %6064 = vst [vmem:[%s9731_s5 + $0xb8] sm:$0x3] %v5984_v22  ;;  %v5986_v50 = vld [vmem:[#allocation2 + $0xc8] sm:$0xff]  ;;  %v5989_v1 = vld [vmem:[#allocation2 + $0xe0] sm:$0xff] }
 0x3a8   : > { %v5987_v42 = vld [vmem:[#allocation2 + $0xd0] sm:$0x3]  ;;  %6065 = vst [vmem:[%s9731_s5 + $0xc0] sm:$0xff] %v5985_v3  ;;  %6066 = vst [vmem:[%s9731_s5 + $0xc8] sm:$0xff] %v5986_v50  ;;  %v5988_v5 = vld [vmem:[#allocation2 + $0xd8] sm:$0x3] }
 0x3a9   : > { %6067 = vst [vmem:[%s9731_s5 + $0xd0] sm:$0x3] %v5987_v42  ;;  %v5990_v16 = vld [vmem:[#allocation2 + $0xe8] sm:$0xff]  ;;  %6068 = vst [vmem:[%s9731_s5 + $0xd8] sm:$0x3] %v5988_v5  ;;  %v5993_v19 = vld [vmem:[#allocation2 + $0x100] sm:$0xff] }
 0x3aa   : > { %6069 = vst [vmem:[%s9731_s5 + $0xe0] sm:$0xff] %v5989_v1  ;;  %6070 = vst [vmem:[%s9731_s5 + $0xe8] sm:$0xff] %v5990_v16  ;;  %v5991_v48 = vld [vmem:[#allocation2 + $0xf0] sm:$0x3]  ;;  %v5992_v17 = vld [vmem:[#allocation2 + $0xf8] sm:$0x3] }
 0x3ab   : > { %6071 = vst [vmem:[%s9731_s5 + $0xf0] sm:$0x3] %v5991_v48  ;;  %6072 = vst [vmem:[%s9731_s5 + $0xf8] sm:$0x3] %v5992_v17  ;;  %v5994_v7 = vld [vmem:[#allocation2 + $0x108] sm:$0xff]  ;;  %v5997_v58 = vld [vmem:[#allocation2 + $0x120] sm:$0xff] }
 0x3ac   : > { %6073 = vst [vmem:[%s9731_s5 + $0x100] sm:$0xff] %v5993_v19  ;;  %v5995_v34 = vld [vmem:[#allocation2 + $0x110] sm:$0x3]  ;;  %v5996_v41 = vld [vmem:[#allocation2 + $0x118] sm:$0x3]  ;;  %6074 = vst [vmem:[%s9731_s5 + $0x108] sm:$0xff] %v5994_v7 }
 0x3ad   : > { %6075 = vst [vmem:[%s9731_s5 + $0x110] sm:$0x3] %v5995_v34  ;;  %6076 = vst [vmem:[%s9731_s5 + $0x118] sm:$0x3] %v5996_v41  ;;  %v5998_v15 = vld [vmem:[#allocation2 + $0x128] sm:$0xff]  ;;  %v6001_v57 = vld [vmem:[#allocation2 + $0x140] sm:$0xff] }
 0x3ae   : > { %v5999_v49 = vld [vmem:[#allocation2 + $0x130] sm:$0x3]  ;;  %6077 = vst [vmem:[%s9731_s5 + $0x120] sm:$0xff] %v5997_v58  ;;  %6078 = vst [vmem:[%s9731_s5 + $0x128] sm:$0xff] %v5998_v15  ;;  %v6000_v61 = vld [vmem:[#allocation2 + $0x138] sm:$0x3] }
 0x3af   : > { %6079 = vst [vmem:[%s9731_s5 + $0x130] sm:$0x3] %v5999_v49  ;;  %v6002_v12 = vld [vmem:[#allocation2 + $0x148] sm:$0xff]  ;;  %6080 = vst [vmem:[%s9731_s5 + $0x138] sm:$0x3] %v6000_v61  ;;  %v6005_v30 = vld [vmem:[#allocation2 + $0x160] sm:$0xff] }
 0x3b0   : > { %6081 = vst [vmem:[%s9731_s5 + $0x140] sm:$0xff] %v6001_v57  ;;  %6082 = vst [vmem:[%s9731_s5 + $0x148] sm:$0xff] %v6002_v12  ;;  %v6003_v33 = vld [vmem:[#allocation2 + $0x150] sm:$0x3]  ;;  %v6004_v28 = vld [vmem:[#allocation2 + $0x158] sm:$0x3] }
 0x3b1   : > { %6083 = vst [vmem:[%s9731_s5 + $0x150] sm:$0x3] %v6003_v33  ;;  %6084 = vst [vmem:[%s9731_s5 + $0x158] sm:$0x3] %v6004_v28  ;;  %v6006_v35 = vld [vmem:[#allocation2 + $0x168] sm:$0xff]  ;;  %v6009_v13 = vld [vmem:[#allocation2 + $0x180] sm:$0xff] }
 0x3b2   : > { %6085 = vst [vmem:[%s9731_s5 + $0x160] sm:$0xff] %v6005_v30  ;;  %v6007_v40 = vld [vmem:[#allocation2 + $0x170] sm:$0x3]  ;;  %v6008_v62 = vld [vmem:[#allocation2 + $0x178] sm:$0x3]  ;;  %6086 = vst [vmem:[%s9731_s5 + $0x168] sm:$0xff] %v6006_v35 }
 0x3b3   : > { %6087 = vst [vmem:[%s9731_s5 + $0x170] sm:$0x3] %v6007_v40  ;;  %6088 = vst [vmem:[%s9731_s5 + $0x178] sm:$0x3] %v6008_v62  ;;  %v6010_v45 = vld [vmem:[#allocation2 + $0x188] sm:$0xff]  ;;  %v6013_v56 = vld [vmem:[#allocation2 + $0x1a0] sm:$0xff] }
 0x3b4   : > { %v6011_v53 = vld [vmem:[#allocation2 + $0x190] sm:$0x3]  ;;  %6089 = vst [vmem:[%s9731_s5 + $0x180] sm:$0xff] %v6009_v13  ;;  %6090 = vst [vmem:[%s9731_s5 + $0x188] sm:$0xff] %v6010_v45  ;;  %v6012_v60 = vld [vmem:[#allocation2 + $0x198] sm:$0x3] }
 0x3b5   : > { %6091 = vst [vmem:[%s9731_s5 + $0x190] sm:$0x3] %v6011_v53  ;;  %v6014_v39 = vld [vmem:[#allocation2 + $0x1a8] sm:$0xff]  ;;  %6092 = vst [vmem:[%s9731_s5 + $0x198] sm:$0x3] %v6012_v60  ;;  %v6017_v59 = vld [vmem:[#allocation2 + $0x1c0] sm:$0xff] }
 0x3b6   : > { %6093 = vst [vmem:[%s9731_s5 + $0x1a0] sm:$0xff] %v6013_v56  ;;  %6094 = vst [vmem:[%s9731_s5 + $0x1a8] sm:$0xff] %v6014_v39  ;;  %v6015_v24 = vld [vmem:[#allocation2 + $0x1b0] sm:$0x3]  ;;  %v6016_v4 = vld [vmem:[#allocation2 + $0x1b8] sm:$0x3] }
 0x3b7   : > { %6095 = vst [vmem:[%s9731_s5 + $0x1b0] sm:$0x3] %v6015_v24  ;;  %6096 = vst [vmem:[%s9731_s5 + $0x1b8] sm:$0x3] %v6016_v4  ;;  %v6018_v32 = vld [vmem:[#allocation2 + $0x1c8] sm:$0xff]  ;;  %v6021_v25 = vld [vmem:[#allocation2 + $0x1e0] sm:$0xff] }
 0x3b8   : > { %6097 = vst [vmem:[%s9731_s5 + $0x1c0] sm:$0xff] %v6017_v59  ;;  %v6019_v38 = vld [vmem:[#allocation2 + $0x1d0] sm:$0x3]  ;;  %v6020_v26 = vld [vmem:[#allocation2 + $0x1d8] sm:$0x3]  ;;  %6098 = vst [vmem:[%s9731_s5 + $0x1c8] sm:$0xff] %v6018_v32 }
 0x3b9   : > { %6099 = vst [vmem:[%s9731_s5 + $0x1d0] sm:$0x3] %v6019_v38  ;;  %6100 = vst [vmem:[%s9731_s5 + $0x1d8] sm:$0x3] %v6020_v26  ;;  %v6022_v37 = vld [vmem:[#allocation2 + $0x1e8] sm:$0xff]  ;;  %v6025_v44 = vld [vmem:[#allocation2 + $0x200] sm:$0xff] }
 0x3ba   : > { %v6023_v55 = vld [vmem:[#allocation2 + $0x1f0] sm:$0x3]  ;;  %6101 = vst [vmem:[%s9731_s5 + $0x1e0] sm:$0xff] %v6021_v25  ;;  %6102 = vst [vmem:[%s9731_s5 + $0x1e8] sm:$0xff] %v6022_v37  ;;  %v6024_v14 = vld [vmem:[#allocation2 + $0x1f8] sm:$0x3] }
 0x3bb   : > { %6103 = vst [vmem:[%s9731_s5 + $0x1f0] sm:$0x3] %v6023_v55  ;;  %v6026_v10 = vld [vmem:[#allocation2 + $0x208] sm:$0xff]  ;;  %6104 = vst [vmem:[%s9731_s5 + $0x1f8] sm:$0x3] %v6024_v14  ;;  %v6029_v20 = vld [vmem:[#allocation2 + $0x220] sm:$0xff] }
 0x3bc   : > { %6105 = vst [vmem:[%s9731_s5 + $0x200] sm:$0xff] %v6025_v44  ;;  %6106 = vst [vmem:[%s9731_s5 + $0x208] sm:$0xff] %v6026_v10  ;;  %v6027_v21 = vld [vmem:[#allocation2 + $0x210] sm:$0x3]  ;;  %v6028_v46 = vld [vmem:[#allocation2 + $0x218] sm:$0x3] }
 0x3bd   : > { %6107 = vst [vmem:[%s9731_s5 + $0x210] sm:$0x3] %v6027_v21  ;;  %6108 = vst [vmem:[%s9731_s5 + $0x218] sm:$0x3] %v6028_v46  ;;  %v6030_v2 = vld [vmem:[#allocation2 + $0x228] sm:$0xff]  ;;  %v6033_v47 = vld [vmem:[#allocation2 + $0x240] sm:$0xff] }
 0x3be   : > { %6109 = vst [vmem:[%s9731_s5 + $0x220] sm:$0xff] %v6029_v20  ;;  %v6031_v54 = vld [vmem:[#allocation2 + $0x230] sm:$0x3]  ;;  %v6032_v27 = vld [vmem:[#allocation2 + $0x238] sm:$0x3]  ;;  %6110 = vst [vmem:[%s9731_s5 + $0x228] sm:$0xff] %v6030_v2 }
 0x3bf   : > { %6111 = vst [vmem:[%s9731_s5 + $0x230] sm:$0x3] %v6031_v54  ;;  %6112 = vst [vmem:[%s9731_s5 + $0x238] sm:$0x3] %v6032_v27  ;;  %v6034_v43 = vld [vmem:[#allocation2 + $0x248] sm:$0xff]  ;;  %v6037_v51 = vld [vmem:[#allocation2 + $0x260] sm:$0xff] }
 0x3c0   : > { %v6035_v29 = vld [vmem:[#allocation2 + $0x250] sm:$0x3]  ;;  %6113 = vst [vmem:[%s9731_s5 + $0x240] sm:$0xff] %v6033_v47  ;;  %6114 = vst [vmem:[%s9731_s5 + $0x248] sm:$0xff] %v6034_v43  ;;  %v6036_v18 = vld [vmem:[#allocation2 + $0x258] sm:$0x3] }
 0x3c1   : > { %6115 = vst [vmem:[%s9731_s5 + $0x250] sm:$0x3] %v6035_v29  ;;  %v6038_v9 = vld [vmem:[#allocation2 + $0x268] sm:$0xff]  ;;  %6116 = vst [vmem:[%s9731_s5 + $0x258] sm:$0x3] %v6036_v18 }
 0x3c2   : > { %6117 = vst [vmem:[%s9731_s5 + $0x260] sm:$0xff] %v6037_v51  ;;  %6118 = vst [vmem:[%s9731_s5 + $0x268] sm:$0xff] %v6038_v9  ;;  %v6039_v63 = vld [vmem:[#allocation2 + $0x270] sm:$0x3]  ;;  %v6040_v31 = vld [vmem:[#allocation2 + $0x278] sm:$0x3] }
 0x3c3   : > { %6119 = vst [vmem:[%s9731_s5 + $0x270] sm:$0x3] %v6039_v63  ;;  %6120 = vst [vmem:[%s9731_s5 + $0x278] sm:$0x3] %v6040_v31 }
 0x3c4 PF: > { %p21_p9 = scmp.ge.s32.totalorder %s7902_s23, 23   ;;  %s9746_s18 = smov %s7833_s19 }
 0x3c5   : > { %s9747_s19 = smov %s7837_s20  ;;  %s9748_s20 = smov %s7912_s26 }
 0x3c6   : > { %s9749_s21 = smov %s7902_s23  ;;  %23 = sbr.rel (!%p21_p9) target bundleno = 9 (0x9), region = 135 }
 0x3cd   :  { %6132 = vsyncpa [#allocation5], 1 }
 0x3ce   :  { %6134 = vsyncpa [#allocation5 + $0x1], 1 }
 0x3cf   :  { %6135 = vsyncpa [#allocation7], 1 }
 0x3d0   :  { %6137 = vsyncpa [#allocation7 + $0x1], 1 }
 0x3d1   :  { %6138 = vsyncpa [#allocation10], 1 }
 0x3d2   :  { %6140 = vsyncpa [#allocation10 + $0x1], 1 }

// kernel: net_forward.3
= control target key start
LH: loop header
LB: loop body
LE: loop exit
PB: predicated region body
PF: predicated region fallthrough
CT: control target
= control target key end

     0   :  { %s10279_s0 = inlined_call_operand.vmem [shape: f32[2,10,10,256], index: 0, kind: input, shape index: {}]   ;;  %s10280_s1 = inlined_call_operand.vmem [shape: f32[9,256,4], index: 1, kind: input, shape index: {}]   ;;  %s10281_s2 = inlined_call_operand.vmem [shape: f32[1,4], index: 2, kind: input, shape index: {}]   ;;  %s10282_s3 = inlined_call_operand.vmem [shape: f32[1,4], index: 3, kind: input, shape index: {}]   ;;  %s10283_s4 = inlined_call_operand.vmem [shape: f32[1,4], index: 4, kind: input, shape index: {}]   ;;  %s10284_s5 = inlined_call_operand.vmem [shape: f32[128,64], index: 5, kind: input, shape index: {}]   ;;  %s10285_s6 = inlined_call_operand.vmem [shape: f32[1,64], index: 6, kind: input, shape index: {}]   ;;  %s10286_s7 = inlined_call_operand.vmem [shape: f32[128,64], index: 7, kind: input, shape index: {}]   ;;  %s10287_s8 = inlined_call_operand.vmem [shape: f32[1,64], index: 8, kind: input, shape index: {}]   ;;  %s10288_s9 = inlined_call_operand.vmem [shape: f32[1,64], index: 9, kind: input, shape index: {}]   ;;  %s10289_s10 = inlined_call_operand.<no memory space> [shape: f32[1,1], index: 10, kind: input, shape index: {}]   ;;  %s10290_s11 = inlined_call_operand.hbm [shape: f32[2,64], index: 11, kind: output, shape index: {0}]   ;;  %s10291_s12 = inlined_call_operand.vmem [shape: f32[2,1], index: 12, kind: output, shape index: {1}]  }
   0x1   :  { %v18_v0 = vstv %s10289_s10 }
   0x2   :  { %19 = vst [vmem:[#allocation2] sm:$0x1] %v18_v0 }
   0x3   :  { %v4214_v1 = vld [vmem:[%s10280_s1 + $0x180] sm:$0xff]  ;;  %v4215_v2 = vld [vmem:[%s10280_s1 + $0x188] sm:$0xff]  ;;  %v4216_v6 = vld [vmem:[%s10280_s1 + $0x190] sm:$0xff]  ;;  %vm235_vm0 = vcmask 1046528   ;;  %vm815_vm1 = vcmask 1045504  }
   0x4   :  { %v4198_v3 = vld [vmem:[%s10280_s1 + $0x100] sm:$0xff]  ;;  %v5501_v4 = vpack.c.bf16 %v4215_v2, %v4214_v1  ;;  %v4199_v5 = vld [vmem:[%s10280_s1 + $0x108] sm:$0xff]  ;;  %v4217_v7 = vld [vmem:[%s10280_s1 + $0x198] sm:$0xff] }
   0x5   :  { %v5503_v8 = vpack.c.bf16 %v4199_v5, %v4198_v3  ;;  %v5505_v9 = vpack.c.bf16 %v4217_v7, %v4216_v6  ;;  %v4200_v10 = vld [vmem:[%s10280_s1 + $0x110] sm:$0xff]  ;;  %v4201_v11 = vld [vmem:[%s10280_s1 + $0x118] sm:$0xff]  ;;  %v4218_v12 = vld [vmem:[%s10280_s1 + $0x1a0] sm:$0xff] }
   0x6   :  { %5789 = vmatprep.subr.bf16.mxu1 %v5501_v4  ;;  %5502 = vmatprep.subr.bf16.mxu0 %v5501_v4  ;;  %v4219_v13 = vld [vmem:[%s10280_s1 + $0x1a8] sm:$0xff]  ;;  %v5507_v14 = vpack.c.bf16 %v4201_v11, %v4200_v10  ;;  %v4202_v16 = vld [vmem:[%s10280_s1 + $0x120] sm:$0xff]  ;;  %v4220_v18 = vld [vmem:[%s10280_s1 + $0x1b0] sm:$0xff] }
   0x7   :  { %5797 = vmatpush3.bf16.msra.mxu1 %v5503_v8  ;;  %5504 = vmatpush3.bf16.msra.mxu0 %v5503_v8  ;;  %v5509_v15 = vpack.c.bf16 %v4219_v13, %v4218_v12  ;;  %v4203_v17 = vld [vmem:[%s10280_s1 + $0x128] sm:$0xff]  ;;  %v4221_v19 = vld [vmem:[%s10280_s1 + $0x1b8] sm:$0xff]  ;;  %v4204_v22 = vld [vmem:[%s10280_s1 + $0x130] sm:$0xff] }
   0x8   :  { %5790 = vmatprep.subr.bf16.mxu1 %v5505_v9  ;;  %5506 = vmatprep.subr.bf16.mxu0 %v5505_v9  ;;  %v5511_v20 = vpack.c.bf16 %v4203_v17, %v4202_v16  ;;  %v5513_v21 = vpack.c.bf16 %v4221_v19, %v4220_v18  ;;  %v4205_v23 = vld [vmem:[%s10280_s1 + $0x138] sm:$0xff]  ;;  %v4222_v24 = vld [vmem:[%s10280_s1 + $0x1c0] sm:$0xff]  ;;  %v4223_v25 = vld [vmem:[%s10280_s1 + $0x1c8] sm:$0xff] }
   0x9   :  { %v140_v26 = vld [vmem:[%s10279_s0 + $0x148] sm:$0xfe]  ;;  %v142_v27 = vld [vmem:[%s10279_s0 + $0x158] sm:$0x1]  ;;  %v5515_v29 = vpack.c.bf16 %v4205_v23, %v4204_v22  ;;  %v4206_v30 = vld [vmem:[%s10280_s1 + $0x140] sm:$0xff]  ;;  %v5517_v32 = vpack.c.bf16 %v4223_v25, %v4222_v24 }
   0xa   :  { %v287_v28 = vrot.slane %v140_v26, 1  ;;  %v288_v31 = vrot.slane %v142_v27, 1  ;;  %v4207_v33 = vld [vmem:[%s10280_s1 + $0x148] sm:$0xff]  ;;  %v110_v35 = vld [vmem:[%s10279_s0 + $0x18] sm:$0x1]  ;;  %v4224_v36 = vld [vmem:[%s10280_s1 + $0x1d0] sm:$0xff] }
   0xb   :  { %5798 = vmatpush3.bf16.msra.mxu1 %v5507_v14  ;;  %5508 = vmatpush3.bf16.msra.mxu0 %v5507_v14  ;;  %v108_v34 = vld [vmem:[%s10279_s0 + $0x8] sm:$0xfe]  ;;  %v4225_v37 = vld [vmem:[%s10280_s1 + $0x1d8] sm:$0xff]  ;;  %v240_v40 = vrot.slane %v110_v35, 1  ;;  %v5519_v41 = vpack.c.bf16 %v4207_v33, %v4206_v30  ;;  %v4208_v42 = vld [vmem:[%s10280_s1 + $0x150] sm:$0xff] }
   0xc   :  { %5791 = vmatprep.subr.bf16.mxu1 %v5509_v15  ;;  %5510 = vmatprep.subr.bf16.mxu0 %v5509_v15  ;;  %v289_v38 = vsel %vm235_vm0, %v287_v28, %v288_v31  ;;  %v239_v39 = vrot.slane %v108_v34, 1  ;;  %v5521_v44 = vpack.c.bf16 %v4225_v37, %v4224_v36  ;;  %v4209_v45 = vld [vmem:[%s10280_s1 + $0x158] sm:$0xff]  ;;  %v4226_v46 = vld [vmem:[%s10280_s1 + $0x1e0] sm:$0xff]  ;;  %v4227_v48 = vld [vmem:[%s10280_s1 + $0x1e8] sm:$0xff] }
   0xd   :  { %501 = vmatprep.mubr.f32.mxu1 %v289_v38  ;;  %v6050_v47 = vld [vmem:[%s10279_s0 + $0x140] sm:$0xfe]  ;;  %v6058_v49 = vld [vmem:[%s10279_s0 + $0x150] sm:$0x1]  ;;  %v5523_v52 = vpack.c.bf16 %v4209_v45, %v4208_v42  ;;  %v4211_v53 = vld [vmem:[%s10280_s1 + $0x168] sm:$0xff]  ;;  %v5525_v57 = vpack.c.bf16 %v4227_v48, %v4226_v46 }
   0xe   :  { %v241_v43 = vsel %vm235_vm0, %v239_v39, %v240_v40  ;;  %v6063_v50 = vld [vmem:[%s10279_s0] sm:$0xfe]  ;;  %v4228_v54 = vld [vmem:[%s10280_s1 + $0x1f0] sm:$0xff]  ;;  %v4229_v55 = vld [vmem:[%s10280_s1 + $0x1f8] sm:$0xff]  ;;  %v284_v56 = vrot.slane %v6050_v47, 1  ;;  %v285_v58 = vrot.slane %v6058_v49, 1 }
   0xf   :  { %5799 = vmatpush3.bf16.msra.mxu1 %v5511_v20  ;;  %5512 = vmatpush3.bf16.msra.mxu0 %v5511_v20  ;;  %v4210_v51 = vld [vmem:[%s10280_s1 + $0x160] sm:$0xff]  ;;  %v6082_v59 = vld [vmem:[%s10279_s0 + $0x10] sm:$0x1]  ;;  %v236_v60 = vrot.slane %v6063_v50, 1  ;;  %v144_v61 = vld [vmem:[%s10279_s0 + $0x168] sm:$0xfe]  ;;  %v5529_v15 = vpack.c.bf16 %v4229_v55, %v4228_v54 }
  0x10   :  { %5792 = vmatprep.subr.bf16.mxu1 %v5513_v21  ;;  %5514 = vmatprep.subr.bf16.mxu0 %v5513_v21  ;;  %v146_v62 = vld [vmem:[%s10279_s0 + $0x178] sm:$0x1]  ;;  %v6094_v63 = vld [vmem:[%s10279_s0 + $0x160] sm:$0xfe]  ;;  %v6099_v0 = vld [vmem:[%s10279_s0 + $0x170] sm:$0x1]  ;;  %v5527_v6 = vpack.c.bf16 %v4211_v53, %v4210_v51  ;;  %v286_v48 = vsel %vm235_vm0, %v284_v56, %v285_v58 }
  0x11   :  { %461 = vmatprep.mubr.f32.mxu0 %v241_v43  ;;  %v4212_v1 = vld [vmem:[%s10280_s1 + $0x170] sm:$0xff]  ;;  %v4213_v2 = vld [vmem:[%s10280_s1 + $0x178] sm:$0xff]  ;;  %v6110_v3 = vld [vmem:[%s10279_s0 + $0x28] sm:$0xfe]  ;;  %v237_v16 = vrot.slane %v6082_v59, 1  ;;  %v293_v18 = vrot.slane %v144_v61, 1 }
  0x12   :  { %v6115_v4 = vld [vmem:[%s10279_s0 + $0x38] sm:$0x1]  ;;  %v6120_v5 = vld [vmem:[%s10279_s0 + $0x20] sm:$0xfe]  ;;  %v6130_v8 = vld [vmem:[%s10280_s1 + $0x88] sm:$0xff]  ;;  %v294_v19 = vrot.slane %v146_v62, 1  ;;  %v5531_v33 = vpack.c.bf16 %v4213_v2, %v4212_v1 }
  0x13   :  { %5800 = vmatpush3.bf16.msra.mxu1 %v5515_v29  ;;  %5516 = vmatpush3.bf16.msra.mxu0 %v5515_v29  ;;  %v6125_v7 = vld [vmem:[%s10280_s1 + $0x80] sm:$0xff]  ;;  %v6140_v10 = vld [vmem:[%s10280_s1 + $0x8] sm:$0xff]  ;;  %v6150_v12 = vld [vmem:[%s10279_s0 + $0x30] sm:$0x1]  ;;  %v290_v22 = vrot.slane %v6094_v63, 1  ;;  %v291_v23 = vrot.slane %v6099_v0, 1  ;;  %v238_v49 = vsel %vm235_vm0, %v236_v60, %v237_v16 }
  0x14   :  { %5793 = vmatprep.subr.bf16.mxu1 %v5517_v32  ;;  %5518 = vmatprep.subr.bf16.mxu0 %v5517_v32  ;;  %v6135_v9 = vld [vmem:[%s10280_s1] sm:$0xff]  ;;  %v6155_v13 = vld [vmem:[%s10279_s0 + $0x188] sm:$0xfe]  ;;  %v6160_v14 = vld [vmem:[%s10279_s0 + $0x198] sm:$0x1]  ;;  %v245_v26 = vrot.slane %v6110_v3, 1  ;;  %v5533_v37 = vpack.c.bf16 %v6130_v8, %v6125_v7  ;;  %v295_v50 = vsel %vm235_vm0, %v293_v18, %v294_v19 }
  0x15   :  { %v6145_v11 = vld [vmem:[%s10280_s1 + $0x280] sm:$0xff]  ;;  %v4247_v17 = vld [vmem:[%s10280_s1 + $0x288] sm:$0xff]  ;;  %v6181_v24 = vld [vmem:[%s10280_s1 + $0x90] sm:$0xff]  ;;  %v246_v27 = vrot.slane %v6115_v4, 1  ;;  %v242_v28 = vrot.slane %v6120_v5, 1  ;;  %v243_v29 = vrot.slane %v6150_v12, 1  ;;  %v5535_v38 = vpack.c.bf16 %v6140_v10, %v6135_v9 }
  0x16   :  { %v6169_v20 = vld [vmem:[%s10280_s1 + $0x200] sm:$0xff]  ;;  %v6174_v21 = vld [vmem:[%s10280_s1 + $0x208] sm:$0xff]  ;;  %v6186_v25 = vld [vmem:[%s10280_s1 + $0x98] sm:$0xff]  ;;  %v299_v30 = vrot.slane %v6155_v13, 1  ;;  %v300_v31 = vrot.slane %v6160_v14, 1  ;;  %v5565_v39 = vpack.c.bf16 %v4247_v17, %v6145_v11  ;;  %v292_v63 = vsel %vm235_vm0, %v290_v22, %v291_v23 }
  0x17   :  { %5801 = vmatpush3.bf16.msra.mxu1 %v5519_v41  ;;  %5520 = vmatpush3.bf16.msra.mxu0 %v5519_v41  ;;  %v6197_v32 = vld [vmem:[%s10279_s0 + $0x180] sm:$0xfe]  ;;  %v6202_v34 = vld [vmem:[%s10279_s0 + $0x190] sm:$0x1]  ;;  %v6207_v35 = vld [vmem:[%s10279_s0 + $0x48] sm:$0xfe]  ;;  %v5567_v51 = vpack.c.bf16 %v6174_v21, %v6169_v20  ;;  %v5537_v56 = vpack.c.bf16 %v6186_v25, %v6181_v24  ;;  %v247_v11 = vsel %vm235_vm0, %v245_v26, %v246_v27 }
  0x18   :  { %5794 = vmatprep.subr.bf16.mxu1 %v5521_v44  ;;  %5522 = vmatprep.subr.bf16.mxu0 %v5521_v44  ;;  %v6212_v36 = vld [vmem:[%s10279_s0 + $0x58] sm:$0x1]  ;;  %v6222_v40 = vld [vmem:[%s10280_s1 + $0x10] sm:$0xff]  ;;  %v6242_v44 = vld [vmem:[%s10279_s0 + $0x40] sm:$0xfe]  ;;  %v297_v58 = vrot.slane %v6202_v34, 1  ;;  %v244_v14 = vsel %vm235_vm0, %v242_v28, %v243_v29  ;;  %v301_v19 = vsel %vm235_vm0, %v299_v30, %v300_v31 }
  0x19   :  { %v6227_v41 = vld [vmem:[%s10280_s1 + $0x18] sm:$0xff]  ;;  %v6232_v42 = vld [vmem:[%s10280_s1 + $0x290] sm:$0xff]  ;;  %v6252_v46 = vld [vmem:[%s10279_s0 + $0x1a8] sm:$0xfe]  ;;  %v251_v61 = vrot.slane %v6207_v35, 1  ;;  %v252_v0 = vrot.slane %v6212_v36, 1 }
  0x1a   :  { %v6237_v43 = vld [vmem:[%s10280_s1 + $0x298] sm:$0xff]  ;;  %v6247_v45 = vld [vmem:[%s10279_s0 + $0x50] sm:$0x1]  ;;  %v6279_v54 = vld [vmem:[%s10279_s0 + $0x1a0] sm:$0xfe]  ;;  %v248_v2 = vrot.slane %v6242_v44, 1  ;;  %v5539_v12 = vpack.c.bf16 %v6227_v41, %v6222_v40 }
  0x1b   :  { %5802 = vmatpush3.bf16.msra.mxu1 %v5523_v52  ;;  %5524 = vmatpush3.bf16.msra.mxu0 %v5523_v52  ;;  %v6264_v52 = vld [vmem:[%s10280_s1 + $0x210] sm:$0xff]  ;;  %v6269_v53 = vld [vmem:[%s10280_s1 + $0x218] sm:$0xff]  ;;  %v6293_v59 = vld [vmem:[%s10280_s1 + $0xa0] sm:$0xff]  ;;  %v249_v3 = vrot.slane %v6247_v45, 1  ;;  %v302_v8 = vrot.slane %v6279_v54, 1  ;;  %v253_v29 = vsel %vm235_vm0, %v251_v61, %v252_v0 }
  0x1c   :  { %5795 = vmatprep.subr.bf16.mxu1 %v5525_v57  ;;  %5526 = vmatprep.subr.bf16.mxu0 %v5525_v57  ;;  %v6274_v47 = vld [vmem:[%s10279_s0 + $0x1b8] sm:$0x1]  ;;  %v6284_v55 = vld [vmem:[%s10279_s0 + $0x1b0] sm:$0x1]  ;;  %v296_v57 = vrot.slane %v6197_v32, 1  ;;  %v6298_v60 = vld [vmem:[%s10280_s1 + $0xa8] sm:$0xff]  ;;  %v5571_v20 = vpack.c.bf16 %v6269_v53, %v6264_v52 }
  0x1d   :  { %v6304_v62 = vld [vmem:[%s10280_s1 + $0x20] sm:$0xff]  ;;  %v6311_v1 = vld [vmem:[%s10280_s1 + $0x28] sm:$0xff]  ;;  %v306_v7 = vrot.slane %v6274_v47, 1  ;;  %v303_v9 = vrot.slane %v6284_v55, 1  ;;  %v6343_v16 = vld [vmem:[%s10279_s0 + $0x78] sm:$0x1]  ;;  %v5541_v21 = vpack.c.bf16 %v6298_v60, %v6293_v59 }
  0x1e   :  { %v6318_v4 = vld [vmem:[%s10280_s1 + $0x2a0] sm:$0xff]  ;;  %v6323_v5 = vld [vmem:[%s10280_s1 + $0x2a8] sm:$0xff]  ;;  %v6353_v18 = vld [vmem:[%s10279_s0 + $0x70] sm:$0x1]  ;;  %v298_v28 = vsel %vm235_vm0, %v296_v57, %v297_v58  ;;  %v5543_v30 = vpack.c.bf16 %v6311_v1, %v6304_v62 }
  0x1f   :  { %5803 = vmatpush3.bf16.msra.mxu1 %v5527_v6  ;;  %5528 = vmatpush3.bf16.msra.mxu0 %v5527_v6  ;;  %v305_v6 = vrot.slane %v6252_v46, 1  ;;  %v6332_v10 = vld [vmem:[%s10279_s0 + $0x68] sm:$0xfe]  ;;  %v6348_v17 = vld [vmem:[%s10279_s0 + $0x60] sm:$0xfe]  ;;  %v6375_v13 = vld [vmem:[%s10280_s1 + $0xb0] sm:$0xff]  ;;  %v5573_v35 = vpack.c.bf16 %v6323_v5, %v6318_v4  ;;  %v304_v0 = vsel %vm235_vm0, %v302_v8, %v303_v9 }
  0x20   :  { %5796 = vmatprep.subr.bf16.mxu1 %v5529_v15  ;;  %5530 = vmatprep.subr.bf16.mxu0 %v5529_v15  ;;  %v5569_v15 = vpack.c.bf16 %v6237_v43, %v6232_v42  ;;  %v6365_v22 = vld [vmem:[%s10280_s1 + $0x220] sm:$0xff]  ;;  %v6370_v23 = vld [vmem:[%s10280_s1 + $0x228] sm:$0xff]  ;;  %v6380_v24 = vld [vmem:[%s10280_s1 + $0xb8] sm:$0xff]  ;;  %v257_v36 = vrot.slane %v6332_v10, 1  ;;  %v255_v42 = vrot.slane %v6353_v18, 1 }
  0x21   :  { %v6385_v25 = vld [vmem:[%s10279_s0 + $0x1c8] sm:$0xfe]  ;;  %v6390_v26 = vld [vmem:[%s10279_s0 + $0x1d8] sm:$0x1]  ;;  %v6395_v27 = vld [vmem:[%s10279_s0 + $0x1c0] sm:$0xfe]  ;;  %v307_v57 = vsel %vm235_vm0, %v305_v6, %v306_v7  ;;  %v5575_v58 = vpack.c.bf16 %v6370_v23, %v6365_v22  ;;  %v5545_v59 = vpack.c.bf16 %v6380_v24, %v6375_v13 }
  0x22   :  { %v6404_v31 = vld [vmem:[%s10280_s1 + $0x30] sm:$0xff]  ;;  %v6419_v34 = vld [vmem:[%s10279_s0 + $0x98] sm:$0x1]  ;;  %v311_v43 = vrot.slane %v6385_v25, 1  ;;  %v312_v44 = vrot.slane %v6390_v26, 1  ;;  %v6465_v52 = vld [vmem:[%s10280_s1 + $0xc8] sm:$0xff] }
  0x23   :  { %5804 = vmatpush3.bf16.msra.mxu1 %v5531_v33  ;;  %5532 = vmatpush3.bf16.msra.mxu0 %v5531_v33  ;;  %v6409_v32 = vld [vmem:[%s10279_s0 + $0x1d0] sm:$0x1]  ;;  %v6414_v33 = vld [vmem:[%s10279_s0 + $0x88] sm:$0xfe]  ;;  %v6439_v41 = vld [vmem:[%s10280_s1 + $0x2b8] sm:$0xff]  ;;  %v264_v47 = vrot.slane %v6419_v34, 1 }
  0x24   :  { %5534 = vmatprep.subr.bf16.mxu1 %v5533_v37  ;;  %5566 = vmatprep.subr.bf16.mxu0 %v5565_v39  ;;  %v258_v37 = vrot.slane %v6343_v16, 1  ;;  %v254_v39 = vrot.slane %v6348_v17, 1  ;;  %v6434_v40 = vld [vmem:[%s10280_s1 + $0x2b0] sm:$0xff]  ;;  %v6452_v46 = vld [vmem:[%s10280_s1 + $0x238] sm:$0xff]  ;;  %v263_v53 = vrot.slane %v6414_v33, 1  ;;  %v6525_v8 = vld [vmem:[%s10280_s1 + $0x40] sm:$0xff] }
  0x25   :  { %v6447_v45 = vld [vmem:[%s10280_s1 + $0x230] sm:$0xff]  ;;  %v6487_v61 = vld [vmem:[%s10279_s0 + $0x1e8] sm:$0xfe]  ;;  %v6505_v4 = vld [vmem:[%s10279_s0 + $0x1e0] sm:$0xfe]  ;;  %v5577_v6 = vpack.c.bf16 %v6439_v41, %v6434_v40 }
  0x26   :  { %502 = vmatmul.mubr.f32.vlgmr.msra.gmra.mrb[0].mxu1 %v286_v48  ;;  %462 = vmatmul.mubr.f32.vlgmr.msra.gmra.mrb[0].mxu0 %v238_v49  ;;  %v308_v48 = vrot.slane %v6395_v27, 1  ;;  %v250_v49 = vsel %vm235_vm0, %v248_v2, %v249_v3  ;;  %v6482_v60 = vld [vmem:[%s10279_s0 + $0x90] sm:$0x1]  ;;  %v259_v2 = vsel %vm235_vm0, %v257_v36, %v258_v37  ;;  %v6515_v54 = vld [vmem:[%s10279_s0 + $0xa8] sm:$0xfe]  ;;  %v256_v55 = vsel %vm235_vm0, %v254_v39, %v255_v42  ;;  %v4254_v17 = vld [vmem:[%s10280_s1 + $0x2c0] sm:$0xff] }
  0x27   :  { %5536 = vmatpush3.bf16.msra.mxu1 %v5535_v38  ;;  %506 = vmatprep.mubr.f32.mxu1 %v295_v50  ;;  %v6428_v38 = vld [vmem:[%s10280_s1 + $0x38] sm:$0xff]  ;;  %v309_v50 = vrot.slane %v6409_v32, 1  ;;  %v6510_v5 = vld [vmem:[%s10279_s0 + $0x1f0] sm:$0x1]  ;;  %v5579_v7 = vpack.c.bf16 %v6452_v46, %v6447_v45  ;;  %v6530_v9 = vld [vmem:[%s10280_s1 + $0x48] sm:$0xff]  ;;  %v261_v16 = vrot.slane %v6482_v60, 1  ;;  %v265_v40 = vsel %vm235_vm0, %v263_v53, %v264_v47 }
  0x28   :  { %5568 = vmatpush3.bf16.msra.mxu0 %v5567_v51  ;;  %5538 = vmatprep.subr.bf16.mxu1 %v5537_v56  ;;  %v6460_v51 = vld [vmem:[%s10280_s1 + $0xc0] sm:$0xff]  ;;  %v5547_v3 = vpack.c.bf16 %v6428_v38, %v6404_v31  ;;  %v6535_v10 = vld [vmem:[%s10279_s0 + $0xb8] sm:$0x1]  ;;  %v4255_v18 = vld [vmem:[%s10280_s1 + $0x2c8] sm:$0xff]  ;;  %v314_v13 = vrot.slane %v6505_v4, 1  ;;  %v315_v24 = vrot.slane %v6510_v5, 1  ;;  %v5551_v41 = vpack.c.bf16 %v6530_v9, %v6525_v8 }
  0x29   :  { %466 = vmatprep.mubr.f32.mxu0 %v247_v11  ;;  %5570 = vmatprep.subr.bf16.mxu0 %v5569_v15  ;;  %v6472_v56 = vld [vmem:[%s10279_s0 + $0x80] sm:$0xfe]  ;;  %v6571_v23 = vld [vmem:[%s10280_s1 + $0x248] sm:$0xff]  ;;  %v6578_v62 = vld [vmem:[%s10280_s1 + $0xd0] sm:$0xff]  ;;  %v269_v25 = vrot.slane %v6515_v54, 1  ;;  %v270_v26 = vrot.slane %v6535_v10, 1  ;;  %v310_v39 = vsel %vm235_vm0, %v308_v48, %v309_v50 }
  0x2a   :  { %507 = vmatmul.mubr.f32.gmra.mrb[2].mxu1 %v292_v63  ;;  %467 = vmatmul.mubr.f32.gmra.mrb[2].mxu0 %v244_v14  ;;  %v6492_v63 = vld [vmem:[%s10279_s0 + $0x1f8] sm:$0x1]  ;;  %v6540_v11 = vld [vmem:[%s10279_s0 + $0xa0] sm:$0xfe]  ;;  %v313_v14 = vsel %vm235_vm0, %v311_v43, %v312_v44  ;;  %v260_v15 = vrot.slane %v6472_v56, 1  ;;  %v6625_v42 = vld [vmem:[%s10280_s1 + $0x50] sm:$0xff] }
  0x2b   :  { %5540 = vmatpush3.bf16.msra.mxu1 %v5539_v12  ;;  %511 = vmatprep.mubr.f32.mxu1 %v301_v19  ;;  %v6545_v12 = vld [vmem:[%s10279_s0 + $0xb0] sm:$0x1]  ;;  %v317_v19 = vrot.slane %v6487_v61, 1  ;;  %v318_v22 = vrot.slane %v6492_v63, 1  ;;  %v6583_v1 = vld [vmem:[%s10280_s1 + $0xd8] sm:$0xff]  ;;  %v6703_v54 = vld [vmem:[%s10280_s1 + $0x60] sm:$0xff] }
  0x2c   :  { %5572 = vmatpush3.bf16.msra.mxu0 %v5571_v20  ;;  %5542 = vmatprep.subr.bf16.mxu1 %v5541_v21  ;;  %v6560_v20 = vld [vmem:[%s10280_s1 + $0x240] sm:$0xff]  ;;  %v5549_v21 = vpack.c.bf16 %v6465_v52, %v6460_v51  ;;  %v6597_v31 = vld [vmem:[%s10280_s1 + $0x2d8] sm:$0xff]  ;;  %v164_v36 = vld [vmem:[%s10279_s0 + $0x208] sm:$0xfe]  ;;  %v262_v43 = vsel %vm235_vm0, %v260_v15, %v261_v16  ;;  %v5553_v51 = vpack.c.bf16 %v6583_v1, %v6578_v62 }
  0x2d   :  { %471 = vmatprep.mubr.f32.mxu0 %v253_v29  ;;  %5574 = vmatprep.subr.bf16.mxu0 %v5573_v35  ;;  %v267_v29 = vrot.slane %v6545_v12, 1  ;;  %v5581_v35 = vpack.c.bf16 %v4255_v18, %v4254_v17  ;;  %v166_v37 = vld [vmem:[%s10279_s0 + $0x218] sm:$0x1]  ;;  %v6608_v38 = vld [vmem:[%s10279_s0 + $0x200] sm:$0xfe]  ;;  %v319_v44 = vsel %vm235_vm0, %v317_v19, %v318_v22  ;;  %v5583_v45 = vpack.c.bf16 %v6571_v23, %v6560_v20  ;;  %v6652_v46 = vld [vmem:[%s10280_s1 + $0x250] sm:$0xff] }
  0x2e   :  { %512 = vmatmul.mubr.f32.gmra.mrb[4].mxu1 %v298_v28  ;;  %472 = vmatmul.mubr.f32.gmra.mrb[4].mxu0 %v250_v49  ;;  %v266_v28 = vrot.slane %v6540_v11, 1  ;;  %v6630_v27 = vld [vmem:[%s10280_s1 + $0x58] sm:$0xff]  ;;  %v165_v32 = vld [vmem:[%s10279_s0 + $0x210] sm:$0x1]  ;;  %v6638_v33 = vld [vmem:[%s10279_s0 + $0xc8] sm:$0xfe]  ;;  %v316_v11 = vsel %vm235_vm0, %v314_v13, %v315_v24 }
  0x2f   :  { %5544 = vmatpush3.bf16.msra.mxu1 %v5543_v30  ;;  %516 = vmatprep.mubr.f32.mxu1 %v307_v57  ;;  %v6592_v30 = vld [vmem:[%s10280_s1 + $0x2d0] sm:$0xff]  ;;  %v6643_v34 = vld [vmem:[%s10279_s0 + $0xd8] sm:$0x1]  ;;  %v6657_v48 = vld [vmem:[%s10279_s0 + $0xc0] sm:$0xfe]  ;;  %v323_v52 = vrot.slane %v164_v36, 1  ;;  %v5555_v12 = vpack.c.bf16 %v6630_v27, %v6625_v42 }
  0x30   :  { %5576 = vmatpush3.bf16.msra.mxu0 %v5575_v58  ;;  %5546 = vmatprep.subr.bf16.mxu1 %v5545_v59  ;;  %v6662_v49 = vld [vmem:[%s10279_s0 + $0xd0] sm:$0x1]  ;;  %v6667_v50 = vld [vmem:[%s10279_s0 + $0x228] sm:$0xfe]  ;;  %v324_v53 = vrot.slane %v166_v37, 1  ;;  %v6674_v47 = vld [vmem:[%s10280_s1 + $0x258] sm:$0xff]  ;;  %v5585_v59 = vpack.c.bf16 %v6597_v31, %v6592_v30 }
  0x31   :  { %476 = vmatprep.mubr.f32.mxu0 %v259_v2  ;;  %5578 = vmatprep.subr.bf16.mxu0 %v5577_v6  ;;  %v320_v56 = vrot.slane %v6608_v38, 1  ;;  %v6680_v57 = vld [vmem:[%s10280_s1 + $0xe0] sm:$0xff]  ;;  %v6685_v58 = vld [vmem:[%s10280_s1 + $0xe8] sm:$0xff]  ;;  %v321_v60 = vrot.slane %v165_v32, 1  ;;  %v275_v61 = vrot.slane %v6638_v33, 1  ;;  %v276_v63 = vrot.slane %v6643_v34, 1 }
  0x32   :  { %517 = vmatmul.mubr.f32.gmra.mrb[6].mxu1 %v304_v0  ;;  %477 = vmatmul.mubr.f32.gmra.mrb[6].mxu0 %v256_v55  ;;  %v6694_v0 = vld [vmem:[%s10280_s1 + $0x2e0] sm:$0xff]  ;;  %v170_v2 = vld [vmem:[%s10279_s0 + $0x238] sm:$0x1]  ;;  %v6708_v55 = vld [vmem:[%s10280_s1 + $0x68] sm:$0xff]  ;;  %v272_v6 = vrot.slane %v6657_v48, 1  ;;  %v329_v9 = vrot.slane %v6667_v50, 1  ;;  %v325_v5 = vsel %vm235_vm0, %v323_v52, %v324_v53  ;;  %v5587_v17 = vpack.c.bf16 %v6674_v47, %v6652_v46 }
  0x33   :  { %5548 = vmatpush3.bf16.msra.mxu1 %v5547_v3  ;;  %521 = vmatprep.mubr.f32.mxu1 %v313_v14  ;;  %v271_v3 = vsel %vm235_vm0, %v269_v25, %v270_v26  ;;  %v4259_v8 = vld [vmem:[%s10280_s1 + $0x2e8] sm:$0xff]  ;;  %v6719_v10 = vld [vmem:[%s10279_s0 + $0x220] sm:$0xfe]  ;;  %v268_v14 = vsel %vm235_vm0, %v266_v28, %v267_v29  ;;  %v6732_v15 = vld [vmem:[%s10279_s0 + $0x230] sm:$0x1]  ;;  %v5557_v18 = vpack.c.bf16 %v6685_v58, %v6680_v57  ;;  %v330_v19 = vrot.slane %v170_v2, 1 }
  0x34   :  { %5580 = vmatpush3.bf16.msra.mxu0 %v5579_v7  ;;  %5550 = vmatprep.subr.bf16.mxu1 %v5549_v21  ;;  %v273_v7 = vrot.slane %v6662_v49, 1  ;;  %v136_v16 = vld [vmem:[%s10279_s0 + $0xe8] sm:$0xfe]  ;;  %v138_v4 = vld [vmem:[%s10279_s0 + $0xf8] sm:$0x1]  ;;  %v4242_v20 = vld [vmem:[%s10280_s1 + $0x260] sm:$0xff]  ;;  %v322_v23 = vsel %vm235_vm0, %v320_v56, %v321_v60  ;;  %v5589_v13 = vpack.c.bf16 %v4259_v8, %v6694_v0  ;;  %v277_v26 = vsel %vm235_vm0, %v275_v61, %v276_v63 }
  0x35   :  { %481 = vmatprep.mubr.f32.mxu0 %v265_v40  ;;  %5582 = vmatprep.subr.bf16.mxu0 %v5581_v35  ;;  %v135_v21 = vld [vmem:[%s10279_s0 + $0xe0] sm:$0xfe]  ;;  %v137_v22 = vld [vmem:[%s10279_s0 + $0xf0] sm:$0x1]  ;;  %v4243_v24 = vld [vmem:[%s10280_s1 + $0x268] sm:$0xff]  ;;  %v326_v62 = vrot.slane %v6719_v10, 1  ;;  %v5559_v38 = vpack.c.bf16 %v6708_v55, %v6703_v54  ;;  %v331_v32 = vsel %vm235_vm0, %v329_v9, %v330_v19 }
  0x36   :  { %522 = vmatmul.mubr.f32.gmra.mrb[8].mxu1 %v310_v39  ;;  %482 = vmatmul.mubr.f32.gmra.mrb[8].mxu0 %v262_v43  ;;  %v105_v1 = vld [vmem:[%s10280_s1 + $0xf0] sm:$0xff]  ;;  %v106_v25 = vld [vmem:[%s10280_s1 + $0xf8] sm:$0xff]  ;;  %v327_v28 = vrot.slane %v6732_v15, 1  ;;  %v281_v29 = vrot.slane %v136_v16, 1  ;;  %v282_v30 = vrot.slane %v138_v4, 1  ;;  %v274_v39 = vsel %vm235_vm0, %v272_v6, %v273_v7  ;;  %v4310_v48 = vld [vmem:[%s10280_s1 + $0x380] sm:$0xff] }
  0x37   :  { %5552 = vmatpush3.bf16.msra.mxu1 %v5551_v41  ;;  %526 = vmatprep.mubr.f32.mxu1 %v319_v44  ;;  %v6771_v31 = vld [vmem:[%s10280_s1 + $0x70] sm:$0xff]  ;;  %v6776_v35 = vld [vmem:[%s10280_s1 + $0x78] sm:$0xff]  ;;  %v278_v40 = vrot.slane %v135_v21, 1  ;;  %v279_v41 = vrot.slane %v137_v22, 1  ;;  %v688_v42 = vld [vmem:[%s10279_s0 + $0x8] sm:$0xfc]  ;;  %v5591_v33 = vpack.c.bf16 %v4243_v24, %v4242_v20  ;;  %v5561_v34 = vpack.c.bf16 %v106_v25, %v105_v1 }
  0x38   :  { %5584 = vmatpush3.bf16.msra.mxu0 %v5583_v45  ;;  %5554 = vmatprep.subr.bf16.mxu1 %v5553_v51  ;;  %v4260_v36 = vld [vmem:[%s10280_s1 + $0x2f0] sm:$0xff]  ;;  %v4261_v37 = vld [vmem:[%s10280_s1 + $0x2f8] sm:$0xff]  ;;  %v687_v45 = vld [vmem:[%s10279_s0] sm:$0xfc]  ;;  %v283_v51 = vsel %vm235_vm0, %v281_v29, %v282_v30  ;;  %v819_v53 = vrot.slane %v688_v42, 2  ;;  %v5563_v60 = vpack.c.bf16 %v6776_v35, %v6771_v31 }
  0x39   :  { %486 = vmatprep.mubr.f32.mxu0 %v271_v3  ;;  %5586 = vmatprep.subr.bf16.mxu0 %v5585_v59  ;;  %v690_v27 = vld [vmem:[%s10279_s0 + $0x18] sm:$0x3]  ;;  %v4244_v43 = vld [vmem:[%s10280_s1 + $0x270] sm:$0xff]  ;;  %v5593_v46 = vpack.c.bf16 %v4261_v37, %v4260_v36  ;;  %v4311_v49 = vld [vmem:[%s10280_s1 + $0x388] sm:$0xff]  ;;  %v328_v59 = vsel %vm235_vm0, %v326_v62, %v327_v28  ;;  %v280_v61 = vsel %vm235_vm0, %v278_v40, %v279_v41  ;;  %v816_v0 = vrot.slane %v687_v45, 2 }
  0x3a   :  { %527 = vmatmul.mubr.f32.gmra.mrb[10].mxu1 %v316_v11  ;;  %487 = vmatmul.mubr.f32.gmra.mrb[10].mxu0 %v268_v14  ;;  %v4245_v44 = vld [vmem:[%s10280_s1 + $0x278] sm:$0xff]  ;;  %v689_v50 = vld [vmem:[%s10279_s0 + $0x10] sm:$0x3]  ;;  %v44_v52 = vld [vmem:[%s10279_s0 + $0x8] sm:$0xff]  ;;  %v820_v47 = vrot.slane %v690_v27, 2  ;;  %v5597_v55 = vpack.c.bf16 %v4311_v49, %v4310_v48 }
  0x3b   :  { %5556 = vmatpush3.bf16.msra.mxu1 %v5555_v12  ;;  %531 = vmatprep.mubr.f32.mxu1 %v325_v5  ;;  %v6819_v56 = vld [vmem:[%s10280_s1 + $0x300] sm:$0xff]  ;;  %v4407_v58 = vld [vmem:[%s10280_s1 + $0x488] sm:$0xff]  ;;  %v694_v3 = vld [vmem:[%s10279_s0 + $0x38] sm:$0x3]  ;;  %v5595_v54 = vpack.c.bf16 %v4245_v44, %v4244_v43  ;;  %v817_v6 = vrot.slane %v689_v50, 2 }
  0x3c   :  { %5588 = vmatpush3.bf16.msra.mxu0 %v5587_v17  ;;  %5558 = vmatprep.subr.bf16.mxu1 %v5557_v18  ;;  %v4406_v57 = vld [vmem:[%s10280_s1 + $0x480] sm:$0xff]  ;;  %v4295_v63 = vld [vmem:[%s10280_s1 + $0x308] sm:$0xff]  ;;  %v693_v9 = vld [vmem:[%s10279_s0 + $0x30] sm:$0x3]  ;;  %v821_v15 = vsel %vm815_vm1, %v819_v53, %v820_v47  ;;  %v826_v4 = vrot.slane %v694_v3, 2 }
  0x3d   :  { %491 = vmatprep.mubr.f32.mxu0 %v277_v26  ;;  %5590 = vmatprep.subr.bf16.mxu0 %v5589_v13  ;;  %v692_v2 = vld [vmem:[%s10279_s0 + $0x28] sm:$0xfc]  ;;  %v4390_v7 = vld [vmem:[%s10280_s1 + $0x400] sm:$0xff]  ;;  %v5629_v10 = vpack.c.bf16 %v4407_v58, %v4406_v57  ;;  %v698_v14 = vld [vmem:[%s10279_s0 + $0x58] sm:$0x3]  ;;  %v5599_v19 = vpack.c.bf16 %v4295_v63, %v6819_v56  ;;  %v823_v21 = vrot.slane %v693_v9, 2  ;;  %v818_v13 = vsel %vm815_vm1, %v816_v0, %v817_v6 }
  0x3e   :  { %532 = vmatmul.mubr.f32.gmra.mrb[12].mxu1 %v322_v23  ;;  %492 = vmatmul.mubr.f32.gmra.mrb[12].mxu0 %v274_v39  ;;  %v691_v8 = vld [vmem:[%s10279_s0 + $0x20] sm:$0xfc]  ;;  %v4391_v11 = vld [vmem:[%s10280_s1 + $0x408] sm:$0xff]  ;;  %v825_v16 = vrot.slane %v692_v2, 2  ;;  %v4312_v5 = vld [vmem:[%s10280_s1 + $0x390] sm:$0xff]  ;;  %v832_v25 = vrot.slane %v698_v14, 2 }
  0x3f   :  { %5560 = vmatpush3.bf16.msra.mxu1 %v5559_v38  ;;  %536 = vmatprep.mubr.f32.mxu1 %v331_v32  ;;  %v696_v12 = vld [vmem:[%s10279_s0 + $0x48] sm:$0xfc]  ;;  %v4313_v17 = vld [vmem:[%s10280_s1 + $0x398] sm:$0xff]  ;;  %v43_v18 = vld [vmem:[%s10279_s0] sm:$0xff]  ;;  %v822_v20 = vrot.slane %v691_v8, 2  ;;  %v5631_v62 = vpack.c.bf16 %v4391_v11, %v4390_v7 }
  0x40   :  { %5592 = vmatpush3.bf16.msra.mxu0 %v5591_v33  ;;  %5562 = vmatprep.subr.bf16.mxu1 %v5561_v34  ;;  %v4408_v22 = vld [vmem:[%s10280_s1 + $0x490] sm:$0xff]  ;;  %v4409_v23 = vld [vmem:[%s10280_s1 + $0x498] sm:$0xff]  ;;  %v6879_v24 = vld [vmem:[%s10279_s0 + $0x28] sm:$0xff]  ;;  %v831_v1 = vrot.slane %v696_v12, 2  ;;  %v5601_v30 = vpack.c.bf16 %v4313_v17, %v4312_v5  ;;  %v827_v37 = vsel %vm815_vm1, %v825_v16, %v826_v4 }
  0x41   :  { %496 = vmatprep.mubr.f32.mxu0 %v283_v51  ;;  %5594 = vmatprep.subr.bf16.mxu0 %v5593_v46  ;;  %v4296_v26 = vld [vmem:[%s10280_s1 + $0x310] sm:$0xff]  ;;  %v4297_v28 = vld [vmem:[%s10280_s1 + $0x318] sm:$0xff]  ;;  %v6890_v29 = vld [vmem:[%s10279_s0 + $0x20] sm:$0xff]  ;;  %v5633_v38 = vpack.c.bf16 %v4409_v23, %v4408_v22  ;;  %v824_v42 = vsel %vm815_vm1, %v822_v20, %v823_v21 }
  0x42   :  { %537 = vmatmul.mubr.f32.gmra.mrb[14].mxu1 %v328_v59  ;;  %497 = vmatmul.mubr.f32.gmra.mrb[14].mxu0 %v280_v61  ;;  %v695_v31 = vld [vmem:[%s10279_s0 + $0x40] sm:$0xfc]  ;;  %v697_v35 = vld [vmem:[%s10279_s0 + $0x50] sm:$0x3]  ;;  %v4393_v39 = vld [vmem:[%s10280_s1 + $0x418] sm:$0xff]  ;;  %v833_v34 = vsel %vm815_vm1, %v831_v1, %v832_v25  ;;  %v5603_v43 = vpack.c.bf16 %v4297_v28, %v4296_v26 }
  0x43   :  { %5564 = vmatpush3.bf16.msra.mxu1 %v5563_v60  ;;  %606 = vmatprep.mubr.f32.mxu1 %v44_v52  ;;  %v4392_v36 = vld [vmem:[%s10280_s1 + $0x410] sm:$0xff]  ;;  %v700_v40 = vld [vmem:[%s10279_s0 + $0x68] sm:$0xfc]  ;;  %v702_v41 = vld [vmem:[%s10279_s0 + $0x78] sm:$0x3]  ;;  %v828_v44 = vrot.slane %v695_v31, 2 }
  0x44   :  { %5596 = vmatpush3.bf16.msra.mxu0 %v5595_v54  ;;  %5598 = vmatprep.subr.bf16.mxu1 %v5597_v55  ;;  %v6915_v27 = vld [vmem:[%s10279_s0 + $0x48] sm:$0xff]  ;;  %v4314_v32 = vld [vmem:[%s10280_s1 + $0x3a0] sm:$0xff]  ;;  %v829_v45 = vrot.slane %v697_v35, 2  ;;  %v701_v48 = vld [vmem:[%s10279_s0 + $0x70] sm:$0x3]  ;;  %v5635_v49 = vpack.c.bf16 %v4393_v39, %v4392_v36  ;;  %v837_v50 = vrot.slane %v700_v40, 2 }
  0x45   :  { %1041 = vmatprep.mubr.f32.mxu0 %v821_v15  ;;  %5630 = vmatprep.subr.bf16.mxu0 %v5629_v10  ;;  %v4315_v33 = vld [vmem:[%s10280_s1 + $0x3a8] sm:$0xff]  ;;  %v699_v46 = vld [vmem:[%s10279_s0 + $0x60] sm:$0xfc]  ;;  %v838_v51 = vrot.slane %v702_v41, 2  ;;  %v706_v58 = vld [vmem:[%s10279_s0 + $0x98] sm:$0x3] }
  0x46   :  { %607 = vmatmul.mubr.f32.vlgmr.msra.gmra.mrb[16].mxu1 %v43_v18  ;;  %v5605_v52 = vpack.c.bf16 %v4315_v33, %v4314_v32  ;;  %v4298_v53 = vld [vmem:[%s10280_s1 + $0x320] sm:$0xff]  ;;  %v4299_v47 = vld [vmem:[%s10280_s1 + $0x328] sm:$0xff]  ;;  %v830_v2 = vsel %vm815_vm1, %v828_v44, %v829_v45  ;;  %v834_v54 = vrot.slane %v699_v46, 2  ;;  %v835_v55 = vrot.slane %v701_v48, 2  ;;  %v705_v11 = vld [vmem:[%s10279_s0 + $0x90] sm:$0x3] }
  0x47   :  { %5600 = vmatpush3.bf16.msra.mxu1 %v5599_v19  ;;  %1042 = vmatmul.mubr.f32.vlgmr.msra.gmra.mrb[16].mxu0 %v818_v13  ;;  %v4410_v56 = vld [vmem:[%s10280_s1 + $0x4a0] sm:$0xff]  ;;  %v704_v57 = vld [vmem:[%s10279_s0 + $0x88] sm:$0xfc]  ;;  %v5607_v6 = vpack.c.bf16 %v4299_v47, %v4298_v53  ;;  %v839_v8 = vsel %vm815_vm1, %v837_v50, %v838_v51  ;;  %v844_v10 = vrot.slane %v706_v58, 2  ;;  %v710_v15 = vld [vmem:[%s10279_s0 + $0xb8] sm:$0x3] }
  0x48   :  { %611 = vmatprep.mubr.f32.mxu1 %v6879_v24  ;;  %5632 = vmatpush3.bf16.msra.mxu0 %v5631_v62  ;;  %v4411_v59 = vld [vmem:[%s10280_s1 + $0x4a8] sm:$0xff]  ;;  %v6954_v60 = vld [vmem:[%s10279_s0 + $0x40] sm:$0xff]  ;;  %v843_v9 = vrot.slane %v704_v57, 2  ;;  %v4316_v16 = vld [vmem:[%s10280_s1 + $0x3b0] sm:$0xff]  ;;  %v836_v21 = vsel %vm815_vm1, %v834_v54, %v835_v55  ;;  %v841_v22 = vrot.slane %v705_v11, 2  ;;  %v850_v26 = vrot.slane %v710_v15, 2 }
  0x49   :  { %1046 = vmatprep.mubr.f32.mxu0 %v827_v37  ;;  %5602 = vmatprep.subr.bf16.mxu1 %v5601_v30  ;;  %v5637_v61 = vpack.c.bf16 %v4411_v59, %v4410_v56  ;;  %v4394_v63 = vld [vmem:[%s10280_s1 + $0x420] sm:$0xff]  ;;  %v4395_v0 = vld [vmem:[%s10280_s1 + $0x428] sm:$0xff]  ;;  %v4317_v4 = vld [vmem:[%s10280_s1 + $0x3b8] sm:$0xff] }
  0x4a   :  { %612 = vmatmul.mubr.f32.gmra.mrb[18].mxu1 %v6890_v29  ;;  %5634 = vmatprep.subr.bf16.mxu0 %v5633_v38  ;;  %v6966_v3 = vld [vmem:[%s10279_s0 + $0x68] sm:$0xff]  ;;  %v703_v7 = vld [vmem:[%s10279_s0 + $0x80] sm:$0xfc]  ;;  %v5639_v12 = vpack.c.bf16 %v4395_v0, %v4394_v63  ;;  %v5609_v19 = vpack.c.bf16 %v4317_v4, %v4316_v16  ;;  %v4300_v20 = vld [vmem:[%s10280_s1 + $0x330] sm:$0xff]  ;;  %v845_v25 = vsel %vm815_vm1, %v843_v9, %v844_v10 }
  0x4b   :  { %1047 = vmatmul.mubr.f32.gmra.mrb[18].mxu0 %v824_v42  ;;  %616 = vmatprep.mubr.f32.mxu1 %v6915_v27  ;;  %v708_v14 = vld [vmem:[%s10279_s0 + $0xa8] sm:$0xfc]  ;;  %v6992_v5 = vld [vmem:[%s10279_s0 + $0x60] sm:$0xff]  ;;  %v840_v18 = vrot.slane %v703_v7, 2  ;;  %v4301_v62 = vld [vmem:[%s10280_s1 + $0x338] sm:$0xff] }
  0x4c   :  { %1051 = vmatprep.mubr.f32.mxu0 %v833_v34  ;;  %5604 = vmatpush3.bf16.msra.mxu1 %v5603_v43  ;;  %v6997_v17 = vld [vmem:[%s10279_s0 + $0x88] sm:$0xff]  ;;  %v849_v23 = vrot.slane %v708_v14, 2  ;;  %v707_v13 = vld [vmem:[%s10279_s0 + $0xa0] sm:$0xfc]  ;;  %v4412_v1 = vld [vmem:[%s10280_s1 + $0x4b0] sm:$0xff]  ;;  %v5611_v31 = vpack.c.bf16 %v4301_v62, %v4300_v20 }
  0x4d   :  { %5636 = vmatpush3.bf16.msra.mxu0 %v5635_v49  ;;  %5606 = vmatprep.subr.bf16.mxu1 %v5605_v52  ;;  %v709_v28 = vld [vmem:[%s10279_s0 + $0xb0] sm:$0x3]  ;;  %v712_v30 = vld [vmem:[%s10279_s0 + $0xc8] sm:$0xfc]  ;;  %v4413_v35 = vld [vmem:[%s10280_s1 + $0x4b8] sm:$0xff]  ;;  %v842_v42 = vsel %vm815_vm1, %v840_v18, %v841_v22  ;;  %v846_v33 = vrot.slane %v707_v13, 2 }
  0x4e   :  { %617 = vmatmul.mubr.f32.gmra.mrb[20].mxu1 %v6954_v60  ;;  %5638 = vmatprep.subr.bf16.mxu0 %v5637_v61  ;;  %v714_v36 = vld [vmem:[%s10279_s0 + $0xd8] sm:$0x3]  ;;  %v5641_v37 = vpack.c.bf16 %v4413_v35, %v4412_v1  ;;  %v4396_v38 = vld [vmem:[%s10280_s1 + $0x430] sm:$0xff]  ;;  %v7036_v40 = vld [vmem:[%s10279_s0 + $0x80] sm:$0xff]  ;;  %v847_v34 = vrot.slane %v709_v28, 2  ;;  %v851_v45 = vsel %vm815_vm1, %v849_v23, %v850_v26  ;;  %v855_v46 = vrot.slane %v712_v30, 2 }
  0x4f   :  { %1052 = vmatmul.mubr.f32.gmra.mrb[20].mxu0 %v830_v2  ;;  %621 = vmatprep.mubr.f32.mxu1 %v6966_v3  ;;  %v4397_v39 = vld [vmem:[%s10280_s1 + $0x438] sm:$0xff]  ;;  %v7042_v32 = vld [vmem:[%s10279_s0 + $0xa8] sm:$0xff]  ;;  %v711_v43 = vld [vmem:[%s10279_s0 + $0xc0] sm:$0xfc]  ;;  %v856_v48 = vrot.slane %v714_v36, 2 }
  0x50   :  { %1056 = vmatprep.mubr.f32.mxu0 %v839_v8  ;;  %5608 = vmatpush3.bf16.msra.mxu1 %v5607_v6  ;;  %v5643_v41 = vpack.c.bf16 %v4397_v39, %v4396_v38  ;;  %v7050_v44 = vld [vmem:[%s10279_s0 + $0xa0] sm:$0xff]  ;;  %v713_v49 = vld [vmem:[%s10279_s0 + $0xd0] sm:$0x3]  ;;  %v4319_v51 = vld [vmem:[%s10280_s1 + $0x3c8] sm:$0xff]  ;;  %v852_v58 = vrot.slane %v711_v43, 2  ;;  %v848_v63 = vsel %vm815_vm1, %v846_v33, %v847_v34 }
  0x51   :  { %5640 = vmatpush3.bf16.msra.mxu0 %v5639_v12  ;;  %5610 = vmatprep.subr.bf16.mxu1 %v5609_v19  ;;  %v4318_v50 = vld [vmem:[%s10280_s1 + $0x3c0] sm:$0xff]  ;;  %v716_v52 = vld [vmem:[%s10279_s0 + $0xe8] sm:$0xfc]  ;;  %v718_v53 = vld [vmem:[%s10279_s0 + $0xf8] sm:$0x3]  ;;  %v853_v0 = vrot.slane %v713_v49, 2  ;;  %v857_v7 = vsel %vm815_vm1, %v855_v46, %v856_v48 }
  0x52   :  { %622 = vmatmul.mubr.f32.gmra.mrb[22].mxu1 %v6992_v5  ;;  %5642 = vmatprep.subr.bf16.mxu0 %v5641_v37  ;;  %v5613_v47 = vpack.c.bf16 %v4319_v51, %v4318_v50  ;;  %v4302_v56 = vld [vmem:[%s10280_s1 + $0x340] sm:$0xff]  ;;  %v7076_v57 = vld [vmem:[%s10279_s0 + $0xc8] sm:$0xff]  ;;  %v717_v54 = vld [vmem:[%s10279_s0 + $0xf0] sm:$0x3]  ;;  %v861_v8 = vrot.slane %v716_v52, 2  ;;  %v862_v9 = vrot.slane %v718_v53, 2 }
  0x53   :  { %1057 = vmatmul.mubr.f32.gmra.mrb[22].mxu0 %v836_v21  ;;  %626 = vmatprep.mubr.f32.mxu1 %v6997_v17  ;;  %v4303_v59 = vld [vmem:[%s10280_s1 + $0x348] sm:$0xff]  ;;  %v4414_v61 = vld [vmem:[%s10280_s1 + $0x4c0] sm:$0xff]  ;;  %v722_v15 = vld [vmem:[%s10279_s0 + $0x158] sm:$0x3]  ;;  %v854_v20 = vsel %vm815_vm1, %v852_v58, %v853_v0  ;;  %v859_v21 = vrot.slane %v717_v54, 2 }
  0x54   :  { %1061 = vmatprep.mubr.f32.mxu0 %v845_v25  ;;  %5612 = vmatpush3.bf16.msra.mxu1 %v5611_v31  ;;  %v715_v2 = vld [vmem:[%s10279_s0 + $0xe0] sm:$0xfc]  ;;  %v5615_v55 = vpack.c.bf16 %v4303_v59, %v4302_v56  ;;  %v4415_v6 = vld [vmem:[%s10280_s1 + $0x4c8] sm:$0xff]  ;;  %v4320_v13 = vld [vmem:[%s10280_s1 + $0x3d0] sm:$0xff]  ;;  %v863_v1 = vsel %vm815_vm1, %v861_v8, %v862_v9  ;;  %v868_v25 = vrot.slane %v722_v15, 2 }
  0x55   :  { %5644 = vmatpush3.bf16.msra.mxu0 %v5643_v41  ;;  %5614 = vmatprep.subr.bf16.mxu1 %v5613_v47  ;;  %v720_v10 = vld [vmem:[%s10279_s0 + $0x148] sm:$0xfc]  ;;  %v5645_v11 = vpack.c.bf16 %v4415_v6, %v4414_v61  ;;  %v4398_v12 = vld [vmem:[%s10280_s1 + $0x440] sm:$0xff]  ;;  %v858_v19 = vrot.slane %v715_v2, 2  ;;  %v4321_v62 = vld [vmem:[%s10280_s1 + $0x3d8] sm:$0xff] }
  0x56   :  { %627 = vmatmul.mubr.f32.gmra.mrb[24].mxu1 %v7036_v40  ;;  %v4399_v14 = vld [vmem:[%s10280_s1 + $0x448] sm:$0xff]  ;;  %v7112_v4 = vld [vmem:[%s10279_s0 + $0xc0] sm:$0xff]  ;;  %v867_v22 = vrot.slane %v720_v10, 2  ;;  %v721_v26 = vld [vmem:[%s10279_s0 + $0x150] sm:$0x3]  ;;  %v5617_v30 = vpack.c.bf16 %v4321_v62, %v4320_v13 }
  0x57   :  { %1062 = vmatmul.mubr.f32.gmra.mrb[24].mxu0 %v842_v42  ;;  %631 = vmatprep.mubr.f32.mxu1 %v7042_v32  ;;  %v5647_v16 = vpack.c.bf16 %v4399_v14, %v4398_v12  ;;  %v7117_v18 = vld [vmem:[%s10279_s0 + $0xe8] sm:$0xff]  ;;  %v719_v23 = vld [vmem:[%s10279_s0 + $0x140] sm:$0xfc]  ;;  %v4304_v31 = vld [vmem:[%s10280_s1 + $0x350] sm:$0xff]  ;;  %v860_v42 = vsel %vm815_vm1, %v858_v19, %v859_v21  ;;  %v865_v43 = vrot.slane %v721_v26, 2 }
  0x58   :  { %1066 = vmatprep.mubr.f32.mxu0 %v851_v45  ;;  %5616 = vmatpush3.bf16.msra.mxu1 %v5615_v55  ;;  %v724_v28 = vld [vmem:[%s10279_s0 + $0x168] sm:$0xfc]  ;;  %v726_v35 = vld [vmem:[%s10279_s0 + $0x178] sm:$0x3]  ;;  %v4416_v37 = vld [vmem:[%s10280_s1 + $0x4d0] sm:$0xff]  ;;  %v864_v34 = vrot.slane %v719_v23, 2  ;;  %v869_v49 = vsel %vm815_vm1, %v867_v22, %v868_v25 }
  0x59   :  { %5646 = vmatprep.subr.bf16.mxu0 %v5645_v11  ;;  %v4305_v36 = vld [vmem:[%s10280_s1 + $0x358] sm:$0xff]  ;;  %v7153_v38 = vld [vmem:[%s10279_s0 + $0xe0] sm:$0xff]  ;;  %v60_v33 = vld [vmem:[%s10279_s0 + $0x148] sm:$0xff]  ;;  %5618 = vmatprep.subr.bf16.mxu1 %v5617_v30  ;;  %v873_v50 = vrot.slane %v724_v28, 2  ;;  %v874_v51 = vrot.slane %v726_v35, 2 }
  0x5a   :  { %632 = vmatmul.mubr.f32.gmra.mrb[26].mxu1 %v7050_v44  ;;  %5648 = vmatpush3.bf16.msra.mxu0 %v5647_v16  ;;  %v5619_v39 = vpack.c.bf16 %v4305_v36, %v4304_v31  ;;  %v4417_v41 = vld [vmem:[%s10280_s1 + $0x4d8] sm:$0xff]  ;;  %v4400_v46 = vld [vmem:[%s10280_s1 + $0x450] sm:$0xff]  ;;  %v723_v52 = vld [vmem:[%s10279_s0 + $0x160] sm:$0xfc]  ;;  %v866_v0 = vsel %vm815_vm1, %v864_v34, %v865_v43 }
  0x5b   :  { %1067 = vmatmul.mubr.f32.gmra.mrb[26].mxu0 %v848_v63  ;;  %636 = vmatprep.mubr.f32.mxu1 %v7076_v57  ;;  %v5649_v45 = vpack.c.bf16 %v4417_v41, %v4416_v37  ;;  %v4401_v48 = vld [vmem:[%s10280_s1 + $0x458] sm:$0xff]  ;;  %v725_v53 = vld [vmem:[%s10279_s0 + $0x170] sm:$0x3]  ;;  %v728_v56 = vld [vmem:[%s10279_s0 + $0x188] sm:$0xfc]  ;;  %v870_v54 = vrot.slane %v723_v52, 2  ;;  %v875_v9 = vsel %vm815_vm1, %v873_v50, %v874_v51 }
  0x5c   :  { %1071 = vmatprep.mubr.f32.mxu0 %v857_v7  ;;  %5620 = vmatpush3.bf16.msra.mxu1 %v5619_v39  ;;  %v5651_v47 = vpack.c.bf16 %v4401_v48, %v4400_v46  ;;  %v730_v58 = vld [vmem:[%s10279_s0 + $0x198] sm:$0x3]  ;;  %v59_v59 = vld [vmem:[%s10279_s0 + $0x140] sm:$0xff]  ;;  %v4323_v63 = vld [vmem:[%s10280_s1 + $0x3e8] sm:$0xff]  ;;  %v871_v55 = vrot.slane %v725_v53, 2  ;;  %v879_v10 = vrot.slane %v728_v56, 2 }
  0x5d   :  { %5650 = vmatprep.subr.bf16.mxu0 %v5649_v45  ;;  %v4322_v61 = vld [vmem:[%s10280_s1 + $0x3e0] sm:$0xff]  ;;  %v7195_v2 = vld [vmem:[%s10279_s0 + $0x168] sm:$0xff]  ;;  %v880_v11 = vrot.slane %v730_v58, 2  ;;  %v729_v12 = vld [vmem:[%s10279_s0 + $0x190] sm:$0x3] }
  0x5e   :  { %637 = vmatmul.mubr.f32.gmra.mrb[28].mxu1 %v7112_v4  ;;  %v727_v6 = vld [vmem:[%s10279_s0 + $0x180] sm:$0xfc]  ;;  %5652 = vmatpush3.bf16.msra.mxu0 %v5651_v47  ;;  %v5621_v7 = vpack.c.bf16 %v4323_v63, %v4322_v61  ;;  %v4307_v14 = vld [vmem:[%s10280_s1 + $0x368] sm:$0xff]  ;;  %v734_v19 = vld [vmem:[%s10279_s0 + $0x1b8] sm:$0x3]  ;;  %v877_v28 = vrot.slane %v729_v12, 2 }
  0x5f   :  { %1072 = vmatmul.mubr.f32.gmra.mrb[28].mxu0 %v854_v20  ;;  %641 = vmatprep.mubr.f32.mxu1 %v7117_v18  ;;  %v4306_v8 = vld [vmem:[%s10280_s1 + $0x360] sm:$0xff]  ;;  %v732_v16 = vld [vmem:[%s10279_s0 + $0x1a8] sm:$0xfc]  ;;  %v876_v26 = vrot.slane %v727_v6, 2  ;;  %v881_v35 = vsel %vm815_vm1, %v879_v10, %v880_v11  ;;  %v886_v37 = vrot.slane %v734_v19, 2  ;;  %v4325_v34 = vld [vmem:[%s10280_s1 + $0x3f8] sm:$0xff] }
  0x60   :  { %1076 = vmatprep.mubr.f32.mxu0 %v863_v1  ;;  %v4418_v15 = vld [vmem:[%s10280_s1 + $0x4e0] sm:$0xff]  ;;  %5622 = vmatprep.subr.bf16.mxu1 %v5621_v7  ;;  %v5623_v20 = vpack.c.bf16 %v4307_v14, %v4306_v8  ;;  %v4419_v21 = vld [vmem:[%s10280_s1 + $0x4e8] sm:$0xff]  ;;  %v872_v1 = vsel %vm815_vm1, %v870_v54, %v871_v55  ;;  %v885_v36 = vrot.slane %v732_v16, 2  ;;  %v733_v39 = vld [vmem:[%s10279_s0 + $0x1b0] sm:$0x3] }
  0x61   :  { %v7226_v22 = vld [vmem:[%s10279_s0 + $0x160] sm:$0xff]  ;;  %v5653_v23 = vpack.c.bf16 %v4419_v21, %v4418_v15  ;;  %v4403_v62 = vld [vmem:[%s10280_s1 + $0x468] sm:$0xff]  ;;  %v878_v50 = vsel %vm815_vm1, %v876_v26, %v877_v28  ;;  %v883_v51 = vrot.slane %v733_v39, 2  ;;  %v4309_v47 = vld [vmem:[%s10280_s1 + $0x378] sm:$0xff] }
  0x62   :  { %642 = vmatmul.mubr.f32.gmra.mrb[30].mxu1 %v7153_v38  ;;  %v4402_v13 = vld [vmem:[%s10280_s1 + $0x460] sm:$0xff]  ;;  %v7238_v25 = vld [vmem:[%s10279_s0 + $0x188] sm:$0xff]  ;;  %v4420_v56 = vld [vmem:[%s10280_s1 + $0x4f0] sm:$0xff]  ;;  %v887_v58 = vsel %vm815_vm1, %v885_v36, %v886_v37 }
  0x63   :  { %1077 = vmatmul.mubr.f32.gmra.mrb[30].mxu0 %v860_v42  ;;  %646 = vmatprep.mubr.f32.mxu1 %v60_v33  ;;  %v731_v30 = vld [vmem:[%s10279_s0 + $0x1a0] sm:$0xfc]  ;;  %v5655_v31 = vpack.c.bf16 %v4403_v62, %v4402_v13  ;;  %v736_v41 = vld [vmem:[%s10279_s0 + $0x1c8] sm:$0xfc]  ;;  %v738_v42 = vld [vmem:[%s10279_s0 + $0x1d8] sm:$0x3] }
  0x64   :  { %1081 = vmatprep.mubr.f32.mxu0 %v869_v49  ;;  %5624 = vmatpush3.bf16.msra.mxu1 %v5623_v20  ;;  %v4324_v33 = vld [vmem:[%s10280_s1 + $0x3f0] sm:$0xff]  ;;  %v7264_v43 = vld [vmem:[%s10279_s0 + $0x180] sm:$0xff]  ;;  %v7269_v45 = vld [vmem:[%s10279_s0 + $0x1a8] sm:$0xff]  ;;  %v882_v46 = vrot.slane %v731_v30, 2  ;;  %v891_v52 = vrot.slane %v736_v41, 2 }
  0x65   :  { %5654 = vmatprep.subr.bf16.mxu0 %v5653_v23  ;;  %v5625_v48 = vpack.c.bf16 %v4325_v34, %v4324_v33  ;;  %v4308_v49 = vld [vmem:[%s10280_s1 + $0x370] sm:$0xff]  ;;  %v735_v53 = vld [vmem:[%s10279_s0 + $0x1c0] sm:$0xfc]  ;;  %v740_v63 = vld [vmem:[%s10279_s0 + $0x1e8] sm:$0xfc] }
  0x66   :  { %647 = vmatmul.mubr.f32.gmra.mrb[32].mxu1 %v59_v59  ;;  %5656 = vmatpush3.bf16.msra.mxu0 %v5655_v31  ;;  %v892_v59 = vrot.slane %v738_v42, 2  ;;  %v737_v61 = vld [vmem:[%s10279_s0 + $0x1d0] sm:$0x3]  ;;  %v4421_v54 = vld [vmem:[%s10280_s1 + $0x4f8] sm:$0xff]  ;;  %v884_v11 = vsel %vm815_vm1, %v882_v46, %v883_v51  ;;  %v7314_v12 = vld [vmem:[%s10279_s0 + $0x1c8] sm:$0xff]  ;;  %v888_v14 = vrot.slane %v735_v53, 2 }
  0x67   :  { %1082 = vmatmul.mubr.f32.gmra.mrb[32].mxu0 %v866_v0  ;;  %651 = vmatprep.mubr.f32.mxu1 %v7195_v2  ;;  %v5627_v0 = vpack.c.bf16 %v4309_v47, %v4308_v49  ;;  %v742_v55 = vld [vmem:[%s10279_s0 + $0x1f8] sm:$0x3]  ;;  %v5657_v6 = vpack.c.bf16 %v4421_v54, %v4420_v56  ;;  %v4404_v7 = vld [vmem:[%s10280_s1 + $0x470] sm:$0xff]  ;;  %v889_v15 = vrot.slane %v737_v61, 2  ;;  %v739_v16 = vld [vmem:[%s10279_s0 + $0x1e0] sm:$0xfc] }
  0x68   :  { %1086 = vmatprep.mubr.f32.mxu0 %v875_v9  ;;  %5626 = vmatprep.subr.bf16.mxu1 %v5625_v48  ;;  %v4405_v8 = vld [vmem:[%s10280_s1 + $0x478] sm:$0xff]  ;;  %v7308_v9 = vld [vmem:[%s10279_s0 + $0x1a0] sm:$0xff]  ;;  %v893_v20 = vsel %vm815_vm1, %v891_v52, %v892_v59  ;;  %v897_v21 = vrot.slane %v740_v63, 2  ;;  %v898_v23 = vrot.slane %v742_v55, 2  ;;  %v741_v13 = vld [vmem:[%s10279_s0 + $0x1f0] sm:$0x3] }
  0x69   :  { %v5659_v10 = vpack.c.bf16 %v4405_v8, %v4404_v7  ;;  %5628 = vmatpush3.bf16.msra.mxu1 %v5627_v0  ;;  %v4502_v19 = vld [vmem:[%s10280_s1 + $0x580] sm:$0xff]  ;;  %5658 = vmatprep.subr.bf16.mxu0 %v5657_v6  ;;  %v4503_v62 = vld [vmem:[%s10280_s1 + $0x588] sm:$0xff]  ;;  %v746_v26 = vld [vmem:[%s10279_s0 + $0x218] sm:$0x3]  ;;  %v890_v36 = vsel %vm815_vm1, %v888_v14, %v889_v15  ;;  %v894_v39 = vrot.slane %v739_v16, 2  ;;  %v895_v41 = vrot.slane %v741_v13, 2 }
  0x6a   :  { %652 = vmatmul.mubr.f32.gmra.mrb[34].mxu1 %v7226_v22  ;;  %v5661_v28 = vpack.c.bf16 %v4503_v62, %v4502_v19  ;;  %v7340_v30 = vld [vmem:[%s10279_s0 + $0x1c0] sm:$0xff]  ;;  %v7352_v37 = vld [vmem:[%s10279_s0 + $0x1e8] sm:$0xff]  ;;  %v899_v33 = vsel %vm815_vm1, %v897_v21, %v898_v23  ;;  %v904_v46 = vrot.slane %v746_v26, 2  ;;  %v745_v49 = vld [vmem:[%s10279_s0 + $0x210] sm:$0x3] }
  0x6b   :  { %1087 = vmatmul.mubr.f32.gmra.mrb[34].mxu0 %v872_v1  ;;  %656 = vmatprep.mubr.f32.mxu1 %v7238_v25  ;;  %v744_v1 = vld [vmem:[%s10279_s0 + $0x208] sm:$0xfc]  ;;  %v4566_v31 = vld [vmem:[%s10280_s1 + $0x680] sm:$0xff]  ;;  %v750_v51 = vld [vmem:[%s10279_s0 + $0x238] sm:$0x3]  ;;  %v896_v53 = vsel %vm815_vm1, %v894_v39, %v895_v41 }
  0x6c   :  { %1091 = vmatprep.mubr.f32.mxu0 %v881_v35  ;;  %5660 = vmatpush3.bf16.msra.mxu0 %v5659_v10  ;;  %v4567_v35 = vld [vmem:[%s10280_s1 + $0x688] sm:$0xff]  ;;  %v903_v34 = vrot.slane %v744_v1, 2  ;;  %v743_v48 = vld [vmem:[%s10279_s0 + $0x200] sm:$0xfc]  ;;  %v910_v63 = vrot.slane %v750_v51, 2 }
  0x6d   :  { %5662 = vmatprep.subr.bf16.mxu1 %v5661_v28  ;;  %v5693_v42 = vpack.c.bf16 %v4567_v35, %v4566_v31  ;;  %v7372_v52 = vld [vmem:[%s10279_s0 + $0x1e0] sm:$0xff]  ;;  %v7378_v47 = vld [vmem:[%s10279_s0 + $0x208] sm:$0xff]  ;;  %v900_v56 = vrot.slane %v743_v48, 2  ;;  %v749_v54 = vld [vmem:[%s10279_s0 + $0x230] sm:$0x3] }
  0x6e   :  { %657 = vmatmul.mubr.f32.gmra.mrb[36].mxu1 %v7264_v43  ;;  %v905_v59 = vsel %vm815_vm1, %v903_v34, %v904_v46  ;;  %v747_v0 = vld [vmem:[%s10279_s0 + $0x220] sm:$0xfc]  ;;  %v4327_v55 = vld [vmem:[%s10279_s0 + $0x28] sm:$0xfe]  ;;  %v4329_v6 = vld [vmem:[%s10279_s0 + $0x38] sm:$0x1] }
  0x6f   :  { %1092 = vmatmul.mubr.f32.gmra.mrb[36].mxu0 %v878_v50  ;;  %661 = vmatprep.mubr.f32.mxu1 %v7269_v45  ;;  %v748_v50 = vld [vmem:[%s10279_s0 + $0x228] sm:$0xfc]  ;;  %v7398_v7 = vld [vmem:[%s10279_s0 + $0x200] sm:$0xff]  ;;  %v907_v14 = vrot.slane %v749_v54, 2  ;;  %v1496_v16 = vrot.slane %v4327_v55, 1  ;;  %v1497_v19 = vrot.slane %v4329_v6, 1 }
  0x70   :  { %1096 = vmatprep.mubr.f32.mxu0 %v887_v58  ;;  %5694 = vmatprep.subr.bf16.mxu0 %v5693_v42  ;;  %v901_v58 = vrot.slane %v745_v49, 2  ;;  %v909_v61 = vrot.slane %v748_v50, 2  ;;  %v7404_v10 = vld [vmem:[%s10279_s0 + $0x228] sm:$0xff]  ;;  %v4328_v21 = vld [vmem:[%s10279_s0 + $0x30] sm:$0x1]  ;;  %v7421_v13 = vld [vmem:[%s10279_s0 + $0x220] sm:$0xff] }
  0x71   :  { %v4331_v23 = vld [vmem:[%s10279_s0 + $0x48] sm:$0xfe]  ;;  %v4486_v62 = vld [vmem:[%s10280_s1 + $0x500] sm:$0xff]  ;;  %v4333_v1 = vld [vmem:[%s10279_s0 + $0x58] sm:$0x1]  ;;  %v1494_v35 = vrot.slane %v4328_v21, 1  ;;  %v1498_v41 = vsel %vm235_vm0, %v1496_v16, %v1497_v19 }
  0x72   :  { %662 = vmatmul.mubr.f32.gmra.mrb[38].mxu1 %v7308_v9  ;;  %v902_v8 = vsel %vm815_vm1, %v900_v56, %v901_v58  ;;  %v911_v15 = vsel %vm815_vm1, %v909_v61, %v910_v63  ;;  %v4487_v28 = vld [vmem:[%s10280_s1 + $0x508] sm:$0xff]  ;;  %v4330_v39 = vld [vmem:[%s10279_s0 + $0x40] sm:$0xfe]  ;;  %v4332_v34 = vld [vmem:[%s10279_s0 + $0x50] sm:$0x1]  ;;  %v1503_v48 = vrot.slane %v4333_v1, 1 }
  0x73   :  { %1097 = vmatmul.mubr.f32.gmra.mrb[38].mxu0 %v884_v11  ;;  %666 = vmatprep.mubr.f32.mxu1 %v7314_v12  ;;  %v906_v11 = vrot.slane %v747_v0, 2  ;;  %v4551_v42 = vld [vmem:[%s10280_s1 + $0x608] sm:$0xff]  ;;  %v4504_v46 = vld [vmem:[%s10280_s1 + $0x590] sm:$0xff]  ;;  %v4505_v49 = vld [vmem:[%s10280_s1 + $0x598] sm:$0xff]  ;;  %v1499_v56 = vrot.slane %v4330_v39, 1  ;;  %v1500_v54 = vrot.slane %v4332_v34, 1 }
  0x74   :  { %1101 = vmatprep.mubr.f32.mxu0 %v893_v20  ;;  %v4326_v20 = vld [vmem:[%s10279_s0 + $0x20] sm:$0xfe]  ;;  %v4335_v50 = vld [vmem:[%s10279_s0 + $0x68] sm:$0xfe]  ;;  %v4337_v51 = vld [vmem:[%s10279_s0 + $0x78] sm:$0x1] }
  0x75   :  { %v908_v26 = vsel %vm815_vm1, %v906_v11, %v907_v14  ;;  %v1493_v31 = vrot.slane %v4326_v20, 1  ;;  %v4334_v58 = vld [vmem:[%s10279_s0 + $0x60] sm:$0xfe]  ;;  %v4569_v61 = vld [vmem:[%s10280_s1 + $0x698] sm:$0xff]  ;;  %v4336_v55 = vld [vmem:[%s10279_s0 + $0x70] sm:$0x1] }
  0x76   :  { %667 = vmatmul.mubr.f32.gmra.mrb[40].mxu1 %v7340_v30  ;;  %v4339_v6 = vld [vmem:[%s10279_s0 + $0x88] sm:$0xfe]  ;;  %v1508_v11 = vrot.slane %v4335_v50, 1  ;;  %v1509_v14 = vrot.slane %v4337_v51, 1  ;;  %v4552_v16 = vld [vmem:[%s10280_s1 + $0x610] sm:$0xff]  ;;  %v1505_v21 = vrot.slane %v4334_v58, 1 }
  0x77   :  { %1102 = vmatmul.mubr.f32.gmra.mrb[40].mxu0 %v890_v36  ;;  %671 = vmatprep.mubr.f32.mxu1 %v7352_v37  ;;  %v4550_v36 = vld [vmem:[%s10280_s1 + $0x600] sm:$0xff]  ;;  %v1495_v63 = vsel %vm235_vm0, %v1493_v31, %v1494_v35  ;;  %v4341_v19 = vld [vmem:[%s10279_s0 + $0x98] sm:$0x1]  ;;  %v7507_v35 = vld [vmem:[%s10279_s0 + $0x90] sm:$0x1] }
  0x78   :  { %1106 = vmatprep.mubr.f32.mxu0 %v899_v33  ;;  %v1502_v33 = vrot.slane %v4331_v23, 1  ;;  %v5695_v0 = vpack.c.bf16 %v4551_v42, %v4550_v36  ;;  %v4506_v1 = vld [vmem:[%s10280_s1 + $0x5a0] sm:$0xff]  ;;  %v4571_v39 = vld [vmem:[%s10280_s1 + $0x6a8] sm:$0xff] }
  0x79   :  { %v7502_v31 = vld [vmem:[%s10279_s0 + $0x80] sm:$0xfe]  ;;  %v7520_v34 = vld [vmem:[%s10279_s0 + $0xa8] sm:$0xfe] }
  0x7a   :  { %672 = vmatmul.mubr.f32.gmra.mrb[42].mxu1 %v7372_v52  ;;  %v1504_v20 = vsel %vm235_vm0, %v1502_v33, %v1503_v48  ;;  %v4570_v36 = vld [vmem:[%s10280_s1 + $0x6a0] sm:$0xff]  ;;  %v1515_v33 = vrot.slane %v4341_v19, 1  ;;  %v4491_v51 = vld [vmem:[%s10280_s1 + $0x528] sm:$0xff] }
  0x7b   :  { %1107 = vmatmul.mubr.f32.gmra.mrb[42].mxu0 %v896_v53  ;;  %676 = vmatprep.mubr.f32.mxu1 %v7378_v47  ;;  %v5663_v53 = vpack.c.bf16 %v4487_v28, %v4486_v62  ;;  %v4553_v62 = vld [vmem:[%s10280_s1 + $0x618] sm:$0xff]  ;;  %v1506_v28 = vrot.slane %v4336_v55, 1  ;;  %v4490_v48 = vld [vmem:[%s10280_s1 + $0x520] sm:$0xff]  ;;  %v5701_v58 = vpack.c.bf16 %v4571_v39, %v4570_v36 }
  0x7c   :  { %1111 = vmatprep.mubr.f32.mxu0 %v905_v59  ;;  %v4568_v59 = vld [vmem:[%s10280_s1 + $0x690] sm:$0xff]  ;;  %v7598_v39 = vld [vmem:[%s10279_s0 + $0xc0] sm:$0xfe] }
  0x7d   :  { %v5697_v23 = vpack.c.bf16 %v4569_v61, %v4568_v59  ;;  %v4555_v59 = vld [vmem:[%s10280_s1 + $0x628] sm:$0xff]  ;;  %v4508_v61 = vld [vmem:[%s10280_s1 + $0x5b0] sm:$0xff] }
  0x7e   :  { %677 = vmatmul.mubr.f32.gmra.mrb[44].mxu1 %v7398_v7 }
  0x7f   :  { %1112 = vmatmul.mubr.f32.gmra.mrb[44].mxu0 %v902_v8  ;;  %681 = vmatprep.mubr.f32.mxu1 %v7404_v10  ;;  %v5665_v8 = vpack.c.bf16 %v4505_v49, %v4504_v46  ;;  %v7525_v46 = vld [vmem:[%s10279_s0 + $0xb8] sm:$0x1]  ;;  %v5699_v49 = vpack.c.bf16 %v4553_v62, %v4552_v16  ;;  %v4556_v62 = vld [vmem:[%s10280_s1 + $0x630] sm:$0xff] }
  0x80   :  { %1116 = vmatprep.mubr.f32.mxu0 %v911_v15  ;;  %v4489_v15 = vld [vmem:[%s10280_s1 + $0x518] sm:$0xff]  ;;  %v1521_v16 = vrot.slane %v7525_v46, 1 }
  0x81   :  { %v7618_v46 = vld [vmem:[%s10279_s0 + $0xf8] sm:$0x1] }
  0x82   :  { %682 = vmatmul.mubr.f32.gmra.mrb[46].mxu1 %v7421_v13 }
  0x83   :  { %1117 = vmatmul.mubr.f32.gmra.mrb[46].mxu0 %v908_v26  ;;  %1268 = vmatprep.mubr.f32.mxu1 %v6879_v24  ;;  %v4488_v24 = vld [vmem:[%s10280_s1 + $0x510] sm:$0xff]  ;;  %v4507_v26 = vld [vmem:[%s10280_s1 + $0x5a8] sm:$0xff] }
  0x84   :  { %1718 = vmatprep.mubr.f32.mxu0 %v1498_v41  ;;  %v1501_v41 = vsel %vm235_vm0, %v1499_v56, %v1500_v54  ;;  %v5667_v42 = vpack.c.bf16 %v4489_v15, %v4488_v24  ;;  %v5669_v50 = vpack.c.bf16 %v4507_v26, %v4506_v1  ;;  %v4554_v56 = vld [vmem:[%s10280_s1 + $0x620] sm:$0xff]  ;;  %v4572_v54 = vld [vmem:[%s10280_s1 + $0x6b0] sm:$0xff]  ;;  %v4573_v24 = vld [vmem:[%s10280_s1 + $0x6b8] sm:$0xff]  ;;  %v1520_v15 = vrot.slane %v7520_v34, 1 }
  0x85   :  { %v5703_v19 = vpack.c.bf16 %v4555_v59, %v4554_v56  ;;  %v7613_v34 = vld [vmem:[%s10279_s0 + $0xe8] sm:$0xfe] }
  0x86   :  { %1269 = vmatmul.mubr.f32.vlgmr.msra.gmra.mrb[48].mxu1 %v6890_v29  ;;  %v1514_v29 = vrot.slane %v4339_v6, 1  ;;  %v1512_v6 = vrot.slane %v7507_v35, 1  ;;  %v4511_v35 = vld [vmem:[%s10280_s1 + $0x5c8] sm:$0xff] }
  0x87   :  { %5664 = vmatpush3.bf16.msra.mxu1 %v5663_v53  ;;  %1719 = vmatmul.mubr.f32.vlgmr.msra.gmra.mrb[48].mxu0 %v1495_v63  ;;  %v7537_v53 = vld [vmem:[%s10279_s0 + $0xa0] sm:$0xfe]  ;;  %v4509_v63 = vld [vmem:[%s10280_s1 + $0x5b8] sm:$0xff]  ;;  %v4495_v56 = vld [vmem:[%s10280_s1 + $0x548] sm:$0xff] }
  0x88   :  { %1273 = vmatprep.mubr.f32.mxu1 %v6915_v27  ;;  %5696 = vmatpush3.bf16.msra.mxu0 %v5695_v0  ;;  %v1510_v27 = vsel %vm235_vm0, %v1508_v11, %v1509_v14  ;;  %v1507_v0 = vsel %vm235_vm0, %v1505_v21, %v1506_v28  ;;  %v1516_v55 = vsel %vm235_vm0, %v1514_v29, %v1515_v33  ;;  %v4347_v11 = vld [vmem:[%s10279_s0 + $0xc8] sm:$0xfe]  ;;  %v4349_v14 = vld [vmem:[%s10279_s0 + $0xd8] sm:$0x1]  ;;  %v4492_v21 = vld [vmem:[%s10280_s1 + $0x530] sm:$0xff]  ;;  %v1517_v1 = vrot.slane %v7537_v53, 1 }
  0x89   :  { %1723 = vmatprep.mubr.f32.mxu0 %v1504_v20  ;;  %5666 = vmatprep.subr.bf16.mxu1 %v5665_v8  ;;  %v5671_v8 = vpack.c.bf16 %v4491_v51, %v4490_v48  ;;  %v5673_v20 = vpack.c.bf16 %v4509_v63, %v4508_v61  ;;  %v5705_v28 = vpack.c.bf16 %v4573_v24, %v4572_v54  ;;  %v4557_v29 = vld [vmem:[%s10280_s1 + $0x638] sm:$0xff]  ;;  %v1527_v36 = vrot.slane %v4349_v14, 1  ;;  %v4494_v53 = vld [vmem:[%s10280_s1 + $0x540] sm:$0xff]  ;;  %v4559_v61 = vld [vmem:[%s10280_s1 + $0x648] sm:$0xff] }
  0x8a   :  { %1274 = vmatmul.mubr.f32.gmra.mrb[50].mxu1 %v6954_v60  ;;  %5698 = vmatprep.subr.bf16.mxu0 %v5697_v23  ;;  %v4344_v60 = vld [vmem:[%s10279_s0 + $0xb0] sm:$0x1]  ;;  %v4493_v23 = vld [vmem:[%s10280_s1 + $0x538] sm:$0xff]  ;;  %v1532_v14 = vrot.slane %v7613_v34, 1 }
  0x8b   :  { %1724 = vmatmul.mubr.f32.gmra.mrb[50].mxu0 %v1501_v41  ;;  %1278 = vmatprep.mubr.f32.mxu1 %v6966_v3  ;;  %v1511_v3 = vrot.slane %v7502_v31, 1  ;;  %v1518_v26 = vrot.slane %v4344_v60, 1  ;;  %v4510_v31 = vld [vmem:[%s10280_s1 + $0x5c0] sm:$0xff]  ;;  %v5675_v48 = vpack.c.bf16 %v4493_v23, %v4492_v21  ;;  %v4512_v63 = vld [vmem:[%s10280_s1 + $0x5d0] sm:$0xff]  ;;  %v4577_v24 = vld [vmem:[%s10280_s1 + $0x6d8] sm:$0xff] }
  0x8c   :  { %1728 = vmatprep.mubr.f32.mxu0 %v1510_v27  ;;  %5668 = vmatpush3.bf16.msra.mxu1 %v5667_v42  ;;  %v4574_v41 = vld [vmem:[%s10280_s1 + $0x6c0] sm:$0xff]  ;;  %v4575_v42 = vld [vmem:[%s10280_s1 + $0x6c8] sm:$0xff]  ;;  %v1522_v27 = vsel %vm235_vm0, %v1520_v15, %v1521_v16  ;;  %v5677_v51 = vpack.c.bf16 %v4511_v35, %v4510_v31  ;;  %v4576_v54 = vld [vmem:[%s10280_s1 + $0x6d0] sm:$0xff]  ;;  %v1533_v15 = vrot.slane %v7618_v46, 1 }
  0x8d   :  { %5700 = vmatpush3.bf16.msra.mxu0 %v5699_v49  ;;  %5670 = vmatprep.subr.bf16.mxu1 %v5669_v50  ;;  %v1513_v33 = vsel %vm235_vm0, %v1511_v3, %v1512_v6  ;;  %v7624_v49 = vld [vmem:[%s10279_s0 + $0xe0] sm:$0xfe]  ;;  %v5707_v50 = vpack.c.bf16 %v4557_v29, %v4556_v62  ;;  %v5709_v59 = vpack.c.bf16 %v4575_v42, %v4574_v41  ;;  %v4355_v6 = vld [vmem:[%s10279_s0 + $0x108] sm:$0xfe]  ;;  %v4497_v21 = vld [vmem:[%s10280_s1 + $0x558] sm:$0xff] }
  0x8e   :  { %1279 = vmatmul.mubr.f32.gmra.mrb[52].mxu1 %v6992_v5  ;;  %5702 = vmatprep.subr.bf16.mxu0 %v5701_v58  ;;  %v1526_v5 = vrot.slane %v4347_v11, 1  ;;  %v4558_v58 = vld [vmem:[%s10280_s1 + $0x640] sm:$0xff]  ;;  %v1519_v60 = vsel %vm235_vm0, %v1517_v1, %v1518_v26  ;;  %v5679_v11 = vpack.c.bf16 %v4495_v56, %v4494_v53  ;;  %v4560_v23 = vld [vmem:[%s10280_s1 + $0x650] sm:$0xff]  ;;  %v1529_v62 = vrot.slane %v7624_v49, 1  ;;  %v4515_v31 = vld [vmem:[%s10280_s1 + $0x5e8] sm:$0xff] }
  0x8f   :  { %1729 = vmatmul.mubr.f32.gmra.mrb[52].mxu0 %v1507_v0  ;;  %1283 = vmatprep.mubr.f32.mxu1 %v6997_v17  ;;  %v4348_v17 = vld [vmem:[%s10279_s0 + $0xd0] sm:$0x1]  ;;  %v4513_v0 = vld [vmem:[%s10280_s1 + $0x5d8] sm:$0xff]  ;;  %v5711_v16 = vpack.c.bf16 %v4559_v61, %v4558_v58  ;;  %v5713_v26 = vpack.c.bf16 %v4577_v24, %v4576_v54  ;;  %v4514_v29 = vld [vmem:[%s10280_s1 + $0x5e0] sm:$0xff]  ;;  %v1534_v34 = vsel %vm235_vm0, %v1532_v14, %v1533_v15 }
  0x90   :  { %1733 = vmatprep.mubr.f32.mxu0 %v1516_v55  ;;  %5672 = vmatpush3.bf16.msra.mxu1 %v5671_v8  ;;  %v1528_v55 = vsel %vm235_vm0, %v1526_v5, %v1527_v36  ;;  %v1524_v3 = vrot.slane %v4348_v17, 1  ;;  %v4357_v8 = vld [vmem:[%s10279_s0 + $0x118] sm:$0x1]  ;;  %v4354_v5 = vld [vmem:[%s10279_s0 + $0x100] sm:$0xfe]  ;;  %v4499_v49 = vld [vmem:[%s10280_s1 + $0x568] sm:$0xff] }
  0x91   :  { %5704 = vmatpush3.bf16.msra.mxu0 %v5703_v19  ;;  %5674 = vmatprep.subr.bf16.mxu1 %v5673_v20  ;;  %v5681_v19 = vpack.c.bf16 %v4513_v0, %v4512_v63  ;;  %v4496_v20 = vld [vmem:[%s10280_s1 + $0x550] sm:$0xff]  ;;  %v1539_v35 = vrot.slane %v4357_v8, 1  ;;  %v4578_v36 = vld [vmem:[%s10280_s1 + $0x6e0] sm:$0xff]  ;;  %v4359_v42 = vld [vmem:[%s10279_s0 + $0x168] sm:$0xfe] }
  0x92   :  { %1284 = vmatmul.mubr.f32.gmra.mrb[54].mxu1 %v7036_v40  ;;  %5706 = vmatprep.subr.bf16.mxu0 %v5705_v28  ;;  %v7650_v40 = vld [vmem:[%s10279_s0 + $0xf0] sm:$0x1]  ;;  %v4561_v28 = vld [vmem:[%s10280_s1 + $0x658] sm:$0xff]  ;;  %v5683_v17 = vpack.c.bf16 %v4497_v21, %v4496_v20  ;;  %v4563_v53 = vld [vmem:[%s10280_s1 + $0x668] sm:$0xff] }
  0x93   :  { %1734 = vmatmul.mubr.f32.gmra.mrb[54].mxu0 %v1513_v33  ;;  %1288 = vmatprep.mubr.f32.mxu1 %v7042_v32  ;;  %v1523_v32 = vrot.slane %v7598_v39, 1  ;;  %v1530_v1 = vrot.slane %v7650_v40, 1  ;;  %v4579_v39 = vld [vmem:[%s10280_s1 + $0x6e8] sm:$0xff]  ;;  %v4361_v33 = vld [vmem:[%s10279_s0 + $0x178] sm:$0x1]  ;;  %v5715_v46 = vpack.c.bf16 %v4561_v28, %v4560_v23  ;;  %v4516_v56 = vld [vmem:[%s10280_s1 + $0x5f0] sm:$0xff] }
  0x94   :  { %1738 = vmatprep.mubr.f32.mxu0 %v1522_v27  ;;  %5676 = vmatpush3.bf16.msra.mxu1 %v5675_v48  ;;  %v5685_v48 = vpack.c.bf16 %v4515_v31, %v4514_v29  ;;  %v4498_v27 = vld [vmem:[%s10280_s1 + $0x560] sm:$0xff]  ;;  %v4517_v58 = vld [vmem:[%s10280_s1 + $0x5f8] sm:$0xff]  ;;  %v4580_v61 = vld [vmem:[%s10280_s1 + $0x6f0] sm:$0xff] }
  0x95   :  { %5708 = vmatpush3.bf16.msra.mxu0 %v5707_v50  ;;  %5678 = vmatprep.subr.bf16.mxu1 %v5677_v51  ;;  %v1525_v41 = vsel %vm235_vm0, %v1523_v32, %v1524_v3  ;;  %v4562_v50 = vld [vmem:[%s10280_s1 + $0x660] sm:$0xff]  ;;  %v5717_v51 = vpack.c.bf16 %v4579_v39, %v4578_v36  ;;  %v1531_v63 = vsel %vm235_vm0, %v1529_v62, %v1530_v1  ;;  %v4360_v40 = vld [vmem:[%s10279_s0 + $0x170] sm:$0x1]  ;;  %v4581_v24 = vld [vmem:[%s10280_s1 + $0x6f8] sm:$0xff]  ;;  %v1545_v32 = vrot.slane %v4361_v33, 1 }
  0x96   :  { %1289 = vmatmul.mubr.f32.gmra.mrb[56].mxu1 %v7050_v44  ;;  %5710 = vmatprep.subr.bf16.mxu0 %v5709_v59  ;;  %v1538_v44 = vrot.slane %v4355_v6, 1  ;;  %v1535_v59 = vrot.slane %v4354_v5, 1  ;;  %v5687_v54 = vpack.c.bf16 %v4499_v49, %v4498_v27  ;;  %v4363_v3 = vld [vmem:[%s10279_s0 + $0x188] sm:$0xfe]  ;;  %v5719_v6 = vpack.c.bf16 %v4563_v53, %v4562_v50  ;;  %v4501_v14 = vld [vmem:[%s10280_s1 + $0x578] sm:$0xff]  ;;  %v4662_v21 = vld [vmem:[%s10280_s1 + $0x780] sm:$0xff] }
  0x97   :  { %1739 = vmatmul.mubr.f32.gmra.mrb[56].mxu0 %v1519_v60  ;;  %1293 = vmatprep.mubr.f32.mxu1 %v7076_v57  ;;  %v4356_v57 = vld [vmem:[%s10279_s0 + $0x110] sm:$0x1]  ;;  %v5689_v8 = vpack.c.bf16 %v4517_v58, %v4516_v56  ;;  %v4365_v15 = vld [vmem:[%s10279_s0 + $0x198] sm:$0x1]  ;;  %v1542_v1 = vrot.slane %v4360_v40, 1  ;;  %v1550_v31 = vrot.slane %v4363_v3, 1 }
  0x98   :  { %1743 = vmatprep.mubr.f32.mxu0 %v1528_v55  ;;  %5680 = vmatpush3.bf16.msra.mxu1 %v5679_v11  ;;  %v1540_v0 = vsel %vm235_vm0, %v1538_v44, %v1539_v35  ;;  %v1536_v60 = vrot.slane %v4356_v57, 1  ;;  %v1544_v55 = vrot.slane %v4359_v42, 1  ;;  %v4500_v11 = vld [vmem:[%s10280_s1 + $0x570] sm:$0xff]  ;;  %v4565_v20 = vld [vmem:[%s10280_s1 + $0x678] sm:$0xff]  ;;  %v1551_v44 = vrot.slane %v4365_v15, 1  ;;  %v4663_v36 = vld [vmem:[%s10280_s1 + $0x788] sm:$0xff] }
  0x99   :  { %5712 = vmatpush3.bf16.msra.mxu0 %v5711_v16  ;;  %5682 = vmatprep.subr.bf16.mxu1 %v5681_v19  ;;  %v5721_v16 = vpack.c.bf16 %v4581_v24, %v4580_v61  ;;  %v4564_v19 = vld [vmem:[%s10280_s1 + $0x670] sm:$0xff]  ;;  %v5691_v28 = vpack.c.bf16 %v4501_v14, %v4500_v11  ;;  %v4367_v39 = vld [vmem:[%s10279_s0 + $0x1a8] sm:$0xfe]  ;;  %v5725_v57 = vpack.c.bf16 %v4663_v36, %v4662_v21  ;;  %v4758_v42 = vld [vmem:[%s10280_s1 + $0x880] sm:$0xff] }
  0x9a   :  { %1294 = vmatmul.mubr.f32.gmra.mrb[58].mxu1 %v7112_v4  ;;  %5714 = vmatprep.subr.bf16.mxu0 %v5713_v26  ;;  %v7733_v4 = vld [vmem:[%s10279_s0 + $0x108] sm:$0xff]  ;;  %v1537_v23 = vsel %vm235_vm0, %v1535_v59, %v1536_v60  ;;  %v4362_v26 = vld [vmem:[%s10279_s0 + $0x180] sm:$0xfe]  ;;  %v1546_v29 = vsel %vm235_vm0, %v1544_v55, %v1545_v32  ;;  %v4364_v35 = vld [vmem:[%s10279_s0 + $0x190] sm:$0x1]  ;;  %v5723_v5 = vpack.c.bf16 %v4565_v20, %v4564_v19  ;;  %v1556_v49 = vrot.slane %v4367_v39, 1 }
  0x9b   :  { %1744 = vmatmul.mubr.f32.gmra.mrb[58].mxu0 %v1525_v41  ;;  %1298 = vmatprep.mubr.f32.mxu1 %v7117_v18  ;;  %v4358_v18 = vld [vmem:[%s10279_s0 + $0x160] sm:$0xfe]  ;;  %v4369_v41 = vld [vmem:[%s10279_s0 + $0x1b8] sm:$0x1]  ;;  %v4759_v33 = vld [vmem:[%s10280_s1 + $0x888] sm:$0xff]  ;;  %v1552_v27 = vsel %vm235_vm0, %v1550_v31, %v1551_v44 }
  0x9c   :  { %1748 = vmatprep.mubr.f32.mxu0 %v1534_v34  ;;  %5684 = vmatpush3.bf16.msra.mxu1 %v5683_v17  ;;  %v1541_v62 = vrot.slane %v4358_v18, 1  ;;  %v1547_v34 = vrot.slane %v4362_v26, 1  ;;  %v1557_v50 = vrot.slane %v4369_v41, 1  ;;  %v4371_v53 = vld [vmem:[%s10279_s0 + $0x1c8] sm:$0xfe] }
  0x9d   :  { %5716 = vmatpush3.bf16.msra.mxu0 %v5715_v46  ;;  %5686 = vmatprep.subr.bf16.mxu1 %v5685_v48  ;;  %v1548_v46 = vrot.slane %v4364_v35, 1  ;;  %v5757_v48 = vpack.c.bf16 %v4759_v33, %v4758_v42  ;;  %v4373_v56 = vld [vmem:[%s10279_s0 + $0x1d8] sm:$0x1]  ;;  %v4370_v60 = vld [vmem:[%s10279_s0 + $0x1c0] sm:$0xfe] }
  0x9e   :  { %1299 = vmatmul.mubr.f32.gmra.mrb[60].mxu1 %v7153_v38  ;;  %5718 = vmatprep.subr.bf16.mxu0 %v5717_v51  ;;  %v7772_v38 = vld [vmem:[%s10279_s0 + $0x100] sm:$0xff]  ;;  %v1543_v17 = vsel %vm235_vm0, %v1541_v62, %v1542_v1  ;;  %v4368_v51 = vld [vmem:[%s10279_s0 + $0x1b0] sm:$0x1]  ;;  %v4377_v40 = vld [vmem:[%s10279_s0 + $0x1f8] sm:$0x1]  ;;  %v1559_v24 = vrot.slane %v4370_v60, 1 }
  0x9f   :  { %1749 = vmatmul.mubr.f32.gmra.mrb[60].mxu0 %v1531_v63  ;;  %1303 = vmatprep.mubr.f32.mxu1 %v7733_v4  ;;  %v1549_v58 = vsel %vm235_vm0, %v1547_v34, %v1548_v46  ;;  %v1554_v61 = vrot.slane %v4368_v51, 1  ;;  %v1558_v63 = vsel %vm235_vm0, %v1556_v49, %v1557_v50  ;;  %v4372_v18 = vld [vmem:[%s10279_s0 + $0x1d0] sm:$0x1]  ;;  %v4381_v11 = vld [vmem:[%s10279_s0 + $0x218] sm:$0x1]  ;;  %v7901_v46 = vld [vmem:[%s10279_s0 + $0x248] sm:$0xff] }
  0xa0   :  { %1753 = vmatprep.mubr.f32.mxu0 %v1540_v0  ;;  %5688 = vmatpush3.bf16.msra.mxu1 %v5687_v54  ;;  %v1563_v0 = vrot.slane %v4373_v56, 1  ;;  %v1560_v55 = vrot.slane %v4372_v18, 1  ;;  %v4378_v21 = vld [vmem:[%s10279_s0 + $0x200] sm:$0xfe]  ;;  %v4385_v62 = vld [vmem:[%s10279_s0 + $0x238] sm:$0x1] }
  0xa1   :  { %5720 = vmatpush3.bf16.msra.mxu0 %v5719_v6  ;;  %5690 = vmatprep.subr.bf16.mxu1 %v5689_v8  ;;  %v4374_v6 = vld [vmem:[%s10279_s0 + $0x1e0] sm:$0xfe]  ;;  %v4376_v8 = vld [vmem:[%s10279_s0 + $0x1f0] sm:$0x1]  ;;  %v1571_v26 = vrot.slane %v4378_v21, 1 }
  0xa2   :  { %1304 = vmatmul.mubr.f32.gmra.mrb[62].mxu1 %v7772_v38  ;;  %5722 = vmatprep.subr.bf16.mxu0 %v5721_v16  ;;  %v1561_v14 = vsel %vm235_vm0, %v1559_v24, %v1560_v55  ;;  %v1565_v15 = vrot.slane %v4374_v6, 1  ;;  %v1566_v16 = vrot.slane %v4376_v8, 1  ;;  %v4382_v44 = vld [vmem:[%s10279_s0 + $0x220] sm:$0xfe]  ;;  %v4384_v35 = vld [vmem:[%s10279_s0 + $0x230] sm:$0x1] }
  0xa3   :  { %1754 = vmatmul.mubr.f32.gmra.mrb[62].mxu0 %v1537_v23  ;;  %1308 = vmatprep.mubr.f32.mxu1 %v7195_v2  ;;  %v4366_v2 = vld [vmem:[%s10279_s0 + $0x1a0] sm:$0xfe]  ;;  %v4380_v23 = vld [vmem:[%s10279_s0 + $0x210] sm:$0x1]  ;;  %v1577_v39 = vrot.slane %v4382_v44, 1  ;;  %v1578_v41 = vrot.slane %v4384_v35, 1 }
  0xa4   :  { %1758 = vmatprep.mubr.f32.mxu0 %v1546_v29  ;;  %5692 = vmatpush3.bf16.msra.mxu1 %v5691_v28  ;;  %v1553_v59 = vrot.slane %v4366_v2, 1  ;;  %v1567_v1 = vsel %vm235_vm0, %v1565_v15, %v1566_v16  ;;  %v1572_v28 = vrot.slane %v4380_v23, 1  ;;  %v4425_v34 = vld [vmem:[%s10279_s0 + $0x38] sm:$0x3]  ;;  %v4422_v51 = vld [vmem:[%s10279_s0 + $0x20] sm:$0xfc] }
  0xa5   :  { %5724 = vmatpush3.bf16.msra.mxu0 %v5723_v5  ;;  %5726 = vmatprep.subr.bf16.mxu1 %v5725_v57  ;;  %v4389_v5 = vld [vmem:[%s10279_s0 + $0x258] sm:$0x1]  ;;  %v4388_v57 = vld [vmem:[%s10279_s0 + $0x250] sm:$0x1]  ;;  %v1579_v49 = vsel %vm235_vm0, %v1577_v39, %v1578_v41  ;;  %v1947_v2 = vrot.slane %v4425_v34, 2  ;;  %v7918_v56 = vld [vmem:[%s10279_s0 + $0x240] sm:$0xff] }
  0xa6   :  { %1309 = vmatmul.mubr.f32.gmra.mrb[64].mxu1 %v7226_v22  ;;  %5758 = vmatprep.subr.bf16.mxu0 %v5757_v48  ;;  %v1562_v22 = vrot.slane %v4371_v53, 1  ;;  %v1555_v54 = vsel %vm235_vm0, %v1553_v59, %v1554_v61  ;;  %v1573_v36 = vsel %vm235_vm0, %v1571_v26, %v1572_v28  ;;  %v4427_v53 = vld [vmem:[%s10279_s0 + $0x48] sm:$0xfc]  ;;  %v1943_v59 = vrot.slane %v4422_v51, 2  ;;  %v7960_v6 = vld [vmem:[%s10279_s0 + $0x60] sm:$0xfc] }
  0xa7   :  { %1759 = vmatmul.mubr.f32.gmra.mrb[64].mxu0 %v1543_v17  ;;  %1313 = vmatprep.mubr.f32.mxu1 %v7238_v25  ;;  %v4375_v25 = vld [vmem:[%s10279_s0 + $0x1e8] sm:$0xfe]  ;;  %v1587_v17 = vrot.slane %v4389_v5, 1  ;;  %v1952_v18 = vrot.slane %v4427_v53, 2  ;;  %v4664_v8 = vld [vmem:[%s10280_s1 + $0x790] sm:$0xff]  ;;  %v4520_v35 = vld [vmem:[%s10279_s0 + $0x60] sm:$0xff] }
  0xa8   :  { %1763 = vmatprep.mubr.f32.mxu0 %v1552_v27  ;;  %v1564_v32 = vsel %vm235_vm0, %v1562_v22, %v1563_v0  ;;  %v1568_v3 = vrot.slane %v4375_v25, 1  ;;  %v1584_v27 = vrot.slane %v4388_v57, 1  ;;  %v4647_v22 = vld [vmem:[%s10280_s1 + $0x708] sm:$0xff]  ;;  %v4742_v25 = vld [vmem:[%s10280_s1 + $0x800] sm:$0xff]  ;;  %v4437_v26 = vld [vmem:[%s10279_s0 + $0x98] sm:$0x3] }
  0xa9   :  { %v4743_v55 = vld [vmem:[%s10280_s1 + $0x808] sm:$0xff]  ;;  %v4744_v44 = vld [vmem:[%s10280_s1 + $0x810] sm:$0xff]  ;;  %v4745_v39 = vld [vmem:[%s10280_s1 + $0x818] sm:$0xff] }
  0xaa   :  { %1314 = vmatmul.mubr.f32.gmra.mrb[66].mxu1 %v7264_v43  ;;  %v1569_v43 = vrot.slane %v4377_v40, 1  ;;  %v4426_v40 = vld [vmem:[%s10279_s0 + $0x40] sm:$0xfc]  ;;  %v5759_v21 = vpack.c.bf16 %v4743_v55, %v4742_v25  ;;  %v4521_v23 = vld [vmem:[%s10279_s0 + $0x68] sm:$0xff]  ;;  %v4441_v51 = vld [vmem:[%s10279_s0 + $0xb8] sm:$0x3] }
  0xab   :  { %1764 = vmatmul.mubr.f32.gmra.mrb[66].mxu0 %v1549_v58  ;;  %1318 = vmatprep.mubr.f32.mxu1 %v7269_v45  ;;  %v4379_v45 = vld [vmem:[%s10279_s0 + $0x208] sm:$0xfe]  ;;  %v4429_v58 = vld [vmem:[%s10279_s0 + $0x58] sm:$0x3]  ;;  %v1949_v15 = vrot.slane %v4426_v40, 2  ;;  %v4666_v41 = vld [vmem:[%s10280_s1 + $0x7a0] sm:$0xff] }
  0xac   :  { %1768 = vmatprep.mubr.f32.mxu0 %v1558_v63  ;;  %v1570_v19 = vsel %vm235_vm0, %v1568_v3, %v1569_v43  ;;  %v1574_v20 = vrot.slane %v4379_v45, 1  ;;  %v4519_v63 = vld [vmem:[%s10279_s0 + $0x48] sm:$0xff]  ;;  %v1953_v24 = vrot.slane %v4429_v58, 2  ;;  %v4433_v3 = vld [vmem:[%s10279_s0 + $0x78] sm:$0x3]  ;;  %v4518_v43 = vld [vmem:[%s10279_s0 + $0x40] sm:$0xff] }
  0xad   :  { %v4665_v45 = vld [vmem:[%s10280_s1 + $0x798] sm:$0xff]  ;;  %v4762_v34 = vld [vmem:[%s10280_s1 + $0x8a0] sm:$0xff]  ;;  %v4764_v55 = vld [vmem:[%s10280_s1 + $0x8b0] sm:$0xff] }
  0xae   :  { %1319 = vmatmul.mubr.f32.gmra.mrb[68].mxu1 %v7308_v9  ;;  %v1575_v9 = vrot.slane %v4381_v11, 1  ;;  %v1954_v28 = vsel %vm815_vm1, %v1952_v18, %v1953_v24  ;;  %v4650_v58 = vld [vmem:[%s10280_s1 + $0x720] sm:$0xff]  ;;  %v4440_v24 = vld [vmem:[%s10279_s0 + $0xb0] sm:$0x3] }
  0xaf   :  { %1769 = vmatmul.mubr.f32.gmra.mrb[68].mxu0 %v1555_v54  ;;  %1323 = vmatprep.mubr.f32.mxu1 %v7314_v12  ;;  %v4383_v12 = vld [vmem:[%s10279_s0 + $0x228] sm:$0xfe]  ;;  %v4428_v54 = vld [vmem:[%s10279_s0 + $0x50] sm:$0x3] }
  0xb0   :  { %1773 = vmatprep.mubr.f32.mxu0 %v1564_v32  ;;  %v1576_v29 = vsel %vm235_vm0, %v1574_v20, %v1575_v9  ;;  %v1580_v31 = vrot.slane %v4383_v12, 1  ;;  %v4431_v32 = vld [vmem:[%s10279_s0 + $0x68] sm:$0xfc]  ;;  %v1950_v16 = vrot.slane %v4428_v54, 2  ;;  %v4760_v20 = vld [vmem:[%s10280_s1 + $0x890] sm:$0xff]  ;;  %v4761_v9 = vld [vmem:[%s10280_s1 + $0x898] sm:$0xff] }
  0xb1   :  { %v1958_v12 = vrot.slane %v4431_v32, 2  ;;  %v4525_v54 = vld [vmem:[%s10279_s0 + $0xa8] sm:$0xff]  ;;  %v4765_v32 = vld [vmem:[%s10280_s1 + $0x8b8] sm:$0xff] }
  0xb2   :  { %1324 = vmatmul.mubr.f32.gmra.mrb[70].mxu1 %v7340_v30  ;;  %v1581_v30 = vrot.slane %v4385_v62, 1  ;;  %v1959_v62 = vrot.slane %v4433_v3, 2  ;;  %v1951_v57 = vsel %vm815_vm1, %v1949_v15, %v1950_v16  ;;  %v4652_v16 = vld [vmem:[%s10280_s1 + $0x730] sm:$0xff] }
  0xb3   :  { %1774 = vmatmul.mubr.f32.gmra.mrb[70].mxu0 %v1561_v14  ;;  %1328 = vmatprep.mubr.f32.mxu1 %v7352_v37  ;;  %v4387_v37 = vld [vmem:[%s10279_s0 + $0x248] sm:$0xfe] }
  0xb4   :  { %1778 = vmatprep.mubr.f32.mxu0 %v1570_v19  ;;  %v1582_v42 = vsel %vm235_vm0, %v1580_v31, %v1581_v30  ;;  %v1586_v33 = vrot.slane %v4387_v37, 1  ;;  %v4432_v19 = vld [vmem:[%s10279_s0 + $0x70] sm:$0x3]  ;;  %v4649_v30 = vld [vmem:[%s10280_s1 + $0x718] sm:$0xff]  ;;  %v1955_v37 = vrot.slane %v7960_v6, 2  ;;  %v1971_v6 = vrot.slane %v4441_v51, 2 }
  0xb5   :  { %v4648_v31 = vld [vmem:[%s10280_s1 + $0x710] sm:$0xff]  ;;  %v1956_v5 = vrot.slane %v4432_v19, 2  ;;  %v4653_v19 = vld [vmem:[%s10280_s1 + $0x738] sm:$0xff] }
  0xb6   :  { %1329 = vmatmul.mubr.f32.gmra.mrb[72].mxu1 %v7372_v52  ;;  %v4386_v52 = vld [vmem:[%s10279_s0 + $0x240] sm:$0xfe] }
  0xb7   :  { %1779 = vmatmul.mubr.f32.gmra.mrb[72].mxu0 %v1567_v1  ;;  %1333 = vmatprep.mubr.f32.mxu1 %v7378_v47  ;;  %v4423_v47 = vld [vmem:[%s10279_s0 + $0x28] sm:$0xfc]  ;;  %v1583_v48 = vrot.slane %v4386_v52, 1  ;;  %v1957_v18 = vsel %vm815_vm1, %v1955_v37, %v1956_v5 }
  0xb8   :  { %1783 = vmatprep.mubr.f32.mxu0 %v1576_v29  ;;  %v1946_v50 = vrot.slane %v4423_v47, 2  ;;  %v4435_v1 = vld [vmem:[%s10279_s0 + $0x88] sm:$0xfc]  ;;  %v5729_v29 = vpack.c.bf16 %v4665_v45, %v4664_v8  ;;  %v4434_v47 = vld [vmem:[%s10279_s0 + $0x80] sm:$0xfc] }
  0xb9   :  { %v1585_v0 = vsel %vm235_vm0, %v1583_v48, %v1584_v27  ;;  %v4667_v52 = vld [vmem:[%s10280_s1 + $0x7a8] sm:$0xff]  ;;  %v1960_v27 = vsel %vm815_vm1, %v1958_v12, %v1959_v62  ;;  %v1961_v25 = vrot.slane %v4434_v47, 2  ;;  %v5769_v12 = vpack.c.bf16 %v4765_v32, %v4764_v55  ;;  %v4749_v62 = vld [vmem:[%s10280_s1 + $0x838] sm:$0xff]  ;;  %v4752_v32 = vld [vmem:[%s10280_s1 + $0x850] sm:$0xff] }
  0xba   :  { %1334 = vmatmul.mubr.f32.gmra.mrb[74].mxu1 %v7398_v7  ;;  %v4424_v7 = vld [vmem:[%s10279_s0 + $0x30] sm:$0x3]  ;;  %v1948_v60 = vsel %vm815_vm1, %v1946_v50, %v1947_v2  ;;  %v4763_v48 = vld [vmem:[%s10280_s1 + $0x8a8] sm:$0xff]  ;;  %v5733_v53 = vpack.c.bf16 %v4667_v52, %v4666_v41  ;;  %v8128_v41 = vld [vmem:[%s10279_s0 + $0xf8] sm:$0x3]  ;;  %v5739_v52 = vpack.c.bf16 %v4653_v19, %v4652_v16 }
  0xbb   :  { %1784 = vmatmul.mubr.f32.gmra.mrb[74].mxu0 %v1573_v36  ;;  %1338 = vmatprep.mubr.f32.mxu1 %v7404_v10  ;;  %v1588_v10 = vsel %vm235_vm0, %v1586_v33, %v1587_v17  ;;  %v1944_v61 = vrot.slane %v4424_v7, 2  ;;  %v5761_v36 = vpack.c.bf16 %v4761_v9, %v4760_v20  ;;  %v1964_v33 = vrot.slane %v4435_v1, 2  ;;  %v4436_v50 = vld [vmem:[%s10279_s0 + $0x90] sm:$0x3]  ;;  %v4439_v2 = vld [vmem:[%s10279_s0 + $0xa8] sm:$0xfc] }
  0xbc   :  { %1788 = vmatprep.mubr.f32.mxu0 %v1582_v42  ;;  %v4523_v42 = vld [vmem:[%s10279_s0 + $0x88] sm:$0xff]  ;;  %v1965_v17 = vrot.slane %v4437_v26, 2  ;;  %v5763_v7 = vpack.c.bf16 %v4745_v39, %v4744_v44  ;;  %v1962_v40 = vrot.slane %v4436_v50, 2  ;;  %v4748_v20 = vld [vmem:[%s10280_s1 + $0x830] sm:$0xff]  ;;  %v4524_v9 = vld [vmem:[%s10279_s0 + $0xa0] sm:$0xff] }
  0xbd   :  { %v1945_v11 = vsel %vm815_vm1, %v1943_v59, %v1944_v61  ;;  %v4651_v59 = vld [vmem:[%s10280_s1 + $0x728] sm:$0xff]  ;;  %v4746_v61 = vld [vmem:[%s10280_s1 + $0x820] sm:$0xff]  ;;  %v4672_v50 = vld [vmem:[%s10280_s1 + $0x7d0] sm:$0xff] }
  0xbe   :  { %1339 = vmatmul.mubr.f32.gmra.mrb[76].mxu1 %v7421_v13  ;;  %v4646_v13 = vld [vmem:[%s10280_s1 + $0x700] sm:$0xff]  ;;  %v1966_v3 = vsel %vm815_vm1, %v1964_v33, %v1965_v17  ;;  %v5735_v8 = vpack.c.bf16 %v4651_v59, %v4650_v58  ;;  %v4443_v45 = vld [vmem:[%s10279_s0 + $0xc8] sm:$0xfc]  ;;  %v8164_v58 = vld [vmem:[%s10279_s0 + $0xf0] sm:$0x3] }
  0xbf   :  { %1789 = vmatmul.mubr.f32.gmra.mrb[76].mxu0 %v1579_v49  ;;  %1343 = vmatprep.mubr.f32.mxu1 %v7901_v46  ;;  %v5727_v14 = vpack.c.bf16 %v4647_v22, %v4646_v13  ;;  %v5731_v49 = vpack.c.bf16 %v4649_v30, %v4648_v31  ;;  %v5765_v13 = vpack.c.bf16 %v4763_v48, %v4762_v34  ;;  %v4747_v22 = vld [vmem:[%s10280_s1 + $0x828] sm:$0xff]  ;;  %v4670_v1 = vld [vmem:[%s10280_s1 + $0x7c0] sm:$0xff]  ;;  %v1976_v31 = vrot.slane %v4443_v45, 2  ;;  %v4768_v59 = vld [vmem:[%s10280_s1 + $0x8d0] sm:$0xff] }
  0xc0   :  { %1793 = vmatprep.mubr.f32.mxu0 %v1588_v10  ;;  %v8036_v10 = vld [vmem:[%s10279_s0 + $0xa0] sm:$0xfc]  ;;  %v4671_v26 = vld [vmem:[%s10280_s1 + $0x7c8] sm:$0xff]  ;;  %v4657_v55 = vld [vmem:[%s10280_s1 + $0x758] sm:$0xff] }
  0xc1   :  { %v8108_v44 = vld [vmem:[%s10279_s0 + $0xc0] sm:$0xfc]  ;;  %v4767_v37 = vld [vmem:[%s10280_s1 + $0x8c8] sm:$0xff]  ;;  %v5741_v33 = vpack.c.bf16 %v4671_v26, %v4670_v1  ;;  %v8243_v26 = vld [vmem:[%s10279_s0 + $0x170] sm:$0x3] }
  0xc2   :  { %1344 = vmatmul.mubr.f32.gmra.mrb[78].mxu1 %v7918_v56  ;;  %v8123_v39 = vld [vmem:[%s10279_s0 + $0xe8] sm:$0xfc]  ;;  %v4654_v17 = vld [vmem:[%s10280_s1 + $0x740] sm:$0xff] }
  0xc3   :  { %1794 = vmatmul.mubr.f32.gmra.mrb[78].mxu0 %v1585_v0  ;;  %2168 = vmatprep.mubr.f32.mxu1 %v1948_v60  ;;  %v4668_v0 = vld [vmem:[%s10280_s1 + $0x7b0] sm:$0xff]  ;;  %v4669_v60 = vld [vmem:[%s10280_s1 + $0x7b8] sm:$0xff]  ;;  %v4655_v47 = vld [vmem:[%s10280_s1 + $0x748] sm:$0xff] }
  0xc4   :  { %2395 = vmatprep.mubr.f32.mxu0 %v4519_v63  ;;  %v4522_v63 = vld [vmem:[%s10279_s0 + $0x80] sm:$0xff]  ;;  %v5737_v15 = vpack.c.bf16 %v4669_v60, %v4668_v0  ;;  %v8178_v0 = vld [vmem:[%s10279_s0 + $0x108] sm:$0xfc]  ;;  %v4453_v60 = vld [vmem:[%s10279_s0 + $0x118] sm:$0x3] }
  0xc5   :  { %v4750_v34 = vld [vmem:[%s10280_s1 + $0x840] sm:$0xff]  ;;  %v8210_v45 = vld [vmem:[%s10279_s0 + $0x168] sm:$0xfc] }
  0xc6   :  { %2169 = vmatmul.mubr.f32.vlgmr.msra.gmra.mrb[80].mxu1 %v1945_v11  ;;  %v4445_v11 = vld [vmem:[%s10279_s0 + $0xd8] sm:$0x3]  ;;  %v4526_v48 = vld [vmem:[%s10279_s0 + $0xc0] sm:$0xff]  ;;  %v4675_v16 = vld [vmem:[%s10280_s1 + $0x7e8] sm:$0xff] }
  0xc7   :  { %5728 = vmatpush3.bf16.msra.mxu1 %v5727_v14  ;;  %2396 = vmatmul.mubr.f32.vlgmr.msra.gmra.mrb[80].mxu0 %v4518_v43  ;;  %v1970_v43 = vrot.slane %v4439_v2, 2  ;;  %v5767_v14 = vpack.c.bf16 %v4747_v22, %v4746_v61  ;;  %v1977_v30 = vrot.slane %v4445_v11, 2  ;;  %v4673_v2 = vld [vmem:[%s10280_s1 + $0x7d8] sm:$0xff]  ;;  %v1983_v22 = vrot.slane %v8128_v41, 2  ;;  %v8238_v1 = vld [vmem:[%s10279_s0 + $0x160] sm:$0xfc] }
  0xc8   :  { %2173 = vmatprep.mubr.f32.mxu1 %v1954_v28  ;;  %5760 = vmatpush3.bf16.msra.mxu0 %v5759_v21  ;;  %v1967_v21 = vrot.slane %v8036_v10, 2  ;;  %v1963_v28 = vsel %vm815_vm1, %v1961_v25, %v1962_v40  ;;  %v4769_v61 = vld [vmem:[%s10280_s1 + $0x8d8] sm:$0xff]  ;;  %v8186_v25 = vld [vmem:[%s10279_s0 + $0x100] sm:$0xfc]  ;;  %v4755_v41 = vld [vmem:[%s10280_s1 + $0x868] sm:$0xff] }
  0xc9   :  { %2400 = vmatprep.mubr.f32.mxu0 %v4521_v23  ;;  %5730 = vmatprep.subr.bf16.mxu1 %v5729_v29  ;;  %v1968_v23 = vrot.slane %v4440_v24, 2  ;;  %v4527_v29 = vld [vmem:[%s10279_s0 + $0xc8] sm:$0xff]  ;;  %v1972_v5 = vsel %vm815_vm1, %v1970_v43, %v1971_v6  ;;  %v4656_v24 = vld [vmem:[%s10280_s1 + $0x750] sm:$0xff]  ;;  %v1980_v6 = vrot.slane %v8164_v58, 2  ;;  %v5777_v11 = vpack.c.bf16 %v4769_v61, %v4768_v59 }
  0xca   :  { %2174 = vmatmul.mubr.f32.gmra.mrb[82].mxu1 %v1951_v57  ;;  %5762 = vmatprep.subr.bf16.mxu0 %v5761_v36  ;;  %v4444_v36 = vld [vmem:[%s10279_s0 + $0xd0] sm:$0x3]  ;;  %v8133_v57 = vld [vmem:[%s10279_s0 + $0xe0] sm:$0xfc] }
  0xcb   :  { %2401 = vmatmul.mubr.f32.gmra.mrb[82].mxu0 %v4520_v35  ;;  %2178 = vmatprep.mubr.f32.mxu1 %v1960_v27  ;;  %v4766_v35 = vld [vmem:[%s10280_s1 + $0x8c0] sm:$0xff]  ;;  %v1969_v51 = vsel %vm815_vm1, %v1967_v21, %v1968_v23  ;;  %v1974_v10 = vrot.slane %v4444_v36, 2  ;;  %v1979_v43 = vrot.slane %v8133_v57, 2  ;;  %v8226_v21 = vld [vmem:[%s10279_s0 + $0x178] sm:$0x3]  ;;  %v1985_v36 = vrot.slane %v8186_v25, 2 }
  0xcc   :  { %2405 = vmatprep.mubr.f32.mxu0 %v4523_v42  ;;  %5732 = vmatpush3.bf16.msra.mxu1 %v5731_v49  ;;  %v5771_v42 = vpack.c.bf16 %v4749_v62, %v4748_v20  ;;  %v5773_v27 = vpack.c.bf16 %v4767_v37, %v4766_v35  ;;  %v4751_v49 = vld [vmem:[%s10280_s1 + $0x848] sm:$0xff]  ;;  %v1988_v20 = vrot.slane %v8178_v0, 2  ;;  %v4770_v23 = vld [vmem:[%s10280_s1 + $0x8e0] sm:$0xff]  ;;  %v4677_v57 = vld [vmem:[%s10280_s1 + $0x7f8] sm:$0xff] }
  0xcd   :  { %5764 = vmatpush3.bf16.msra.mxu0 %v5763_v7  ;;  %5734 = vmatprep.subr.bf16.mxu1 %v5733_v53  ;;  %v1973_v7 = vrot.slane %v8108_v44, 2  ;;  %v4529_v53 = vld [vmem:[%s10279_s0 + $0xe8] sm:$0xff]  ;;  %v5775_v40 = vpack.c.bf16 %v4751_v49, %v4750_v34  ;;  %v4658_v35 = vld [vmem:[%s10280_s1 + $0x760] sm:$0xff]  ;;  %v4772_v34 = vld [vmem:[%s10280_s1 + $0x8f0] sm:$0xff]  ;;  %v1995_v49 = vrot.slane %v8226_v21, 2 }
  0xce   :  { %2179 = vmatmul.mubr.f32.gmra.mrb[84].mxu1 %v1957_v18  ;;  %5766 = vmatprep.subr.bf16.mxu0 %v5765_v13  ;;  %v1982_v13 = vrot.slane %v8123_v39, 2  ;;  %v5743_v18 = vpack.c.bf16 %v4655_v47, %v4654_v17  ;;  %v4659_v37 = vld [vmem:[%s10280_s1 + $0x768] sm:$0xff]  ;;  %v1994_v17 = vrot.slane %v8210_v45, 2  ;;  %v8280_v47 = vld [vmem:[%s10279_s0 + $0x180] sm:$0xfc]  ;;  %v4660_v61 = vld [vmem:[%s10280_s1 + $0x770] sm:$0xff] }
  0xcf   :  { %2406 = vmatmul.mubr.f32.gmra.mrb[84].mxu0 %v4522_v63  ;;  %2183 = vmatprep.mubr.f32.mxu1 %v1966_v3  ;;  %v1978_v63 = vsel %vm815_vm1, %v1976_v31, %v1977_v30  ;;  %v4528_v3 = vld [vmem:[%s10279_s0 + $0xe0] sm:$0xff]  ;;  %v1975_v19 = vsel %vm815_vm1, %v1973_v7, %v1974_v10  ;;  %v8253_v31 = vld [vmem:[%s10279_s0 + $0x198] sm:$0x3]  ;;  %v5751_v7 = vpack.c.bf16 %v4659_v37, %v4658_v35  ;;  %v1992_v10 = vrot.slane %v8243_v26, 2  ;;  %v4756_v25 = vld [vmem:[%s10280_s1 + $0x870] sm:$0xff] }
  0xd0   :  { %2410 = vmatprep.mubr.f32.mxu0 %v4525_v54  ;;  %5736 = vmatpush3.bf16.msra.mxu1 %v5735_v8  ;;  %v5745_v54 = vpack.c.bf16 %v4673_v2, %v4672_v50  ;;  %v8205_v8 = vld [vmem:[%s10279_s0 + $0x110] sm:$0x3]  ;;  %v1984_v62 = vsel %vm815_vm1, %v1982_v13, %v1983_v22  ;;  %v1991_v50 = vrot.slane %v8238_v1, 2  ;;  %v4532_v13 = vld [vmem:[%s10279_s0 + $0x120] sm:$0xff]  ;;  %v2001_v22 = vrot.slane %v8253_v31, 2  ;;  %v4537_v31 = vld [vmem:[%s10279_s0 + $0x1a8] sm:$0xff] }
  0xd1   :  { %5768 = vmatpush3.bf16.msra.mxu0 %v5767_v14  ;;  %5738 = vmatprep.subr.bf16.mxu1 %v5737_v15  ;;  %v4753_v14 = vld [vmem:[%s10280_s1 + $0x858] sm:$0xff]  ;;  %v4674_v15 = vld [vmem:[%s10280_s1 + $0x7e0] sm:$0xff]  ;;  %v8295_v2 = vld [vmem:[%s10279_s0 + $0x190] sm:$0x3]  ;;  %v1997_v0 = vrot.slane %v8280_v47, 2 }
  0xd2   :  { %2184 = vmatmul.mubr.f32.gmra.mrb[86].mxu1 %v1963_v28  ;;  %5770 = vmatprep.subr.bf16.mxu0 %v5769_v12  ;;  %v4771_v12 = vld [vmem:[%s10280_s1 + $0x8e8] sm:$0xff]  ;;  %v5779_v30 = vpack.c.bf16 %v4753_v14, %v4752_v32  ;;  %v5749_v44 = vpack.c.bf16 %v4675_v16, %v4674_v15  ;;  %v8356_v45 = vld [vmem:[%s10279_s0 + $0x1c0] sm:$0xfc]  ;;  %v8361_v14 = vld [vmem:[%s10279_s0 + $0x1d0] sm:$0x3] }
  0xd3   :  { %2411 = vmatmul.mubr.f32.gmra.mrb[86].mxu0 %v4524_v9  ;;  %2188 = vmatprep.mubr.f32.mxu1 %v1972_v5  ;;  %v1989_v9 = vrot.slane %v4453_v60, 2  ;;  %v8248_v28 = vld [vmem:[%s10279_s0 + $0x188] sm:$0xfc]  ;;  %v4754_v5 = vld [vmem:[%s10280_s1 + $0x860] sm:$0xff]  ;;  %v5781_v39 = vpack.c.bf16 %v4771_v12, %v4770_v23  ;;  %v8321_v60 = vld [vmem:[%s10279_s0 + $0x1b8] sm:$0x3] }
  0xd4   :  { %2415 = vmatprep.mubr.f32.mxu0 %v4527_v29  ;;  %5740 = vmatpush3.bf16.msra.mxu1 %v5739_v52  ;;  %v5747_v29 = vpack.c.bf16 %v4657_v55, %v4656_v24  ;;  %v4676_v52 = vld [vmem:[%s10280_s1 + $0x7f0] sm:$0xff]  ;;  %v5783_v58 = vpack.c.bf16 %v4755_v41, %v4754_v5  ;;  %v4535_v24 = vld [vmem:[%s10279_s0 + $0x188] sm:$0xff]  ;;  %v1998_v55 = vrot.slane %v8295_v2, 2  ;;  %v8371_v16 = vld [vmem:[%s10279_s0 + $0x1f8] sm:$0x3]  ;;  %v2010_v35 = vrot.slane %v8361_v14, 2 }
  0xd5   :  { %5772 = vmatpush3.bf16.msra.mxu0 %v5771_v42  ;;  %5742 = vmatprep.subr.bf16.mxu1 %v5741_v33  ;;  %v1981_v42 = vsel %vm815_vm1, %v1979_v43, %v1980_v6  ;;  %v1986_v33 = vrot.slane %v8205_v8, 2  ;;  %v5753_v59 = vpack.c.bf16 %v4677_v57, %v4676_v52  ;;  %v4464_v43 = vld [vmem:[%s10279_s0 + $0x1b0] sm:$0x3]  ;;  %v8346_v6 = vld [vmem:[%s10279_s0 + $0x1c8] sm:$0xfc]  ;;  %v2019_v5 = vrot.slane %v8371_v16, 2 }
  0xd6   :  { %2189 = vmatmul.mubr.f32.gmra.mrb[88].mxu1 %v1969_v51  ;;  %5774 = vmatprep.subr.bf16.mxu0 %v5773_v27  ;;  %v1990_v27 = vsel %vm815_vm1, %v1988_v20, %v1989_v9  ;;  %v8300_v51 = vld [vmem:[%s10279_s0 + $0x1a8] sm:$0xfc]  ;;  %v8351_v8 = vld [vmem:[%s10279_s0 + $0x1d8] sm:$0x3]  ;;  %v1993_v20 = vsel %vm815_vm1, %v1991_v50, %v1992_v10  ;;  %v8378_v21 = vld [vmem:[%s10279_s0 + $0x1e0] sm:$0xfc]  ;;  %v1999_v47 = vsel %vm815_vm1, %v1997_v0, %v1998_v55 }
  0xd7   :  { %2416 = vmatmul.mubr.f32.gmra.mrb[88].mxu0 %v4526_v48  ;;  %2193 = vmatprep.mubr.f32.mxu1 %v1978_v63  ;;  %v4773_v48 = vld [vmem:[%s10280_s1 + $0x8f8] sm:$0xff]  ;;  %v2006_v32 = vrot.slane %v8300_v51, 2  ;;  %v8366_v15 = vld [vmem:[%s10279_s0 + $0x1e8] sm:$0xfc]  ;;  %v8383_v23 = vld [vmem:[%s10279_s0 + $0x1f0] sm:$0x3] }
  0xd8   :  { %2420 = vmatprep.mubr.f32.mxu0 %v4529_v53  ;;  %5744 = vmatpush3.bf16.msra.mxu1 %v5743_v18  ;;  %v2000_v53 = vrot.slane %v8248_v28, 2  ;;  %v4661_v63 = vld [vmem:[%s10280_s1 + $0x778] sm:$0xff]  ;;  %v5785_v18 = vpack.c.bf16 %v4773_v48, %v4772_v34  ;;  %v8388_v12 = vld [vmem:[%s10279_s0 + $0x208] sm:$0xfc]  ;;  %v2004_v26 = vrot.slane %v4464_v43, 2  ;;  %v2012_v28 = vrot.slane %v8346_v6, 2 }
  0xd9   :  { %5776 = vmatpush3.bf16.msra.mxu0 %v5775_v40  ;;  %5746 = vmatprep.subr.bf16.mxu1 %v5745_v54  ;;  %v4757_v40 = vld [vmem:[%s10280_s1 + $0x878] sm:$0xff]  ;;  %v1987_v54 = vsel %vm815_vm1, %v1985_v36, %v1986_v33  ;;  %v2018_v37 = vrot.slane %v8366_v15, 2  ;;  %v2015_v36 = vrot.slane %v8378_v21, 2  ;;  %v2024_v52 = vrot.slane %v8388_v12, 2  ;;  %v4536_v57 = vld [vmem:[%s10279_s0 + $0x1a0] sm:$0xff]  ;;  %v4539_v34 = vld [vmem:[%s10279_s0 + $0x1c8] sm:$0xff] }
  0xda   :  { %2194 = vmatmul.mubr.f32.gmra.mrb[90].mxu1 %v1975_v19  ;;  %5778 = vmatprep.subr.bf16.mxu0 %v5777_v11  ;;  %v5755_v11 = vpack.c.bf16 %v4661_v63, %v4660_v61  ;;  %v5787_v19 = vpack.c.bf16 %v4757_v40, %v4756_v25  ;;  %v2002_v9 = vsel %vm815_vm1, %v2000_v53, %v2001_v22  ;;  %v8408_v41 = vld [vmem:[%s10279_s0 + $0x218] sm:$0x3]  ;;  %v8422_v33 = vld [vmem:[%s10279_s0 + $0x210] sm:$0x3]  ;;  %v8452_v2 = vld [vmem:[%s10279_s0 + $0x248] sm:$0xfc] }
  0xdb   :  { %2421 = vmatmul.mubr.f32.gmra.mrb[90].mxu0 %v4528_v3  ;;  %2198 = vmatprep.mubr.f32.mxu1 %v1984_v62  ;;  %v4462_v3 = vld [vmem:[%s10279_s0 + $0x1a0] sm:$0xfc]  ;;  %v2007_v62 = vrot.slane %v8321_v60, 2  ;;  %v8436_v48 = vld [vmem:[%s10279_s0 + $0x238] sm:$0x3]  ;;  %v2025_v10 = vrot.slane %v8408_v41, 2 }
  0xdc   :  { %2425 = vmatprep.mubr.f32.mxu0 %v7733_v4  ;;  %5748 = vmatpush3.bf16.msra.mxu1 %v5747_v29  ;;  %v4533_v4 = vld [vmem:[%s10279_s0 + $0x128] sm:$0xff]  ;;  %v2003_v1 = vrot.slane %v4462_v3, 2  ;;  %v4534_v29 = vld [vmem:[%s10279_s0 + $0x180] sm:$0xff]  ;;  %v8457_v51 = vld [vmem:[%s10279_s0 + $0x258] sm:$0x3]  ;;  %v2022_v63 = vrot.slane %v8422_v33, 2 }
  0xdd   :  { %5780 = vmatpush3.bf16.msra.mxu0 %v5779_v30  ;;  %5750 = vmatprep.subr.bf16.mxu1 %v5749_v44  ;;  %v2013_v30 = vrot.slane %v8351_v8, 2  ;;  %v2009_v44 = vrot.slane %v8356_v45, 2  ;;  %v2008_v50 = vsel %vm815_vm1, %v2006_v32, %v2007_v62  ;;  %v4538_v61 = vld [vmem:[%s10279_s0 + $0x1c0] sm:$0xff]  ;;  %v2031_v22 = vrot.slane %v8436_v48, 2  ;;  %v4541_v60 = vld [vmem:[%s10279_s0 + $0x1e8] sm:$0xff] }
  0xde   :  { %2199 = vmatmul.mubr.f32.gmra.mrb[92].mxu1 %v1981_v42  ;;  %5782 = vmatprep.subr.bf16.mxu0 %v5781_v39  ;;  %v2016_v39 = vrot.slane %v8383_v23, 2  ;;  %v8417_v42 = vld [vmem:[%s10279_s0 + $0x200] sm:$0xfc]  ;;  %v2036_v25 = vrot.slane %v8452_v2, 2  ;;  %v2037_v40 = vrot.slane %v8457_v51, 2  ;;  %v2026_v23 = vsel %vm815_vm1, %v2024_v52, %v2025_v10 }
  0xdf   :  { %2426 = vmatmul.mubr.f32.gmra.mrb[92].mxu0 %v7772_v38  ;;  %2203 = vmatprep.mubr.f32.mxu1 %v1990_v27  ;;  %v1996_v38 = vsel %vm815_vm1, %v1994_v17, %v1995_v49  ;;  %v8427_v17 = vld [vmem:[%s10279_s0 + $0x228] sm:$0xfc]  ;;  %v8441_v27 = vld [vmem:[%s10279_s0 + $0x220] sm:$0xfc]  ;;  %v8446_v49 = vld [vmem:[%s10279_s0 + $0x230] sm:$0x3]  ;;  %v2014_v55 = vsel %vm815_vm1, %v2012_v28, %v2013_v30  ;;  %v2011_v16 = vsel %vm815_vm1, %v2009_v44, %v2010_v35 }
  0xe0   :  { %2430 = vmatprep.mubr.f32.mxu0 %v4533_v4  ;;  %5752 = vmatpush3.bf16.msra.mxu1 %v5751_v7  ;;  %v8462_v7 = vld [vmem:[%s10279_s0 + $0x240] sm:$0xfc]  ;;  %v2005_v4 = vsel %vm815_vm1, %v2003_v1, %v2004_v26  ;;  %v2021_v53 = vrot.slane %v8417_v42, 2  ;;  %v2027_v0 = vrot.slane %v8441_v27, 2  ;;  %v8512_v6 = vld [vmem:[%s10279_s0 + $0x48] sm:$0xfc] }
  0xe1   :  { %5784 = vmatpush3.bf16.msra.mxu0 %v5783_v58  ;;  %5754 = vmatprep.subr.bf16.mxu1 %v5753_v59  ;;  %v8470_v58 = vld [vmem:[%s10279_s0 + $0x250] sm:$0x3]  ;;  %v8475_v59 = vld [vmem:[%s10279_s0 + $0x48] sm:$0xfe]  ;;  %v8502_v43 = vld [vmem:[%s10279_s0 + $0x40] sm:$0xfe] }
  0xe2   :  { %2204 = vmatmul.mubr.f32.gmra.mrb[94].mxu1 %v1987_v54  ;;  %5786 = vmatprep.subr.bf16.mxu0 %v5785_v18  ;;  %v2028_v18 = vrot.slane %v8446_v49, 2  ;;  %v2033_v54 = vrot.slane %v8462_v7, 2  ;;  %v2034_v32 = vrot.slane %v8470_v58, 2  ;;  %v2623_v3 = vrot.slane %v8475_v59, 1  ;;  %v8517_v8 = vld [vmem:[%s10279_s0 + $0x58] sm:$0x3] }
  0xe3   :  { %2431 = vmatmul.mubr.f32.gmra.mrb[94].mxu0 %v4532_v13  ;;  %2208 = vmatprep.mubr.f32.mxu1 %v1996_v38  ;;  %v2030_v13 = vrot.slane %v8427_v17, 2  ;;  %v8507_v38 = vld [vmem:[%s10279_s0 + $0x50] sm:$0x1]  ;;  %v8522_v45 = vld [vmem:[%s10279_s0 + $0x40] sm:$0xfc]  ;;  %v2620_v28 = vrot.slane %v8502_v43, 1  ;;  %v2038_v49 = vsel %vm815_vm1, %v2036_v25, %v2037_v40 }
  0xe4   :  { %2435 = vmatprep.mubr.f32.mxu0 %v4535_v24  ;;  %5756 = vmatpush3.bf16.msra.mxu1 %v5755_v11  ;;  %v8494_v24 = vld [vmem:[%s10279_s0 + $0x58] sm:$0x1]  ;;  %v8527_v11 = vld [vmem:[%s10279_s0 + $0x50] sm:$0x3]  ;;  %v8532_v14 = vld [vmem:[%s10279_s0 + $0x68] sm:$0xfe]  ;;  %v2035_v2 = vsel %vm815_vm1, %v2033_v54, %v2034_v32 }
  0xe5   :  { %5788 = vmatpush3.bf16.msra.mxu0 %v5787_v19  ;;  %v8537_v15 = vld [vmem:[%s10279_s0 + $0x78] sm:$0x1]  ;;  %v2020_v19 = vsel %vm815_vm1, %v2018_v37, %v2019_v5  ;;  %v8554_v62 = vld [vmem:[%s10279_s0 + $0x68] sm:$0xfc]  ;;  %v4540_v1 = vld [vmem:[%s10279_s0 + $0x1e0] sm:$0xff]  ;;  %v2624_v26 = vrot.slane %v8494_v24, 1 }
  0xe6   :  { %2209 = vmatmul.mubr.f32.gmra.mrb[96].mxu1 %v1993_v20  ;;  %v8544_v20 = vld [vmem:[%s10279_s0 + $0x60] sm:$0xfe]  ;;  %v4543_v30 = vld [vmem:[%s10279_s0 + $0x208] sm:$0xff]  ;;  %v3074_v44 = vrot.slane %v8517_v8, 2  ;;  %v3070_v35 = vrot.slane %v8522_v45, 2  ;;  %v3071_v37 = vrot.slane %v8527_v11, 2 }
  0xe7   :  { %2436 = vmatmul.mubr.f32.gmra.mrb[96].mxu0 %v4534_v29  ;;  %2213 = vmatprep.mubr.f32.mxu1 %v2002_v9  ;;  %v8549_v9 = vld [vmem:[%s10279_s0 + $0x70] sm:$0x1]  ;;  %v2621_v29 = vrot.slane %v8507_v38, 1  ;;  %v2629_v5 = vrot.slane %v8532_v14, 1  ;;  %v8603_v21 = vld [vmem:[%s10279_s0 + $0x88] sm:$0xfe] }
  0xe8   :  { %2440 = vmatprep.mubr.f32.mxu0 %v4537_v31  ;;  %v3073_v31 = vrot.slane %v8512_v6, 2  ;;  %v8628_v12 = vld [vmem:[%s10279_s0 + $0x88] sm:$0xfc]  ;;  %v8633_v41 = vld [vmem:[%s10279_s0 + $0x98] sm:$0x3]  ;;  %v4544_v33 = vld [vmem:[%s10279_s0 + $0x220] sm:$0xff]  ;;  %v3072_v8 = vsel %vm815_vm1, %v3070_v35, %v3071_v37 }
  0xe9   :  { %v8638_v52 = vld [vmem:[%s10279_s0 + $0x80] sm:$0xfc]  ;;  %v8664_v42 = vld [vmem:[%s10279_s0 + $0xa8] sm:$0xfe]  ;;  %v8743_v25 = vld [vmem:[%s10279_s0 + $0xd8] sm:$0x1]  ;;  %v2622_v6 = vsel %vm235_vm0, %v2620_v28, %v2621_v29 }
  0xea   :  { %2214 = vmatmul.mubr.f32.gmra.mrb[98].mxu1 %v1999_v47  ;;  %v2630_v47 = vrot.slane %v8537_v15, 1  ;;  %v8705_v48 = vld [vmem:[%s10279_s0 + $0xa8] sm:$0xfc]  ;;  %v8715_v27 = vld [vmem:[%s10279_s0 + $0xa0] sm:$0xfc]  ;;  %v3075_v59 = vsel %vm815_vm1, %v3073_v31, %v3074_v44  ;;  %v10292_v14 = vrot.slane %v8549_v9, 1 }
  0xeb   :  { %2441 = vmatmul.mubr.f32.gmra.mrb[98].mxu0 %v4536_v57  ;;  %2218 = vmatprep.mubr.f32.mxu1 %v2008_v50  ;;  %v4542_v57 = vld [vmem:[%s10279_s0 + $0x200] sm:$0xff]  ;;  %v2023_v50 = vsel %vm815_vm1, %v2021_v53, %v2022_v63  ;;  %v8688_v63 = vld [vmem:[%s10279_s0 + $0xb0] sm:$0x1]  ;;  %v4549_v53 = vld [vmem:[%s10279_s0 + $0x268] sm:$0xff]  ;;  %v3088_v54 = vrot.slane %v8715_v27, 2  ;;  %v10293_v15 = vrot.slane %v8544_v20, 1 }
  0xec   :  { %2445 = vmatprep.mubr.f32.mxu0 %v4539_v34  ;;  %v8748_v40 = vld [vmem:[%s10279_s0 + $0xc0] sm:$0xfe]  ;;  %v8767_v58 = vld [vmem:[%s10279_s0 + $0xd0] sm:$0x1]  ;;  %v8814_v31 = vld [vmem:[%s10279_s0 + $0xe8] sm:$0xfe]  ;;  %v2631_v45 = vsel %vm235_vm0, %v2629_v5, %v2630_v47 }
  0xed   :  { %v8819_v44 = vld [vmem:[%s10279_s0 + $0xf8] sm:$0x1]  ;;  %v8833_v11 = vld [vmem:[%s10279_s0 + $0xe0] sm:$0xfe]  ;;  %v8838_v28 = vld [vmem:[%s10279_s0 + $0xf0] sm:$0x1]  ;;  %v2628_v35 = vsel %vm235_vm0, %v10293_v15, %v10292_v14 }
  0xee   :  { %2219 = vmatmul.mubr.f32.gmra.mrb[100].mxu1 %v2005_v4  ;;  %v8579_v4 = vld [vmem:[%s10279_s0 + $0x78] sm:$0x3]  ;;  %v8843_v29 = vld [vmem:[%s10279_s0 + $0xe8] sm:$0xfc]  ;;  %v10294_v37 = vrot.slane %v8554_v62, 2 }
  0xef   :  { %2446 = vmatmul.mubr.f32.gmra.mrb[100].mxu0 %v4538_v61  ;;  %2223 = vmatprep.mubr.f32.mxu1 %v2014_v55  ;;  %v4545_v55 = vld [vmem:[%s10279_s0 + $0x228] sm:$0xff]  ;;  %v3080_v10 = vrot.slane %v8579_v4, 2  ;;  %v8865_v20 = vld [vmem:[%s10279_s0 + $0xe0] sm:$0xfc] }
  0xf0   :  { %2450 = vmatprep.mubr.f32.mxu0 %v4541_v60  ;;  %v2017_v60 = vsel %vm815_vm1, %v2015_v36, %v2016_v39  ;;  %v8613_v36 = vld [vmem:[%s10279_s0 + $0x98] sm:$0x1]  ;;  %v8618_v39 = vld [vmem:[%s10279_s0 + $0x80] sm:$0xfe]  ;;  %v9039_v27 = vld [vmem:[%s10279_s0 + $0x188] sm:$0xfe] }
  0xf1   :  { %v3081_v5 = vsel %vm815_vm1, %v10294_v37, %v3080_v10 }
  0xf2   :  { %2224 = vmatmul.mubr.f32.gmra.mrb[102].mxu1 %v2011_v16  ;;  %v8593_v16 = vld [vmem:[%s10279_s0 + $0x60] sm:$0xfc] }
  0xf3   :  { %2451 = vmatmul.mubr.f32.gmra.mrb[102].mxu0 %v4540_v1  ;;  %2228 = vmatprep.mubr.f32.mxu1 %v2020_v19  ;;  %v8598_v1 = vld [vmem:[%s10279_s0 + $0x70] sm:$0x3]  ;;  %v10296_v14 = vrot.slane %v8593_v16, 2  ;;  %v8909_v16 = vld [vmem:[%s10279_s0 + $0x100] sm:$0xfe] }
  0xf4   :  { %2455 = vmatprep.mubr.f32.mxu0 %v4543_v30  ;;  %v8623_v19 = vld [vmem:[%s10279_s0 + $0x90] sm:$0x1] }
  0xf5   :  { %v10301_v15 = vrot.slane %v8623_v19, 1 }
  0xf6   :  { %2229 = vmatmul.mubr.f32.gmra.mrb[104].mxu1 %v2017_v60  ;;  %v2032_v60 = vsel %vm815_vm1, %v2030_v13, %v2031_v22 }
  0xf7   :  { %2456 = vmatmul.mubr.f32.gmra.mrb[104].mxu0 %v4542_v57  ;;  %2233 = vmatprep.mubr.f32.mxu1 %v2026_v23  ;;  %v8659_v57 = vld [vmem:[%s10279_s0 + $0x90] sm:$0x3]  ;;  %v8676_v23 = vld [vmem:[%s10279_s0 + $0xb8] sm:$0x1] }
  0xf8   :  { %2460 = vmatprep.mubr.f32.mxu0 %v4545_v55  ;;  %v8681_v55 = vld [vmem:[%s10279_s0 + $0xa0] sm:$0xfe] }
  0xf9   :  { %v4837_v13 = vpop.f32.mrb[0].mxu1  ;;  %v4813_v22 = vpop.f32.mrb[0].mxu0 }
  0xfa   :  { %v4838_v61 = vpop.f32.mrb[1].mxu1  ;;  %2234 = vmatmul.mubr.f32.gmra.mrb[106].mxu1 %v2023_v50  ;;  %v4814_v17 = vpop.f32.mrb[1].mxu0  ;;  %v2029_v50 = vsel %vm815_vm1, %v2027_v0, %v2028_v18 }
  0xfb   :  { %v8690_v34 = vadd.f32 %v4838_v61, %v4837_v13  ;;  %v8692_v30 = vadd.f32 %v4814_v17, %v4813_v22  ;;  %2461 = vmatmul.mubr.f32.gmra.mrb[106].mxu0 %v4544_v33  ;;  %2238 = vmatprep.mubr.f32.mxu1 %v2032_v60  ;;  %v8710_v61 = vld [vmem:[%s10279_s0 + $0xb8] sm:$0x3]  ;;  %v8728_v60 = vld [vmem:[%s10279_s0 + $0xb0] sm:$0x3]  ;;  %v8733_v33 = vld [vmem:[%s10279_s0 + $0xc8] sm:$0xfe] }
  0xfc   :  { %2465 = vmatprep.mubr.f32.mxu0 %v7901_v46  ;;  %v3092_v7 = vrot.slane %v8710_v61, 2  ;;  %v3089_v0 = vrot.slane %v8728_v60, 2  ;;  %v2647_v22 = vrot.slane %v8733_v33, 1 }
  0xfd   :  { %v4840_v46 = vpop.f32.mrb[2].mxu1  ;;  %v4816_v51 = vpop.f32.mrb[2].mxu0 }
  0xfe   :  { %v4841_v17 = vpop.f32.mrb[3].mxu1  ;;  %2239 = vmatmul.mubr.f32.gmra.mrb[108].mxu1 %v2029_v50  ;;  %v4817_v13 = vpop.f32.mrb[3].mxu0  ;;  %v4548_v50 = vld [vmem:[%s10279_s0 + $0x260] sm:$0xff] }
  0xff   :  { %v8754_v32 = vadd.f32 %v4841_v17, %v4840_v46  ;;  %v8756_v18 = vadd.f32 %v4817_v13, %v4816_v51  ;;  %2466 = vmatmul.mubr.f32.gmra.mrb[108].mxu0 %v7918_v56  ;;  %2243 = vmatprep.mubr.f32.mxu1 %v2038_v49  ;;  %v2625_v56 = vsel %vm235_vm0, %v2623_v3, %v2624_v26  ;;  %v2648_v49 = vrot.slane %v8743_v25, 1  ;;  %v8779_v51 = vld [vmem:[%s10279_s0 + $0xc8] sm:$0xfc]  ;;  %v8784_v17 = vld [vmem:[%s10279_s0 + $0xd8] sm:$0x3] }
 0x100   :  { %2470 = vmatprep.mubr.f32.mxu0 %v4549_v53  ;;  %v8794_v3 = vld [vmem:[%s10279_s0 + $0xc0] sm:$0xfc]  ;;  %v8799_v26 = vld [vmem:[%s10279_s0 + $0xd0] sm:$0x3]  ;;  %v3098_v62 = vrot.slane %v8784_v17, 2  ;;  %v10311_v17 = vrot.slane %v8748_v40, 1 }
 0x101   :  { %v4843_v53 = vpop.f32.mrb[4].mxu1  ;;  %v4819_v24 = vpop.f32.mrb[4].mxu0  ;;  %v9049_v25 = vld [vmem:[%s10279_s0 + $0x198] sm:$0x1] }
 0x102   :  { %v4844_v13 = vpop.f32.mrb[5].mxu1  ;;  %2244 = vmatmul.mubr.f32.gmra.mrb[110].mxu1 %v2035_v2  ;;  %v4820_v46 = vpop.f32.mrb[5].mxu0  ;;  %v3097_v2 = vrot.slane %v8779_v51, 2 }
 0x103   :  { %v8821_v38 = vadd.f32 %v4844_v13, %v4843_v53  ;;  %v8823_v43 = vadd.f32 %v4820_v46, %v4819_v24  ;;  %2471 = vmatmul.mubr.f32.gmra.mrb[110].mxu0 %v4548_v50  ;;  %2845 = vmatprep.mubr.f32.mxu1 %v2625_v56  ;;  %v8860_v50 = vld [vmem:[%s10279_s0 + $0xf8] sm:$0x3]  ;;  %v10295_v13 = vrot.slane %v8598_v1, 2 }
 0x104   :  { %3295 = vmatprep.mubr.f32.mxu0 %v3075_v59  ;;  %v8939_v59 = vld [vmem:[%s10279_s0 + $0x118] sm:$0x3]  ;;  %v3099_v33 = vsel %vm815_vm1, %v3097_v2, %v3098_v62  ;;  %v10312_v2 = vrot.slane %v8799_v26, 2  ;;  %v10313_v62 = vrot.slane %v8794_v3, 2  ;;  %v9079_v26 = vld [vmem:[%s10279_s0 + $0x190] sm:$0x1] }
 0x105   :  { %v4846_v9 = vpop.f32.mrb[6].mxu1  ;;  %v4822_v4 = vpop.f32.mrb[6].mxu0  ;;  %v9084_v3 = vld [vmem:[%s10279_s0 + $0x188] sm:$0xfc] }
 0x106   :  { %v4847_v53 = vpop.f32.mrb[7].mxu1  ;;  %2846 = vmatmul.mubr.f32.vlgmr.msra.gmra.mrb[112].mxu1 %v2622_v6  ;;  %v4823_v24 = vpop.f32.mrb[7].mxu0  ;;  %v8883_v6 = vld [vmem:[%s10279_s0 + $0xf0] sm:$0x3] }
 0x107   :  { %v8875_v37 = vadd.f32 %v4847_v53, %v4846_v9  ;;  %v8877_v47 = vadd.f32 %v4823_v24, %v4822_v4  ;;  %3296 = vmatmul.mubr.f32.vlgmr.msra.gmra.mrb[112].mxu0 %v3072_v8  ;;  %2850 = vmatprep.mubr.f32.mxu1 %v2631_v45  ;;  %v3078_v9 = vsel %vm815_vm1, %v10296_v14, %v10295_v13  ;;  %v10297_v4 = vrot.slane %v8613_v36, 1  ;;  %v8899_v53 = vld [vmem:[%s10279_s0 + $0x108] sm:$0xfe]  ;;  %v8919_v14 = vld [vmem:[%s10279_s0 + $0x110] sm:$0x1] }
 0x108   :  { %3300 = vmatprep.mubr.f32.mxu0 %v3081_v5  ;;  %v10298_v8 = vrot.slane %v8603_v21, 1  ;;  %v8904_v5 = vld [vmem:[%s10279_s0 + $0x118] sm:$0x1]  ;;  %v10299_v21 = vrot.slane %v8633_v41, 2  ;;  %v10300_v24 = vrot.slane %v8628_v12, 2  ;;  %v10302_v41 = vrot.slane %v8618_v39, 1 }
 0x109   :  { %v4849_v1 = vpop.f32.mrb[8].mxu1  ;;  %v4825_v36 = vpop.f32.mrb[8].mxu0 }
 0x10a   :  { %v2637_v45 = vsel %vm235_vm0, %v10298_v8, %v10297_v4  ;;  %v3087_v13 = vsel %vm815_vm1, %v10300_v24, %v10299_v21  ;;  %v8924_v4 = vld [vmem:[%s10279_s0 + $0x108] sm:$0xfc]  ;;  %v4850_v8 = vpop.f32.mrb[9].mxu1  ;;  %2851 = vmatmul.mubr.f32.gmra.mrb[114].mxu1 %v2628_v35  ;;  %v4826_v46 = vpop.f32.mrb[9].mxu0  ;;  %v2634_v12 = vsel %vm235_vm0, %v10302_v41, %v10301_v15  ;;  %v10303_v21 = vrot.slane %v8659_v57, 2 }
 0x10b   :  { %v10304_v24 = vrot.slane %v8638_v52, 2  ;;  %v8944_v35 = vld [vmem:[%s10279_s0 + $0x100] sm:$0xfc]  ;;  %v8946_v19 = vadd.f32 %v4850_v8, %v4849_v1  ;;  %v8948_v39 = vadd.f32 %v4826_v46, %v4825_v36  ;;  %3301 = vmatmul.mubr.f32.gmra.mrb[114].mxu0 %v3078_v9  ;;  %2855 = vmatprep.mubr.f32.mxu1 %v2637_v45  ;;  %v8955_v15 = vld [vmem:[%s10279_s0 + $0x110] sm:$0x3]  ;;  %v10305_v46 = vrot.slane %v8676_v23, 1 }
 0x10c   :  { %v8960_v41 = vld [vmem:[%s10279_s0 + $0x128] sm:$0xfe]  ;;  %3305 = vmatprep.mubr.f32.mxu0 %v3087_v13  ;;  %v10306_v9 = vrot.slane %v8664_v42, 1  ;;  %v10307_v1 = vrot.slane %v8705_v48, 2  ;;  %v8977_v13 = vld [vmem:[%s10279_s0 + $0x138] sm:$0x1] }
 0x10d   :  { %v3084_v10 = vsel %vm815_vm1, %v10304_v24, %v10303_v21  ;;  %v8982_v42 = vld [vmem:[%s10279_s0 + $0x120] sm:$0xfe]  ;;  %v4852_v23 = vpop.f32.mrb[10].mxu1  ;;  %v4828_v61 = vpop.f32.mrb[10].mxu0  ;;  %v2657_v48 = vrot.slane %v8919_v14, 1  ;;  %v10308_v21 = vrot.slane %v8688_v63, 1 }
 0x10e   :  { %v2643_v45 = vsel %vm235_vm0, %v10306_v9, %v10305_v46  ;;  %v3093_v36 = vsel %vm815_vm1, %v10307_v1, %v3092_v7  ;;  %v4853_v9 = vpop.f32.mrb[11].mxu1  ;;  %2856 = vmatmul.mubr.f32.gmra.mrb[116].mxu1 %v2634_v12  ;;  %v4829_v1 = vpop.f32.mrb[11].mxu0  ;;  %v10309_v57 = vrot.slane %v8681_v55, 1  ;;  %v3107_v52 = vrot.slane %v8955_v15, 2  ;;  %v8998_v7 = vld [vmem:[%s10279_s0 + $0x130] sm:$0x1] }
 0x10f   :  { %v2665_v56 = vrot.slane %v8960_v41, 1  ;;  %v9000_v24 = vadd.f32 %v4853_v9, %v4852_v23  ;;  %v9002_v46 = vadd.f32 %v4829_v1, %v4828_v61  ;;  %3306 = vmatmul.mubr.f32.gmra.mrb[116].mxu0 %v3084_v10  ;;  %2860 = vmatprep.mubr.f32.mxu1 %v2643_v45  ;;  %v2666_v63 = vrot.slane %v8977_v13, 1  ;;  %v9009_v12 = vld [vmem:[%s10279_s0 + $0x128] sm:$0xfc]  ;;  %v9185_v14 = vld [vmem:[%s10279_s0 + $0x1b0] sm:$0x3] }
 0x110   :  { %v2640_v8 = vsel %vm235_vm0, %v10309_v57, %v10308_v21  ;;  %v9014_v57 = vld [vmem:[%s10279_s0 + $0x138] sm:$0x3]  ;;  %3310 = vmatprep.mubr.f32.mxu0 %v3093_v36  ;;  %v3090_v10 = vsel %vm815_vm1, %v3088_v54, %v3089_v0  ;;  %v2649_v45 = vsel %vm235_vm0, %v2647_v22, %v2648_v49  ;;  %v9029_v21 = vld [vmem:[%s10279_s0 + $0x120] sm:$0xfc]  ;;  %v9034_v36 = vld [vmem:[%s10279_s0 + $0x130] sm:$0x3]  ;;  %v3096_v61 = vsel %vm815_vm1, %v10313_v62, %v10312_v2 }
 0x111   :  { %v4855_v0 = vpop.f32.mrb[12].mxu1  ;;  %v4831_v60 = vpop.f32.mrb[12].mxu0  ;;  %v9054_v22 = vld [vmem:[%s10279_s0 + $0x180] sm:$0xfe]  ;;  %v10310_v23 = vrot.slane %v8767_v58, 1  ;;  %v10314_v9 = vrot.slane %v8819_v44, 1 }
 0x112   :  { %v4856_v54 = vpop.f32.mrb[13].mxu1  ;;  %2861 = vmatmul.mubr.f32.gmra.mrb[118].mxu1 %v2640_v8  ;;  %v4832_v49 = vpop.f32.mrb[13].mxu0  ;;  %v10315_v1 = vrot.slane %v8814_v31, 1  ;;  %v10316_v8 = vrot.slane %v8860_v50, 2  ;;  %v10317_v58 = vrot.slane %v8843_v29, 2  ;;  %v2663_v29 = vrot.slane %v8998_v7, 1 }
 0x113   :  { %v2646_v51 = vsel %vm235_vm0, %v10311_v17, %v10310_v23  ;;  %v9086_v44 = vadd.f32 %v4856_v54, %v4855_v0  ;;  %v9088_v31 = vadd.f32 %v4832_v49, %v4831_v60  ;;  %3311 = vmatmul.mubr.f32.gmra.mrb[118].mxu0 %v3090_v10  ;;  %2865 = vmatprep.mubr.f32.mxu1 %v2649_v45  ;;  %v3115_v50 = vrot.slane %v9009_v12, 2  ;;  %v9095_v23 = vld [vmem:[%s10279_s0 + $0x198] sm:$0x3]  ;;  %v9100_v17 = vld [vmem:[%s10279_s0 + $0x180] sm:$0xfc] }
 0x114   :  { %v2655_v55 = vsel %vm235_vm0, %v10315_v1, %v10314_v9  ;;  %v3105_v40 = vsel %vm815_vm1, %v10317_v58, %v10316_v8  ;;  %3315 = vmatprep.mubr.f32.mxu0 %v3099_v33  ;;  %v3116_v0 = vrot.slane %v9014_v57, 2  ;;  %v3113_v45 = vrot.slane %v9034_v36, 2  ;;  %v9114_v58 = vld [vmem:[%s10279_s0 + $0x190] sm:$0x3]  ;;  %v9129_v1 = vld [vmem:[%s10279_s0 + $0x1a8] sm:$0xfe] }
 0x115   :  { %v4858_v54 = vpop.f32.mrb[14].mxu1  ;;  %v4834_v49 = vpop.f32.mrb[14].mxu0  ;;  %v3122_v57 = vrot.slane %v9095_v23, 2  ;;  %v10318_v62 = vrot.slane %v8838_v28, 1  ;;  %v10321_v28 = vrot.slane %v8865_v20, 2  ;;  %v10328_v12 = vrot.slane %v8982_v42, 1 }
 0x116   :  { %v4859_v8 = vpop.f32.mrb[15].mxu1  ;;  %2866 = vmatmul.mubr.f32.gmra.mrb[120].mxu1 %v2646_v51  ;;  %v4835_v33 = vpop.f32.mrb[15].mxu0  ;;  %v10319_v51 = vrot.slane %v8833_v11, 1  ;;  %v10320_v11 = vrot.slane %v8883_v6, 2  ;;  %v9164_v20 = vld [vmem:[%s10279_s0 + $0x1b8] sm:$0x3] }
 0x117   :  { %v9117_v10 = vadd.f32 %v4859_v8, %v4858_v54  ;;  %v9119_v2 = vadd.f32 %v4835_v33, %v4834_v49  ;;  %3316 = vmatmul.mubr.f32.gmra.mrb[120].mxu0 %v3096_v61  ;;  %2870 = vmatprep.mubr.f32.mxu1 %v2655_v55  ;;  %v9134_v54 = vld [vmem:[%s10279_s0 + $0x1b8] sm:$0x1]  ;;  %v9139_v55 = vld [vmem:[%s10279_s0 + $0x1a0] sm:$0xfe]  ;;  %v10322_v49 = vrot.slane %v8904_v5, 1  ;;  %v3128_v13 = vrot.slane %v9164_v20, 2 }
 0x118   :  { %v2652_v9 = vsel %vm235_vm0, %v10319_v51, %v10318_v62  ;;  %3320 = vmatprep.mubr.f32.mxu0 %v3105_v40  ;;  %v3102_v61 = vsel %vm815_vm1, %v10321_v28, %v10320_v11  ;;  %v10323_v62 = vrot.slane %v8899_v53, 1  ;;  %v9154_v33 = vld [vmem:[%s10279_s0 + $0x1b0] sm:$0x1]  ;;  %v9159_v40 = vld [vmem:[%s10279_s0 + $0x1a8] sm:$0xfc]  ;;  %v10324_v53 = vrot.slane %v8909_v16, 1 }
 0x119   :  { %v4893_v6 = vpop.f32.mrb[16].mxu1  ;;  %v10325_v51 = vrot.slane %v8939_v59, 2  ;;  %v10326_v11 = vrot.slane %v8924_v4, 2  ;;  %v10327_v59 = vrot.slane %v8944_v35, 2  ;;  %v2674_v35 = vrot.slane %v9139_v55, 1 }
 0x11a   :  { %v2661_v8 = vsel %vm235_vm0, %v10323_v62, %v10322_v49  ;;  %v2658_v5 = vsel %vm235_vm0, %v10324_v53, %v2657_v48  ;;  %v3119_v49 = vrot.slane %v9114_v58, 2  ;;  %v9180_v62 = vld [vmem:[%s10279_s0 + $0x1a0] sm:$0xfc]  ;;  %v4894_v16 = vpop.f32.mrb[17].mxu1  ;;  %2871 = vmatmul.mubr.f32.gmra.mrb[122].mxu1 %v2652_v9  ;;  %v4973_v48 = vpop.f32.mrb[16].mxu0  ;;  %v2667_v53 = vsel %vm235_vm0, %v2665_v56, %v2666_v63 }
 0x11b   :  { %v3111_v28 = vsel %vm815_vm1, %v10326_v11, %v10325_v51  ;;  %v3108_v4 = vsel %vm815_vm1, %v10327_v59, %v3107_v52  ;;  %v2677_v51 = vrot.slane %v9129_v1, 1  ;;  %v2678_v11 = vrot.slane %v9134_v54, 1  ;;  %v9202_v9 = vld [vmem:[%s10279_s0 + $0x1c8] sm:$0xfe]  ;;  %v4974_v60 = vpop.f32.mrb[17].mxu0  ;;  %3321 = vmatmul.mubr.f32.gmra.mrb[122].mxu0 %v3102_v61  ;;  %2875 = vmatprep.mubr.f32.mxu1 %v2661_v8 }
 0x11c   :  { %v4895_v15 = vadd.f32 %v4894_v16, %v4893_v6  ;;  %v2675_v52 = vrot.slane %v9154_v33, 1  ;;  %v3127_v41 = vrot.slane %v9159_v40, 2  ;;  %v4975_v56 = vadd.f32 %v4974_v60, %v4973_v48  ;;  %3325 = vmatprep.mubr.f32.mxu0 %v3111_v28  ;;  %v9213_v6 = vld [vmem:[%s10279_s0 + $0x1d8] sm:$0x1]  ;;  %v9223_v28 = vld [vmem:[%s10279_s0 + $0x1c0] sm:$0xfe] }
 0x11d   :  { %v4896_v8 = vpop.f32.mrb[18].mxu1  ;;  %v3117_v16 = vsel %vm815_vm1, %v3115_v50, %v3116_v0  ;;  %v9228_v48 = vld [vmem:[%s10279_s0 + $0x1d0] sm:$0x1]  ;;  %v2664_v50 = vsel %vm235_vm0, %v10328_v12, %v2663_v29  ;;  %v9238_v0 = vld [vmem:[%s10279_s0 + $0x1c8] sm:$0xfc]  ;;  %v10329_v42 = vrot.slane %v9029_v21, 2 }
 0x11e   :  { %v609_v61 = vadd.f32 %v4895_v15, %v8692_v30  ;;  %v4897_v63 = vpop.f32.mrb[19].mxu1  ;;  %2876 = vmatmul.mubr.f32.gmra.mrb[124].mxu1 %v2658_v5  ;;  %v4976_v30 = vpop.f32.mrb[18].mxu0  ;;  %v9243_v15 = vld [vmem:[%s10279_s0 + $0x1d8] sm:$0x3]  ;;  %v2684_v29 = vrot.slane %v9213_v6, 1 }
 0x11f   :  { %v4898_v5 = vadd.f32 %v4897_v63, %v4896_v8  ;;  %v4977_v59 = vpop.f32.mrb[19].mxu0  ;;  %3326 = vmatmul.mubr.f32.gmra.mrb[124].mxu0 %v3108_v4  ;;  %2880 = vmatprep.mubr.f32.mxu1 %v2667_v53  ;;  %v3114_v7 = vsel %vm815_vm1, %v10329_v42, %v3113_v45  ;;  %v9256_v12 = vld [vmem:[%s10279_s0 + $0x1c0] sm:$0xfc] }
 0x120   :  { %v9245_v60 = vadd.f32 %v4975_v56, %v609_v61 }
 0x121   :  { %20 = vsyncpa [#allocation4], 0  ;;  %v4978_v56 = vadd.f32 %v4977_v59, %v4976_v30  ;;  %3330 = vmatprep.mubr.f32.mxu0 %v3117_v16  ;;  %v10330_v63 = vrot.slane %v9049_v25, 1  ;;  %v10331_v4 = vrot.slane %v9039_v27, 1  ;;  %v2681_v45 = vrot.slane %v9228_v48, 1  ;;  %v4899_v61 = vpop.f32.mrb[20].mxu1 }
 0x122   :  { %v9268_v53 = vld [vmem:[%s10279_s0 + $0x1d0] sm:$0x3]  ;;  %v9273_v59 = vld [vmem:[%s10279_s0 + $0x1e8] sm:$0xfe]  ;;  %v614_v25 = vadd.f32 %v4898_v5, %v8756_v18  ;;  %v10332_v27 = vrot.slane %v9084_v3, 2  ;;  %v3133_v16 = vrot.slane %v9238_v0, 2  ;;  %2881 = vmatmul.mubr.f32.gmra.mrb[126].mxu1 %v2664_v50  ;;  %v2676_v40 = vsel %vm235_vm0, %v2674_v35, %v2675_v52 }
 0x123   :  { %v2673_v36 = vsel %vm235_vm0, %v10331_v4, %v10330_v63  ;;  %v9285_v30 = vld [vmem:[%s10279_s0 + $0x1f8] sm:$0x1]  ;;  %v9290_v42 = vld [vmem:[%s10279_s0 + $0x1e0] sm:$0xfe]  ;;  %v4900_v18 = vpop.f32.mrb[21].mxu1  ;;  %v4979_v5 = vpop.f32.mrb[20].mxu0  ;;  %3331 = vmatmul.mubr.f32.gmra.mrb[126].mxu0 %v3114_v7 }
 0x124   :  { %v3123_v8 = vsel %vm815_vm1, %v10332_v27, %v3122_v57  ;;  %v10333_v23 = vrot.slane %v9079_v26, 1  ;;  %v10334_v3 = vrot.slane %v9054_v22, 1  ;;  %v10335_v0 = vrot.slane %v9100_v17, 2  ;;  %v9307_v50 = vld [vmem:[%s10279_s0 + $0x1f0] sm:$0x1]  ;;  %v4980_v21 = vpop.f32.mrb[21].mxu0  ;;  %2885 = vmatprep.mubr.f32.mxu1 %v2673_v36 }
 0x125   :  { %v3134_v4 = vrot.slane %v9243_v15, 2  ;;  %v3130_v27 = vrot.slane %v9256_v12, 2  ;;  %v9309_v26 = vadd.f32 %v4978_v56, %v614_v25  ;;  %v4901_v22 = vadd.f32 %v4900_v18, %v4899_v61  ;;  %v9325_v15 = vld [vmem:[%s10279_s0 + $0x1f8] sm:$0x3]  ;;  %3335 = vmatprep.mubr.f32.mxu0 %v3123_v8  ;;  %v4902_v56 = vpop.f32.mrb[22].mxu1 }
 0x126   :  { %v2670_v57 = vsel %vm235_vm0, %v10334_v3, %v10333_v23  ;;  %v3120_v63 = vsel %vm815_vm1, %v10335_v0, %v3119_v49  ;;  %v2679_v17 = vsel %vm235_vm0, %v2677_v51, %v2678_v11  ;;  %v3131_v58 = vrot.slane %v9268_v53, 2  ;;  %v9320_v49 = vld [vmem:[%s10279_s0 + $0x1e8] sm:$0xfc]  ;;  %v9333_v11 = vld [vmem:[%s10279_s0 + $0x1e0] sm:$0xfc]  ;;  %v4982_v25 = vpop.f32.mrb[22].mxu0 }
 0x127   :  { %v4981_v7 = vadd.f32 %v4980_v21, %v4979_v5  ;;  %v2689_v54 = vrot.slane %v9273_v59, 1  ;;  %v2690_v1 = vrot.slane %v9285_v30, 1  ;;  %v2686_v51 = vrot.slane %v9290_v42, 1  ;;  %v9345_v53 = vld [vmem:[%s10279_s0 + $0x1f0] sm:$0x3]  ;;  %2886 = vmatmul.mubr.f32.gmra.mrb[128].mxu1 %v2670_v57  ;;  %v4983_v30 = vpop.f32.mrb[23].mxu0  ;;  %3336 = vmatmul.mubr.f32.gmra.mrb[128].mxu0 %v3120_v63 }
 0x128   :  { %v619_v12 = vadd.f32 %v4901_v22, %v8823_v43  ;;  %v3129_v36 = vsel %vm815_vm1, %v3127_v41, %v3128_v13  ;;  %v2687_v21 = vrot.slane %v9307_v50, 1  ;;  %v9350_v59 = vld [vmem:[%s10279_s0 + $0x208] sm:$0xfe]  ;;  %v4903_v43 = vpop.f32.mrb[23].mxu1  ;;  %v3139_v20 = vrot.slane %v9320_v49, 2  ;;  %2890 = vmatprep.mubr.f32.mxu1 %v2679_v17 }
 0x129   :  { %v3140_v41 = vrot.slane %v9325_v15, 2  ;;  %v9362_v13 = vld [vmem:[%s10279_s0 + $0x218] sm:$0x1]  ;;  %v4904_v8 = vadd.f32 %v4903_v43, %v4902_v56  ;;  %v10336_v33 = vrot.slane %v9185_v14, 2  ;;  %v10337_v55 = vrot.slane %v9180_v62, 2  ;;  %3340 = vmatprep.mubr.f32.mxu0 %v3129_v36  ;;  %v4905_v22 = vpop.f32.mrb[24].mxu1 }
 0x12a   :  { %v9364_v61 = vadd.f32 %v4981_v7, %v619_v12  ;;  %v3136_v52 = vrot.slane %v9333_v11, 2  ;;  %v9375_v18 = vld [vmem:[%s10279_s0 + $0x200] sm:$0xfe]  ;;  %v9380_v5 = vld [vmem:[%s10279_s0 + $0x210] sm:$0x1]  ;;  %v4984_v23 = vadd.f32 %v4983_v30, %v4982_v25  ;;  %v10338_v62 = vrot.slane %v9202_v9, 1 }
 0x12b   :  { %v3126_v35 = vsel %vm815_vm1, %v10337_v55, %v10336_v33  ;;  %v3137_v3 = vrot.slane %v9345_v53, 2  ;;  %v2695_v57 = vrot.slane %v9350_v59, 1  ;;  %v9392_v0 = vld [vmem:[%s10279_s0 + $0x208] sm:$0xfc]  ;;  %v9397_v63 = vld [vmem:[%s10279_s0 + $0x218] sm:$0x3]  ;;  %v624_v6 = vadd.f32 %v4904_v8, %v8877_v47  ;;  %2891 = vmatmul.mubr.f32.gmra.mrb[130].mxu1 %v2676_v40 }
 0x12c   :  { %v2685_v14 = vsel %vm235_vm0, %v10338_v62, %v2684_v29  ;;  %v3135_v9 = vsel %vm815_vm1, %v3133_v16, %v3134_v4  ;;  %v2696_v29 = vrot.slane %v9362_v13, 1  ;;  %v9405_v17 = vld [vmem:[%s10279_s0 + $0x200] sm:$0xfc]  ;;  %v9410_v49 = vld [vmem:[%s10279_s0 + $0x210] sm:$0x3]  ;;  %v4906_v15 = vpop.f32.mrb[25].mxu1  ;;  %v3132_v4 = vsel %vm815_vm1, %v3130_v27, %v3131_v58  ;;  %3341 = vmatmul.mubr.f32.gmra.mrb[130].mxu0 %v3126_v35 }
 0x12d   :  { %v4985_v7 = vpop.f32.mrb[24].mxu0  ;;  %v10339_v47 = vrot.slane %v9223_v28, 1  ;;  %v2692_v11 = vrot.slane %v9375_v18, 1  ;;  %v2693_v12 = vrot.slane %v9380_v5, 1  ;;  %v9423_v56 = vld [vmem:[%s10279_s0 + $0x228] sm:$0xfe]  ;;  %v9425_v36 = vadd.f32 %v4984_v23, %v624_v6  ;;  %2895 = vmatprep.mubr.f32.mxu1 %v2685_v14  ;;  %3345 = vmatprep.mubr.f32.mxu0 %v3135_v9 }
 0x12e   :  { %v4907_v53 = vadd.f32 %v4906_v15, %v4905_v22  ;;  %v4986_v59 = vpop.f32.mrb[25].mxu0  ;;  %v2691_v28 = vsel %vm235_vm0, %v2689_v54, %v2690_v1  ;;  %v3145_v48 = vrot.slane %v9392_v0, 2  ;;  %v9435_v27 = vld [vmem:[%s10279_s0 + $0x220] sm:$0xfe]  ;;  %v3146_v43 = vrot.slane %v9397_v63, 2  ;;  %v4908_v13 = vpop.f32.mrb[26].mxu1 }
 0x12f   :  { %v2682_v16 = vsel %vm235_vm0, %v10339_v47, %v2681_v45  ;;  %v4637_v45 = vld [vmem:[%s10279_s0 + $0x238] sm:$0x1]  ;;  %v4987_v58 = vadd.f32 %v4986_v59, %v4985_v7  ;;  %v3142_v25 = vrot.slane %v9405_v17, 2  ;;  %v3143_v40 = vrot.slane %v9410_v49, 2  ;;  %v9443_v54 = vld [vmem:[%s10279_s0 + $0x230] sm:$0x1] }
 0x130   :  { %v629_v1 = vadd.f32 %v4907_v53, %v8948_v39  ;;  %v3141_v8 = vsel %vm815_vm1, %v3139_v20, %v3140_v41  ;;  %v2701_v30 = vrot.slane %v9423_v56, 1  ;;  %v4731_v33 = vld [vmem:[%s10279_s0 + $0x228] sm:$0xfc]  ;;  %v4733_v55 = vld [vmem:[%s10279_s0 + $0x238] sm:$0x3]  ;;  %v4909_v35 = vpop.f32.mrb[27].mxu1  ;;  %2896 = vmatmul.mubr.f32.gmra.mrb[132].mxu1 %v2682_v16  ;;  %v2688_v39 = vsel %vm235_vm0, %v2686_v51, %v2687_v21  ;;  %3346 = vmatmul.mubr.f32.gmra.mrb[132].mxu0 %v3132_v4 }
 0x131   :  { %v4988_v18 = vpop.f32.mrb[26].mxu0  ;;  %v2702_v20 = vrot.slane %v4637_v45, 1  ;;  %v2698_v41 = vrot.slane %v9435_v27, 1  ;;  %v9463_v5 = vld [vmem:[%s10279_s0 + $0x220] sm:$0xfc]  ;;  %v4910_v62 = vadd.f32 %v4909_v35, %v4908_v13  ;;  %2900 = vmatprep.mubr.f32.mxu1 %v2691_v28  ;;  %v3138_v50 = vsel %vm815_vm1, %v3136_v52, %v3137_v3  ;;  %3350 = vmatprep.mubr.f32.mxu0 %v3141_v8  ;;  %v4911_v17 = vpop.f32.mrb[28].mxu1 }
 0x132   :  { %v9465_v23 = vadd.f32 %v4987_v58, %v629_v1  ;;  %v4989_v14 = vpop.f32.mrb[27].mxu0  ;;  %v2699_v42 = vrot.slane %v9443_v54, 1  ;;  %v4732_v51 = vld [vmem:[%s10279_s0 + $0x230] sm:$0x3]  ;;  %v4639_v21 = vld [vmem:[%s10279_s0 + $0x248] sm:$0xfe]  ;;  %v2697_v63 = vsel %vm235_vm0, %v2695_v57, %v2696_v29  ;;  %v3147_v49 = vsel %vm815_vm1, %v3145_v48, %v3146_v43 }
 0x133   :  { %v4990_v0 = vadd.f32 %v4989_v14, %v4988_v18  ;;  %v3151_v6 = vrot.slane %v4731_v33, 2  ;;  %v3152_v22 = vrot.slane %v4733_v55, 2  ;;  %v4641_v52 = vld [vmem:[%s10279_s0 + $0x258] sm:$0x1]  ;;  %v9482_v3 = vld [vmem:[%s10279_s0 + $0x240] sm:$0xfe]  ;;  %v634_v9 = vadd.f32 %v4910_v62, %v9002_v46 }
 0x134   :  { %v3148_v15 = vrot.slane %v9463_v5, 2  ;;  %v9490_v57 = vld [vmem:[%s10279_s0 + $0x250] sm:$0x1]  ;;  %v4735_v29 = vld [vmem:[%s10279_s0 + $0x248] sm:$0xfc]  ;;  %v4912_v7 = vpop.f32.mrb[29].mxu1  ;;  %2901 = vmatmul.mubr.f32.gmra.mrb[134].mxu1 %v2688_v39  ;;  %v2694_v16 = vsel %vm235_vm0, %v2692_v11, %v2693_v12  ;;  %v3144_v46 = vsel %vm815_vm1, %v3142_v25, %v3143_v40  ;;  %3351 = vmatmul.mubr.f32.gmra.mrb[134].mxu0 %v3138_v50  ;;  %v2703_v45 = vsel %vm235_vm0, %v2701_v30, %v2702_v20 }
 0x135   :  { %v4991_v47 = vpop.f32.mrb[28].mxu0  ;;  %v3149_v4 = vrot.slane %v4732_v51, 2  ;;  %v2707_v56 = vrot.slane %v4639_v21, 1  ;;  %v4737_v53 = vld [vmem:[%s10279_s0 + $0x258] sm:$0x3]  ;;  %v9500_v59 = vadd.f32 %v4990_v0, %v634_v9  ;;  %v4913_v28 = vadd.f32 %v4912_v7, %v4911_v17  ;;  %2905 = vmatprep.mubr.f32.mxu1 %v2697_v63  ;;  %3355 = vmatprep.mubr.f32.mxu0 %v3147_v49  ;;  %v4914_v13 = vpop.f32.mrb[30].mxu1 }
 0x136   :  { %v4992_v48 = vpop.f32.mrb[29].mxu0  ;;  %v2708_v27 = vrot.slane %v4641_v52, 1  ;;  %v4734_v11 = vld [vmem:[%s10279_s0 + $0x240] sm:$0xfc]  ;;  %v4736_v12 = vld [vmem:[%s10279_s0 + $0x250] sm:$0x3]  ;;  %v3153_v8 = vsel %vm815_vm1, %v3151_v6, %v3152_v22  ;;  %v2700_v39 = vsel %vm235_vm0, %v2698_v41, %v2699_v42 }
 0x137   :  { %v4993_v58 = vadd.f32 %v4992_v48, %v4991_v47  ;;  %v2704_v43 = vrot.slane %v9482_v3, 1  ;;  %v2705_v25 = vrot.slane %v9490_v57, 1  ;;  %v3157_v40 = vrot.slane %v4735_v29, 2  ;;  %v4643_v54 = vld [vmem:[%s10279_s0 + $0x268] sm:$0xfe]  ;;  %v4915_v35 = vpop.f32.mrb[31].mxu1 }
 0x138   :  { %v639_v1 = vadd.f32 %v4913_v28, %v9088_v31  ;;  %v3158_v30 = vrot.slane %v4737_v53, 2  ;;  %v4645_v33 = vld [vmem:[%s10279_s0 + $0x278] sm:$0x1]  ;;  %v4739_v55 = vld [vmem:[%s10279_s0 + $0x268] sm:$0xfc]  ;;  %2906 = vmatmul.mubr.f32.gmra.mrb[136].mxu1 %v2694_v16  ;;  %v4994_v18 = vpop.f32.mrb[30].mxu0  ;;  %v4916_v14 = vadd.f32 %v4915_v35, %v4914_v13  ;;  %3356 = vmatmul.mubr.f32.gmra.mrb[136].mxu0 %v3144_v46  ;;  %v3150_v51 = vsel %vm815_vm1, %v3148_v15, %v3149_v4 }
 0x139   :  { %v3154_v20 = vrot.slane %v4734_v11, 2  ;;  %v3155_v5 = vrot.slane %v4736_v12, 2  ;;  %v4741_v31 = vld [vmem:[%s10279_s0 + $0x278] sm:$0x3]  ;;  %v4995_v50 = vpop.f32.mrb[31].mxu0  ;;  %2910 = vmatprep.mubr.f32.mxu1 %v2703_v45  ;;  %v2713_v21 = vrot.slane %v4643_v54, 1  ;;  %3360 = vmatprep.mubr.f32.mxu0 %v3153_v8  ;;  %v2709_v63 = vsel %vm235_vm0, %v2707_v56, %v2708_v27 }
 0x13a   :  { %v9526_v62 = vadd.f32 %v4993_v58, %v639_v1  ;;  %v4996_v0 = vadd.f32 %v4995_v50, %v4994_v18  ;;  %v2714_v41 = vrot.slane %v4645_v33, 1  ;;  %v4642_v42 = vld [vmem:[%s10279_s0 + $0x260] sm:$0xfe]  ;;  %v4644_v6 = vld [vmem:[%s10279_s0 + $0x270] sm:$0x1]  ;;  %v3163_v22 = vrot.slane %v4739_v55, 2 }
 0x13b   :  { %v644_v52 = vadd.f32 %v4916_v14, %v9119_v2  ;;  %v4917_v3 = vpop.f32.mrb[32].mxu1  ;;  %v3159_v9 = vsel %vm815_vm1, %v3157_v40, %v3158_v30  ;;  %v3164_v17 = vrot.slane %v4741_v31, 2  ;;  %v4738_v49 = vld [vmem:[%s10279_s0 + $0x260] sm:$0xfc]  ;;  %v4740_v15 = vld [vmem:[%s10279_s0 + $0x270] sm:$0x3]  ;;  %v2706_v7 = vsel %vm235_vm0, %v2704_v43, %v2705_v25 }
 0x13c   :  { %v4918_v57 = vpop.f32.mrb[33].mxu1  ;;  %2911 = vmatmul.mubr.f32.gmra.mrb[138].mxu1 %v2700_v39  ;;  %v4997_v29 = vpop.f32.mrb[32].mxu0  ;;  %v3156_v47 = vsel %vm815_vm1, %v3154_v20, %v3155_v5  ;;  %3361 = vmatmul.mubr.f32.gmra.mrb[138].mxu0 %v3150_v51  ;;  %v2710_v4 = vrot.slane %v4642_v42, 1  ;;  %v2711_v56 = vrot.slane %v4644_v6, 1  ;;  %v2715_v28 = vsel %vm235_vm0, %v2713_v21, %v2714_v41 }
 0x13d   :  { %v9546_v2 = vadd.f32 %v4996_v0, %v644_v52  ;;  %v4919_v16 = vadd.f32 %v4918_v57, %v4917_v3  ;;  %v4998_v46 = vpop.f32.mrb[33].mxu0  ;;  %2915 = vmatprep.mubr.f32.mxu1 %v2709_v63  ;;  %3365 = vmatprep.mubr.f32.mxu0 %v3159_v9  ;;  %v3160_v48 = vrot.slane %v4738_v49, 2  ;;  %v3161_v45 = vrot.slane %v4740_v15, 2  ;;  %v4920_v11 = vpop.f32.mrb[34].mxu1 }
 0x13e   :  { %v4999_v53 = vadd.f32 %v4998_v46, %v4997_v29  ;;  %v3165_v12 = vsel %vm815_vm1, %v3163_v22, %v3164_v17  ;;  %v4921_v58 = vpop.f32.mrb[35].mxu1  ;;  %v5000_v43 = vpop.f32.mrb[34].mxu0  ;;  %v2712_v1 = vsel %vm235_vm0, %v2710_v4, %v2711_v56  ;;  %vm3433_vm2 = vcmask 31744  }
 0x13f   :  { %v649_v27 = vadd.f32 %v4919_v16, %v8690_v34  ;;  %v4922_v40 = vadd.f32 %v4921_v58, %v4920_v11  ;;  %v5001_v54 = vpop.f32.mrb[35].mxu0  ;;  %v3162_v8 = vsel %vm815_vm1, %v3160_v48, %v3161_v45  ;;  %vm3814_vm3 = vcmask 523264  }
 0x140   :  { %2916 = vmatmul.mubr.f32.gmra.mrb[140].mxu1 %v2706_v7  ;;  %3366 = vmatmul.mubr.f32.gmra.mrb[140].mxu0 %v3156_v47  ;;  %v5002_v13 = vadd.f32 %v5001_v54, %v5000_v43  ;;  %vm3868_vm4 = vcmask 1041409   ;;  %vm3871_vm5 = vcmask 517120  }
 0x141   :  { %v9551_v25 = vadd.f32 %v4999_v53, %v649_v27  ;;  %2920 = vmatprep.mubr.f32.mxu1 %v2715_v28  ;;  %3370 = vmatprep.mubr.f32.mxu0 %v3165_v12  ;;  %v654_v34 = vadd.f32 %v4922_v40, %v8754_v32  ;;  %v4923_v30 = vpop.f32.mrb[36].mxu1 }
 0x142   :  { %v4924_v33 = vpop.f32.mrb[37].mxu1  ;;  %v5003_v55 = vpop.f32.mrb[36].mxu0 }
 0x143   :  { %v9556_v35 = vadd.f32 %v5002_v13, %v654_v34  ;;  %v4925_v18 = vadd.f32 %v4924_v33, %v4923_v30  ;;  %v5004_v39 = vpop.f32.mrb[37].mxu0 }
 0x144   :  { %2921 = vmatmul.mubr.f32.gmra.mrb[142].mxu1 %v2712_v1  ;;  %3371 = vmatmul.mubr.f32.gmra.mrb[142].mxu0 %v3162_v8  ;;  %v5005_v20 = vadd.f32 %v5004_v39, %v5003_v55 }
 0x145   :  { %v659_v5 = vadd.f32 %v4925_v18, %v8821_v38  ;;  %v4926_v31 = vpop.f32.mrb[38].mxu1 }
 0x146   :  { %v4927_v14 = vpop.f32.mrb[39].mxu1  ;;  %v5006_v50 = vpop.f32.mrb[38].mxu0 }
 0x147   :  { %v9559_v51 = vadd.f32 %v5005_v20, %v659_v5  ;;  %v4928_v21 = vadd.f32 %v4927_v14, %v4926_v31  ;;  %v5007_v0 = vpop.f32.mrb[39].mxu0 }
 0x148   :  { %v5008_v32 = vadd.f32 %v5007_v0, %v5006_v50 }
 0x149   :  { %v664_v63 = vadd.f32 %v4928_v21, %v8875_v37  ;;  %v4929_v41 = vpop.f32.mrb[40].mxu1 }
 0x14a   :  { %v4930_v42 = vpop.f32.mrb[41].mxu1  ;;  %v5009_v6 = vpop.f32.mrb[40].mxu0 }
 0x14b   :  { %v9562_v22 = vadd.f32 %v5008_v32, %v664_v63  ;;  %v4931_v52 = vadd.f32 %v4930_v42, %v4929_v41  ;;  %v5010_v3 = vpop.f32.mrb[41].mxu0 }
 0x14c   :  { %v5011_v9 = vadd.f32 %v5010_v3, %v5009_v6 }
 0x14d   :  { %v669_v38 = vadd.f32 %v4931_v52, %v8946_v19  ;;  %v4932_v17 = vpop.f32.mrb[42].mxu1 }
 0x14e   :  { %v4933_v49 = vpop.f32.mrb[43].mxu1  ;;  %v5012_v15 = vpop.f32.mrb[42].mxu0 }
 0x14f   :  { %v9565_v57 = vadd.f32 %v5011_v9, %v669_v38  ;;  %v4934_v29 = vadd.f32 %v4933_v49, %v4932_v17  ;;  %v5013_v7 = vpop.f32.mrb[43].mxu0 }
 0x150   :  { %v5014_v47 = vadd.f32 %v5013_v7, %v5012_v15 }
 0x151   :  { %v674_v37 = vadd.f32 %v4934_v29, %v9000_v24  ;;  %v4935_v16 = vpop.f32.mrb[44].mxu1 }
 0x152   :  { %v4936_v46 = vpop.f32.mrb[45].mxu1  ;;  %v5015_v4 = vpop.f32.mrb[44].mxu0 }
 0x153   :  { %v9568_v56 = vadd.f32 %v5014_v47, %v674_v37  ;;  %v4937_v53 = vadd.f32 %v4936_v46, %v4935_v16  ;;  %v5016_v28 = vpop.f32.mrb[45].mxu0 }
 0x154   :  { %v5017_v48 = vadd.f32 %v5016_v28, %v5015_v4 }
 0x155   :  { %v679_v19 = vadd.f32 %v4937_v53, %v9086_v44  ;;  %v4938_v45 = vpop.f32.mrb[46].mxu1 }
 0x156   :  { %v4939_v27 = vpop.f32.mrb[47].mxu1  ;;  %v5018_v11 = vpop.f32.mrb[46].mxu0 }
 0x157   :  { %v9571_v12 = vadd.f32 %v5017_v48, %v679_v19  ;;  %v4940_v58 = vadd.f32 %v4939_v27, %v4938_v45  ;;  %v5019_v43 = vpop.f32.mrb[47].mxu0 }
 0x158   :  { %v5020_v40 = vadd.f32 %v5019_v43, %v5018_v11 }
 0x159   :  { %v684_v24 = vadd.f32 %v4940_v58, %v9117_v10  ;;  %v5053_v54 = vpop.f32.mrb[48].mxu1 }
 0x15a   :  { %v5054_v1 = vpop.f32.mrb[49].mxu1  ;;  %v5133_v13 = vpop.f32.mrb[48].mxu0 }
 0x15b   :  { %v9574_v8 = vadd.f32 %v5020_v40, %v684_v24  ;;  %v5055_v34 = vadd.f32 %v5054_v1, %v5053_v54  ;;  %v5134_v30 = vpop.f32.mrb[49].mxu0 }
 0x15c   :  { %v5135_v33 = vadd.f32 %v5134_v30, %v5133_v13 }
 0x15d   :  { %v1349_v44 = vadd.f32 %v5055_v34, %v9245_v60  ;;  %v5056_v55 = vpop.f32.mrb[50].mxu1 }
 0x15e   :  { %v5057_v18 = vpop.f32.mrb[51].mxu1  ;;  %v5136_v39 = vpop.f32.mrb[50].mxu0 }
 0x15f   :  { %v9577_v20 = vadd.f32 %v5135_v33, %v1349_v44  ;;  %v5058_v5 = vadd.f32 %v5057_v18, %v5056_v55  ;;  %v5137_v31 = vpop.f32.mrb[51].mxu0 }
 0x160   :  { %v5138_v14 = vadd.f32 %v5137_v31, %v5136_v39 }
 0x161   :  { %v1350_v10 = vadd.f32 %v5058_v5, %v9309_v26  ;;  %v5059_v50 = vpop.f32.mrb[52].mxu1 }
 0x162   :  { %v5060_v21 = vpop.f32.mrb[53].mxu1  ;;  %v5139_v0 = vpop.f32.mrb[52].mxu0 }
 0x163   :  { %v9580_v32 = vadd.f32 %v5138_v14, %v1350_v10  ;;  %v5061_v63 = vadd.f32 %v5060_v21, %v5059_v50  ;;  %v5140_v41 = vpop.f32.mrb[53].mxu0 }
 0x164   :  { %v5141_v42 = vadd.f32 %v5140_v41, %v5139_v0 }
 0x165   :  { %v1351_v60 = vadd.f32 %v5061_v63, %v9364_v61  ;;  %v5062_v6 = vpop.f32.mrb[54].mxu1 }
 0x166   :  { %v5063_v52 = vpop.f32.mrb[55].mxu1  ;;  %v5142_v3 = vpop.f32.mrb[54].mxu0 }
 0x167   :  { %v9583_v9 = vadd.f32 %v5141_v42, %v1351_v60  ;;  %v5064_v38 = vadd.f32 %v5063_v52, %v5062_v6  ;;  %v5143_v17 = vpop.f32.mrb[55].mxu0 }
 0x168   :  { %v5144_v49 = vadd.f32 %v5143_v17, %v5142_v3 }
 0x169   :  { %v1352_v26 = vadd.f32 %v5064_v38, %v9425_v36  ;;  %v5065_v15 = vpop.f32.mrb[56].mxu1 }
 0x16a   :  { %v5066_v29 = vpop.f32.mrb[57].mxu1  ;;  %v5145_v7 = vpop.f32.mrb[56].mxu0 }
 0x16b   :  { %v9586_v47 = vadd.f32 %v5144_v49, %v1352_v26  ;;  %v5067_v37 = vadd.f32 %v5066_v29, %v5065_v15  ;;  %v5146_v16 = vpop.f32.mrb[57].mxu0 }
 0x16c   :  { %v5147_v46 = vadd.f32 %v5146_v16, %v5145_v7 }
 0x16d   :  { %v1353_v61 = vadd.f32 %v5067_v37, %v9465_v23  ;;  %v5068_v4 = vpop.f32.mrb[58].mxu1 }
 0x16e   :  { %v5069_v53 = vpop.f32.mrb[59].mxu1  ;;  %v5148_v28 = vpop.f32.mrb[58].mxu0 }
 0x16f   :  { %v9589_v48 = vadd.f32 %v5147_v46, %v1353_v61  ;;  %v5070_v19 = vadd.f32 %v5069_v53, %v5068_v4  ;;  %v5149_v45 = vpop.f32.mrb[59].mxu0 }
 0x170   :  { %v5150_v27 = vadd.f32 %v5149_v45, %v5148_v28 }
 0x171   :  { %v1354_v36 = vadd.f32 %v5070_v19, %v9500_v59  ;;  %v5071_v11 = vpop.f32.mrb[60].mxu1 }
 0x172   :  { %v5072_v58 = vpop.f32.mrb[61].mxu1  ;;  %v5151_v43 = vpop.f32.mrb[60].mxu0 }
 0x173   :  { %v9592_v40 = vadd.f32 %v5150_v27, %v1354_v36  ;;  %v5073_v24 = vadd.f32 %v5072_v58, %v5071_v11  ;;  %v5152_v54 = vpop.f32.mrb[61].mxu0 }
 0x174   :  { %v5153_v1 = vadd.f32 %v5152_v54, %v5151_v43 }
 0x175   :  { %v1355_v23 = vadd.f32 %v5073_v24, %v9526_v62  ;;  %v5074_v13 = vpop.f32.mrb[62].mxu1 }
 0x176   :  { %v5075_v34 = vpop.f32.mrb[63].mxu1  ;;  %v5154_v30 = vpop.f32.mrb[62].mxu0 }
 0x177   :  { %v9595_v33 = vadd.f32 %v5153_v1, %v1355_v23  ;;  %v5076_v44 = vadd.f32 %v5075_v34, %v5074_v13  ;;  %v5155_v55 = vpop.f32.mrb[63].mxu0 }
 0x178   :  { %v5156_v18 = vadd.f32 %v5155_v55, %v5154_v30 }
 0x179   :  { %v1356_v59 = vadd.f32 %v5076_v44, %v9546_v2  ;;  %v5077_v39 = vpop.f32.mrb[64].mxu1 }
 0x17a   :  { %v5078_v5 = vpop.f32.mrb[65].mxu1  ;;  %v5157_v31 = vpop.f32.mrb[64].mxu0 }
 0x17b   :  { %v9598_v14 = vadd.f32 %v5156_v18, %v1356_v59  ;;  %v5079_v10 = vadd.f32 %v5078_v5, %v5077_v39  ;;  %v5158_v50 = vpop.f32.mrb[65].mxu0 }
 0x17c   :  { %v5159_v21 = vadd.f32 %v5158_v50, %v5157_v31 }
 0x17d   :  { %v1357_v62 = vadd.f32 %v5079_v10, %v9551_v25  ;;  %v5080_v0 = vpop.f32.mrb[66].mxu1 }
 0x17e   :  { %v5081_v63 = vpop.f32.mrb[67].mxu1  ;;  %v5160_v41 = vpop.f32.mrb[66].mxu0 }
 0x17f   :  { %v9601_v42 = vadd.f32 %v5159_v21, %v1357_v62  ;;  %v5082_v60 = vadd.f32 %v5081_v63, %v5080_v0  ;;  %v5161_v6 = vpop.f32.mrb[67].mxu0 }
 0x180   :  { %v5162_v52 = vadd.f32 %v5161_v6, %v5160_v41 }
 0x181   :  { %v1358_v2 = vadd.f32 %v5082_v60, %v9556_v35  ;;  %v5083_v3 = vpop.f32.mrb[68].mxu1 }
 0x182   :  { %v5084_v38 = vpop.f32.mrb[69].mxu1  ;;  %v5163_v17 = vpop.f32.mrb[68].mxu0 }
 0x183   :  { %v9604_v49 = vadd.f32 %v5162_v52, %v1358_v2  ;;  %v5085_v26 = vadd.f32 %v5084_v38, %v5083_v3  ;;  %v5164_v15 = vpop.f32.mrb[69].mxu0 }
 0x184   :  { %v5165_v29 = vadd.f32 %v5164_v15, %v5163_v17 }
 0x185   :  { %v1359_v25 = vadd.f32 %v5085_v26, %v9559_v51  ;;  %v5086_v7 = vpop.f32.mrb[70].mxu1 }
 0x186   :  { %v5087_v37 = vpop.f32.mrb[71].mxu1  ;;  %v5166_v16 = vpop.f32.mrb[70].mxu0 }
 0x187   :  { %v9607_v46 = vadd.f32 %v5165_v29, %v1359_v25  ;;  %v5088_v61 = vadd.f32 %v5087_v37, %v5086_v7  ;;  %v5167_v4 = vpop.f32.mrb[71].mxu0 }
 0x188   :  { %v5168_v53 = vadd.f32 %v5167_v4, %v5166_v16 }
 0x189   :  { %v1360_v35 = vadd.f32 %v5088_v61, %v9562_v22  ;;  %v5089_v28 = vpop.f32.mrb[72].mxu1 }
 0x18a   :  { %v5090_v19 = vpop.f32.mrb[73].mxu1  ;;  %v5169_v45 = vpop.f32.mrb[72].mxu0 }
 0x18b   :  { %v9610_v27 = vadd.f32 %v5168_v53, %v1360_v35  ;;  %v5091_v36 = vadd.f32 %v5090_v19, %v5089_v28  ;;  %v5170_v11 = vpop.f32.mrb[73].mxu0 }
 0x18c   :  { %v5171_v58 = vadd.f32 %v5170_v11, %v5169_v45 }
 0x18d   :  { %v1361_v51 = vadd.f32 %v5091_v36, %v9565_v57  ;;  %v5092_v43 = vpop.f32.mrb[74].mxu1 }
 0x18e   :  { %v5093_v24 = vpop.f32.mrb[75].mxu1  ;;  %v5172_v54 = vpop.f32.mrb[74].mxu0 }
 0x18f   :  { %v9613_v1 = vadd.f32 %v5171_v58, %v1361_v51  ;;  %v5094_v23 = vadd.f32 %v5093_v24, %v5092_v43  ;;  %v5173_v13 = vpop.f32.mrb[75].mxu0 }
 0x190   :  { %v5174_v34 = vadd.f32 %v5173_v13, %v5172_v54 }
 0x191   :  { %v1362_v22 = vadd.f32 %v5094_v23, %v9568_v56  ;;  %v5095_v30 = vpop.f32.mrb[76].mxu1 }
 0x192   :  { %v5096_v44 = vpop.f32.mrb[77].mxu1  ;;  %v5175_v55 = vpop.f32.mrb[76].mxu0 }
 0x193   :  { %v9616_v18 = vadd.f32 %v5174_v34, %v1362_v22  ;;  %v5097_v59 = vadd.f32 %v5096_v44, %v5095_v30  ;;  %v5176_v39 = vpop.f32.mrb[77].mxu0 }
 0x194   :  { %v5177_v5 = vadd.f32 %v5176_v39, %v5175_v55 }
 0x195   :  { %v1363_v57 = vadd.f32 %v5097_v59, %v9571_v12  ;;  %v5098_v31 = vpop.f32.mrb[78].mxu1 }
 0x196   :  { %v5099_v10 = vpop.f32.mrb[79].mxu1  ;;  %v5178_v50 = vpop.f32.mrb[78].mxu0 }
 0x197   :  { %v9619_v21 = vadd.f32 %v5177_v5, %v1363_v57  ;;  %v5100_v62 = vadd.f32 %v5099_v10, %v5098_v31  ;;  %v5179_v0 = vpop.f32.mrb[79].mxu0 }
 0x198   :  { %v5180_v63 = vadd.f32 %v5179_v0, %v5178_v50 }
 0x199   :  { %v1364_v56 = vadd.f32 %v5100_v62, %v9574_v8  ;;  %v5213_v41 = vpop.f32.mrb[80].mxu1 }
 0x19a   :  { %v5214_v60 = vpop.f32.mrb[81].mxu1  ;;  %v5293_v6 = vpop.f32.mrb[80].mxu0 }
 0x19b   :  { %v9622_v52 = vadd.f32 %v5180_v63, %v1364_v56  ;;  %v5215_v2 = vadd.f32 %v5214_v60, %v5213_v41  ;;  %v5294_v3 = vpop.f32.mrb[81].mxu0 }
 0x19c   :  { %v5295_v38 = vadd.f32 %v5294_v3, %v5293_v6 }
 0x19d   :  { %v2249_v12 = vadd.f32 %v5215_v2, %v9577_v20  ;;  %v5216_v17 = vpop.f32.mrb[82].mxu1 }
 0x19e   :  { %v5217_v26 = vpop.f32.mrb[83].mxu1  ;;  %v5296_v15 = vpop.f32.mrb[82].mxu0 }
 0x19f   :  { %v9625_v29 = vadd.f32 %v5295_v38, %v2249_v12  ;;  %v5218_v25 = vadd.f32 %v5217_v26, %v5216_v17  ;;  %v5297_v7 = vpop.f32.mrb[83].mxu0 }
 0x1a0   :  { %v5298_v37 = vadd.f32 %v5297_v7, %v5296_v15 }
 0x1a1   :  { %v2250_v8 = vadd.f32 %v5218_v25, %v9580_v32  ;;  %v5219_v16 = vpop.f32.mrb[84].mxu1 }
 0x1a2   :  { %v5220_v61 = vpop.f32.mrb[85].mxu1  ;;  %v5299_v4 = vpop.f32.mrb[84].mxu0 }
 0x1a3   :  { %v9628_v53 = vadd.f32 %v5298_v37, %v2250_v8  ;;  %v5221_v35 = vadd.f32 %v5220_v61, %v5219_v16  ;;  %v5300_v28 = vpop.f32.mrb[85].mxu0 }
 0x1a4   :  { %v5301_v19 = vadd.f32 %v5300_v28, %v5299_v4 }
 0x1a5   :  { %v2251_v20 = vadd.f32 %v5221_v35, %v9583_v9  ;;  %v5222_v45 = vpop.f32.mrb[86].mxu1 }
 0x1a6   :  { %v5223_v36 = vpop.f32.mrb[87].mxu1  ;;  %v5302_v11 = vpop.f32.mrb[86].mxu0 }
 0x1a7   :  { %v9631_v58 = vadd.f32 %v5301_v19, %v2251_v20  ;;  %v5224_v51 = vadd.f32 %v5223_v36, %v5222_v45  ;;  %v5303_v43 = vpop.f32.mrb[87].mxu0 }
 0x1a8   :  { %v5304_v24 = vadd.f32 %v5303_v43, %v5302_v11 }
 0x1a9   :  { %v2252_v32 = vadd.f32 %v5224_v51, %v9586_v47  ;;  %v5225_v54 = vpop.f32.mrb[88].mxu1 }
 0x1aa   :  { %v5226_v23 = vpop.f32.mrb[89].mxu1  ;;  %v5305_v13 = vpop.f32.mrb[88].mxu0 }
 0x1ab   :  { %v9634_v34 = vadd.f32 %v5304_v24, %v2252_v32  ;;  %v5227_v22 = vadd.f32 %v5226_v23, %v5225_v54  ;;  %v5306_v30 = vpop.f32.mrb[89].mxu0 }
 0x1ac   :  { %v5307_v44 = vadd.f32 %v5306_v30, %v5305_v13 }
 0x1ad   :  { %v2253_v9 = vadd.f32 %v5227_v22, %v9589_v48  ;;  %v5228_v55 = vpop.f32.mrb[90].mxu1 }
 0x1ae   :  { %v5229_v59 = vpop.f32.mrb[91].mxu1  ;;  %v5308_v39 = vpop.f32.mrb[90].mxu0 }
 0x1af   :  { %v9637_v5 = vadd.f32 %v5307_v44, %v2253_v9  ;;  %v5230_v57 = vadd.f32 %v5229_v59, %v5228_v55  ;;  %v5309_v31 = vpop.f32.mrb[91].mxu0 }
 0x1b0   :  { %v5310_v10 = vadd.f32 %v5309_v31, %v5308_v39 }
 0x1b1   :  { %v2254_v47 = vadd.f32 %v5230_v57, %v9592_v40  ;;  %v5231_v50 = vpop.f32.mrb[92].mxu1 }
 0x1b2   :  { %v5232_v62 = vpop.f32.mrb[93].mxu1  ;;  %v5311_v0 = vpop.f32.mrb[92].mxu0 }
 0x1b3   :  { %v9640_v63 = vadd.f32 %v5310_v10, %v2254_v47  ;;  %v5233_v56 = vadd.f32 %v5232_v62, %v5231_v50  ;;  %v5312_v41 = vpop.f32.mrb[93].mxu0 }
 0x1b4   :  { %v5313_v60 = vadd.f32 %v5312_v41, %v5311_v0 }
 0x1b5   :  { %v2255_v48 = vadd.f32 %v5233_v56, %v9595_v33  ;;  %v5234_v6 = vpop.f32.mrb[94].mxu1 }
 0x1b6   :  { %v5235_v2 = vpop.f32.mrb[95].mxu1  ;;  %v5314_v3 = vpop.f32.mrb[94].mxu0 }
 0x1b7   :  { %v9643_v38 = vadd.f32 %v5313_v60, %v2255_v48  ;;  %v5236_v12 = vadd.f32 %v5235_v2, %v5234_v6  ;;  %v5315_v17 = vpop.f32.mrb[95].mxu0 }
 0x1b8   :  { %v5316_v26 = vadd.f32 %v5315_v17, %v5314_v3 }
 0x1b9   :  { %v2256_v40 = vadd.f32 %v5236_v12, %v9598_v14  ;;  %v5237_v15 = vpop.f32.mrb[96].mxu1 }
 0x1ba   :  { %v5238_v25 = vpop.f32.mrb[97].mxu1  ;;  %v5317_v7 = vpop.f32.mrb[96].mxu0 }
 0x1bb   :  { %v9646_v37 = vadd.f32 %v5316_v26, %v2256_v40  ;;  %v5239_v8 = vadd.f32 %v5238_v25, %v5237_v15  ;;  %v5318_v16 = vpop.f32.mrb[97].mxu0 }
 0x1bc   :  { %v5319_v61 = vadd.f32 %v5318_v16, %v5317_v7 }
 0x1bd   :  { %v2257_v33 = vadd.f32 %v5239_v8, %v9601_v42  ;;  %v5240_v4 = vpop.f32.mrb[98].mxu1 }
 0x1be   :  { %v5241_v35 = vpop.f32.mrb[99].mxu1  ;;  %v5320_v28 = vpop.f32.mrb[98].mxu0 }
 0x1bf   :  { %v9649_v19 = vadd.f32 %v5319_v61, %v2257_v33  ;;  %v5242_v20 = vadd.f32 %v5241_v35, %v5240_v4  ;;  %v5321_v45 = vpop.f32.mrb[99].mxu0 }
 0x1c0   :  { %v5322_v36 = vadd.f32 %v5321_v45, %v5320_v28 }
 0x1c1   :  { %v2258_v14 = vadd.f32 %v5242_v20, %v9604_v49  ;;  %v5243_v11 = vpop.f32.mrb[100].mxu1 }
 0x1c2   :  { %v5244_v51 = vpop.f32.mrb[101].mxu1  ;;  %v5323_v43 = vpop.f32.mrb[100].mxu0 }
 0x1c3   :  { %v9652_v24 = vadd.f32 %v5322_v36, %v2258_v14  ;;  %v5245_v32 = vadd.f32 %v5244_v51, %v5243_v11  ;;  %v5324_v54 = vpop.f32.mrb[101].mxu0 }
 0x1c4   :  { %v5325_v23 = vadd.f32 %v5324_v54, %v5323_v43 }
 0x1c5   :  { %v2259_v42 = vadd.f32 %v5245_v32, %v9607_v46  ;;  %v5246_v13 = vpop.f32.mrb[102].mxu1  ;;  %v9676_v32 = vld [vmem:[%s10281_s2] ss:$0 sm:$0xff] }
 0x1c6   :  { %v5247_v22 = vpop.f32.mrb[103].mxu1  ;;  %v5326_v30 = vpop.f32.mrb[102].mxu0 }
 0x1c7   :  { %v9655_v44 = vadd.f32 %v5325_v23, %v2259_v42  ;;  %v5248_v9 = vadd.f32 %v5247_v22, %v5246_v13  ;;  %v5327_v55 = vpop.f32.mrb[103].mxu0 }
 0x1c8   :  { %v5328_v59 = vadd.f32 %v5327_v55, %v5326_v30 }
 0x1c9   :  { %v2260_v49 = vadd.f32 %v5248_v9, %v9610_v27  ;;  %v5249_v39 = vpop.f32.mrb[104].mxu1 }
 0x1ca   :  { %v5250_v57 = vpop.f32.mrb[105].mxu1  ;;  %v5329_v31 = vpop.f32.mrb[104].mxu0 }
 0x1cb   :  { %v9658_v10 = vadd.f32 %v5328_v59, %v2260_v49  ;;  %v5251_v47 = vadd.f32 %v5250_v57, %v5249_v39  ;;  %v5330_v50 = vpop.f32.mrb[105].mxu0 }
 0x1cc   :  { %v5331_v62 = vadd.f32 %v5330_v50, %v5329_v31 }
 0x1cd   :  { %v2261_v46 = vadd.f32 %v5251_v47, %v9613_v1  ;;  %v5252_v0 = vpop.f32.mrb[106].mxu1 }
 0x1ce   :  { %v5253_v56 = vpop.f32.mrb[107].mxu1  ;;  %v5332_v41 = vpop.f32.mrb[106].mxu0 }
 0x1cf   :  { %v9661_v60 = vadd.f32 %v5331_v62, %v2261_v46  ;;  %v5254_v48 = vadd.f32 %v5253_v56, %v5252_v0  ;;  %v5333_v6 = vpop.f32.mrb[107].mxu0 }
 0x1d0   :  { %v5334_v2 = vadd.f32 %v5333_v6, %v5332_v41 }
 0x1d1   :  { %v2262_v27 = vadd.f32 %v5254_v48, %v9616_v18  ;;  %v5255_v3 = vpop.f32.mrb[108].mxu1 }
 0x1d2   :  { %v5256_v12 = vpop.f32.mrb[109].mxu1  ;;  %v5335_v17 = vpop.f32.mrb[108].mxu0 }
 0x1d3   :  { %v9664_v26 = vadd.f32 %v5334_v2, %v2262_v27  ;;  %v5257_v40 = vadd.f32 %v5256_v12, %v5255_v3  ;;  %v5336_v15 = vpop.f32.mrb[109].mxu0 }
 0x1d4   :  { %v5337_v25 = vadd.f32 %v5336_v15, %v5335_v17 }
 0x1d5   :  { %v2263_v1 = vadd.f32 %v5257_v40, %v9619_v21  ;;  %v5258_v7 = vpop.f32.mrb[110].mxu1 }
 0x1d6   :  { %v5259_v8 = vpop.f32.mrb[111].mxu1  ;;  %v5338_v16 = vpop.f32.mrb[110].mxu0 }
 0x1d7   :  { %v9667_v61 = vadd.f32 %v5337_v25, %v2263_v1  ;;  %v5260_v33 = vadd.f32 %v5259_v8, %v5258_v7  ;;  %v5339_v4 = vpop.f32.mrb[111].mxu0  ;;  %v5885_v1 = vmov 0  }
 0x1d8   :  { %v5340_v35 = vadd.f32 %v5339_v4, %v5338_v16  ;;  %5811 = vset.pattern.permute.xlu1 %v5885_v1  ;;  %5810 = vset.pattern.permute.xlu0 %v5885_v1 }
 0x1d9   :  { %v2264_v18 = vadd.f32 %v5260_v33, %v9622_v52  ;;  %v5373_v28 = vpop.f32.mrb[112].mxu1 }
 0x1da   :  { %v5374_v20 = vpop.f32.mrb[113].mxu1  ;;  %v5453_v45 = vpop.f32.mrb[112].mxu0 }
 0x1db   :  { %v9670_v36 = vadd.f32 %v5340_v35, %v2264_v18  ;;  %v5375_v14 = vadd.f32 %v5374_v20, %v5373_v28  ;;  %v5454_v11 = vpop.f32.mrb[113].mxu0 }
 0x1dc   :  { %v5455_v51 = vadd.f32 %v5454_v11, %v5453_v45 }
 0x1dd   :  { %v2926_v21 = vadd.f32 %v5375_v14, %v9625_v29  ;;  %v5376_v43 = vpop.f32.mrb[114].mxu1 }
 0x1de   :  { %v5377_v54 = vpop.f32.mrb[115].mxu1  ;;  %v5456_v23 = vpop.f32.mrb[114].mxu0 }
 0x1df   :  { %v3376_v42 = vadd.f32 %v5455_v51, %v2926_v21  ;;  %v5378_v52 = vadd.f32 %v5377_v54, %v5376_v43  ;;  %v5457_v13 = vpop.f32.mrb[115].mxu0 }
 0x1e0   :  { %v5458_v22 = vadd.f32 %v5457_v13, %v5456_v23 }
 0x1e1   :  { %v9679_v30 = vadd.f32 %v9676_v32, %v3376_v42  ;;  %v2927_v9 = vadd.f32 %v5378_v52, %v9628_v53  ;;  %v5379_v55 = vpop.f32.mrb[116].mxu1 }
 0x1e2   :  { %v5380_v59 = vpop.f32.mrb[117].mxu1  ;;  %v5459_v29 = vpop.f32.mrb[116].mxu0 }
 0x1e3   :  { %v3377_v49 = vadd.f32 %v5458_v22, %v2927_v9  ;;  %v5381_v39 = vadd.f32 %v5380_v59, %v5379_v55  ;;  %v5460_v57 = vpop.f32.mrb[117].mxu0  ;;  %v3415_v31 = vmax.f32 %v9679_v30, 0.0 }
 0x1e4   :  { %v5461_v47 = vadd.f32 %v5460_v57, %v5459_v29 }
 0x1e5   :  { %v9684_v50 = vadd.f32 %v9676_v32, %v3377_v49  ;;  %v2928_v62 = vadd.f32 %v5381_v39, %v9631_v58  ;;  %v5382_v46 = vpop.f32.mrb[118].mxu1  ;;  %v3434_v2 = vsel %vm3433_vm2, %v3415_v31, 0.0 }
 0x1e6   :  { %v5383_v0 = vpop.f32.mrb[119].mxu1  ;;  %v5462_v56 = vpop.f32.mrb[118].mxu0 }
 0x1e7   :  { %v3416_v53 = vmax.f32 %v9684_v50, 0.0  ;;  %v3378_v41 = vadd.f32 %v5461_v47, %v2928_v62  ;;  %v5384_v48 = vadd.f32 %v5383_v0, %v5382_v46  ;;  %v5463_v6 = vpop.f32.mrb[119].mxu0 }
 0x1e8   :  { %v5464_v27 = vadd.f32 %v5463_v6, %v5462_v56 }
 0x1e9   :  { %v3435_v3 = vsel %vm3433_vm2, %v3416_v53, 0.0  ;;  %v9695_v12 = vadd.f32 %v9676_v32, %v3378_v41  ;;  %v2929_v58 = vadd.f32 %v5384_v48, %v9634_v34  ;;  %v5385_v17 = vpop.f32.mrb[120].mxu1 }
 0x1ea   :  { %v3436_v40 = vadd.f32 %v3435_v3, %v3434_v2  ;;  %v5386_v15 = vpop.f32.mrb[121].mxu1  ;;  %v5465_v25 = vpop.f32.mrb[120].mxu0 }
 0x1eb   :  { %v3417_v7 = vmax.f32 %v9695_v12, 0.0  ;;  %v3379_v8 = vadd.f32 %v5464_v27, %v2929_v58  ;;  %v5387_v16 = vadd.f32 %v5386_v15, %v5385_v17  ;;  %v5466_v33 = vpop.f32.mrb[121].mxu0 }
 0x1ec   :  { %v5467_v4 = vadd.f32 %v5466_v33, %v5465_v25 }
 0x1ed   :  { %v3437_v35 = vsel %vm3433_vm2, %v3417_v7, 0.0  ;;  %v9705_v34 = vadd.f32 %v9676_v32, %v3379_v8  ;;  %v2930_v18 = vadd.f32 %v5387_v16, %v9637_v5  ;;  %v5388_v28 = vpop.f32.mrb[122].mxu1 }
 0x1ee   :  { %v3438_v20 = vadd.f32 %v3437_v35, %v3436_v40  ;;  %v5389_v45 = vpop.f32.mrb[123].mxu1  ;;  %v5468_v14 = vpop.f32.mrb[122].mxu0 }
 0x1ef   :  { %v3418_v11 = vmax.f32 %v9705_v34, 0.0  ;;  %v3380_v51 = vadd.f32 %v5467_v4, %v2930_v18  ;;  %v5390_v21 = vadd.f32 %v5389_v45, %v5388_v28  ;;  %v5469_v43 = vpop.f32.mrb[123].mxu0 }
 0x1f0   :  { %v5470_v54 = vadd.f32 %v5469_v43, %v5468_v14 }
 0x1f1   :  { %v3439_v23 = vsel %vm3433_vm2, %v3418_v11, 0.0  ;;  %v9713_v42 = vadd.f32 %v9676_v32, %v3380_v51  ;;  %v2931_v52 = vadd.f32 %v5390_v21, %v9640_v63  ;;  %v5391_v5 = vpop.f32.mrb[124].mxu1 }
 0x1f2   :  { %v3440_v13 = vadd.f32 %v3439_v23, %v3438_v20  ;;  %v5392_v22 = vpop.f32.mrb[125].mxu1  ;;  %v5471_v9 = vpop.f32.mrb[124].mxu0 }
 0x1f3   :  { %v3419_v55 = vmax.f32 %v9713_v42, 0.0  ;;  %v3381_v59 = vadd.f32 %v5470_v54, %v2931_v52  ;;  %v5393_v29 = vadd.f32 %v5392_v22, %v5391_v5  ;;  %v5472_v49 = vpop.f32.mrb[125].mxu0 }
 0x1f4   :  { %v5473_v39 = vadd.f32 %v5472_v49, %v5471_v9 }
 0x1f5   :  { %v3441_v57 = vsel %vm3433_vm2, %v3419_v55, 0.0  ;;  %v9721_v47 = vadd.f32 %v9676_v32, %v3381_v59  ;;  %v2932_v62 = vadd.f32 %v5393_v29, %v9643_v38  ;;  %v5394_v63 = vpop.f32.mrb[126].mxu1 }
 0x1f6   :  { %v3442_v46 = vadd.f32 %v3441_v57, %v3440_v13  ;;  %v5395_v0 = vpop.f32.mrb[127].mxu1  ;;  %v5474_v56 = vpop.f32.mrb[126].mxu0 }
 0x1f7   :  { %v3420_v41 = vmax.f32 %v9721_v47, 0.0  ;;  %v3382_v48 = vadd.f32 %v5473_v39, %v2932_v62  ;;  %v5396_v6 = vadd.f32 %v5395_v0, %v5394_v63  ;;  %v5475_v2 = vpop.f32.mrb[127].mxu0 }
 0x1f8   :  { %v5476_v27 = vadd.f32 %v5475_v2, %v5474_v56 }
 0x1f9   :  { %v3443_v3 = vsel %vm3433_vm2, %v3420_v41, 0.0  ;;  %v9729_v58 = vadd.f32 %v9676_v32, %v3382_v48  ;;  %v2933_v17 = vadd.f32 %v5396_v6, %v9646_v37 }
 0x1fa   :  { %v5397_v38 = vpop.f32.mrb[128].mxu1  ;;  %v3444_v40 = vadd.f32 %v3443_v3, %v3442_v46  ;;  %v5477_v25 = vpop.f32.mrb[128].mxu0 }
 0x1fb   :  { %v5398_v15 = vpop.f32.mrb[129].mxu1  ;;  %v3421_v8 = vmax.f32 %v9729_v58, 0.0  ;;  %v3383_v16 = vadd.f32 %v5476_v27, %v2933_v17  ;;  %v5478_v4 = vpop.f32.mrb[129].mxu0 }
 0x1fc   :  { %v5399_v33 = vadd.f32 %v5398_v15, %v5397_v38  ;;  %v5479_v35 = vadd.f32 %v5478_v4, %v5477_v25 }
 0x1fd   :  { %v3445_v18 = vsel %vm3433_vm2, %v3421_v8, 0.0  ;;  %v9737_v28 = vadd.f32 %v9676_v32, %v3383_v16 }
 0x1fe   :  { %v2934_v20 = vadd.f32 %v5399_v33, %v9649_v19  ;;  %v5400_v37 = vpop.f32.mrb[130].mxu1  ;;  %v3446_v45 = vadd.f32 %v3445_v18, %v3444_v40 }
 0x1ff   :  { %v5401_v14 = vpop.f32.mrb[131].mxu1  ;;  %v5480_v51 = vpop.f32.mrb[130].mxu0  ;;  %v3422_v21 = vmax.f32 %v9737_v28, 0.0 }
 0x200   :  { %v3384_v43 = vadd.f32 %v5479_v35, %v2934_v20  ;;  %v5402_v54 = vadd.f32 %v5401_v14, %v5400_v37  ;;  %v5481_v23 = vpop.f32.mrb[131].mxu0 }
 0x201   :  { %v5482_v52 = vadd.f32 %v5481_v23, %v5480_v51  ;;  %v3447_v5 = vsel %vm3433_vm2, %v3422_v21, 0.0 }
 0x202   :  { %v9745_v13 = vadd.f32 %v9676_v32, %v3384_v43  ;;  %v2935_v22 = vadd.f32 %v5402_v54, %v9652_v24  ;;  %v3448_v9 = vadd.f32 %v3447_v5, %v3446_v45 }
 0x203   :  { %v5403_v19 = vpop.f32.mrb[132].mxu1  ;;  %v5483_v29 = vpop.f32.mrb[132].mxu0 }
 0x204   :  { %v5404_v59 = vpop.f32.mrb[133].mxu1  ;;  %v3423_v49 = vmax.f32 %v9745_v13, 0.0  ;;  %v3385_v39 = vadd.f32 %v5482_v52, %v2935_v22  ;;  %v5484_v62 = vpop.f32.mrb[133].mxu0 }
 0x205   :  { %v5405_v57 = vadd.f32 %v5404_v59, %v5403_v19  ;;  %v5485_v63 = vadd.f32 %v5484_v62, %v5483_v29 }
 0x206   :  { %v3449_v46 = vsel %vm3433_vm2, %v3423_v49, 0.0  ;;  %v9753_v0 = vadd.f32 %v9676_v32, %v3385_v39 }
 0x207   :  { %v2936_v56 = vadd.f32 %v5405_v57, %v9655_v44  ;;  %v5406_v24 = vpop.f32.mrb[134].mxu1  ;;  %v3450_v48 = vadd.f32 %v3449_v46, %v3448_v9  ;;  %v5486_v2 = vpop.f32.mrb[134].mxu0 }
 0x208   :  { %v5407_v6 = vpop.f32.mrb[135].mxu1  ;;  %v3424_v27 = vmax.f32 %v9753_v0, 0.0  ;;  %v5487_v38 = vpop.f32.mrb[135].mxu0 }
 0x209   :  { %v3386_v3 = vadd.f32 %v5485_v63, %v2936_v56  ;;  %v5408_v17 = vadd.f32 %v5407_v6, %v5406_v24  ;;  %v5488_v40 = vadd.f32 %v5487_v38, %v5486_v2 }
 0x20a   :  { %v3451_v15 = vsel %vm3433_vm2, %v3424_v27, 0.0 }
 0x20b   :  { %v9761_v25 = vadd.f32 %v9676_v32, %v3386_v3  ;;  %v2937_v16 = vadd.f32 %v5408_v17, %v9658_v10  ;;  %v5409_v44 = vpop.f32.mrb[136].mxu1  ;;  %v3452_v33 = vadd.f32 %v3451_v15, %v3450_v48  ;;  %v5489_v35 = vpop.f32.mrb[136].mxu0 }
 0x20c   :  { %v5410_v4 = vpop.f32.mrb[137].mxu1  ;;  %v5490_v45 = vpop.f32.mrb[137].mxu0 }
 0x20d   :  { %v3425_v18 = vmax.f32 %v9761_v25, 0.0  ;;  %v3387_v20 = vadd.f32 %v5488_v40, %v2937_v16  ;;  %v5411_v37 = vadd.f32 %v5410_v4, %v5409_v44  ;;  %v5491_v14 = vadd.f32 %v5490_v45, %v5489_v35 }
 0x20f   :  { %v3453_v51 = vsel %vm3433_vm2, %v3425_v18, 0.0  ;;  %v9769_v43 = vadd.f32 %v9676_v32, %v3387_v20  ;;  %v2938_v54 = vadd.f32 %v5411_v37, %v9661_v60  ;;  %v5412_v10 = vpop.f32.mrb[138].mxu1  ;;  %v5492_v5 = vpop.f32.mrb[138].mxu0 }
 0x210   :  { %v3454_v23 = vadd.f32 %v3453_v51, %v3452_v33  ;;  %v5413_v52 = vpop.f32.mrb[139].mxu1  ;;  %v5493_v59 = vpop.f32.mrb[139].mxu0 }
 0x211   :  { %v3426_v22 = vmax.f32 %v9769_v43, 0.0  ;;  %v3388_v19 = vadd.f32 %v5491_v14, %v2938_v54  ;;  %v5414_v9 = vadd.f32 %v5413_v52, %v5412_v10  ;;  %v5494_v29 = vadd.f32 %v5493_v59, %v5492_v5 }
 0x213   :  { %v3455_v39 = vsel %vm3433_vm2, %v3426_v22, 0.0  ;;  %v3411_v57 = vadd.f32 %v9676_v32, %v3388_v19  ;;  %v2939_v62 = vadd.f32 %v5414_v9, %v9664_v26  ;;  %v5415_v63 = vpop.f32.mrb[140].mxu1  ;;  %v5495_v60 = vpop.f32.mrb[140].mxu0 }
 0x214   :  { %v3456_v46 = vadd.f32 %v3455_v39, %v3454_v23  ;;  %v5416_v56 = vpop.f32.mrb[141].mxu1  ;;  %v5496_v2 = vpop.f32.mrb[141].mxu0 }
 0x215   :  { %v3427_v24 = vmax.f32 %v3411_v57, 0.0  ;;  %v3389_v48 = vadd.f32 %v5494_v29, %v2939_v62  ;;  %v5417_v6 = vadd.f32 %v5416_v56, %v5415_v63  ;;  %v5497_v3 = vadd.f32 %v5496_v2, %v5495_v60 }
 0x217   :  { %v3457_v17 = vsel %vm3433_vm2, %v3427_v24, 0.0  ;;  %v3412_v38 = vadd.f32 %v9676_v32, %v3389_v48  ;;  %v2940_v40 = vadd.f32 %v5417_v6, %v9667_v61  ;;  %v5418_v15 = vpop.f32.mrb[142].mxu1  ;;  %v5498_v33 = vpop.f32.mrb[142].mxu0  ;;  %v9856_v6 = vld [vmem:[%s10282_s3] ss:$0 sm:$0xff] }
 0x218   :  { %v3458_v16 = vadd.f32 %v3457_v17, %v3456_v46  ;;  %v5419_v44 = vpop.f32.mrb[143].mxu1  ;;  %v5499_v20 = vpop.f32.mrb[143].mxu0 }
 0x219   :  { %v3428_v26 = vmax.f32 %v3412_v38, 0.0  ;;  %v3390_v4 = vadd.f32 %v5497_v3, %v2940_v40  ;;  %v5420_v35 = vadd.f32 %v5419_v44, %v5418_v15  ;;  %v5500_v37 = vadd.f32 %v5499_v20, %v5498_v33 }
 0x21b   :  { %v3459_v45 = vsel %vm3433_vm2, %v3428_v26, 0.0  ;;  %v3413_v14 = vadd.f32 %v9676_v32, %v3390_v4  ;;  %v2941_v51 = vadd.f32 %v5420_v35, %v9670_v36 }
 0x21c   :  { %v3460_v43 = vadd.f32 %v3459_v45, %v3458_v16 }
 0x21d   :  { %v3429_v54 = vmax.f32 %v3413_v14, 0.0  ;;  %v3391_v10 = vadd.f32 %v5500_v37, %v2941_v51 }
 0x21f   :  { %v3461_v61 = vsel %vm3433_vm2, %v3429_v54, 0.0  ;;  %v3414_v23 = vadd.f32 %v9676_v32, %v3391_v10 }
 0x220   :  { %v3462_v52 = vadd.f32 %v3461_v61, %v3460_v43 }
 0x221   :  { %v3430_v5 = vmax.f32 %v3414_v23, 0.0 }
 0x223   :  { %v3463_v19 = vsel %vm3433_vm2, %v3430_v5, 0.0 }
 0x224   :  { %v3464_v9 = vadd.f32 %v3463_v19, %v3462_v52 }
 0x226   :  { %v3465_v59 = vrot.slane %v3464_v9, 4 }
 0x228   :  { %v3466_v29 = vadd.f32 %v3465_v59, %v3464_v9 }
 0x22a   :  { %v3467_v39 = vrot.slane %v3466_v29, 2 }
 0x22c   :  { %v3468_v57 = vadd.f32 %v3467_v39, %v3466_v29 }
 0x22e   :  { %v3469_v62 = vrot.slane %v3468_v57, 1 }
 0x230   :  { %v3470_v63 = vadd.f32 %v3469_v62, %v3468_v57 }
 0x232   :  { %v3472_v46 = vmul.f32 0.0078125, %v3470_v63 }
 0x234   :  { %v9787_v36 = vsub.f32 %v3415_v31, %v3472_v46  ;;  %v9791_v56 = vsub.f32 %v3416_v53, %v3472_v46  ;;  %v9795_v32 = vsub.f32 %v3417_v7, %v3472_v46  ;;  %v9799_v60 = vsub.f32 %v3418_v11, %v3472_v46 }
 0x235   :  { %v9803_v48 = vsub.f32 %v3419_v55, %v3472_v46  ;;  %v9807_v30 = vsub.f32 %v3420_v41, %v3472_v46  ;;  %v3479_v31 = vsub.f32 %v3421_v8, %v3472_v46  ;;  %v9813_v50 = vsub.f32 %v3422_v21, %v3472_v46 }
 0x236   :  { %v9817_v53 = vsub.f32 %v3423_v49, %v3472_v46  ;;  %v9821_v12 = vsub.f32 %v3424_v27, %v3472_v46  ;;  %v9825_v7 = vsub.f32 %v3425_v18, %v3472_v46  ;;  %v9827_v34 = vsub.f32 %v3426_v22, %v3472_v46 }
 0x237   :  { %v9829_v11 = vsub.f32 %v3427_v24, %v3472_v46  ;;  %v9831_v42 = vsub.f32 %v3428_v26, %v3472_v46  ;;  %v9833_v55 = vsub.f32 %v3429_v54, %v3472_v46  ;;  %v9835_v47 = vsub.f32 %v3430_v5, %v3472_v46 }
 0x238   :  { %v3489_v41 = vmul.f32 %v9787_v36, %v9787_v36  ;;  %v3490_v58 = vmul.f32 %v9791_v56, %v9791_v56  ;;  %v3491_v8 = vmul.f32 %v9795_v32, %v9795_v32  ;;  %v3492_v28 = vmul.f32 %v9799_v60, %v9799_v60 }
 0x239   :  { %v3493_v0 = vmul.f32 %v9803_v48, %v9803_v48  ;;  %v3494_v18 = vmul.f32 %v9807_v30, %v9807_v30  ;;  %v3495_v2 = vmul.f32 %v3479_v31, %v3479_v31  ;;  %v3496_v38 = vmul.f32 %v9813_v50, %v9813_v50 }
 0x23a   :  { %v3505_v21 = vsel %vm3433_vm2, %v3489_v41, 0.0  ;;  %v3506_v13 = vsel %vm3433_vm2, %v3490_v58, 0.0  ;;  %v3508_v27 = vsel %vm3433_vm2, %v3491_v8, 0.0  ;;  %v3510_v22 = vsel %vm3433_vm2, %v3492_v28, 0.0 }
 0x23b   :  { %v3507_v49 = vadd.f32 %v3506_v13, %v3505_v21  ;;  %v3512_v3 = vsel %vm3433_vm2, %v3493_v0, 0.0  ;;  %v3514_v40 = vsel %vm3433_vm2, %v3494_v18, 0.0  ;;  %v9863_v16 = vmul.f32 %v9856_v6, %v3479_v31 }
 0x23c   :  { %v3497_v44 = vmul.f32 %v9817_v53, %v9817_v53  ;;  %v3516_v33 = vsel %vm3433_vm2, %v3495_v2, 0.0  ;;  %v3498_v4 = vmul.f32 %v9821_v12, %v9821_v12  ;;  %v3518_v35 = vsel %vm3433_vm2, %v3496_v38, 0.0 }
 0x23d   :  { %v3509_v25 = vadd.f32 %v3508_v27, %v3507_v49  ;;  %v3499_v37 = vmul.f32 %v9825_v7, %v9825_v7  ;;  %v3500_v51 = vmul.f32 %v9827_v34, %v9827_v34  ;;  %v3501_v10 = vmul.f32 %v9829_v11, %v9829_v11 }
 0x23e   :  { %v3520_v45 = vsel %vm3433_vm2, %v3497_v44, 0.0  ;;  %v3522_v43 = vsel %vm3433_vm2, %v3498_v4, 0.0  ;;  %v3502_v52 = vmul.f32 %v9831_v42, %v9831_v42  ;;  %v3503_v9 = vmul.f32 %v9833_v55, %v9833_v55 }
 0x23f   :  { %v3511_v24 = vadd.f32 %v3510_v22, %v3509_v25  ;;  %v3524_v61 = vsel %vm3433_vm2, %v3499_v37, 0.0  ;;  %v3526_v5 = vsel %vm3433_vm2, %v3500_v51, 0.0  ;;  %v3528_v59 = vsel %vm3433_vm2, %v3501_v10, 0.0 }
 0x240   :  { %v3504_v39 = vmul.f32 %v9835_v47, %v9835_v47  ;;  %v3530_v57 = vsel %vm3433_vm2, %v3502_v52, 0.0  ;;  %v3532_v63 = vsel %vm3433_vm2, %v3503_v9, 0.0  ;;  %v3551_v25 = vmul.f32 %v9856_v6, %v9795_v32 }
 0x241   :  { %v3513_v17 = vadd.f32 %v3512_v3, %v3511_v24  ;;  %v3549_v18 = vmul.f32 %v9856_v6, %v9787_v36  ;;  %v3552_v22 = vmul.f32 %v9856_v6, %v9799_v60  ;;  %v3550_v24 = vmul.f32 %v9856_v6, %v9791_v56 }
 0x242   :  { %v3534_v31 = vsel %vm3433_vm2, %v3504_v39, 0.0  ;;  %v3554_v2 = vmul.f32 %v9856_v6, %v9807_v30  ;;  %v3553_v32 = vmul.f32 %v9856_v6, %v9803_v48  ;;  %v3558_v36 = vmul.f32 %v9856_v6, %v9821_v12 }
 0x243   :  { %v3515_v15 = vadd.f32 %v3514_v40, %v3513_v17  ;;  %v9904_v17 = vld [vmem:[%s10283_s4] ss:$0 sm:$0xff]  ;;  %v3557_v60 = vmul.f32 %v9856_v6, %v9817_v53  ;;  %v3559_v56 = vmul.f32 %v9856_v6, %v9825_v7  ;;  %v3560_v53 = vmul.f32 %v9856_v6, %v9827_v34 }
 0x244   :  { %v3561_v12 = vmul.f32 %v9856_v6, %v9829_v11  ;;  %v3564_v7 = vmul.f32 %v9856_v6, %v9835_v47  ;;  %v3563_v37 = vmul.f32 %v9856_v6, %v9833_v55  ;;  %v5886_v52 = vmov 1  }
 0x245   :  { %v3517_v26 = vadd.f32 %v3516_v33, %v3515_v15 }
 0x247   :  { %v3519_v20 = vadd.f32 %v3518_v35, %v3517_v26 }
 0x249   :  { %v3521_v14 = vadd.f32 %v3520_v45, %v3519_v20  ;;  %v3562_v20 = vmul.f32 %v9856_v6, %v9831_v42  ;;  %v3556_v45 = vmul.f32 %v9856_v6, %v9813_v50 }
 0x24b   :  { %v3523_v54 = vadd.f32 %v3522_v43, %v3521_v14 }
 0x24d   :  { %v3525_v23 = vadd.f32 %v3524_v61, %v3523_v54 }
 0x24f   :  { %v3527_v19 = vadd.f32 %v3526_v5, %v3525_v23 }
 0x251   :  { %v3529_v29 = vadd.f32 %v3528_v59, %v3527_v19 }
 0x253   :  { %v3531_v62 = vadd.f32 %v3530_v57, %v3529_v29 }
 0x255   :  { %v3533_v46 = vadd.f32 %v3532_v63, %v3531_v62  ;;  %v5887_v62 = vmov 2   ;;  %v5888_v63 = vmov 3  }
 0x257   :  { %v3535_v41 = vadd.f32 %v3534_v31, %v3533_v46 }
 0x259   :  { %v3536_v58 = vrot.slane %v3535_v41, 4 }
 0x25b   :  { %v3537_v8 = vadd.f32 %v3536_v58, %v3535_v41 }
 0x25d   :  { %v3538_v28 = vrot.slane %v3537_v8, 2 }
 0x25f   :  { %v3539_v21 = vadd.f32 %v3538_v28, %v3537_v8 }
 0x261   :  { %v3540_v13 = vrot.slane %v3539_v21, 1 }
 0x263   :  { %v3541_v49 = vadd.f32 %v3540_v13, %v3539_v21 }
 0x265   :  { %v3542_v0 = vmul.f32 0.0078125, %v3541_v49 }
 0x267   :  { %v3565_v27 = vadd.f32 1e-05, %v3542_v0 }
 0x269   :  { %5849 = vrsqrt.f32 %v3565_v27 }
 0x273   :  { %v5850_v3 = vpop.eup %5849 }
 0x274   :  { %v3569_v38 = vmul.f32 %v5850_v3, %v3551_v25  ;;  %v3567_v30 = vmul.f32 %v5850_v3, %v3549_v18  ;;  %v3570_v40 = vmul.f32 %v5850_v3, %v3552_v22  ;;  %v3568_v15 = vmul.f32 %v5850_v3, %v3550_v24 }
 0x275   :  { %v3572_v44 = vmul.f32 %v5850_v3, %v3554_v2  ;;  %v3571_v33 = vmul.f32 %v5850_v3, %v3553_v32  ;;  %v3576_v26 = vmul.f32 %v5850_v3, %v3558_v36  ;;  %v3575_v4 = vmul.f32 %v5850_v3, %v3557_v60  ;;  %v3614_v60 = vld [vmem:[%s10284_s5 + $0x48] sm:$0xff] }
 0x276   :  { %v9915_v35 = vadd.f32 %v9904_v17, %v3569_v38  ;;  %v9918_v48 = vadd.f32 %v9904_v17, %v3567_v30  ;;  %v3577_v34 = vmul.f32 %v5850_v3, %v3559_v56  ;;  %v3578_v14 = vmul.f32 %v5850_v3, %v3560_v53  ;;  %v3613_v56 = vld [vmem:[%s10284_s5 + $0x40] sm:$0xff] }
 0x277   :  { %v3579_v51 = vmul.f32 %v5850_v3, %v3561_v12  ;;  %v3580_v11 = vmul.f32 %v5850_v3, %v3562_v20  ;;  %v3581_v43 = vmul.f32 %v5850_v3, %v3563_v37  ;;  %v3582_v54 = vmul.f32 %v5850_v3, %v3564_v7  ;;  %v3607_v12 = vld [vmem:[%s10284_s5 + $0x10] sm:$0xff] }
 0x278   :  { %3634 = vperm.xlu1 %5811, %v9915_v35   ;;  %3624 = vperm.xlu0 %5810, %v9918_v48   ;;  %v3574_v47 = vmul.f32 %v5850_v3, %v3556_v45  ;;  %v9935_v10 = vadd.f32 %v9904_v17, %v3570_v40  ;;  %v9938_v42 = vadd.f32 %v9904_v17, %v3568_v15  ;;  %v3615_v40 = vld [vmem:[%s10284_s5 + $0x50] sm:$0xff]  ;;  %v3606_v15 = vld [vmem:[%s10284_s5 + $0x8] sm:$0xff]  ;;  %v3617_v45 = vld [vmem:[%s10284_s5 + $0x60] sm:$0xff] }
 0x279   :  { %v3573_v55 = vmul.f32 %v5850_v3, %v9863_v16  ;;  %v9947_v6 = vadd.f32 %v9904_v17, %v3572_v44  ;;  %v9950_v61 = vadd.f32 %v9904_v17, %v3571_v33  ;;  %v3598_v23 = vadd.f32 %v9904_v17, %v3576_v26  ;;  %v3605_v26 = vld [vmem:[%s10284_s5] sm:$0xff] }
 0x27a   :  { %v9956_v16 = vadd.f32 %v9904_v17, %v3575_v4  ;;  %v3599_v5 = vadd.f32 %v9904_v17, %v3577_v34  ;;  %v9966_v19 = vadd.f32 %v9904_v17, %v3578_v14  ;;  %v9971_v9 = vadd.f32 %v9904_v17, %v3579_v51 }
 0x27b   :  { %v9944_v50 = vadd.f32 %v9904_v17, %v3573_v55  ;;  %v3602_v59 = vadd.f32 %v9904_v17, %v3580_v11  ;;  %v9980_v29 = vadd.f32 %v9904_v17, %v3581_v43  ;;  %v9985_v39 = vadd.f32 %v9904_v17, %v3582_v54  ;;  %v3608_v11 = vld [vmem:[%s10284_s5 + $0x18] sm:$0xff] }
 0x27c   :  { %3639 = vperm.xlu1 %5811, %v9935_v10   ;;  %3629 = vperm.xlu0 %5810, %v9938_v42   ;;  %v9992_v57 = vadd.f32 %v9904_v17, %v3574_v47 }
 0x280   :  { %3649 = vperm.xlu1 %5811, %v9947_v6   ;;  %3644 = vperm.xlu0 %5810, %v9950_v61  }
 0x284   :  { %3669 = vperm.xlu1 %5811, %v3598_v23   ;;  %3664 = vperm.xlu0 %5810, %v9956_v16  }
 0x288   :  { %5813 = vset.pattern.permute.xlu1 %v5886_v52  ;;  %5812 = vset.pattern.permute.xlu0 %v5886_v52 }
 0x289   :  { %3755 = vperm.xlu1 %5813, %v3598_v23   ;;  %3751 = vperm.xlu0 %5812, %v9956_v16  }
 0x28d   :  { %5814 = vset.pattern.permute.xlu1 %v5885_v1  ;;  %3719 = vperm.xlu0 %5812, %v9918_v48  }
 0x28e   :  { %3674 = vperm.xlu1 %5814, %v3599_v5  }
 0x291   :  { %3759 = vperm.xlu0 %5812, %v3599_v5  }
 0x292   :  { %5815 = vset.pattern.permute.xlu1 %v5886_v52 }
 0x293   :  { %3723 = vperm.xlu1 %5815, %v9938_v42  }
 0x295   :  { %3727 = vperm.xlu0 %5812, %v9915_v35  }
 0x297   :  { %5816 = vset.pattern.permute.xlu1 %v5885_v1 }
 0x298   :  { %3679 = vperm.xlu1 %5816, %v9966_v19  }
 0x299   :  { %5818 = vset.pattern.permute.xlu0 %v5885_v1 }
 0x29a   :  { %3684 = vperm.xlu0 %5818, %v9971_v9  }
 0x29c   :  { %5817 = vset.pattern.permute.xlu1 %v5886_v52 }
 0x29d   :  { %3763 = vperm.xlu1 %5817, %v9966_v19  }
 0x29e   :  { %3689 = vperm.xlu0 %5818, %v3602_v59  }
 0x2a1   :  { %3731 = vperm.xlu1 %5817, %v9935_v10  }
 0x2a2   :  { %5819 = vset.pattern.permute.xlu0 %v5886_v52 }
 0x2a3   :  { %3771 = vperm.xlu0 %5819, %v3602_v59  }
 0x2a5   :  { %3767 = vperm.xlu1 %5817, %v9971_v9  }
 0x2a7   :  { %3775 = vperm.xlu0 %5819, %v9980_v29  }
 0x2a9   :  { %3735 = vperm.xlu1 %5817, %v9950_v61  }
 0x2ab   :  { %5823 = vset.pattern.permute.xlu0 %v5885_v1 }
 0x2ac   :  { %3699 = vperm.xlu0 %5823, %v9985_v39  }
 0x2ad   :  { %5820 = vset.pattern.permute.xlu1 %v5885_v1 }
 0x2ae   :  { %3694 = vperm.xlu1 %5820, %v9980_v29  }
 0x2b0   :  { %3659 = vperm.xlu0 %5823, %v9992_v57  }
 0x2b2   :  { %5821 = vset.pattern.permute.xlu1 %v5886_v52 }
 0x2b3   :  { %3739 = vperm.xlu1 %5821, %v9947_v6  }
 0x2b4   :  { %5825 = vset.pattern.permute.xlu0 %v5887_v62 }
 0x2b5   :  { %3957 = vperm.xlu0 %5825, %v9956_v16  }
 0x2b7   :  { %5822 = vset.pattern.permute.xlu1 %v5885_v1 }
 0x2b8   :  { %3654 = vperm.xlu1 %5822, %v9944_v50  }
 0x2b9   :  { %5828 = vset.pattern.permute.xlu0 %v5888_v63 }
 0x2ba   :  { %4041 = vperm.xlu0 %5828, %v3598_v23  }
 0x2bc   :  { %5824 = vset.pattern.permute.xlu1 %v5886_v52 }
 0x2bd   :  { %3743 = vperm.xlu1 %5824, %v9944_v50  }
 0x2be   :  { %5830 = vset.pattern.permute.xlu0 %v5887_v62 }
 0x2bf   :  { %3965 = vperm.xlu0 %5830, %v3599_v5  }
 0x2c1   :  { %3779 = vperm.xlu1 %5824, %v9985_v39  }
 0x2c3   :  { %5832 = vset.pattern.permute.xlu0 %v5888_v63 }
 0x2c4   :  { %4045 = vperm.xlu0 %5832, %v3599_v5  }
 0x2c5   :  { %3747 = vperm.xlu1 %5824, %v9992_v57  }
 0x2c8   :  { %4013 = vperm.xlu0 %5832, %v9915_v35  }
 0x2c9   :  { %5826 = vset.pattern.permute.xlu1 %v5887_v62 }
 0x2ca   :  { %3961 = vperm.xlu1 %5826, %v3598_v23  }
 0x2cc   :  { %5835 = vset.pattern.permute.xlu0 %v5887_v62 }
 0x2cd   :  { %3937 = vperm.xlu0 %5835, %v9935_v10  }
 0x2ce   :  { %5827 = vset.pattern.permute.xlu1 %v5888_v63 }
 0x2cf   :  { %4037 = vperm.xlu1 %5827, %v9956_v16  }
 0x2d1   :  { %5838 = vset.pattern.permute.xlu0 %v5888_v63 }
 0x2d2   :  { %4053 = vperm.xlu0 %5838, %v9971_v9  }
 0x2d3   :  { %5829 = vset.pattern.permute.xlu1 %v5887_v62 }
 0x2d4   :  { %3925 = vperm.xlu1 %5829, %v9918_v48  }
 0x2d6   :  { %5839 = vset.pattern.permute.xlu0 %v5887_v62 }
 0x2d7   :  { %3941 = vperm.xlu0 %5839, %v9950_v61  }
 0x2d8   :  { %3929 = vperm.xlu1 %5829, %v9938_v42  }
 0x2db   :  { %3977 = vperm.xlu0 %5839, %v3602_v59  }
 0x2dc   :  { %5831 = vset.pattern.permute.xlu1 %v5888_v63 }
 0x2dd   :  { %4005 = vperm.xlu1 %5831, %v9918_v48  }
 0x2df   :  { %5840 = vset.pattern.permute.xlu0 %v5888_v63 }
 0x2e0   :  { %4021 = vperm.xlu0 %5840, %v9950_v61  }
 0x2e1   :  { %4009 = vperm.xlu1 %5831, %v9938_v42  }
 0x2e4   :  { %4057 = vperm.xlu0 %5840, %v3602_v59  }
 0x2e5   :  { %5833 = vset.pattern.permute.xlu1 %v5887_v62 }
 0x2e6   :  { %3933 = vperm.xlu1 %5833, %v9915_v35   ;;  %v3616_v35 = vld [vmem:[%s10284_s5 + $0x58] sm:$0xff] }
 0x2e8   :  { %5841 = vset.pattern.permute.xlu0 %v5887_v62 }
 0x2e9   :  { %3945 = vperm.xlu0 %5841, %v9947_v6  }
 0x2ea   :  { %3969 = vperm.xlu1 %5833, %v9966_v19  }
 0x2ed   :  { %5843 = vset.pattern.permute.xlu0 %v5888_v63 }
 0x2ee   :  { %5834 = vset.pattern.permute.xlu1 %v5888_v63  ;;  %4025 = vperm.xlu0 %5843, %v9947_v6   ;;  %v3609_v6 = vld [vmem:[%s10284_s5 + $0x20] sm:$0xff] }
 0x2ef   :  { %4049 = vperm.xlu1 %5834, %v9966_v19  }
 0x2f2   :  { %4061 = vperm.xlu0 %5843, %v9980_v29  }
 0x2f3   :  { %5836 = vset.pattern.permute.xlu1 %v5887_v62 }
 0x2f4   :  { %3973 = vperm.xlu1 %5836, %v9971_v9   ;;  %v3618_v9 = vld [vmem:[%s10284_s5 + $0x68] sm:$0xff] }
 0x2f6   :  { %5844 = vset.pattern.permute.xlu0 %v5887_v62 }
 0x2f7   :  { %v10037_v1 = vpop.permute.xlu1 %3634  ;;  %3949 = vperm.xlu0 %5844, %v9944_v50   ;;  %v3625_v46 = vpop.permute.xlu0 %3624 }
 0x2f8   :  { %5837 = vset.pattern.permute.xlu1 %v5888_v63 }
 0x2f9   :  { %4017 = vperm.xlu1 %5837, %v9935_v10  }
 0x2fb   :  { %v10042_v31 = vpop.permute.xlu1 %3639  ;;  %5846 = vset.pattern.permute.xlu0 %v5888_v63  ;;  %v3630_v41 = vpop.permute.xlu0 %3629 }
 0x2fc   :  { %4065 = vperm.xlu0 %5846, %v9985_v39   ;;  %v3703_v43 = vmul.f32 %v3630_v41, %v3606_v15 }
 0x2fd   :  { %5842 = vset.pattern.permute.xlu1 %v5887_v62 }
 0x2fe   :  { %3981 = vperm.xlu1 %5842, %v9980_v29  }
 0x2ff   :  { %v10048_v58 = vpop.permute.xlu1 %3649  ;;  %v10050_v8 = vpop.permute.xlu0 %3644 }
 0x302   :  { %3985 = vperm.xlu1 %5842, %v9985_v39   ;;  %v3611_v39 = vld [vmem:[%s10284_s5 + $0x30] sm:$0xff] }
 0x303   :  { %v3670_v28 = vpop.permute.xlu1 %3669  ;;  %v3665_v21 = vpop.permute.xlu0 %3664 }
 0x304   :  { %v3711_v4 = vmul.f32 %v3670_v28, %v3606_v15  ;;  %v3710_v48 = vmul.f32 %v3665_v21, %v3605_v26  ;;  %v3705_v21 = vmul.f32 %v10042_v31, %v3608_v11 }
 0x306   :  { %5845 = vset.pattern.permute.xlu1 %v5888_v63 }
 0x307   :  { %4029 = vperm.xlu1 %5845, %v9944_v50   ;;  %v3702_v50 = vmul.f32 %v3625_v46, %v3605_v26 }
 0x308   :  { %v3756_v13 = vpop.permute.xlu1 %3755  ;;  %v3752_v49 = vpop.permute.xlu0 %3751 }
 0x309   :  { %v3791_v30 = vmul.f32 %v3756_v13, %v3614_v60  ;;  %v3790_v44 = vmul.f32 %v3752_v49, %v3613_v56 }
 0x30b   :  { %5847 = vset.pattern.permute.xlu1 %v5887_v62  ;;  %v3807_v7 = vadd.f32 %v3791_v30, %v3711_v4  ;;  %v3806_v34 = vadd.f32 %v3790_v44, %v3710_v48  ;;  %v3704_v62 = vmul.f32 %v10037_v1, %v3607_v12 }
 0x30c   :  { %3953 = vperm.xlu1 %5847, %v9992_v57   ;;  %v3720_v27 = vpop.permute.xlu0 %3719 }
 0x30d   :  { %v3675_v0 = vpop.permute.xlu1 %3674  ;;  %v3782_v54 = vmul.f32 %v3720_v27, %v3613_v56  ;;  %v3837_v61 = vsel %vm3814_vm3, %v3807_v7, 0.0  ;;  %v3836_v16 = vsel %vm3814_vm3, %v3806_v34, 0.0  ;;  %v3619_v27 = vld [vmem:[%s10284_s5 + $0x70] sm:$0xff] }
 0x30e   :  { %v3712_v14 = vmul.f32 %v3675_v0, %v3607_v12  ;;  %v3838_v13 = vadd.f32 %v3837_v61, %v3836_v16  ;;  %v3620_v12 = vld [vmem:[%s10284_s5 + $0x78] sm:$0xff] }
 0x30f   :  { %v3798_v59 = vadd.f32 %v3782_v54, %v3702_v50 }
 0x310   :  { %5848 = vset.pattern.permute.xlu1 %v5888_v63  ;;  %v3760_v22 = vpop.permute.xlu0 %3759 }
 0x311   :  { %v3792_v53 = vmul.f32 %v3760_v22, %v3615_v40  ;;  %v3815_v31 = vsel %vm3814_vm3, %v3798_v59, 0.0 }
 0x312   :  { %v3724_v25 = vpop.permute.xlu1 %3723 }
 0x313   :  { %v3783_v20 = vmul.f32 %v3724_v25, %v3614_v60  ;;  %v3808_v10 = vadd.f32 %v3792_v53, %v3712_v14  ;;  %v3610_v25 = vld [vmem:[%s10284_s5 + $0x28] sm:$0xff] }
 0x314   :  { %v3728_v2 = vpop.permute.xlu0 %3727 }
 0x315   :  { %v3799_v23 = vadd.f32 %v3783_v20, %v3703_v43  ;;  %v3784_v52 = vmul.f32 %v3728_v2, %v3615_v40  ;;  %v3839_v63 = vsel %vm3814_vm3, %v3808_v10, 0.0  ;;  %v3706_v2 = vmul.f32 %v10050_v8, %v3609_v6  ;;  %v3612_v8 = vld [vmem:[%s10284_s5 + $0x38] sm:$0xff] }
 0x316   :  { %v3707_v40 = vmul.f32 %v10048_v58, %v3610_v25 }
 0x317   :  { %v3680_v18 = vpop.permute.xlu1 %3679  ;;  %v3816_v49 = vsel %vm3814_vm3, %v3799_v23, 0.0  ;;  %v3800_v1 = vadd.f32 %v3784_v52, %v3704_v62 }
 0x318   :  { %v3713_v42 = vmul.f32 %v3680_v18, %v3608_v11  ;;  %v3817_v15 = vadd.f32 %v3816_v49, %v3815_v31 }
 0x319   :  { %v3685_v17 = vpop.permute.xlu0 %3684 }
 0x31a   :  { %v3714_v5 = vmul.f32 %v3685_v17, %v3609_v6 }
 0x31c   :  { %v3764_v24 = vpop.permute.xlu1 %3763 }
 0x31d   :  { %v3690_v38 = vpop.permute.xlu0 %3689  ;;  %v3793_v51 = vmul.f32 %v3764_v24, %v3616_v35 }
 0x31e   :  { %v3715_v17 = vmul.f32 %v3690_v38, %v3610_v25  ;;  %v4777_v25 = vld [vmem:[%s10285_s6] ss:$0 sm:$0xff] }
 0x31f   :  { %v3809_v19 = vadd.f32 %v3793_v51, %v3713_v42 }
 0x320   :  { %v3732_v3 = vpop.permute.xlu1 %3731 }
 0x321   :  { %v3785_v46 = vmul.f32 %v3732_v3, %v3616_v35  ;;  %v3841_v18 = vsel %vm3814_vm3, %v3809_v19, 0.0  ;;  %v3840_v3 = vadd.f32 %v3839_v63, %v3838_v13 }
 0x322   :  { %v3772_v37 = vpop.permute.xlu0 %3771 }
 0x323   :  { %v3795_v0 = vmul.f32 %v3772_v37, %v3618_v9  ;;  %v3842_v44 = vadd.f32 %v3841_v18, %v3840_v3 }
 0x324   :  { %v3768_v32 = vpop.permute.xlu1 %3767 }
 0x325   :  { %v3794_v55 = vmul.f32 %v3768_v32, %v3617_v45  ;;  %v3801_v32 = vadd.f32 %v3785_v46, %v3705_v21  ;;  %v3811_v26 = vadd.f32 %v3795_v0, %v3715_v17 }
 0x326   :  { %v3776_v29 = vpop.permute.xlu0 %3775 }
 0x327   :  { %v3810_v41 = vadd.f32 %v3794_v55, %v3714_v5  ;;  %v3796_v56 = vmul.f32 %v3776_v29, %v3619_v27  ;;  %v3820_v58 = vsel %vm3814_vm3, %v3801_v32, 0.0 }
 0x328   :  { %v3736_v36 = vpop.permute.xlu1 %3735 }
 0x329   :  { %v3786_v22 = vmul.f32 %v3736_v36, %v3617_v45  ;;  %v3843_v60 = vsel %vm3814_vm3, %v3810_v41, 0.0  ;;  %v3818_v36 = vsel %vm3814_vm3, %v3800_v1, 0.0  ;;  %v3845_v45 = vsel %vm3814_vm3, %v3811_v26, 0.0 }
 0x32a   :  { %v3844_v53 = vadd.f32 %v3843_v60, %v3842_v44  ;;  %v3819_v37 = vadd.f32 %v3818_v36, %v3817_v15 }
 0x32b   :  { %v3700_v4 = vpop.permute.xlu0 %3699 }
 0x32c   :  { %v3717_v34 = vmul.f32 %v3700_v4, %v3612_v8  ;;  %v3846_v10 = vadd.f32 %v3845_v45, %v3844_v53 }
 0x32d   :  { %v3695_v33 = vpop.permute.xlu1 %3694 }
 0x32e   :  { %v3716_v24 = vmul.f32 %v3695_v33, %v3611_v39  ;;  %v3802_v33 = vadd.f32 %v3786_v22, %v3706_v2 }
 0x32f   :  { %v3660_v42 = vpop.permute.xlu0 %3659 }
 0x330   :  { %v3812_v38 = vadd.f32 %v3796_v56, %v3716_v24  ;;  %v3822_v51 = vsel %vm3814_vm3, %v3802_v33, 0.0  ;;  %v3709_v16 = vmul.f32 %v3660_v42, %v3612_v8 }
 0x332   :  { %v3740_v47 = vpop.permute.xlu1 %3739  ;;  %v3847_v11 = vsel %vm3814_vm3, %v3812_v38, 0.0 }
 0x333   :  { %v3787_v30 = vmul.f32 %v3740_v47, %v3618_v9  ;;  %v3821_v47 = vadd.f32 %v3820_v58, %v3819_v37  ;;  %v3848_v61 = vadd.f32 %v3847_v11, %v3846_v10  ;;  %v3908_v11 = vld [vmem:[%s10286_s7 + $0x8] sm:$0xff] }
 0x334   :  { %v3958_v60 = vpop.permute.xlu0 %3957 }
 0x335   :  { %v3803_v7 = vadd.f32 %v3787_v30, %v3707_v40  ;;  %v3823_v6 = vadd.f32 %v3822_v51, %v3821_v47  ;;  %v10166_v51 = vld [vmem:[%s10286_s7] sm:$0xff] }
 0x336   :  { %v3996_v10 = vmul.f32 %v3958_v60, %v10166_v51 }
 0x337   :  { %v3655_v28 = vpop.permute.xlu1 %3654  ;;  %v3824_v55 = vsel %vm3814_vm3, %v3803_v7, 0.0 }
 0x338   :  { %v3708_v20 = vmul.f32 %v3655_v28, %v3611_v39  ;;  %v3825_v9 = vadd.f32 %v3824_v55, %v3823_v6  ;;  %v3917_v55 = vld [vmem:[%s10286_s7 + $0x50] sm:$0xff] }
 0x339   :  { %v4042_v56 = vpop.permute.xlu0 %4041 }
 0x33c   :  { %v3744_v35 = vpop.permute.xlu1 %3743 }
 0x33d   :  { %v3788_v48 = vmul.f32 %v3744_v35, %v3619_v27 }
 0x33e   :  { %v3966_v30 = vpop.permute.xlu0 %3965 }
 0x33f   :  { %v3804_v43 = vadd.f32 %v3788_v48, %v3708_v20 }
 0x340   :  { %v3780_v14 = vpop.permute.xlu1 %3779 }
 0x341   :  { %v3797_v54 = vmul.f32 %v3780_v14, %v3620_v12  ;;  %v3826_v52 = vsel %vm3814_vm3, %v3804_v43, 0.0 }
 0x342   :  { %v3827_v39 = vadd.f32 %v3826_v52, %v3825_v9  ;;  %v3910_v9 = vld [vmem:[%s10286_s7 + $0x18] sm:$0xff] }
 0x343   :  { %v3813_v50 = vadd.f32 %v3797_v54, %v3717_v34  ;;  %v4046_v15 = vpop.permute.xlu0 %4045  ;;  %v3915_v34 = vld [vmem:[%s10286_s7 + $0x40] sm:$0xff]  ;;  %v3916_v54 = vld [vmem:[%s10286_s7 + $0x48] sm:$0xff] }
 0x344   :  { %v3748_v23 = vpop.permute.xlu1 %3747  ;;  %v4078_v52 = vmul.f32 %v4046_v15, %v3917_v55  ;;  %v10219_v15 = vld [vmem:[%s10286_s7 + $0x78] sm:$0xff] }
 0x345   :  { %v3849_v5 = vsel %vm3814_vm3, %v3813_v50, 0.0  ;;  %v3789_v19 = vmul.f32 %v3748_v23, %v3620_v12  ;;  %v3918_v50 = vld [vmem:[%s10286_s7 + $0x58] sm:$0xff] }
 0x346   :  { %v3850_v59 = vadd.f32 %v3849_v5, %v3848_v61  ;;  %v4077_v61 = vmul.f32 %v4042_v56, %v3916_v54 }
 0x347   :  { %v3805_v29 = vadd.f32 %v3789_v19, %v3709_v16  ;;  %v10138_v26 = vpop.permute.xlu0 %4013  ;;  %v3909_v16 = vld [vmem:[%s10286_s7 + $0x10] sm:$0xff] }
 0x348   :  { %v3851_v62 = vrot.slane %v3850_v59, 4 }
 0x349   :  { %v3828_v63 = vsel %vm3814_vm3, %v3805_v29, 0.0  ;;  %v3962_v40 = vpop.permute.xlu1 %3961  ;;  %v3911_v29 = vld [vmem:[%s10286_s7 + $0x20] sm:$0xff] }
 0x34a   :  { %v3852_v46 = vadd.f32 %v3851_v62, %v3850_v59  ;;  %v3829_v41 = vadd.f32 %v3828_v63, %v3827_v39  ;;  %v3997_v42 = vmul.f32 %v3962_v40, %v3908_v11  ;;  %v3919_v59 = vld [vmem:[%s10286_s7 + $0x60] sm:$0xff]  ;;  %v3998_v62 = vmul.f32 %v3966_v30, %v3909_v16 }
 0x34c   :  { %v3853_v28 = vrot.slane %v3852_v46, 2  ;;  %v3830_v21 = vrot.slane %v3829_v41, 4  ;;  %v10142_v35 = vpop.permute.xlu0 %3937  ;;  %v4093_v5 = vadd.f32 %v4077_v61, %v3997_v42 }
 0x34e   :  { %v3854_v13 = vadd.f32 %v3853_v28, %v3852_v46  ;;  %v3831_v49 = vadd.f32 %v3830_v21, %v3829_v41  ;;  %v4038_v44 = vpop.permute.xlu1 %4037  ;;  %v4094_v21 = vadd.f32 %v4078_v52, %v3998_v62 }
 0x34f   :  { %v4076_v43 = vmul.f32 %v4038_v44, %v3915_v34 }
 0x350   :  { %v3855_v0 = vrot.slane %v3854_v13, 1  ;;  %v3832_v27 = vrot.slane %v3831_v49, 2 }
 0x351   :  { %v4054_v33 = vpop.permute.xlu0 %4053  ;;  %v4092_v23 = vadd.f32 %v4076_v43, %v3996_v10 }
 0x352   :  { %v3833_v1 = vadd.f32 %v3832_v27, %v3831_v49  ;;  %v3856_v18 = vadd.f32 %v3855_v0, %v3854_v13  ;;  %v4122_v13 = vsel %vm3814_vm3, %v4093_v5, 0.0  ;;  %v4080_v49 = vmul.f32 %v4054_v33, %v3919_v59 }
 0x353   :  { %v10140_v4 = vpop.permute.xlu1 %3925  ;;  %v4121_v63 = vsel %vm3814_vm3, %v4092_v23, 0.0 }
 0x354   :  { %v3834_v22 = vrot.slane %v3833_v1, 1  ;;  %v10129_v24 = vadd.f32 %v4777_v25, %v3856_v18  ;;  %v4123_v27 = vadd.f32 %v4122_v13, %v4121_v63 }
 0x356   :  { %v3835_v2 = vadd.f32 %v3834_v22, %v3833_v1  ;;  %v3867_v3 = vrot.slane %v10129_v24, 7  ;;  %v10148_v38 = vpop.permute.xlu0 %3941  ;;  %v3912_v1 = vld [vmem:[%s10286_s7 + $0x28] sm:$0xff]  ;;  %v3921_v22 = vld [vmem:[%s10286_s7 + $0x70] sm:$0xff] }
 0x357   :  { %v10144_v36 = vpop.permute.xlu1 %3929 }
 0x358   :  { %v10131_v31 = vadd.f32 %v4777_v25, %v3835_v2  ;;  %v3920_v25 = vld [vmem:[%s10286_s7 + $0x68] sm:$0xff]  ;;  %v3913_v2 = vld [vmem:[%s10286_s7 + $0x30] sm:$0xff] }
 0x35a   :  { %v3869_v17 = vsel %vm3868_vm4, %v3867_v3, %v10131_v31  ;;  %v3978_v48 = vpop.permute.xlu0 %3977  ;;  %v10212_v3 = vld [vmem:[%s10286_s7 + $0x38] sm:$0xff] }
 0x35b   :  { %v3872_v32 = vsel %vm3871_vm5, %v3869_v17, -inf  ;;  %v4001_v33 = vmul.f32 %v3978_v48, %v3912_v1  ;;  %v3989_v48 = vmul.f32 %v10144_v36, %v3908_v11 }
 0x35c   :  { %3873 = vmax.xlane.f32.xlu1 %v3872_v32  ;;  %v10146_v8 = vpop.permute.xlu1 %4005  ;;  %v4124_v32 = vsel %vm3814_vm3, %v4094_v21, 0.0  ;;  %v3988_v21 = vmul.f32 %v10140_v4, %v10166_v51  ;;  %v3992_v4 = vmul.f32 %v10148_v38, %v3911_v29 }
 0x35d   :  { %v4125_v40 = vadd.f32 %v4124_v32, %v4123_v27 }
 0x35f   :  { %v10154_v12 = vpop.permute.xlu0 %4021 }
 0x363   :  { %v4058_v7 = vpop.permute.xlu0 %4057 }
 0x364   :  { %v4081_v60 = vmul.f32 %v4058_v7, %v3920_v25 }
 0x366   :  { %v4097_v10 = vadd.f32 %v4081_v60, %v4001_v33 }
 0x368   :  { %v10156_v37 = vpop.permute.xlu0 %3945  ;;  %v4130_v5 = vsel %vm3814_vm3, %v4097_v10, 0.0 }
 0x369   :  { %v3993_v32 = vmul.f32 %v10156_v37, %v3912_v1 }
 0x36d   :  { %4033 = vperm.xlu1 %5848, %v9992_v57   ;;  %v10150_v57 = vpop.permute.xlu1 %4009  ;;  %v10161_v14 = vpop.permute.xlu0 %4025 }
 0x36e   :  { %v4069_v52 = vmul.f32 %v10150_v57, %v3916_v54 }
 0x370   :  { %v4085_v57 = vadd.f32 %v4069_v52, %v3989_v48 }
 0x371   :  { %v10152_v53 = vpop.permute.xlu1 %3933  ;;  %v4062_v6 = vpop.permute.xlu0 %4061 }
 0x372   :  { %v3990_v62 = vmul.f32 %v10152_v53, %v3909_v16  ;;  %v4072_v16 = vmul.f32 %v10154_v12, %v3919_v59 }
 0x375   :  { %v3970_v58 = vpop.permute.xlu1 %3969 }
 0x376   :  { %v3999_v46 = vmul.f32 %v3970_v58, %v3910_v9  ;;  %v10194_v28 = vpop.permute.xlu0 %3949  ;;  %v4082_v58 = vmul.f32 %v4062_v6, %v3921_v22  ;;  %v4068_v6 = vmul.f32 %v10146_v8, %v3915_v34  ;;  %v4101_v8 = vsel %vm3814_vm3, %v4085_v57, 0.0 }
 0x377   :  { %v3994_v60 = vmul.f32 %v10194_v28, %v3913_v2 }
 0x379   :  { %v4050_v20 = vpop.permute.xlu1 %4049 }
 0x37a   :  { %v4079_v19 = vmul.f32 %v4050_v20, %v3918_v50 }
 0x37b   :  { %v4066_v44 = vpop.permute.xlu0 %4065 }
 0x37c   :  { %v4095_v0 = vadd.f32 %v4079_v19, %v3999_v46  ;;  %v4083_v7 = vmul.f32 %v4066_v44, %v10219_v15 }
 0x37d   :  { %v3974_v45 = vpop.permute.xlu1 %3973 }
 0x37e   :  { %v4000_v41 = vmul.f32 %v3974_v45, %v3911_v29  ;;  %v4126_v56 = vsel %vm3814_vm3, %v4095_v0, 0.0  ;;  %v4084_v0 = vadd.f32 %v4068_v6, %v3988_v21 }
 0x37f   :  { %v4127_v43 = vadd.f32 %v4126_v56, %v4125_v40 }
 0x380   :  { %v4096_v18 = vadd.f32 %v4080_v49, %v4000_v41  ;;  %v4070_v41 = vmul.f32 %v10138_v26, %v3917_v55  ;;  %v3991_v49 = vmul.f32 %v10142_v35, %v3910_v9  ;;  %v4100_v11 = vsel %vm3814_vm3, %v4084_v0, 0.0 }
 0x381   :  { %v4018_v47 = vpop.permute.xlu1 %4017  ;;  %v4102_v55 = vadd.f32 %v4101_v8, %v4100_v11  ;;  %v4073_v35 = vmul.f32 %v10161_v14, %v3920_v25 }
 0x382   :  { %v4128_v20 = vsel %vm3814_vm3, %v4096_v18, 0.0  ;;  %v4071_v54 = vmul.f32 %v4018_v47, %v3918_v50  ;;  %v4086_v27 = vadd.f32 %v4070_v41, %v3990_v62  ;;  %v4779_v41 = vld [vmem:[%s10288_s9] ss:$0 sm:$0xff] }
 0x383   :  { %v4129_v61 = vadd.f32 %v4128_v20, %v4127_v43  ;;  %v4089_v12 = vadd.f32 %v4073_v35, %v3993_v32 }
 0x384   :  { %v4087_v34 = vadd.f32 %v4071_v54, %v3991_v49  ;;  %v4103_v26 = vsel %vm3814_vm3, %v4086_v27, 0.0 }
 0x385   :  { %v3982_v39 = vpop.permute.xlu1 %3981  ;;  %v4104_v47 = vadd.f32 %v4103_v26, %v4102_v55  ;;  %v4109_v25 = vsel %vm3814_vm3, %v4089_v12, 0.0 }
 0x386   :  { %v4002_v30 = vmul.f32 %v3982_v39, %v3913_v2  ;;  %v4131_v39 = vadd.f32 %v4130_v5, %v4129_v61  ;;  %v4105_v51 = vsel %vm3814_vm3, %v4087_v34, 0.0 }
 0x387   :  { %v4106_v56 = vadd.f32 %v4105_v51, %v4104_v47 }
 0x388   :  { %v4098_v42 = vadd.f32 %v4082_v58, %v4002_v30 }
 0x389   :  { %v3986_v17 = vpop.permute.xlu1 %3985 }
 0x38a   :  { %v4003_v45 = vmul.f32 %v3986_v17, %v10212_v3  ;;  %v4132_v19 = vsel %vm3814_vm3, %v4098_v42, 0.0  ;;  %v4088_v17 = vadd.f32 %v4072_v16, %v3992_v4 }
 0x38b   :  { %v4133_v46 = vadd.f32 %v4132_v19, %v4131_v39 }
 0x38c   :  { %v4099_v23 = vadd.f32 %v4083_v7, %v4003_v45  ;;  %v4107_v38 = vsel %vm3814_vm3, %v4088_v17, 0.0 }
 0x38d   :  { %v4030_v36 = vpop.permute.xlu1 %4029  ;;  %v4108_v33 = vadd.f32 %v4107_v38, %v4106_v56 }
 0x38e   :  { %v4134_v63 = vsel %vm3814_vm3, %v4099_v23, 0.0  ;;  %v4074_v9 = vmul.f32 %v4030_v36, %v3921_v22  ;;  %v4778_v23 = vld [vmem:[%s10287_s8] ss:$0 sm:$0xff]  ;;  %s5889_s8 = smov [#allocation3]  }
 0x38f   :  { %v4135_v13 = vadd.f32 %v4134_v63, %v4133_v46  ;;  %v4110_v45 = vadd.f32 %v4109_v25, %v4108_v33  ;;  %s4186_s9 = sshll.u32 %s5889_s8, 4  ;;  %s4187_s9 = int_to_ptr.vmem [resolvable:$true] %s4186_s9 }
 0x390   :  { %v4090_v30 = vadd.f32 %v4074_v9, %v3994_v60  ;;  %s5861_s14 = scalar_lea.vmem %s4187_s9, 32  ;;  %p5866_p1 = scmp.lt.s32.totalorder %s4187_s9, %s4187_s9 }
 0x391   :  { %v4136_v53 = vrot.slane %v4135_v13, 4  ;;  %v3954_v18 = vpop.permute.xlu1 %3953  ;;  %p5862_p0 = scmp.ne.s32.totalorder %s4187_s9, %s5861_s14  ;;  %p5867_p2 = scmp.lt.s32.totalorder %s5861_s14, %s5861_s14 }
 0x392   :  { %v4111_v37 = vsel %vm3814_vm3, %v4090_v30, 0.0  ;;  %v3995_v28 = vmul.f32 %v3954_v18, %v10212_v3 }
 0x393   :  { %v4137_v50 = vadd.f32 %v4136_v53, %v4135_v13  ;;  %v4780_v53 = vld [vmem:[#allocation2] ss:$0 sm:$0xff]  ;;  %p5868_p3 = por %p5867_p2, %p5866_p1 }
 0x395   :  { %v4138_v59 = vrot.slane %v4137_v50, 2  ;;  %p5869_p4 = pnand %p5868_p3, %p5862_p0 }
 0x397   :  { %v4139_v22 = vadd.f32 %v4138_v59, %v4137_v50 }
 0x399   :  { %v4140_v10 = vrot.slane %v4139_v22, 1 }
 0x39b   :  { %v4141_v61 = vadd.f32 %v4140_v10, %v4139_v22 }
 0x39d   :  { %v4149_v5 = vadd.f32 %v4778_v23, %v4141_v61 }
 0x39f   :  { %v4151_v63 = vmax.f32 %v4149_v5, 0.0 }
 0x3a1   :  { %v4160_v54 = vmul.f32 %v4779_v41, %v4151_v63 }
 0x3a3   :  { %v4163_v0 = vrot.slane %v4160_v54, 7 }
 0x3e9   :  { %v3874_v40 = vpop.xlane.xlu1 %3873 }
 0x3ea   :  { %v3876_v29 = vrot.slane %v3874_v40, 1  ;;  %v3879_v44 = vsub.f32 %v10131_v31, %v3874_v40  ;;  %v4112_v31 = vadd.f32 %v4111_v37, %v4110_v45 }
 0x3ec   :  { %v3880_v14 = vsub.f32 %v10129_v24, %v3876_v29  ;;  %v3881_v2 = vmul.f32 1.442695, %v3879_v44 }
 0x3ed   :  { %v4034_v1 = vpop.permute.xlu1 %4033 }
 0x3ee   :  { %v3883_v58 = vmul.f32 1.442695, %v3880_v14  ;;  %v4075_v20 = vmul.f32 %v4034_v1, %v10219_v15 }
 0x3f0   :  { %5851 = vpow2.f32 %v3883_v58  ;;  %v4091_v43 = vadd.f32 %v4075_v20, %v3995_v28 }
 0x3f1   :  { %5853 = vpow2.f32 %v3881_v2 }
 0x3f2   :  { %v4113_v24 = vsel %vm3814_vm3, %v4091_v43, 0.0 }
 0x3f3   :  { %v4114_v7 = vadd.f32 %v4113_v24, %v4112_v31 }
 0x3f5   :  { %v4115_v42 = vrot.slane %v4114_v7, 4 }
 0x3f7   :  { %v4116_v3 = vadd.f32 %v4115_v42, %v4114_v7 }
 0x3f9   :  { %v4117_v52 = vrot.slane %v4116_v3, 2 }
 0x3fa   :  { %v5852_v19 = vpop.eup %5851 }
 0x3fb   :  { %v4118_v15 = vadd.f32 %v4117_v52, %v4116_v3  ;;  %v3887_v39 = vrot.slane %v5852_v19, 7  ;;  %v5854_v48 = vpop.eup %5853 }
 0x3fd   :  { %v4119_v6 = vrot.slane %v4118_v15, 1  ;;  %v3888_v62 = vsel %vm3868_vm4, %v3887_v39, %v5854_v48 }
 0x3fe   :  { %v3890_v46 = vsel %vm3871_vm5, %v3888_v62, 0.0 }
 0x3ff   :  { %3891 = vadd.xlane.f32.xlu0 %v3890_v46  ;;  %v4120_v21 = vadd.f32 %v4119_v6, %v4118_v15 }
 0x401   :  { %v4148_v57 = vadd.f32 %v4778_v23, %v4120_v21 }
 0x403   :  { %v4150_v13 = vmax.f32 %v4148_v57, 0.0 }
 0x405   :  { %v4159_v49 = vmul.f32 %v4779_v41, %v4150_v13 }
 0x407   :  { %v4164_v27 = vsel %vm3868_vm4, %v4163_v0, %v4159_v49 }
 0x408   :  { %v4166_v36 = vsel %vm3871_vm5, %v4164_v27, 0.0 }
 0x409   :  { %4167 = vadd.xlane.f32.xlu1 %v4166_v36 }
 0x48c   :  { %v3892_v8 = vpop.xlane.xlu0 %3891 }
 0x48d   :  { %v3894_v34 = vrot.slane %v3892_v8, 1  ;;  %5855 = vrcp.f32 %v3892_v8 }
 0x48f   :  { %5857 = vrcp.f32 %v3894_v34 }
 0x496   :  { %v4168_v11 = vpop.xlane.xlu1 %4167 }
 0x497   :  { %v4176_v16 = vadd.f32 %v4780_v53, %v4168_v11  ;;  %v5856_v26 = vpop.eup %5855 }
 0x498   :  { %v3898_v51 = vmul.f32 %v5856_v26, %v5854_v48 }
 0x499   :  { %v5858_v55 = vpop.eup %5857  ;;  %5859 = vtanh.f32 %v4176_v16 }
 0x49a   :  { %v3900_v4 = vmul.f32 %v5858_v55, %v5852_v19 }
 0x49c   :  { %v3903_v47 = vrot.slane %v3900_v4, 7 }
 0x49e   :  { %v3904_v35 = vsel %vm3868_vm4, %v3903_v47, %v3898_v51 }
 0x49f   :  { %3906 = vst.msk [vmem:[#allocation3] sm:$0x3] %vm3871_vm5, %v3904_v35 }
 0x4a0   :  { %5872 = shalt.err (!%p5869_p4)
}
 0x4a1   :  { %s5873_s2 = scalar_lea.hbm %s10290_s11, 32 }
 0x4a2   :  { %p5874_p5 = scmp.ne.s32.totalorder %s10290_s11, %s5873_s2  ;;  %p5877_p6 = scmp.lt.u32.totalorder %s5873_s2, %s10290_s11 }
 0x4a4   :  { %p5879_p7 = pnand %p5877_p6, %p5874_p5 }
 0x4a6   :  { %5882 = shalt.err (!%p5879_p7)
}
 0x4a7   :  { %4189 = dma.vmem_to_hbm [thread:$0]  %s4187_s9, 32, %s10290_s11, [#allocation4]   ;;  %vm4178_vm6 = vcmask 1024   ;;  %v5860_v50 = vpop.eup %5859 }
 0x4a8   :  { %4179 = vst.msk [vmem:[%s10291_s12] sm:$0x3] %vm4178_vm6, %v5860_v50 }
 0x4a9   :  { %5883 = dma.done.wait [#allocation4], 32  }
 0x4aa   :  { %5884 = vsyncadd [#allocation4], 4294967264 }
 0x4ab   :  { %4197 = vsyncpa [#allocation4], 1 }

</bundles_post_ra>
